<compile_context>
chip_gen: v5e
topology: v5e:2x2
jax: 0.10.0
libtpu: 0.0.40
codegen_flags: <defaults>
</compile_context>

<pallas_src>
import functools
import math

import jax
import jax.numpy as jnp
import numpy as np
from jax.experimental import pallas as pl
from jax.experimental.pallas import tpu as pltpu


PSP_SIZES = (1, 3, 6, 8)


def _psp_matrix(H, W, sizes=PSP_SIZES, pad_to=128):
    """Adaptive-avg-pool pyramid as a static averaging matrix M: [S_pad, H*W].

    PSP(x)[n, c, k] == sum_hw M[k, hw] * x[n, c, hw], using PyTorch's
    AdaptiveAvgPool2d rule: start = floor(i*H/s), end = ceil((i+1)*H/s).
    Rows are zero-padded to a multiple of 128 so S sits on a full lane tile.
    """
    rows = []
    for s in sizes:
        for i in range(s):
            h0 = (i * H) // s
            h1 = math.ceil((i + 1) * H / s)
            for j in range(s):
                w0 = (j * W) // s
                w1 = math.ceil((j + 1) * W / s)
                m = np.zeros((H, W), np.float32)
                m[h0:h1, w0:w1] = 1.0 / float((h1 - h0) * (w1 - w0))
                rows.append(m.reshape(-1))
    m = np.stack(rows, axis=0)
    s_real = m.shape[0]
    s_pad = ((s_real + pad_to - 1) // pad_to) * pad_to
    if s_pad > s_real:
        m = np.concatenate([m, np.zeros((s_pad - s_real, H * W), np.float32)], 0)
    return jnp.asarray(m), s_real


def _pick_tile(total, target, multiple):
    """Largest multiple of `multiple` that divides `total` and is <= target, else `total`."""
    t = min(target, total)
    t -= t % multiple
    while t >= multiple:
        if total % t == 0:
            return t
        t -= multiple
    return total


def proj_psp_kernel(x_ref, wk_ref, bk_ref, wv_ref, bv_ref, m_ref,
                    kpsp_ref, vpsp_ref, *, mm_dtype):
    """Per (batch, HW-tile): key/value 1x1 projections + PSP pooling accumulation."""
    @pl.when(pl.program_id(1) == 0)
    def _():
        kpsp_ref[...] = jnp.zeros_like(kpsp_ref)
        vpsp_ref[...] = jnp.zeros_like(vpsp_ref)

    x = x_ref[0].astype(mm_dtype)                                          # [THW, Cin]

    # f_key: 1x1 conv with eval-BN folded into (wk, bk), then ReLU.
    k = jnp.dot(x, wk_ref[...], preferred_element_type=jnp.float32) + bk_ref[...]
    k = jnp.maximum(k, 0.0)                                                # [THW, Ck]
    # f_value: 1x1 conv with bias.
    v = jnp.dot(x, wv_ref[...], preferred_element_type=jnp.float32) + bv_ref[...]

    m = m_ref[...]                                                         # [S_pad, THW]
    kpsp_ref[0] += jnp.dot(m, k.astype(mm_dtype), preferred_element_type=jnp.float32)
    vpsp_ref[0] += jnp.dot(m, v.astype(mm_dtype), preferred_element_type=jnp.float32)


def attn_out_kernel(x_ref, kpsp_ref, vpsp_ref, wkq_ref, bkq_ref,
                    wfc_ref, wfx_ref, bf_ref, o_ref, *,
                    s_real, mm_dtype, approx_recip):
    """Per (batch, query-tile): recompute q, attention, fused W / output conv + BN + ReLU."""
    x = x_ref[0]                                                           # [TQ, Cin]
    xm = x.astype(mm_dtype)

    # query projection (BN folded; Ck^-0.5 already folded into wkq/bkq), ReLU.
    q = jnp.dot(xm, wkq_ref[...], preferred_element_type=jnp.float32) + bkq_ref[...]
    q = jnp.maximum(q, 0.0)                                                # [TQ, Ck]

    kp = kpsp_ref[0]                                                       # [S_pad, Ck]
    vp = vpsp_ref[0]                                                       # [S_pad, Cv]

    # sim = q @ kp^T  (contract over Ck directly; no transpose copy)
    sim = jax.lax.dot_general(q.astype(mm_dtype), kp.astype(mm_dtype),
                              (((1,), (1,)), ((), ())),
                              preferred_element_type=jnp.float32)          # [TQ, S_pad]

    # mask padded S columns so they contribute 0 to the softmax.
    col = jax.lax.broadcasted_iota(jnp.int32, sim.shape, 1)
    sim = jnp.where(col < s_real, sim, -1e30)

    sim = sim - jnp.max(sim, axis=-1, keepdims=True)
    p = jnp.exp(sim)
    denom = jnp.sum(p, axis=-1, keepdims=True)
    p = p * pl.reciprocal(denom, approx=approx_recip)

    ctx = jnp.dot(p.astype(mm_dtype), vp.astype(mm_dtype),
                  preferred_element_type=jnp.float32)                      # [TQ, Cv]

    # output conv over cat([W(ctx), x]) with W and BN folded; ReLU.
    out = (jnp.dot(ctx.astype(mm_dtype), wfc_ref[...], preferred_element_type=jnp.float32)
           + jnp.dot(xm, wfx_ref[...], preferred_element_type=jnp.float32)
           + bf_ref[...])
    o_ref[0] = jnp.maximum(out, 0.0)


def apnb_forward(feats, params, eps=1e-5, *, tq=512, thw=512,
                 matmul_dtype=jnp.float32):
    """APNB eval-mode forward. feats: NCHW f32. params: torch-layout weights (OI11 convs)."""
    N, Cin, H, W = feats.shape
    HW = H * W
    Ck = params["wk"].shape[0]
    Cv = params["wv"].shape[0]
    Cattn = params["ww"].shape[0]
    Cout = params["wf"].shape[0]
    assert params["wf"].shape[1] == Cattn + Cin

    mm = jnp.dtype(matmul_dtype)
    approx_recip = (mm == jnp.dtype(jnp.bfloat16))

    # NCHW -> tokens [N, HW, C] (token index = h*W + w, matching torch .view flattening).
    x_tok = jnp.transpose(feats, (0, 2, 3, 1)).reshape(N, HW, Cin).astype(mm)

    # Fold eval-mode BN of f_key into the 1x1 conv weight / bias.
    sk = params["gk"] / jnp.sqrt(params["vk"] + eps)
    wk = (params["wk"][:, :, 0, 0] * sk[:, None]).T.astype(jnp.float32)        # [Cin, Ck]
    bk = (params["bk"] * sk + params["bek"] - params["mk"] * sk
          ).reshape(1, Ck).astype(jnp.float32)

    # Fold Ck^-0.5 into the query projection (ReLU commutes with a positive scale).
    inv_sqrt_ck = float(Ck) ** -0.5
    wk_q = wk * inv_sqrt_ck
    bk_q = bk * inv_sqrt_ck

    wv = params["wv"][:, :, 0, 0].T.astype(jnp.float32)                        # [Cin, Cv]
    bv = params["bv"].reshape(1, Cv).astype(jnp.float32)

    # Fold eval-mode BN of the output conv, split along the concat, and fold the W conv
    # (context = ctx_raw @ ww + bw) into the context half of the output conv.
    sf = params["gf"] / jnp.sqrt(params["vf"] + eps)
    wf = params["wf"][:, :, 0, 0] * sf[:, None]                                # [Cout, Cattn+Cin]
    wf_ctx = wf[:, :Cattn].T.astype(jnp.float32)                               # [Cattn, Cout]
    wf_x = wf[:, Cattn:].T.astype(jnp.float32)                                 # [Cin, Cout]
    ww = params["ww"][:, :, 0, 0].T.astype(jnp.float32)                        # [Cv, Cattn]
    wf_ctx_f = ww @ wf_ctx                                                     # [Cv, Cout]
    bf = (params["bf"] * sf + params["bef"] - params["mf"] * sf
          + params["bw"] @ wf_ctx).reshape(1, Cout).astype(jnp.float32)

    m_mat, s_real = _psp_matrix(H, W)                                          # [S_pad, HW]
    S = m_mat.shape[0]

    # Matmul operands in mm dtype; biases / accumulators stay f32.
    wk_ = wk.astype(mm)
    wv_ = wv.astype(mm)
    m_ = m_mat.astype(mm)
    wk_q_ = wk_q.astype(mm)
    wf_ctx_f_ = wf_ctx_f.astype(mm)
    wf_x_ = wf_x.astype(mm)

    thw = _pick_tile(HW, thw, 128)   # lane axis of the M block -> multiple of 128 (or full)
    tq = _pick_tile(HW, tq, 8)

    # ---- kernel 1: HW-tiled projections + PSP pooling (kpsp/vpsp accumulate in VMEM) ----
    kpsp, vpsp = pl.pallas_call(
        functools.partial(proj_psp_kernel, mm_dtype=mm),
        out_shape=(jax.ShapeDtypeStruct((N, S, Ck), jnp.float32),
                   jax.ShapeDtypeStruct((N, S, Cv), jnp.float32)),
        grid=(N, HW // thw),
        in_specs=[
            pl.BlockSpec((1, thw, Cin), lambda b, t: (b, t, 0)),
            pl.BlockSpec((Cin, Ck), lambda b, t: (0, 0)),
            pl.BlockSpec((1, Ck), lambda b, t: (0, 0)),
            pl.BlockSpec((Cin, Cv), lambda b, t: (0, 0)),
            pl.BlockSpec((1, Cv), lambda b, t: (0, 0)),
            pl.BlockSpec((S, thw), lambda b, t: (0, t)),
        ],
        out_specs=(
            pl.BlockSpec((1, S, Ck), lambda b, t: (b, 0, 0)),
            pl.BlockSpec((1, S, Cv), lambda b, t: (b, 0, 0)),
        ),
        compiler_params=pltpu.CompilerParams(
            dimension_semantics=("parallel", "arbitrary")),
    )(x_tok, wk_, bk, wv_, bv, m_)

    # ---- kernel 2: query-tiled attention + fused W / output conv + BN + ReLU -------------
    out_tok = pl.pallas_call(
        functools.partial(attn_out_kernel, s_real=s_real, mm_dtype=mm,
                          approx_recip=approx_recip),
        out_shape=jax.ShapeDtypeStruct((N, HW, Cout), jnp.float32),
        grid=(N, HW // tq),
        in_specs=[
            pl.BlockSpec((1, tq, Cin), lambda b, t: (b, t, 0)),
            pl.BlockSpec((1, S, Ck), lambda b, t: (b, 0, 0)),
            pl.BlockSpec((1, S, Cv), lambda b, t: (b, 0, 0)),
            pl.BlockSpec((Cin, Ck), lambda b, t: (0, 0)),
            pl.BlockSpec((1, Ck), lambda b, t: (0, 0)),
            pl.BlockSpec((Cv, Cout), lambda b, t: (0, 0)),
            pl.BlockSpec((Cin, Cout), lambda b, t: (0, 0)),
            pl.BlockSpec((1, Cout), lambda b, t: (0, 0)),
        ],
        out_specs=pl.BlockSpec((1, tq, Cout), lambda b, t: (b, t, 0)),
        compiler_params=pltpu.CompilerParams(
            dimension_semantics=("parallel", "parallel")),
    )(x_tok, kpsp, vpsp, wk_q_, bk_q, wf_ctx_f_, wf_x_, bf)

    out = out_tok.reshape(N, H, W, Cout)
    return jnp.transpose(out, (0, 3, 1, 2))                    # NHWC tokens -> NCHW


def _reference(feats, params, eps=1e-5, sizes=PSP_SIZES):
    """Pure-JAX reference mirroring the PyTorch APNB eval-mode forward."""
    N, Cin, H, W = feats.shape
    Ck = params["wk"].shape[0]
    Cv = params["wv"].shape[0]

    def conv1x1(x, w, b):
        y = jnp.einsum("nchw,oc->nohw", x, w[:, :, 0, 0])
        return y + b[None, :, None, None]

    def bnorm(x, g, be, m, v):
        return ((x - m[None, :, None, None]) / jnp.sqrt(v[None, :, None, None] + eps)
                * g[None, :, None, None] + be[None, :, None, None])

    def psp(x):
        n, c, h, w = x.shape
        outs = []
        for s in sizes:
            pooled = jnp.zeros((n, c, s, s), jnp.float32)
            for i in range(s):
                h0, h1 = (i * h) // s, math.ceil((i + 1) * h / s)
                for j in range(s):
                    w0, w1 = (j * w) // s, math.ceil((j + 1) * w / s)
                    pooled = pooled.at[:, :, i, j].set(
                        jnp.mean(x[:, :, h0:h1, w0:w1], axis=(2, 3)))
            outs.append(pooled.reshape(n, c, -1))
        return jnp.concatenate(outs, axis=-1)

    value = psp(conv1x1(feats, params["wv"], params["bv"]))                      # [N, Cv, S]
    keyf = jax.nn.relu(bnorm(conv1x1(feats, params["wk"], params["bk"]),
                             params["gk"], params["bek"], params["mk"], params["vk"]))
    query = keyf.reshape(N, Ck, -1).transpose(0, 2, 1)                           # [N, HW, Ck]
    keyp = psp(keyf)                                                             # [N, Ck, S]
    value = value.transpose(0, 2, 1)                                             # [N, S, Cv]

    sim = jnp.einsum("nqc,ncs->nqs", query, keyp) * (Ck ** -0.5)
    sim = jax.nn.softmax(sim, axis=-1)
    ctx = jnp.einsum("nqs,nsv->nqv", sim, value)                                 # [N, HW, Cv]
    ctx = ctx.transpose(0, 2, 1).reshape(N, Cv, H, W)
    ctx = conv1x1(ctx, params["ww"], params["bw"])

    cat = jnp.concatenate([ctx, feats], axis=1)
    out = conv1x1(cat, params["wf"], params["bf"])
    out = jax.nn.relu(bnorm(out, params["gf"], params["bef"], params["mf"], params["vf"]))
    return out


if __name__ == "__main__":
    jax.config.update("jax_default_matmul_precision", "highest")

    key = jax.random.PRNGKey(0)
    N, Cin, H, W = 2, 32, 16, 16
    Ck, Cv, Cout = 16, 16, 32          # out_channels == in_channels (required by the concat)
    ks = jax.random.split(key, 17)

    feats = jax.random.normal(ks[0], (N, Cin, H, W), jnp.float32)

    params = dict(
        # f_key: Conv2d(Cin->Ck, 1x1) + BN + ReLU   (f_query shares these weights)
        wk=0.2 * jax.random.normal(ks[1], (Ck, Cin, 1, 1), jnp.float32),
        bk=0.1 * jax.random.normal(ks[2], (Ck,), jnp.float32),
        gk=1.0 + 0.1 * jax.random.normal(ks[3], (Ck,), jnp.float32),
        bek=0.1 * jax.random.normal(ks[4], (Ck,), jnp.float32),
        mk=0.1 * jax.random.normal(ks[5], (Ck,), jnp.float32),
        vk=jax.random.uniform(ks[6], (Ck,), jnp.float32, 0.5, 1.5),
        # f_value: Conv2d(Cin->Cv, 1x1)
        wv=0.2 * jax.random.normal(ks[7], (Cv, Cin, 1, 1), jnp.float32),
        bv=0.1 * jax.random.normal(ks[8], (Cv,), jnp.float32),
        # W: Conv2d(Cv->Cin, 1x1)  (zero-init in torch; random here to exercise the path)
        ww=0.2 * jax.random.normal(ks[9], (Cin, Cv, 1, 1), jnp.float32),
        bw=0.1 * jax.random.normal(ks[10], (Cin,), jnp.float32),
        # conv_bn_dropout: Conv2d(2*Cin->Cout, 1x1) + BN + ReLU + Dropout2d(eval: identity)
        wf=0.2 * jax.random.normal(ks[11], (Cout, 2 * Cin, 1, 1), jnp.float32),
        bf=0.1 * jax.random.normal(ks[12], (Cout,), jnp.float32),
        gf=1.0 + 0.1 * jax.random.normal(ks[13], (Cout,), jnp.float32),
        bef=0.1 * jax.random.normal(ks[14], (Cout,), jnp.float32),
        mf=0.1 * jax.random.normal(ks[15], (Cout,), jnp.float32),
        vf=jax.random.uniform(ks[16], (Cout,), jnp.float32, 0.5, 1.5),
    )

    ref = jax.block_until_ready(_reference(feats, params))

    # f32 matmul path: tight check against the pure-JAX reference.
    out = jax.block_until_ready(apnb_forward(feats, params))
    assert out.shape == (N, Cout, H, W) and out.dtype == jnp.float32
    err = jnp.max(jnp.abs(out - ref))
    assert jnp.allclose(out, ref, atol=2e-4, rtol=2e-4), f"max abs err {err}"

    # bf16 matmul path (production config): smoke check with loose tolerance.
    out_bf16 = jax.block_until_ready(
        apnb_forward(feats, params, matmul_dtype=jnp.bfloat16))
    assert out_bf16.shape == (N, Cout, H, W)
    assert bool(jnp.all(jnp.isfinite(out_bf16)))
    assert jnp.allclose(out_bf16, ref, atol=2e-1, rtol=2e-1)

    print("KERNEL_OK")
</pallas_src>

<mosaic_0001>
module attributes {stable_mosaic.version = 11 : i64} {
  func.func @proj_psp_kernel(%arg0: i32, %arg1: i32, %arg2: memref<1x256x32xf32, #tpu.memory_space<vmem>>, %arg3: memref<32x16xf32, #tpu.memory_space<vmem>>, %arg4: memref<1x16xf32, #tpu.memory_space<vmem>>, %arg5: memref<32x16xf32, #tpu.memory_space<vmem>>, %arg6: memref<1x16xf32, #tpu.memory_space<vmem>>, %arg7: memref<128x256xf32, #tpu.memory_space<vmem>>, %arg8: memref<1x128x16xf32, #tpu.memory_space<vmem>>, %arg9: memref<1x128x16xf32, #tpu.memory_space<vmem>>) attributes {dimension_semantics = [#tpu.dimension_semantics<parallel>, #tpu.dimension_semantics<arbitrary>], iteration_bounds = array<i64: 2, 1>, scalar_prefetch = 0 : i64, scratch_operands = 0 : i64, tpu.core_type = #tpu.core_type<tc>, window_params = [{transform_indices = @transform_0, window_bounds = array<i64: 1, 256, 32>}, {pipeline_mode = #tpu.pipeline_mode<synchronous>, transform_indices = @transform_1, window_bounds = array<i64: 32, 16>}, {pipeline_mode = #tpu.pipeline_mode<synchronous>, transform_indices = @transform_2, window_bounds = array<i64: 1, 16>}, {pipeline_mode = #tpu.pipeline_mode<synchronous>, transform_indices = @transform_3, window_bounds = array<i64: 32, 16>}, {pipeline_mode = #tpu.pipeline_mode<synchronous>, transform_indices = @transform_4, window_bounds = array<i64: 1, 16>}, {transform_indices = @transform_5, window_bounds = array<i64: 128, 256>}, {transform_indices = @transform_6, window_bounds = array<i64: 1, 128, 16>}, {transform_indices = @transform_7, window_bounds = array<i64: 1, 128, 16>}]} {
    %c0_i32 = arith.constant 0 : i32
    %0 = arith.cmpi eq, %arg1, %c0_i32 : i32
    %1 = arith.extui %0 : i1 to i32
    %c0_i32_0 = arith.constant 0 : i32
    %2 = arith.cmpi ne, %1, %c0_i32_0 : i32
    scf.if %2 {
      %cst_29 = arith.constant 0.000000e+00 : f32
      %32 = vector.broadcast %cst_29 : f32 to vector<1x128x16xf32>
      %c0_30 = arith.constant 0 : index
      %c0_31 = arith.constant 0 : index
      %c0_32 = arith.constant 0 : index
      %33 = vector.load %arg8[%c0_30, %c0_31, %c0_32] : memref<1x128x16xf32, #tpu.memory_space<vmem>>, vector<1x128x16xf32>
      tpu.vector_store %arg8[%c0_30, %c0_31, %c0_32], %32 {strides = array<i32>} : memref<1x128x16xf32, #tpu.memory_space<vmem>>, vector<1x128x16xf32>,
      %cst_33 = arith.constant 0.000000e+00 : f32
      %34 = vector.broadcast %cst_33 : f32 to vector<1x128x16xf32>
      %c0_34 = arith.constant 0 : index
      %c0_35 = arith.constant 0 : index
      %c0_36 = arith.constant 0 : index
      %35 = vector.load %arg9[%c0_34, %c0_35, %c0_36] : memref<1x128x16xf32, #tpu.memory_space<vmem>>, vector<1x128x16xf32>
      tpu.vector_store %arg9[%c0_34, %c0_35, %c0_36], %34 {strides = array<i32>} : memref<1x128x16xf32, #tpu.memory_space<vmem>>, vector<1x128x16xf32>,
    } else {
    }
    %c0 = arith.constant 0 : index
    %c0_1 = arith.constant 0 : index
    %c0_2 = arith.constant 0 : index
    %3 = vector.load %arg2[%c0, %c0_1, %c0_2] : memref<1x256x32xf32, #tpu.memory_space<vmem>>, vector<1x256x32xf32>
    %4 = vector.shape_cast %3 : vector<1x256x32xf32> to vector<256x32xf32>
    %c0_3 = arith.constant 0 : index
    %c0_4 = arith.constant 0 : index
    %5 = vector.load %arg3[%c0_3, %c0_4] : memref<32x16xf32, #tpu.memory_space<vmem>>, vector<32x16xf32>
    %cst = arith.constant dense<0.000000e+00> : vector<256x16xf32>
    %6 = tpu.matmul %4, %5, %cst {dimension_numbers = #tpu.dot_dimension_numbers<[1], [0], [0], [1], [0, 0, 1, 1], [], []>, precision = #tpu.contract_precision<fp32>} : vector<256x32xf32>, vector<32x16xf32>, vector<256x16xf32> -> vector<256x16xf32>
    %c0_5 = arith.constant 0 : index
    %c0_6 = arith.constant 0 : index
    %7 = vector.load %arg4[%c0_5, %c0_6] : memref<1x16xf32, #tpu.memory_space<vmem>>, vector<1x16xf32>
    %8 = vector.broadcast %7 : vector<1x16xf32> to vector<256x16xf32>
    %9 = arith.addf %6, %8 : vector<256x16xf32>
    %cst_7 = arith.constant 0.000000e+00 : f32
    %10 = vector.broadcast %cst_7 : f32 to vector<256x16xf32>
    %11 = arith.maximumf %9, %10 : vector<256x16xf32>
    %c0_8 = arith.constant 0 : index
    %c0_9 = arith.constant 0 : index
    %12 = vector.load %arg5[%c0_8, %c0_9] : memref<32x16xf32, #tpu.memory_space<vmem>>, vector<32x16xf32>
    %cst_10 = arith.constant dense<0.000000e+00> : vector<256x16xf32>
    %13 = tpu.matmul %4, %12, %cst_10 {dimension_numbers = #tpu.dot_dimension_numbers<[1], [0], [0], [1], [0, 0, 1, 1], [], []>, precision = #tpu.contract_precision<fp32>} : vector<256x32xf32>, vector<32x16xf32>, vector<256x16xf32> -> vector<256x16xf32>
    %c0_11 = arith.constant 0 : index
    %c0_12 = arith.constant 0 : index
    %14 = vector.load %arg6[%c0_11, %c0_12] : memref<1x16xf32, #tpu.memory_space<vmem>>, vector<1x16xf32>
    %15 = vector.broadcast %14 : vector<1x16xf32> to vector<256x16xf32>
    %16 = arith.addf %13, %15 : vector<256x16xf32>
    %c0_13 = arith.constant 0 : index
    %c0_14 = arith.constant 0 : index
    %17 = vector.load %arg7[%c0_13, %c0_14] : memref<128x256xf32, #tpu.memory_space<vmem>>, vector<128x256xf32>
    %c0_15 = arith.constant 0 : index
    %c0_16 = arith.constant 0 : index
    %c0_17 = arith.constant 0 : index
    %18 = vector.load %arg8[%c0_15, %c0_16, %c0_17] : memref<1x128x16xf32, #tpu.memory_space<vmem>>, vector<1x128x16xf32>
    %19 = vector.shape_cast %18 : vector<1x128x16xf32> to vector<128x16xf32>
    %cst_18 = arith.constant dense<0.000000e+00> : vector<128x16xf32>
    %20 = tpu.matmul %17, %11, %cst_18 {dimension_numbers = #tpu.dot_dimension_numbers<[1], [0], [0], [1], [0, 0, 1, 1], [], []>, precision = #tpu.contract_precision<fp32>} : vector<128x256xf32>, vector<256x16xf32>, vector<128x16xf32> -> vector<128x16xf32>
    %21 = arith.addf %19, %20 : vector<128x16xf32>
    %c0_19 = arith.constant 0 : index
    %c0_20 = arith.constant 0 : index
    %c0_21 = arith.constant 0 : index
    %22 = vector.load %arg8[%c0_19, %c0_20, %c0_21] : memref<1x128x16xf32, #tpu.memory_space<vmem>>, vector<1x128x16xf32>
    %23 = vector.shape_cast %22 : vector<1x128x16xf32> to vector<128x16xf32>
    %24 = vector.shape_cast %21 : vector<128x16xf32> to vector<1x128x16xf32>
    tpu.vector_store %arg8[%c0_19, %c0_20, %c0_21], %24 {strides = array<i32>} : memref<1x128x16xf32, #tpu.memory_space<vmem>>, vector<1x128x16xf32>,
    %c0_22 = arith.constant 0 : index
    %c0_23 = arith.constant 0 : index
    %c0_24 = arith.constant 0 : index
    %25 = vector.load %arg9[%c0_22, %c0_23, %c0_24] : memref<1x128x16xf32, #tpu.memory_space<vmem>>, vector<1x128x16xf32>
    %26 = vector.shape_cast %25 : vector<1x128x16xf32> to vector<128x16xf32>
    %cst_25 = arith.constant dense<0.000000e+00> : vector<128x16xf32>
    %27 = tpu.matmul %17, %16, %cst_25 {dimension_numbers = #tpu.dot_dimension_numbers<[1], [0], [0], [1], [0, 0, 1, 1], [], []>, precision = #tpu.contract_precision<fp32>} : vector<128x256xf32>, vector<256x16xf32>, vector<128x16xf32> -> vector<128x16xf32>
    %28 = arith.addf %26, %27 : vector<128x16xf32>
    %c0_26 = arith.constant 0 : index
    %c0_27 = arith.constant 0 : index
    %c0_28 = arith.constant 0 : index
    %29 = vector.load %arg9[%c0_26, %c0_27, %c0_28] : memref<1x128x16xf32, #tpu.memory_space<vmem>>, vector<1x128x16xf32>
    %30 = vector.shape_cast %29 : vector<1x128x16xf32> to vector<128x16xf32>
    %31 = vector.shape_cast %28 : vector<128x16xf32> to vector<1x128x16xf32>
    tpu.vector_store %arg9[%c0_26, %c0_27, %c0_28], %31 {strides = array<i32>} : memref<1x128x16xf32, #tpu.memory_space<vmem>>, vector<1x128x16xf32>,
    return
  }
  func.func @transform_0(%arg0: i32, %arg1: i32) -> (i32, i32, i32) {
    %c0_i32 = arith.constant 0 : i32
    %c0_i32_0 = arith.constant 0 : i32
    return %arg0, %arg1, %c0_i32 : i32, i32, i32
  }
  func.func @transform_1(%arg0: i32, %arg1: i32) -> (i32, i32) {
    %c0_i32 = arith.constant 0 : i32
    %c0_i32_0 = arith.constant 0 : i32
    %c0_i32_1 = arith.constant 0 : i32
    return %c0_i32, %c0_i32_0 : i32, i32
  }
  func.func @transform_2(%arg0: i32, %arg1: i32) -> (i32, i32) {
    %c0_i32 = arith.constant 0 : i32
    %c0_i32_0 = arith.constant 0 : i32
    %c0_i32_1 = arith.constant 0 : i32
    return %c0_i32, %c0_i32_0 : i32, i32
  }
  func.func @transform_3(%arg0: i32, %arg1: i32) -> (i32, i32) {
    %c0_i32 = arith.constant 0 : i32
    %c0_i32_0 = arith.constant 0 : i32
    %c0_i32_1 = arith.constant 0 : i32
    return %c0_i32, %c0_i32_0 : i32, i32
  }
  func.func @transform_4(%arg0: i32, %arg1: i32) -> (i32, i32) {
    %c0_i32 = arith.constant 0 : i32
    %c0_i32_0 = arith.constant 0 : i32
    %c0_i32_1 = arith.constant 0 : i32
    return %c0_i32, %c0_i32_0 : i32, i32
  }
  func.func @transform_5(%arg0: i32, %arg1: i32) -> (i32, i32) {
    %c0_i32 = arith.constant 0 : i32
    %c0_i32_0 = arith.constant 0 : i32
    return %c0_i32, %arg1 : i32, i32
  }
  func.func @transform_6(%arg0: i32, %arg1: i32) -> (i32, i32, i32) {
    %c0_i32 = arith.constant 0 : i32
    %c0_i32_0 = arith.constant 0 : i32
    %c0_i32_1 = arith.constant 0 : i32
    return %arg0, %c0_i32, %c0_i32_0 : i32, i32, i32
  }
  func.func @transform_7(%arg0: i32, %arg1: i32) -> (i32, i32, i32) {
    %c0_i32 = arith.constant 0 : i32
    %c0_i32_0 = arith.constant 0 : i32
    %c0_i32_1 = arith.constant 0 : i32
    return %arg0, %c0_i32, %c0_i32_0 : i32, i32, i32
  }
}

</mosaic_0001>

<bundles_post_ra>
// kernel: tpu_custom_call.1
= control target key start
LH: loop header
LB: loop body
LE: loop exit
PB: predicated region body
PF: predicated region fallthrough
CT: control target
= control target key end

     0   :  { %s6430_s24 = smov 0   ;;  %s6432_s25 = smov 0   ;;  %s10492_s0 = inlined_call_operand.vmem [shape: f32[2,256,32], index: 0, kind: input, shape index: {}]   ;;  %s10493_s1 = inlined_call_operand.vmem [shape: f32[32,16], index: 1, kind: input, shape index: {}]   ;;  %s10494_s2 = inlined_call_operand.vmem [shape: f32[1,16], index: 2, kind: input, shape index: {}]   ;;  %s10495_s3 = inlined_call_operand.vmem [shape: f32[32,16], index: 3, kind: input, shape index: {}]   ;;  %s10496_s4 = inlined_call_operand.vmem [shape: f32[1,16], index: 4, kind: input, shape index: {}]   ;;  %s10497_s5 = inlined_call_operand.vmem [shape: f32[128,256], index: 5, kind: input, shape index: {}]   ;;  %s10498_s6 = inlined_call_operand.vmem [shape: f32[2,128,16], index: 6, kind: output, shape index: {0}]   ;;  %s10499_s7 = inlined_call_operand.vmem [shape: f32[2,128,16], index: 7, kind: output, shape index: {1}]  }
   0x1   :  { %s6434_s26 = smov 0  }
   0x2 LB: > { %s30_s27 = sadd.s32 1, %s6383_s25  ;;  %p6324_p0 = scmp.ge.s32.totalorder %s6387_s26, 1  ;;  %s6387_s26 = sphi %s6434_s26, %s18_s26   ;;  %s6383_s25 = sphi %s6432_s25, %s11919_s25   ;;  %s6379_s24 = sphi %s6430_s24, %s11918_s24  }
   0x3   : > { %p32_p1 = scmp.ge.s32.totalorder %s30_s27, 2  ;;  %p270_p2 = scmp.lt.s32.totalorder %s6387_s26, 3 }
   0x5   : > { %s11921_s27 = smov (%p32_p1, %s30_s27), 0  ;;  %p271_p3 = pnand %p6324_p0, %p270_p2 }
   0x7   : > { %274 = sbr.rel (%p271_p3) target bundleno = 1729 (0x6c1), region = 44 }
   0xc   : > { %v414_v0 = vld [vmem:[%s10493_s1 + $0x18] sm:$0xff]  ;;  %v413_v1 = vld [vmem:[%s10493_s1 + $0x10] sm:$0xff]  ;;  %v412_v2 = vld [vmem:[%s10493_s1 + $0x8] sm:$0xff]  ;;  %p317_p4 = scmp.lt.s32.totalorder %s6379_s24, 1  ;;  %vm419_vm0 = vcmask 261120   ;;  %vm346_vm1 = vcmask 130048  }
   0xd   : > { %v6457_v3 = vand.u32 4294901760, %v414_v0  ;;  %v6459_v4 = vand.u32 4294901760, %v413_v1  ;;  %v6461_v5 = vand.u32 4294901760, %v412_v2  ;;  %v411_v6 = vld [vmem:[%s10493_s1] sm:$0xff]  ;;  %v1697_v7 = vld [vmem:[%s10495_s3 + $0x18] sm:$0xff] }
   0xe   : > { %v6469_v8 = vand.u32 4294901760, %v411_v6  ;;  %s11923_s24 = smov (!%p317_p4, %s6379_s24), 1  ;;  %v6473_v9 = vand.u32 4294901760, %v1697_v7 }
   0xf   : > { %v806_v10 = vsub.f32 %v414_v0, %v6457_v3  ;;  %v812_v11 = vsub.f32 %v413_v1, %v6459_v4  ;;  %1156 = vmatpush.msra.mxu3 %v6457_v3  ;;  %v818_v12 = vsub.f32 %v412_v2, %v6461_v5  ;;  %529 = vmatpush.msra.mxu0 %v6457_v3  ;;  %s6333_s15 = sshll.u32 %s11923_s24, 8  ;;  %s6334_s21 = sshll.u32 %s11923_s24, 7 }
  0x10   : > { %v6481_v13 = vsub.f32 %v411_v6, %v6469_v8  ;;  %v6485_v14 = vsub.f32 %v1697_v7, %v6473_v9  ;;  %s6491_s18 = scalar_lea.vmem %s10492_s0, %s6333_s15  ;;  %s9783_s28 = scalar_lea.vmem %s10498_s6, %s6334_s21 }
  0x11   : > { %972 = vmatpush.msra.mxu2 %v806_v10  ;;  %1158 = vmatpush.msra.mxu3 %v6459_v4  ;;  %v807_v15 = vand.u32 4294901760, %v806_v10  ;;  %v813_v16 = vand.u32 4294901760, %v812_v11  ;;  %v819_v17 = vand.u32 4294901760, %v818_v12  ;;  %v379_v18 = vld [vmem:[%s6491_s18] sm:$0xff]  ;;  %v380_v20 = vld [vmem:[%s6491_s18 + $0x8] sm:$0xff]  ;;  %v381_v29 = vld [vmem:[%s6491_s18 + $0x10] sm:$0xff]  ;;  %s10259_s8 = scalar_lea.vmem %s10499_s7, %s6334_s21 }
  0x12   : > { %531 = vmatpush.msra.mxu0 %v6459_v4  ;;  %v825_v19 = vand.u32 4294901760, %v6481_v13  ;;  %v10501_v21 = vand.u32 4294901760, %v6485_v14  ;;  %v421_v23 = vsel %vm419_vm0, %v379_v18, 0  ;;  %v424_v27 = vsel %vm419_vm0, %v380_v20, 0  ;;  %v382_v45 = vld [vmem:[%s6491_s18 + $0x18] sm:$0xff]  ;;  %v383_v52 = vld [vmem:[%s6491_s18 + $0x20] sm:$0xff] }
  0x13   : > { %975 = vmatpush.msra.mxu2 %v812_v11  ;;  %v808_v22 = vsub.f32 %v806_v10, %v807_v15  ;;  %1160 = vmatpush.msra.mxu3 %v6461_v5  ;;  %v814_v24 = vsub.f32 %v812_v11, %v813_v16  ;;  %v820_v25 = vsub.f32 %v818_v12, %v819_v17  ;;  %v6500_v26 = vand.u32 4294901760, %v421_v23  ;;  %v384_v59 = vld [vmem:[%s6491_s18 + $0x28] sm:$0xff]  ;;  %v385_v2 = vld [vmem:[%s6491_s18 + $0x30] sm:$0xff]  ;;  %v386_v10 = vld [vmem:[%s6491_s18 + $0x38] sm:$0xff] }
  0x14   : > { %533 = vmatpush.msra.mxu0 %v6461_v5  ;;  %v1994_v28 = vsub.f32 %v6485_v14, %v10501_v21  ;;  %v826_v32 = vsub.f32 %v6481_v13, %v825_v19  ;;  %v6510_v33 = vand.u32 4294901760, %v424_v27  ;;  %v427_v38 = vsel %vm419_vm0, %v381_v29, 0 }
  0x15   : > { %978 = vmatpush.msra.mxu2 %v818_v12  ;;  %v809_v30 = vand.u32 4294901760, %v808_v22  ;;  %v815_v31 = vand.u32 4294901760, %v814_v24  ;;  %1162 = vmatpush.msra.mxu3 %v6469_v8  ;;  %v6513_v34 = vsub.f32 %v421_v23, %v6500_v26  ;;  %v821_v35 = vand.u32 4294901760, %v820_v25  ;;  %v387_v22 = vld [vmem:[%s6491_s18 + $0x40] sm:$0xff] }
  0x16   : > { %535 = vmatpush.msra.mxu0 %v6469_v8  ;;  %v6518_v36 = vsub.f32 %v424_v27, %v6510_v33  ;;  %v1995_v37 = vand.u32 4294901760, %v1994_v28  ;;  %v827_v40 = vand.u32 4294901760, %v826_v32  ;;  %v6532_v43 = vand.u32 4294901760, %v427_v38 }
  0x17   : > { %10920 = vst [vmem:[#allocation2_spill] sm:$0xff] %v6513_v34  ;;  %810 = vmatpush.msra.mxu1 %v809_v30  ;;  %981 = vmatpush.msra.mxu2 %v6481_v13  ;;  %v6523_v39 = vand.u32 4294901760, %v6513_v34  ;;  %v430_v48 = vsel %vm419_vm0, %v382_v45, 0  ;;  %v433_v55 = vsel %vm419_vm0, %v383_v52, 0  ;;  %v436_v62 = vsel %vm419_vm0, %v384_v59, 0 }
  0x18   : > { %10921 = vst [vmem:[#allocation3_spill] sm:$0xff] %v6518_v36  ;;  %984 = vmatmul.f32.vlgmr.msra.gmra.mxu2 %v6513_v34  ;;  %1371 = vmatpush.msrb.mxu0 %v807_v15  ;;  %v6530_v42 = vand.u32 4294901760, %v6518_v36  ;;  %v6542_v47 = vsub.f32 %v427_v38, %v6532_v43  ;;  %v6555_v51 = vand.u32 4294901760, %v430_v48  ;;  %v6576_v58 = vand.u32 4294901760, %v433_v55  ;;  %v1696_v15 = vld [vmem:[%s10495_s3 + $0x10] sm:$0xff] }
  0x19   : > { %10922 = vst [vmem:[#allocation4_spill] sm:$0xff] %v6523_v39  ;;  %816 = vmatpush.msra.mxu1 %v815_v31  ;;  %1715 = vmatpush.msrb.mxu2 %v6473_v9  ;;  %v539_v41 = vsub.f32 %v6513_v34, %v6523_v39  ;;  %v6594_v1 = vand.u32 4294901760, %v436_v62  ;;  %v442_v13 = vsel %vm419_vm0, %v386_v10, 0  ;;  %v445_v27 = vsel %vm419_vm0, %v387_v22, 0  ;;  %v391_v22 = vld [vmem:[%s6491_s18 + $0x60] sm:$0xff] }
  0x1a   : > { %1166 = vmatmul.f32.vlgmr.msra.gmra.mxu3 %v6523_v39  ;;  %10923 = vst [vmem:[#allocation5_spill] sm:$0xff] %v6530_v42  ;;  %1375 = vmatpush.msrb.mxu0 %v813_v16  ;;  %v547_v46 = vsub.f32 %v6518_v36, %v6530_v42  ;;  %v6553_v50 = vand.u32 4294901760, %v6542_v47  ;;  %v6565_v54 = vsub.f32 %v430_v48, %v6555_v51  ;;  %v6627_v16 = vand.u32 4294901760, %v1696_v15  ;;  %v389_v48 = vld [vmem:[%s6491_s18 + $0x50] sm:$0xff] }
  0x1b   : > { %822 = vmatpush.msra.mxu1 %v821_v35  ;;  %1996 = vmatpush.msrb.mxu3 %v1995_v37  ;;  %v6534_v44 = vand.u32 4294901760, %v539_v41  ;;  %10924 = vst [vmem:[#allocation6_spill] sm:$0xff] %v6542_v47  ;;  %v6584_v61 = vsub.f32 %v433_v55, %v6576_v58  ;;  %v6663_v32 = vand.u32 4294901760, %v445_v27  ;;  %v388_v35 = vld [vmem:[%s6491_s18 + $0x48] sm:$0xff]  ;;  %v451_v55 = vsel %vm419_vm0, %v389_v48, 0 }
  0x1c   : > { %1379 = vmatpush.msrb.mxu0 %v819_v17  ;;  %v6550_v49 = vand.u32 4294901760, %v547_v46  ;;  %10925 = vst [vmem:[#allocation7_spill] sm:$0xff] %v6553_v50  ;;  %v555_v53 = vsub.f32 %v6542_v47, %v6553_v50  ;;  %v6574_v57 = vand.u32 4294901760, %v6565_v54  ;;  %1717 = vmatpush.msrb.mxu2 %v6627_v16  ;;  %v6639_v20 = vsub.f32 %v1696_v15, %v6627_v16 }
  0x1d   : > { %828 = vmatpush.msra.mxu1 %v827_v40  ;;  %541 = vmatmul.f32.vlgmr.msra.gmra.mxu0 %v6534_v44  ;;  %10926 = vst [vmem:[#allocation8_spill] sm:$0xff] %v6565_v54  ;;  %v6592_v0 = vand.u32 4294901760, %v6584_v61  ;;  %v6671_v38 = vsub.f32 %v445_v27, %v6663_v32  ;;  %v448_v40 = vsel %vm419_vm0, %v388_v35, 0 }
  0x1e   : > { %830 = vmatmul.f32.vlgmr.msra.gmra.mxu1 %v6500_v26  ;;  %1383 = vmatpush.msrb.mxu0 %v825_v19  ;;  %v6571_v56 = vand.u32 4294901760, %v555_v53  ;;  %10927 = vst [vmem:[#allocation9_spill] sm:$0xff] %v6574_v57  ;;  %v563_v60 = vsub.f32 %v6565_v54, %v6574_v57  ;;  %v6635_v19 = vand.u32 4294901760, %v442_v13  ;;  %v10500_v23 = vand.u32 4294901760, %v6639_v20 }
  0x1f   : > { %1526 = vmatpush.msrb.mxu1 %v6457_v3  ;;  %10928 = vst [vmem:[#allocation10_spill] sm:$0xff] %v6584_v61  ;;  %v571_v3 = vsub.f32 %v6584_v61, %v6592_v0  ;;  %v6679_v45 = vand.u32 4294901760, %v6671_v38  ;;  %v6681_v46 = vand.u32 4294901760, %v448_v40 }
  0x20   : > { %989 = vmatmul.f32.gmra.mxu2 %v6518_v36  ;;  %2158 = vmatpush.msra.mxu0 %v6485_v14  ;;  %v6589_v63 = vand.u32 4294901760, %v563_v60  ;;  %10929 = vst [vmem:[#allocation11_spill] sm:$0xff] %v6592_v0  ;;  %v6650_v25 = vsub.f32 %v442_v13, %v6635_v19  ;;  %v2000_v28 = vsub.f32 %v6639_v20, %v10500_v23 }
  0x21   : > { %1528 = vmatpush.msrb.mxu1 %v6459_v4  ;;  %v6602_v4 = vsub.f32 %v436_v62, %v6594_v1  ;;  %v6607_v6 = vand.u32 4294901760, %v571_v3  ;;  %10936 = vst [vmem:[#allocation18_spill] sm:$0xff] %v6671_v38  ;;  %v603_v52 = vsub.f32 %v6671_v38, %v6679_v45  ;;  %v6689_v53 = vsub.f32 %v448_v40, %v6681_v46  ;;  %v392_v40 = vld [vmem:[%s6491_s18 + $0x68] sm:$0xff] }
  0x22   : > { %1172 = vmatmul.f32.gmra.mxu3 %v6530_v42  ;;  %2161 = vmatpush.msra.mxu0 %v6639_v20  ;;  %10934 = vst [vmem:[#allocation16_spill] sm:$0xff] %v6650_v25  ;;  %v2001_v29 = vand.u32 4294901760, %v2000_v28  ;;  %v6661_v31 = vand.u32 4294901760, %v6650_v25  ;;  %v6699_v62 = vand.u32 4294901760, %v451_v55  ;;  %v457_v28 = vsel %vm419_vm0, %v391_v22, 0  ;;  %v393_v22 = vld [vmem:[%s6491_s18 + $0x70] sm:$0xff] }
  0x23   : > { %1530 = vmatpush.msrb.mxu1 %v6461_v5  ;;  %10930 = vst [vmem:[#allocation12_spill] sm:$0xff] %v6602_v4  ;;  %v439_v5 = vsel %vm419_vm0, %v385_v2, 0  ;;  %v6610_v7 = vand.u32 4294901760, %v6602_v4  ;;  %v6694_v59 = vand.u32 4294901760, %v603_v52  ;;  %v6697_v60 = vand.u32 4294901760, %v6689_v53  ;;  %v390_v2 = vld [vmem:[%s6491_s18 + $0x58] sm:$0xff] }
  0x24   : > { %10935 = vst [vmem:[#allocation17_spill] sm:$0xff] %v6661_v31  ;;  %2002 = vmatpush.msrb.mxu3 %v2001_v29  ;;  %v595_v37 = vsub.f32 %v6650_v25, %v6661_v31  ;;  %v454_v10 = vsel %vm419_vm0, %v390_v2, 0 }
  0x25   : > { %1532 = vmatpush.msrb.mxu1 %v6469_v8  ;;  %549 = vmatmul.f32.gmra.mxu0 %v6550_v49  ;;  %10931 = vst [vmem:[#allocation13_spill] sm:$0xff] %v6610_v7  ;;  %v6612_v8 = vand.u32 4294901760, %v439_v5  ;;  %v579_v11 = vsub.f32 %v6602_v4, %v6610_v7  ;;  %v611_v3 = vsub.f32 %v6689_v53, %v6697_v60  ;;  %v6717_v15 = vand.u32 4294901760, %v454_v10 }
  0x26   : > { %834 = vmatmul.f32.gmra.mxu1 %v6510_v33  ;;  %v6676_v41 = vand.u32 4294901760, %v595_v37  ;;  %10937 = vst [vmem:[#allocation19_spill] sm:$0xff] %v6679_v45  ;;  %v6735_v37 = vand.u32 4294901760, %v457_v28 }
  0x27   : > { %2342 = vmatpush.msra.mxu1 %v6473_v9  ;;  %v6620_v12 = vsub.f32 %v439_v5, %v6612_v8  ;;  %v6630_v17 = vand.u32 4294901760, %v579_v11  ;;  %10938 = vst [vmem:[#allocation20_spill] sm:$0xff] %v6689_v53  ;;  %v6707_v5 = vsub.f32 %v451_v55, %v6699_v62  ;;  %v6712_v11 = vand.u32 4294901760, %v611_v3 }
  0x28   : > { %994 = vmatmul.f32.gmra.mxu2 %v6542_v47  ;;  %10939 = vst [vmem:[#allocation21_spill] sm:$0xff] %v6697_v60  ;;  %v6725_v27 = vsub.f32 %v454_v10, %v6717_v15  ;;  %v6743_v52 = vsub.f32 %v457_v28, %v6735_v37  ;;  %v460_v55 = vsel %vm419_vm0, %v392_v40, 0  ;;  %v463_v40 = vsel %vm419_vm0, %v393_v22, 0 }
  0x29   : > { %10932 = vst [vmem:[#allocation14_spill] sm:$0xff] %v6620_v12  ;;  %v6633_v18 = vand.u32 4294901760, %v6620_v12  ;;  %2344 = vmatpush.msra.mxu1 %v6627_v16  ;;  %v6715_v13 = vand.u32 4294901760, %v6707_v5  ;;  %v6753_v10 = vand.u32 4294901760, %v460_v55  ;;  %v6771_v21 = vand.u32 4294901760, %v463_v40 }
  0x2a   : > { %1178 = vmatmul.f32.gmra.mxu3 %v6553_v50  ;;  %10940 = vst [vmem:[#allocation22_spill] sm:$0xff] %v6707_v5  ;;  %v6733_v35 = vand.u32 4294901760, %v6725_v27  ;;  %v6751_v3 = vand.u32 4294901760, %v6743_v52 }
  0x2b   : > { %10933 = vst [vmem:[#allocation15_spill] sm:$0xff] %v6633_v18  ;;  %v587_v24 = vsub.f32 %v6620_v12, %v6633_v18  ;;  %v6761_v28 = vsub.f32 %v460_v55, %v6753_v10  ;;  %v6779_v22 = vsub.f32 %v463_v40, %v6771_v21  ;;  %v395_v40 = vld [vmem:[%s6491_s18 + $0x80] sm:$0xff] }
  0x2c   : > { %10941 = vst [vmem:[#allocation23_spill] sm:$0xff] %v6715_v13  ;;  %v627_v48 = vsub.f32 %v6725_v27, %v6733_v35 }
  0x2d   : > { %557 = vmatmul.f32.gmra.mxu0 %v6571_v56  ;;  %v6658_v30 = vand.u32 4294901760, %v587_v24  ;;  %v619_v24 = vsub.f32 %v6707_v5, %v6715_v13  ;;  %10942 = vst [vmem:[#allocation24_spill] sm:$0xff] %v6725_v27  ;;  %v6769_v23 = vand.u32 4294901760, %v6761_v28 }
  0x2e   : > { %838 = vmatmul.f32.gmra.mxu1 %v6532_v43  ;;  %10943 = vst [vmem:[#allocation25_spill] sm:$0xff] %v6733_v35  ;;  %v6748_v2 = vand.u32 4294901760, %v627_v48 }
  0x2f   : > { %v6730_v29 = vand.u32 4294901760, %v619_v24  ;;  %10944 = vst [vmem:[#allocation26_spill] sm:$0xff] %v6743_v52  ;;  %v635_v24 = vsub.f32 %v6743_v52, %v6751_v3  ;;  %v643_v55 = vsub.f32 %v6761_v28, %v6769_v23 }
  0x30   : > { %999 = vmatmul.f32.gmra.mxu2 %v6565_v54  ;;  %10945 = vst [vmem:[#allocation27_spill] sm:$0xff] %v6751_v3 }
  0x31   : > { %10946 = vst [vmem:[#allocation28_spill] sm:$0xff] %v6761_v28  ;;  %v6766_v48 = vand.u32 4294901760, %v635_v24 }
  0x32   : > { %1184 = vmatmul.f32.gmra.mxu3 %v6574_v57  ;;  %10947 = vst [vmem:[#allocation29_spill] sm:$0xff] %v6769_v23 }
  0x33   : > { %10948 = vst [vmem:[#allocation30_spill] sm:$0xff] %v6779_v22 }
  0x35   : > { %565 = vmatmul.f32.gmra.mxu0 %v6589_v63 }
  0x36   : > { %842 = vmatmul.f32.gmra.mxu1 %v6555_v51 }
  0x38   : > { %1004 = vmatmul.f32.gmra.mxu2 %v6584_v61 }
  0x3a   : > { %1190 = vmatmul.f32.gmra.mxu3 %v6592_v0 }
  0x3d   : > { %573 = vmatmul.f32.gmra.mxu0 %v6607_v6 }
  0x3e   : > { %846 = vmatmul.f32.gmra.mxu1 %v6576_v58 }
  0x40   : > { %1009 = vmatmul.f32.gmra.mxu2 %v6602_v4 }
  0x42   : > { %1196 = vmatmul.f32.gmra.mxu3 %v6610_v7 }
  0x45   : > { %581 = vmatmul.f32.gmra.mxu0 %v6630_v17 }
  0x46   : > { %850 = vmatmul.f32.gmra.mxu1 %v6594_v1 }
  0x48   : > { %1014 = vmatmul.f32.gmra.mxu2 %v6620_v12 }
  0x4a   : > { %1202 = vmatmul.f32.gmra.mxu3 %v6633_v18 }
  0x4d   : > { %589 = vmatmul.f32.gmra.mxu0 %v6658_v30 }
  0x4e   : > { %854 = vmatmul.f32.gmra.mxu1 %v6612_v8 }
  0x50   : > { %1019 = vmatmul.f32.gmra.mxu2 %v6650_v25 }
  0x52   : > { %1208 = vmatmul.f32.gmra.mxu3 %v6661_v31 }
  0x55   : > { %597 = vmatmul.f32.gmra.mxu0 %v6676_v41 }
  0x56   : > { %858 = vmatmul.f32.gmra.mxu1 %v6635_v19 }
  0x58   : > { %1024 = vmatmul.f32.gmra.mxu2 %v6671_v38 }
  0x5a   : > { %1214 = vmatmul.f32.gmra.mxu3 %v6679_v45 }
  0x5d   : > { %605 = vmatmul.f32.gmra.mxu0 %v6694_v59 }
  0x5e   : > { %862 = vmatmul.f32.gmra.mxu1 %v6663_v32 }
  0x60   : > { %1029 = vmatmul.f32.gmra.mxu2 %v6689_v53 }
  0x62   : > { %1220 = vmatmul.f32.gmra.mxu3 %v6697_v60 }
  0x65   : > { %613 = vmatmul.f32.gmra.mxu0 %v6712_v11 }
  0x66   : > { %866 = vmatmul.f32.gmra.mxu1 %v6681_v46 }
  0x68   : > { %1034 = vmatmul.f32.gmra.mxu2 %v6707_v5 }
  0x6a   : > { %1226 = vmatmul.f32.gmra.mxu3 %v6715_v13  ;;  %v6792_v13 = vand.u32 4294901760, %v6779_v22 }
  0x6c   : > { %10949 = vst [vmem:[#allocation31_spill] sm:$0xff] %v6792_v13 }
  0x6d   : > { %621 = vmatmul.f32.gmra.mxu0 %v6730_v29 }
  0x6e   : > { %870 = vmatmul.f32.gmra.mxu1 %v6699_v62 }
  0x70   : > { %1039 = vmatmul.f32.gmra.mxu2 %v6725_v27  ;;  %v6789_v27 = vand.u32 4294901760, %v643_v55  ;;  %v651_v55 = vsub.f32 %v6779_v22, %v6792_v13 }
  0x72   : > { %1232 = vmatmul.f32.gmra.mxu3 %v6733_v35  ;;  %v394_v35 = vld [vmem:[%s6491_s18 + $0x78] sm:$0xff]  ;;  %v6817_v45 = vand.u32 4294901760, %v651_v55 }
  0x73   : > { %v466_v24 = vsel %vm419_vm0, %v394_v35, 0 }
  0x74   : > { %v6794_v5 = vand.u32 4294901760, %v466_v24 }
  0x75   : > { %629 = vmatmul.f32.gmra.mxu0 %v6748_v2 }
  0x76   : > { %874 = vmatmul.f32.gmra.mxu1 %v6717_v15 }
  0x78   : > { %1044 = vmatmul.f32.gmra.mxu2 %v6743_v52 }
  0x7a   : > { %1238 = vmatmul.f32.gmra.mxu3 %v6751_v3  ;;  %v1695_v3 = vld [vmem:[%s10495_s3 + $0x8] sm:$0xff] }
  0x7b   : > { %v6786_v52 = vand.u32 4294901760, %v1695_v3 }
  0x7d   : > { %637 = vmatmul.f32.gmra.mxu0 %v6766_v48  ;;  %1719 = vmatpush.msrb.mxu2 %v6786_v52  ;;  %v6798_v35 = vsub.f32 %v1695_v3, %v6786_v52  ;;  %v469_v3 = vsel %vm419_vm0, %v395_v40, 0 }
  0x7e   : > { %878 = vmatmul.f32.gmra.mxu1 %v6735_v37  ;;  %v6822_v31 = vand.u32 4294901760, %v469_v3 }
  0x7f   : > { %2346 = vmatpush.msra.mxu1 %v6786_v52  ;;  %2164 = vmatpush.msra.mxu0 %v6798_v35 }
  0x80   : > { %1049 = vmatmul.f32.gmra.mxu2 %v6761_v28  ;;  %v10515_v28 = vand.u32 4294901760, %v6798_v35  ;;  %10952 = vst [vmem:[#allocation34_spill] sm:$0xff] %v6822_v31 }
  0x82   : > { %1244 = vmatmul.f32.gmra.mxu3 %v6769_v23  ;;  %v6809_v23 = vsub.f32 %v466_v24, %v6794_v5  ;;  %v2006_v60 = vsub.f32 %v6798_v35, %v10515_v28  ;;  %v396_v24 = vld [vmem:[%s6491_s18 + $0x88] sm:$0xff] }
  0x83   : > { %v472_v55 = vsel %vm419_vm0, %v396_v24, 0 }
  0x84   : > { %10950 = vst [vmem:[#allocation32_spill] sm:$0xff] %v6809_v23  ;;  %v2007_v53 = vand.u32 4294901760, %v2006_v60  ;;  %v6820_v38 = vand.u32 4294901760, %v6809_v23  ;;  %v6830_v60 = vsub.f32 %v469_v3, %v6822_v31 }
  0x85   : > { %645 = vmatmul.f32.gmra.mxu0 %v6789_v27 }
  0x86   : > { %882 = vmatmul.f32.gmra.mxu1 %v6753_v10  ;;  %10951 = vst [vmem:[#allocation33_spill] sm:$0xff] %v6820_v38  ;;  %2008 = vmatpush.msrb.mxu3 %v2007_v53  ;;  %v659_v40 = vsub.f32 %v6809_v23, %v6820_v38  ;;  %v6838_v53 = vand.u32 4294901760, %v6830_v60 }
  0x87   : > { %10953 = vst [vmem:[#allocation35_spill] sm:$0xff] %v6830_v60 }
  0x88   : > { %1054 = vmatmul.f32.gmra.mxu2 %v6779_v22  ;;  %v6835_v28 = vand.u32 4294901760, %v659_v40  ;;  %10954 = vst [vmem:[#allocation36_spill] sm:$0xff] %v6838_v53  ;;  %v397_v22 = vld [vmem:[%s6491_s18 + $0x90] sm:$0xff]  ;;  %v667_v3 = vsub.f32 %v6830_v60, %v6838_v53 }
  0x89   : > { %v475_v40 = vsel %vm419_vm0, %v397_v22, 0 }
  0x8a   : > { %1250 = vmatmul.f32.gmra.mxu3 %v6792_v13  ;;  %v6840_v13 = vand.u32 4294901760, %v472_v55  ;;  %v6863_v18 = vand.u32 4294901760, %v475_v40 }
  0x8c   : > { %10955 = vst [vmem:[#allocation37_spill] sm:$0xff] %v6840_v13  ;;  %v6848_v24 = vsub.f32 %v472_v55, %v6840_v13 }
  0x8d   : > { %653 = vmatmul.f32.gmra.mxu0 %v6817_v45  ;;  %10958 = vst [vmem:[#allocation40_spill] sm:$0xff] %v6863_v18 }
  0x8e   : > { %886 = vmatmul.f32.gmra.mxu1 %v6771_v21  ;;  %10956 = vst [vmem:[#allocation38_spill] sm:$0xff] %v6848_v24  ;;  %v6861_v25 = vand.u32 4294901760, %v6848_v24 }
  0x90   : > { %1059 = vmatmul.f32.gmra.mxu2 %v6809_v23  ;;  %v6858_v23 = vand.u32 4294901760, %v667_v3  ;;  %10957 = vst [vmem:[#allocation39_spill] sm:$0xff] %v6861_v25  ;;  %v675_v3 = vsub.f32 %v6848_v24, %v6861_v25 }
  0x92   : > { %1256 = vmatmul.f32.gmra.mxu3 %v6820_v38  ;;  %v6855_v38 = vld [vmem:[%s10494_s2] ss:$0 sm:$0xff] }
  0x95   : > { %661 = vmatmul.f32.gmra.mxu0 %v6835_v28 }
  0x96   : > { %890 = vmatmul.f32.gmra.mxu1 %v6794_v5 }
  0x98   : > { %1064 = vmatmul.f32.gmra.mxu2 %v6830_v60  ;;  %v398_v60 = vld [vmem:[%s6491_s18 + $0x98] sm:$0xff] }
  0x99   : > { %v478_v61 = vsel %vm419_vm0, %v398_v60, 0  ;;  %v399_v60 = vld [vmem:[%s6491_s18 + $0xa0] sm:$0xff] }
  0x9a   : > { %1262 = vmatmul.f32.gmra.mxu3 %v6838_v53  ;;  %v542_v55 = vpop.f32.mrf.mxu0  ;;  %v6872_v53 = vsub.f32 %v475_v40, %v6863_v18  ;;  %v6884_v54 = vand.u32 4294901760, %v478_v61 }
  0x9b   : > { %v831_v12 = vpop.f32.mrf.mxu1  ;;  %v543_v22 = vadd.f32 %v6855_v38, %v542_v55  ;;  %v985_v7 = vpop.f32.mrf.mxu2 }
  0x9c   : > { %10959 = vst [vmem:[#allocation41_spill] sm:$0xff] %v6872_v53 }
  0x9d   : > { %v1167_v4 = vpop.f32.mrf.mxu3  ;;  %v832_v0 = vadd.f32 %v831_v12, %v543_v22  ;;  %669 = vmatmul.f32.gmra.mxu0 %v6858_v23  ;;  %v6879_v12 = vand.u32 4294901760, %v675_v3  ;;  %v6882_v22 = vand.u32 4294901760, %v6872_v53  ;;  %10961 = vst [vmem:[#allocation43_spill] sm:$0xff] %v6884_v54  ;;  %v481_v3 = vsel %vm419_vm0, %v399_v60, 0  ;;  %v400_v60 = vld [vmem:[%s6491_s18 + $0xa8] sm:$0xff] }
  0x9e   : > { %894 = vmatmul.f32.gmra.mxu1 %v6822_v31 }
  0x9f   : > { %v986_v57 = vadd.f32 %v985_v7, %v832_v0  ;;  %10960 = vst [vmem:[#allocation42_spill] sm:$0xff] %v6882_v22 }
  0xa0   : > { %1069 = vmatmul.f32.gmra.mxu2 %v6848_v24  ;;  %v6905_v24 = vand.u32 4294901760, %v481_v3 }
  0xa1   : > { %v6876_v55 = vadd.f32 %v1167_v4, %v986_v57  ;;  %v683_v57 = vsub.f32 %v6872_v53, %v6882_v22  ;;  %v6893_v4 = vsub.f32 %v478_v61, %v6884_v54 }
  0xa2   : > { %1268 = vmatmul.f32.gmra.mxu3 %v6861_v25  ;;  %v550_v50 = vpop.f32.mrf.mxu0  ;;  %10966 = vst [vmem:[#allocation48_spill] sm:$0xff] %v6905_v24 }
  0xa3   : > { %v835_v47 = vpop.f32.mrf.mxu1  ;;  %v551_v40 = vadd.f32 %v6855_v38, %v550_v50  ;;  %v990_v42 = vpop.f32.mrf.mxu2  ;;  %10962 = vst [vmem:[#allocation44_spill] sm:$0xff] %v6893_v4 }
  0xa5   : > { %v1173_v0 = vpop.f32.mrf.mxu3  ;;  %v836_v7 = vadd.f32 %v835_v47, %v551_v40  ;;  %677 = vmatmul.f32.gmra.mxu0 %v6879_v12  ;;  %v6900_v47 = vand.u32 4294901760, %v683_v57  ;;  %v6903_v40 = vand.u32 4294901760, %v6893_v4  ;;  %v484_v57 = vsel %vm419_vm0, %v400_v60, 0  ;;  %v401_v60 = vld [vmem:[%s6491_s18 + $0xb0] sm:$0xff] }
  0xa6   : > { %898 = vmatmul.f32.gmra.mxu1 %v6840_v13 }
  0xa7   : > { %v991_v25 = vadd.f32 %v990_v42, %v836_v7  ;;  %10964 = vst [vmem:[#allocation46_spill] sm:$0xff] %v6900_v47 }
  0xa8   : > { %1074 = vmatmul.f32.gmra.mxu2 %v6872_v53  ;;  %10965 = vst [vmem:[#allocation47_spill] sm:$0xff] %v6903_v40  ;;  %v6926_v53 = vand.u32 4294901760, %v484_v57 }
  0xa9   : > { %v6897_v50 = vadd.f32 %v1173_v0, %v991_v25  ;;  %v691_v25 = vsub.f32 %v6893_v4, %v6903_v40  ;;  %v6914_v0 = vsub.f32 %v481_v3, %v6905_v24 }
  0xaa   : > { %1274 = vmatmul.f32.gmra.mxu3 %v6882_v22  ;;  %v558_v36 = vpop.f32.mrf.mxu0  ;;  %10971 = vst [vmem:[#allocation53_spill] sm:$0xff] %v6926_v53 }
  0xab   : > { %10963 = vst [vmem:[#allocation45_spill] sm:$0xff] %v6897_v50  ;;  %v839_v39 = vpop.f32.mrf.mxu1  ;;  %v559_v61 = vadd.f32 %v6855_v38, %v558_v36  ;;  %v995_v34 = vpop.f32.mrf.mxu2 }
  0xac   : > { %10967 = vst [vmem:[#allocation49_spill] sm:$0xff] %v6914_v0 }
  0xad   : > { %v1179_v42 = vpop.f32.mrf.mxu3  ;;  %v840_v7 = vadd.f32 %v839_v39, %v559_v61  ;;  %685 = vmatmul.f32.gmra.mxu0 %v6900_v47  ;;  %v6921_v39 = vand.u32 4294901760, %v691_v25  ;;  %v6924_v61 = vand.u32 4294901760, %v6914_v0  ;;  %v487_v25 = vsel %vm419_vm0, %v401_v60, 0  ;;  %v402_v60 = vld [vmem:[%s6491_s18 + $0xb8] sm:$0xff] }
  0xae   : > { %902 = vmatmul.f32.gmra.mxu1 %v6863_v18 }
  0xaf   : > { %v996_v22 = vadd.f32 %v995_v34, %v840_v7  ;;  %10969 = vst [vmem:[#allocation51_spill] sm:$0xff] %v6921_v39 }
  0xb0   : > { %1079 = vmatmul.f32.gmra.mxu2 %v6893_v4  ;;  %10970 = vst [vmem:[#allocation52_spill] sm:$0xff] %v6924_v61  ;;  %v6947_v4 = vand.u32 4294901760, %v487_v25 }
  0xb1   : > { %v6918_v36 = vadd.f32 %v1179_v42, %v996_v22  ;;  %v699_v22 = vsub.f32 %v6914_v0, %v6924_v61  ;;  %v6935_v42 = vsub.f32 %v484_v57, %v6926_v53 }
  0xb2   : > { %1280 = vmatmul.f32.gmra.mxu3 %v6903_v40  ;;  %v566_v18 = vpop.f32.mrf.mxu0  ;;  %10976 = vst [vmem:[#allocation58_spill] sm:$0xff] %v6947_v4 }
  0xb3   : > { %10968 = vst [vmem:[#allocation50_spill] sm:$0xff] %v6918_v36  ;;  %v843_v47 = vpop.f32.mrf.mxu1  ;;  %v567_v3 = vadd.f32 %v6855_v38, %v566_v18  ;;  %v1000_v50 = vpop.f32.mrf.mxu2 }
  0xb4   : > { %10972 = vst [vmem:[#allocation54_spill] sm:$0xff] %v6935_v42 }
  0xb5   : > { %v1185_v34 = vpop.f32.mrf.mxu3  ;;  %v844_v7 = vadd.f32 %v843_v47, %v567_v3  ;;  %693 = vmatmul.f32.gmra.mxu0 %v6921_v39  ;;  %v6942_v47 = vand.u32 4294901760, %v699_v22  ;;  %v6945_v3 = vand.u32 4294901760, %v6935_v42  ;;  %v490_v22 = vsel %vm419_vm0, %v402_v60, 0 }
  0xb6   : > { %906 = vmatmul.f32.gmra.mxu1 %v6884_v54 }
  0xb7   : > { %v1001_v40 = vadd.f32 %v1000_v50, %v844_v7  ;;  %10974 = vst [vmem:[#allocation56_spill] sm:$0xff] %v6942_v47 }
  0xb8   : > { %1084 = vmatmul.f32.gmra.mxu2 %v6914_v0  ;;  %10975 = vst [vmem:[#allocation57_spill] sm:$0xff] %v6945_v3 }
  0xb9   : > { %v6939_v18 = vadd.f32 %v1185_v34, %v1001_v40  ;;  %v707_v40 = vsub.f32 %v6935_v42, %v6945_v3  ;;  %v6956_v34 = vsub.f32 %v487_v25, %v6947_v4 }
  0xba   : > { %1286 = vmatmul.f32.gmra.mxu3 %v6924_v61  ;;  %v574_v54 = vpop.f32.mrf.mxu0 }
  0xbb   : > { %10973 = vst [vmem:[#allocation55_spill] sm:$0xff] %v6939_v18  ;;  %v847_v39 = vpop.f32.mrf.mxu1  ;;  %v575_v57 = vadd.f32 %v6855_v38, %v574_v54  ;;  %v1005_v36 = vpop.f32.mrf.mxu2  ;;  %v1694_v54 = vld [vmem:[%s10495_s3] sm:$0xff]  ;;  %v6966_v0 = vand.u32 4294901760, %v707_v40  ;;  %v6969_v25 = vand.u32 4294901760, %v6956_v34 }
  0xbc   : > { %10977 = vst [vmem:[#allocation59_spill] sm:$0xff] %v6956_v34  ;;  %v403_v18 = vld [vmem:[%s6491_s18 + $0xc0] sm:$0xff] }
  0xbd   : > { %v1191_v50 = vpop.f32.mrf.mxu3  ;;  %v848_v7 = vadd.f32 %v847_v39, %v575_v57  ;;  %701 = vmatmul.f32.gmra.mxu0 %v6942_v47  ;;  %v1720_v39 = vand.u32 4294901760, %v1694_v54  ;;  %10979 = vst [vmem:[#allocation61_spill] sm:$0xff] %v6969_v25 }
  0xbe   : > { %910 = vmatmul.f32.gmra.mxu1 %v6905_v24  ;;  %v6971_v24 = vand.u32 4294901760, %v490_v22 }
  0xbf   : > { %v1006_v61 = vadd.f32 %v1005_v36, %v848_v7  ;;  %1721 = vmatpush.msrb.mxu2 %v1720_v39  ;;  %v2010_v7 = vsub.f32 %v1694_v54, %v1720_v39  ;;  %2348 = vmatpush.msra.mxu1 %v1720_v39 }
  0xc0   : > { %1089 = vmatmul.f32.gmra.mxu2 %v6935_v42  ;;  %10980 = vst [vmem:[#allocation62_spill] sm:$0xff] %v6971_v24  ;;  %v6982_v54 = vsub.f32 %v490_v22, %v6971_v24 }
  0xc1   : > { %v6963_v57 = vadd.f32 %v1191_v50, %v1006_v61  ;;  %v10981_v61 = vand.u32 4294901760, %v6485_v14  ;;  %v2011_v40 = vand.u32 4294901760, %v2010_v7  ;;  %2167 = vmatpush.msra.mxu0 %v2010_v7  ;;  %v10983_v14 = vand.u32 4294901760, %v6639_v20 }
  0xc2   : > { %1292 = vmatmul.f32.gmra.mxu3 %v6945_v3  ;;  %v582_v36 = vpop.f32.mrf.mxu0  ;;  %10982 = vst [vmem:[#allocation63_spill] sm:$0xff] %v6982_v54 }
  0xc3   : > { %10978 = vst [vmem:[#allocation60_spill] sm:$0xff] %v6963_v57  ;;  %v851_v60 = vpop.f32.mrf.mxu1  ;;  %v583_v42 = vadd.f32 %v6855_v38, %v582_v36  ;;  %v1010_v47 = vpop.f32.mrf.mxu2  ;;  %2557 = vmatpush.msra.mxu2 %v10981_v61  ;;  %v715_v57 = vsub.f32 %v6956_v34, %v6969_v25  ;;  %v493_v36 = vsel %vm419_vm0, %v403_v18, 0  ;;  %v2012_v13 = vsub.f32 %v2010_v7, %v2011_v40 }
  0xc4   : > { %v6996_v18 = vand.u32 4294901760, %v6982_v54  ;;  %v6998_v7 = vand.u32 4294901760, %v493_v36 }
  0xc5   : > { %v1197_v50 = vpop.f32.mrf.mxu3  ;;  %v852_v3 = vadd.f32 %v851_v60, %v583_v42  ;;  %709 = vmatmul.f32.gmra.mxu0 %v6966_v0  ;;  %2561 = vmatpush.msra.mxu2 %v10983_v14  ;;  %v2013_v42 = vand.u32 4294901760, %v2012_v13  ;;  %v10984_v60 = vand.u32 4294901760, %v6798_v35  ;;  %v6993_v22 = vand.u32 4294901760, %v715_v57  ;;  %v404_v35 = vld [vmem:[%s6491_s18 + $0xc8] sm:$0xff] }
  0xc6   : > { %914 = vmatmul.f32.gmra.mxu1 %v6926_v53  ;;  %10985 = vst [vmem:[#allocation64_spill] sm:$0xff] %v6996_v18  ;;  %v723_v57 = vsub.f32 %v6982_v54, %v6996_v18 }
  0xc7   : > { %v1011_v61 = vadd.f32 %v1010_v47, %v852_v3  ;;  %2565 = vmatpush.msra.mxu2 %v10984_v60  ;;  %10986 = vst [vmem:[#allocation65_spill] sm:$0xff] %v6998_v7  ;;  %2014 = vmatpush.msrb.mxu3 %v2013_v42 }
  0xc8   : > { %1094 = vmatmul.f32.gmra.mxu2 %v6956_v34  ;;  %v7017_v60 = vand.u32 4294901760, %v723_v57 }
  0xc9   : > { %v6990_v53 = vadd.f32 %v1197_v50, %v1011_v61  ;;  %2569 = vmatpush.msra.mxu2 %v2011_v40  ;;  %2712 = vmatpush.msra.mxu3 %v6473_v9  ;;  %v7008_v61 = vsub.f32 %v493_v36, %v6998_v7  ;;  %v496_v40 = vsel %vm419_vm0, %v404_v35, 0  ;;  %v405_v35 = vld [vmem:[%s6491_s18 + $0xd0] sm:$0xff] }
  0xca   : > { %1298 = vmatmul.f32.gmra.mxu3 %v6969_v25  ;;  %v590_v20 = vpop.f32.mrf.mxu0  ;;  %v7022_v36 = vand.u32 4294901760, %v496_v40 }
  0xcb   : > { %v855_v14 = vpop.f32.mrf.mxu1  ;;  %v591_v13 = vadd.f32 %v6855_v38, %v590_v20  ;;  %v1015_v47 = vpop.f32.mrf.mxu2  ;;  %10987 = vst [vmem:[#allocation66_spill] sm:$0xff] %v7008_v61  ;;  %2714 = vmatpush.msra.mxu3 %v6627_v16  ;;  %v7020_v20 = vand.u32 4294901760, %v7008_v61 }
  0xcc   : > { %10989 = vst [vmem:[#allocation68_spill] sm:$0xff] %v7022_v36  ;;  %v7031_v57 = vsub.f32 %v496_v40, %v7022_v36 }
  0xcd   : > { %v1203_v3 = vpop.f32.mrf.mxu3  ;;  %v856_v50 = vadd.f32 %v855_v14, %v591_v13  ;;  %717 = vmatmul.f32.gmra.mxu0 %v6993_v22  ;;  %2716 = vmatpush.msra.mxu3 %v6786_v52  ;;  %10988 = vst [vmem:[#allocation67_spill] sm:$0xff] %v7020_v20 }
  0xce   : > { %918 = vmatmul.f32.gmra.mxu1 %v6947_v4  ;;  %10990 = vst [vmem:[#allocation69_spill] sm:$0xff] %v7031_v57 }
  0xcf   : > { %v1016_v42 = vadd.f32 %v1015_v47, %v856_v50  ;;  %2718 = vmatpush.msra.mxu3 %v1720_v39 }
  0xd0   : > { %1099 = vmatmul.f32.gmra.mxu2 %v6982_v54 }
  0xd1   : > { %v7014_v9 = vadd.f32 %v1203_v3, %v1016_v42  ;;  %v731_v3 = vsub.f32 %v7008_v61, %v7020_v20  ;;  %v499_v42 = vsel %vm419_vm0, %v405_v35, 0  ;;  %v406_v35 = vld [vmem:[%s6491_s18 + $0xd8] sm:$0xff] }
  0xd2   : > { %1304 = vmatmul.f32.gmra.mxu3 %v6996_v18  ;;  %v598_v14 = vpop.f32.mrf.mxu0  ;;  %v7043_v18 = vand.u32 4294901760, %v499_v42 }
  0xd3   : > { %v859_v13 = vpop.f32.mrf.mxu1  ;;  %v599_v16 = vadd.f32 %v6855_v38, %v598_v14  ;;  %v1020_v47 = vpop.f32.mrf.mxu2 }
  0xd4   : > { %10994 = vst [vmem:[#allocation73_spill] sm:$0xff] %v7043_v18 }
  0xd5   : > { %v1209_v50 = vpop.f32.mrf.mxu3  ;;  %v860_v52 = vadd.f32 %v859_v13, %v599_v16  ;;  %725 = vmatmul.f32.gmra.mxu0 %v7017_v60  ;;  %v7038_v13 = vand.u32 4294901760, %v731_v3  ;;  %v7041_v16 = vand.u32 4294901760, %v7031_v57  ;;  %v7052_v3 = vsub.f32 %v499_v42, %v7043_v18 }
  0xd6   : > { %922 = vmatmul.f32.gmra.mxu1 %v6971_v24 }
  0xd7   : > { %v1021_v39 = vadd.f32 %v1020_v47, %v860_v52  ;;  %10992 = vst [vmem:[#allocation71_spill] sm:$0xff] %v7038_v13 }
  0xd8   : > { %1104 = vmatmul.f32.gmra.mxu2 %v7008_v61  ;;  %10993 = vst [vmem:[#allocation72_spill] sm:$0xff] %v7041_v16 }
  0xd9   : > { %v7035_v14 = vadd.f32 %v1209_v50, %v1021_v39  ;;  %v739_v50 = vsub.f32 %v7031_v57, %v7041_v16  ;;  %10995 = vst [vmem:[#allocation74_spill] sm:$0xff] %v7052_v3  ;;  %v502_v39 = vsel %vm419_vm0, %v406_v35, 0  ;;  %v407_v35 = vld [vmem:[%s6491_s18 + $0xe0] sm:$0xff] }
  0xda   : > { %1310 = vmatmul.f32.gmra.mxu3 %v7020_v20  ;;  %v606_v54 = vpop.f32.mrf.mxu0  ;;  %v7064_v61 = vand.u32 4294901760, %v502_v39 }
  0xdb   : > { %10991 = vst [vmem:[#allocation70_spill] sm:$0xff] %v7035_v14  ;;  %v863_v25 = vpop.f32.mrf.mxu1  ;;  %v607_v40 = vadd.f32 %v6855_v38, %v606_v54  ;;  %v1025_v34 = vpop.f32.mrf.mxu2 }
  0xdc   : > { %10999 = vst [vmem:[#allocation78_spill] sm:$0xff] %v7064_v61 }
  0xdd   : > { %v1215_v47 = vpop.f32.mrf.mxu3  ;;  %v864_v52 = vadd.f32 %v863_v25, %v607_v40  ;;  %733 = vmatmul.f32.gmra.mxu0 %v7038_v13  ;;  %v7059_v25 = vand.u32 4294901760, %v739_v50  ;;  %v7062_v40 = vand.u32 4294901760, %v7052_v3  ;;  %v505_v50 = vsel %vm419_vm0, %v407_v35, 0  ;;  %v408_v35 = vld [vmem:[%s6491_s18 + $0xe8] sm:$0xff] }
  0xde   : > { %926 = vmatmul.f32.gmra.mxu1 %v6998_v7 }
  0xdf   : > { %v1026_v20 = vadd.f32 %v1025_v34, %v864_v52  ;;  %10997 = vst [vmem:[#allocation76_spill] sm:$0xff] %v7059_v25 }
  0xe0   : > { %1109 = vmatmul.f32.gmra.mxu2 %v7031_v57  ;;  %10998 = vst [vmem:[#allocation77_spill] sm:$0xff] %v7062_v40  ;;  %v7085_v57 = vand.u32 4294901760, %v505_v50 }
  0xe1   : > { %v7056_v54 = vadd.f32 %v1215_v47, %v1026_v20  ;;  %v747_v20 = vsub.f32 %v7052_v3, %v7062_v40  ;;  %v7073_v47 = vsub.f32 %v502_v39, %v7064_v61 }
  0xe2   : > { %1316 = vmatmul.f32.gmra.mxu3 %v7041_v16  ;;  %v614_v7 = vpop.f32.mrf.mxu0  ;;  %11004 = vst [vmem:[#allocation83_spill] sm:$0xff] %v7085_v57 }
  0xe3   : > { %10996 = vst [vmem:[#allocation75_spill] sm:$0xff] %v7056_v54  ;;  %v867_v13 = vpop.f32.mrf.mxu1  ;;  %v615_v42 = vadd.f32 %v6855_v38, %v614_v7  ;;  %v1030_v14 = vpop.f32.mrf.mxu2 }
  0xe4   : > { %11000 = vst [vmem:[#allocation79_spill] sm:$0xff] %v7073_v47 }
  0xe5   : > { %v1221_v34 = vpop.f32.mrf.mxu3  ;;  %v868_v52 = vadd.f32 %v867_v13, %v615_v42  ;;  %741 = vmatmul.f32.gmra.mxu0 %v7059_v25  ;;  %v7080_v13 = vand.u32 4294901760, %v747_v20  ;;  %v7083_v42 = vand.u32 4294901760, %v7073_v47  ;;  %v508_v20 = vsel %vm419_vm0, %v408_v35, 0  ;;  %v409_v35 = vld [vmem:[%s6491_s18 + $0xf0] sm:$0xff] }
  0xe6   : > { %930 = vmatmul.f32.gmra.mxu1 %v7022_v36 }
  0xe7   : > { %v1031_v16 = vadd.f32 %v1030_v14, %v868_v52  ;;  %11002 = vst [vmem:[#allocation81_spill] sm:$0xff] %v7080_v13 }
  0xe8   : > { %1114 = vmatmul.f32.gmra.mxu2 %v7052_v3  ;;  %11003 = vst [vmem:[#allocation82_spill] sm:$0xff] %v7083_v42  ;;  %v7106_v3 = vand.u32 4294901760, %v508_v20 }
  0xe9   : > { %v7077_v7 = vadd.f32 %v1221_v34, %v1031_v16  ;;  %v755_v16 = vsub.f32 %v7073_v47, %v7083_v42  ;;  %v7094_v34 = vsub.f32 %v505_v50, %v7085_v57 }
  0xea   : > { %1322 = vmatmul.f32.gmra.mxu3 %v7062_v40  ;;  %v622_v36 = vpop.f32.mrf.mxu0  ;;  %11009 = vst [vmem:[#allocation88_spill] sm:$0xff] %v7106_v3 }
  0xeb   : > { %11001 = vst [vmem:[#allocation80_spill] sm:$0xff] %v7077_v7  ;;  %v871_v25 = vpop.f32.mrf.mxu1  ;;  %v623_v39 = vadd.f32 %v6855_v38, %v622_v36  ;;  %v1035_v54 = vpop.f32.mrf.mxu2 }
  0xec   : > { %11005 = vst [vmem:[#allocation84_spill] sm:$0xff] %v7094_v34 }
  0xed   : > { %v1227_v14 = vpop.f32.mrf.mxu3  ;;  %v872_v52 = vadd.f32 %v871_v25, %v623_v39  ;;  %749 = vmatmul.f32.gmra.mxu0 %v7080_v13  ;;  %v7101_v25 = vand.u32 4294901760, %v755_v16  ;;  %v7104_v39 = vand.u32 4294901760, %v7094_v34  ;;  %v511_v16 = vsel %vm419_vm0, %v409_v35, 0  ;;  %v410_v35 = vld [vmem:[%s6491_s18 + $0xf8] sm:$0xff] }
  0xee   : > { %934 = vmatmul.f32.gmra.mxu1 %v7043_v18 }
  0xef   : > { %v1036_v40 = vadd.f32 %v1035_v54, %v872_v52  ;;  %11007 = vst [vmem:[#allocation86_spill] sm:$0xff] %v7101_v25 }
  0xf0   : > { %1119 = vmatmul.f32.gmra.mxu2 %v7073_v47  ;;  %11008 = vst [vmem:[#allocation87_spill] sm:$0xff] %v7104_v39  ;;  %v7127_v47 = vand.u32 4294901760, %v511_v16 }
  0xf1   : > { %v7098_v36 = vadd.f32 %v1227_v14, %v1036_v40  ;;  %v763_v40 = vsub.f32 %v7094_v34, %v7104_v39  ;;  %v7115_v14 = vsub.f32 %v508_v20, %v7106_v3 }
  0xf2   : > { %1328 = vmatmul.f32.gmra.mxu3 %v7083_v42  ;;  %v630_v7 = vpop.f32.mrf.mxu0  ;;  %11014 = vst [vmem:[#allocation93_spill] sm:$0xff] %v7127_v47 }
  0xf3   : > { %11006 = vst [vmem:[#allocation85_spill] sm:$0xff] %v7098_v36  ;;  %v875_v18 = vpop.f32.mrf.mxu1  ;;  %v631_v50 = vadd.f32 %v6855_v38, %v630_v7  ;;  %v1040_v13 = vpop.f32.mrf.mxu2 }
  0xf4   : > { %11010 = vst [vmem:[#allocation89_spill] sm:$0xff] %v7115_v14 }
  0xf5   : > { %v1233_v54 = vpop.f32.mrf.mxu3  ;;  %v876_v52 = vadd.f32 %v875_v18, %v631_v50  ;;  %757 = vmatmul.f32.gmra.mxu0 %v7101_v25  ;;  %v7122_v18 = vand.u32 4294901760, %v763_v40  ;;  %v7125_v50 = vand.u32 4294901760, %v7115_v14  ;;  %v514_v40 = vsel %vm419_vm0, %v410_v35, 0 }
  0xf6   : > { %938 = vmatmul.f32.gmra.mxu1 %v7064_v61 }
  0xf7   : > { %v1041_v42 = vadd.f32 %v1040_v13, %v876_v52  ;;  %11012 = vst [vmem:[#allocation91_spill] sm:$0xff] %v7122_v18 }
  0xf8   : > { %1124 = vmatmul.f32.gmra.mxu2 %v7094_v34  ;;  %11013 = vst [vmem:[#allocation92_spill] sm:$0xff] %v7125_v50  ;;  %v7148_v34 = vand.u32 4294901760, %v514_v40 }
  0xf9   : > { %v7119_v7 = vadd.f32 %v1233_v54, %v1041_v42  ;;  %v771_v42 = vsub.f32 %v7115_v14, %v7125_v50  ;;  %v7136_v54 = vsub.f32 %v511_v16, %v7127_v47 }
  0xfa   : > { %1334 = vmatmul.f32.gmra.mxu3 %v7104_v39  ;;  %v638_v36 = vpop.f32.mrf.mxu0  ;;  %11018 = vst [vmem:[#allocation97_spill] sm:$0xff] %v7148_v34 }
  0xfb   : > { %11011 = vst [vmem:[#allocation90_spill] sm:$0xff] %v7119_v7  ;;  %v879_v61 = vpop.f32.mrf.mxu1  ;;  %v639_v20 = vadd.f32 %v6855_v38, %v638_v36  ;;  %v1045_v25 = vpop.f32.mrf.mxu2 }
  0xfc   : > { %11015 = vst [vmem:[#allocation94_spill] sm:$0xff] %v7136_v54 }
  0xfd   : > { %v1239_v13 = vpop.f32.mrf.mxu3  ;;  %v880_v52 = vadd.f32 %v879_v61, %v639_v20  ;;  %765 = vmatmul.f32.gmra.mxu0 %v7122_v18  ;;  %v7143_v61 = vand.u32 4294901760, %v771_v42  ;;  %v7146_v20 = vand.u32 4294901760, %v7136_v54 }
  0xfe   : > { %942 = vmatmul.f32.gmra.mxu1 %v7085_v57 }
  0xff   : > { %v1046_v39 = vadd.f32 %v1045_v25, %v880_v52  ;;  %11017 = vst [vmem:[#allocation96_spill] sm:$0xff] %v7146_v20 }
 0x100   : > { %1129 = vmatmul.f32.gmra.mxu2 %v7115_v14 }
 0x101   : > { %v7140_v36 = vadd.f32 %v1239_v13, %v1046_v39  ;;  %v779_v39 = vsub.f32 %v7136_v54, %v7146_v20  ;;  %v7156_v13 = vsub.f32 %v514_v40, %v7148_v34 }
 0x102   : > { %1340 = vmatmul.f32.gmra.mxu3 %v7125_v50  ;;  %v646_v7 = vpop.f32.mrf.mxu0 }
 0x103   : > { %11016 = vst [vmem:[#allocation95_spill] sm:$0xff] %v7140_v36  ;;  %v883_v57 = vpop.f32.mrf.mxu1  ;;  %v647_v16 = vadd.f32 %v6855_v38, %v646_v7  ;;  %v1050_v18 = vpop.f32.mrf.mxu2  ;;  %v7162_v7 = vand.u32 4294901760, %v779_v39 }
 0x104   : > { %11019 = vst [vmem:[#allocation98_spill] sm:$0xff] %v7156_v13 }
 0x105   : > { %v1245_v35 = vpop.f32.mrf.mxu3  ;;  %v884_v25 = vadd.f32 %v883_v57, %v647_v16  ;;  %773 = vmatmul.f32.gmra.mxu0 %v7143_v61  ;;  %v7165_v57 = vand.u32 4294901760, %v7156_v13 }
 0x106   : > { %946 = vmatmul.f32.gmra.mxu1 %v7106_v3 }
 0x107   : > { %v1051_v52 = vadd.f32 %v1050_v18, %v884_v25  ;;  %11020 = vst [vmem:[#allocation99_spill] sm:$0xff] %v7165_v57  ;;  %v787_v18 = vsub.f32 %v7156_v13, %v7165_v57 }
 0x108   : > { %1134 = vmatmul.f32.gmra.mxu2 %v7136_v54 }
 0x109   : > { %v7159_v42 = vadd.f32 %v1245_v35, %v1051_v52  ;;  %v7176_v39 = vand.u32 4294901760, %v787_v18 }
 0x10a   : > { %1346 = vmatmul.f32.gmra.mxu3 %v7146_v20  ;;  %v654_v16 = vpop.f32.mrf.mxu0 }
 0x10b   : > { %v887_v50 = vpop.f32.mrf.mxu1  ;;  %v655_v14 = vadd.f32 %v6855_v38, %v654_v16  ;;  %v1055_v36 = vpop.f32.mrf.mxu2 }
 0x10d   : > { %v1251_v3 = vpop.f32.mrf.mxu3  ;;  %v888_v40 = vadd.f32 %v887_v50, %v655_v14  ;;  %781 = vmatmul.f32.gmra.mxu0 %v7162_v7 }
 0x10e   : > { %950 = vmatmul.f32.gmra.mxu1 %v7127_v47 }
 0x10f   : > { %v1056_v35 = vadd.f32 %v1055_v36, %v888_v40 }
 0x110   : > { %1139 = vmatmul.f32.gmra.mxu2 %v7156_v13 }
 0x111   : > { %v7173_v25 = vadd.f32 %v1251_v3, %v1056_v35 }
 0x112   : > { %1352 = vmatmul.f32.gmra.mxu3 %v7165_v57  ;;  %v662_v52 = vpop.f32.mrf.mxu0 }
 0x113   : > { %v891_v16 = vpop.f32.mrf.mxu1  ;;  %v663_v14 = vadd.f32 %v6855_v38, %v662_v52  ;;  %v1060_v50 = vpop.f32.mrf.mxu2 }
 0x115   : > { %v1257_v20 = vpop.f32.mrf.mxu3  ;;  %v892_v54 = vadd.f32 %v891_v16, %v663_v14  ;;  %789 = vmatmul.f32.gmra.mxu0 %v7176_v39 }
 0x116   : > { %954 = vmatmul.f32.gmra.mxu1 %v7148_v34 }
 0x117   : > { %v1061_v36 = vadd.f32 %v1060_v50, %v892_v54 }
 0x118   : > { %1727 = vmatmul.f32.vlgmr.msrb.gmra.mxu2 %v6534_v44 }
 0x119   : > { %v7182_v3 = vadd.f32 %v1257_v20, %v1061_v36 }
 0x11a   : > { %2016 = vmatmul.f32.vlgmr.msrb.gmra.mxu3 %v6500_v26  ;;  %v670_v40 = vpop.f32.mrf.mxu0 }
 0x11b   : > { %v895_v18 = vpop.f32.mrf.mxu1  ;;  %v671_v35 = vadd.f32 %v6855_v38, %v670_v40  ;;  %v1065_v57 = vpop.f32.mrf.mxu2 }
 0x11d   : > { %v1263_v52 = vpop.f32.mrf.mxu3  ;;  %v896_v13 = vadd.f32 %v895_v18, %v671_v35  ;;  %1385 = vmatmul.f32.vlgmr.msrb.gmra.mxu0 %v6500_v26 }
 0x11e   : > { %1534 = vmatmul.f32.vlgmr.msrb.gmra.mxu1 %v6500_v26 }
 0x11f   : > { %v1066_v16 = vadd.f32 %v1065_v57, %v896_v13 }
 0x120   : > { %1735 = vmatmul.f32.gmra.mxu2 %v6550_v49 }
 0x121   : > { %v7189_v54 = vadd.f32 %v1263_v52, %v1066_v16 }
 0x122   : > { %2020 = vmatmul.f32.gmra.mxu3 %v6510_v33  ;;  %v678_v44 = vpop.f32.mrf.mxu0 }
 0x123   : > { %11021 = vst [vmem:[#allocation100_spill] sm:$0xff] %v7189_v54  ;;  %v899_v20 = vpop.f32.mrf.mxu1  ;;  %v679_v14 = vadd.f32 %v6855_v38, %v678_v44  ;;  %v1070_v50 = vpop.f32.mrf.mxu2 }
 0x125   : > { %v1269_v36 = vpop.f32.mrf.mxu3  ;;  %v900_v40 = vadd.f32 %v899_v20, %v679_v14  ;;  %1389 = vmatmul.f32.gmra.mxu0 %v6510_v33 }
 0x126   : > { %1538 = vmatmul.f32.gmra.mxu1 %v6510_v33 }
 0x127   : > { %v1071_v18 = vadd.f32 %v1070_v50, %v900_v40 }
 0x128   : > { %1743 = vmatmul.f32.gmra.mxu2 %v6571_v56 }
 0x129   : > { %v7196_v13 = vadd.f32 %v1269_v36, %v1071_v18 }
 0x12a   : > { %2024 = vmatmul.f32.gmra.mxu3 %v6532_v43  ;;  %v686_v49 = vpop.f32.mrf.mxu0 }
 0x12b   : > { %11022 = vst [vmem:[#allocation101_spill] sm:$0xff] %v7196_v13  ;;  %v903_v57 = vpop.f32.mrf.mxu1  ;;  %v687_v35 = vadd.f32 %v6855_v38, %v686_v49  ;;  %v1075_v52 = vpop.f32.mrf.mxu2 }
 0x12d   : > { %v1275_v16 = vpop.f32.mrf.mxu3  ;;  %v904_v44 = vadd.f32 %v903_v57, %v687_v35  ;;  %1393 = vmatmul.f32.gmra.mxu0 %v6532_v43 }
 0x12e   : > { %1542 = vmatmul.f32.gmra.mxu1 %v6532_v43 }
 0x12f   : > { %v1076_v20 = vadd.f32 %v1075_v52, %v904_v44 }
 0x130   : > { %1751 = vmatmul.f32.gmra.mxu2 %v6589_v63 }
 0x131   : > { %v7203_v14 = vadd.f32 %v1275_v16, %v1076_v20 }
 0x132   : > { %2028 = vmatmul.f32.gmra.mxu3 %v6555_v51  ;;  %v694_v56 = vpop.f32.mrf.mxu0 }
 0x133   : > { %11023 = vst [vmem:[#allocation102_spill] sm:$0xff] %v7203_v14  ;;  %v907_v50 = vpop.f32.mrf.mxu1  ;;  %v695_v36 = vadd.f32 %v6855_v38, %v694_v56  ;;  %v1080_v40 = vpop.f32.mrf.mxu2 }
 0x135   : > { %v1281_v18 = vpop.f32.mrf.mxu3  ;;  %v908_v49 = vadd.f32 %v907_v50, %v695_v36  ;;  %1397 = vmatmul.f32.gmra.mxu0 %v6555_v51 }
 0x136   : > { %1546 = vmatmul.f32.gmra.mxu1 %v6555_v51 }
 0x137   : > { %v1081_v57 = vadd.f32 %v1080_v40, %v908_v49 }
 0x138   : > { %1759 = vmatmul.f32.gmra.mxu2 %v6607_v6 }
 0x139   : > { %v7210_v35 = vadd.f32 %v1281_v18, %v1081_v57 }
 0x13a   : > { %2032 = vmatmul.f32.gmra.mxu3 %v6576_v58  ;;  %v702_v63 = vpop.f32.mrf.mxu0 }
 0x13b   : > { %11024 = vst [vmem:[#allocation103_spill] sm:$0xff] %v7210_v35  ;;  %v911_v52 = vpop.f32.mrf.mxu1  ;;  %v703_v16 = vadd.f32 %v6855_v38, %v702_v63  ;;  %v1085_v44 = vpop.f32.mrf.mxu2 }
 0x13d   : > { %v1287_v20 = vpop.f32.mrf.mxu3  ;;  %v912_v56 = vadd.f32 %v911_v52, %v703_v16  ;;  %1401 = vmatmul.f32.gmra.mxu0 %v6576_v58 }
 0x13e   : > { %1550 = vmatmul.f32.gmra.mxu1 %v6576_v58 }
 0x13f   : > { %v1086_v50 = vadd.f32 %v1085_v44, %v912_v56 }
 0x140   : > { %1767 = vmatmul.f32.gmra.mxu2 %v6630_v17 }
 0x141   : > { %v7217_v36 = vadd.f32 %v1287_v20, %v1086_v50 }
 0x142   : > { %2036 = vmatmul.f32.gmra.mxu3 %v6594_v1  ;;  %v710_v6 = vpop.f32.mrf.mxu0 }
 0x143   : > { %11025 = vst [vmem:[#allocation104_spill] sm:$0xff] %v7217_v36  ;;  %v915_v40 = vpop.f32.mrf.mxu1  ;;  %v711_v18 = vadd.f32 %v6855_v38, %v710_v6  ;;  %v1090_v49 = vpop.f32.mrf.mxu2 }
 0x145   : > { %v1293_v57 = vpop.f32.mrf.mxu3  ;;  %v916_v63 = vadd.f32 %v915_v40, %v711_v18  ;;  %1405 = vmatmul.f32.gmra.mxu0 %v6594_v1 }
 0x146   : > { %1554 = vmatmul.f32.gmra.mxu1 %v6594_v1 }
 0x147   : > { %v1091_v52 = vadd.f32 %v1090_v49, %v916_v63 }
 0x148   : > { %1775 = vmatmul.f32.gmra.mxu2 %v6658_v30 }
 0x149   : > { %v7224_v16 = vadd.f32 %v1293_v57, %v1091_v52 }
 0x14a   : > { %2040 = vmatmul.f32.gmra.mxu3 %v6612_v8  ;;  %v718_v17 = vpop.f32.mrf.mxu0 }
 0x14b   : > { %11026 = vst [vmem:[#allocation105_spill] sm:$0xff] %v7224_v16  ;;  %v919_v44 = vpop.f32.mrf.mxu1  ;;  %v719_v20 = vadd.f32 %v6855_v38, %v718_v17  ;;  %v1095_v56 = vpop.f32.mrf.mxu2 }
 0x14d   : > { %v1299_v50 = vpop.f32.mrf.mxu3  ;;  %v920_v6 = vadd.f32 %v919_v44, %v719_v20  ;;  %1409 = vmatmul.f32.gmra.mxu0 %v6612_v8 }
 0x14e   : > { %1558 = vmatmul.f32.gmra.mxu1 %v6612_v8 }
 0x14f   : > { %v1096_v40 = vadd.f32 %v1095_v56, %v920_v6 }
 0x150   : > { %1783 = vmatmul.f32.gmra.mxu2 %v6676_v41 }
 0x151   : > { %v7231_v18 = vadd.f32 %v1299_v50, %v1096_v40 }
 0x152   : > { %2044 = vmatmul.f32.gmra.mxu3 %v6635_v19  ;;  %v726_v30 = vpop.f32.mrf.mxu0 }
 0x153   : > { %11027 = vst [vmem:[#allocation106_spill] sm:$0xff] %v7231_v18  ;;  %v923_v49 = vpop.f32.mrf.mxu1  ;;  %v727_v57 = vadd.f32 %v6855_v38, %v726_v30  ;;  %v1100_v63 = vpop.f32.mrf.mxu2 }
 0x155   : > { %v1305_v52 = vpop.f32.mrf.mxu3  ;;  %v924_v17 = vadd.f32 %v923_v49, %v727_v57  ;;  %1413 = vmatmul.f32.gmra.mxu0 %v6635_v19 }
 0x156   : > { %1562 = vmatmul.f32.gmra.mxu1 %v6635_v19 }
 0x157   : > { %v1101_v44 = vadd.f32 %v1100_v63, %v924_v17 }
 0x158   : > { %1791 = vmatmul.f32.gmra.mxu2 %v6694_v59 }
 0x159   : > { %v7238_v20 = vadd.f32 %v1305_v52, %v1101_v44 }
 0x15a   : > { %2048 = vmatmul.f32.gmra.mxu3 %v6663_v32  ;;  %v734_v41 = vpop.f32.mrf.mxu0 }
 0x15b   : > { %v927_v56 = vpop.f32.mrf.mxu1  ;;  %v735_v50 = vadd.f32 %v6855_v38, %v734_v41  ;;  %v1105_v6 = vpop.f32.mrf.mxu2 }
 0x15d   : > { %v1311_v40 = vpop.f32.mrf.mxu3  ;;  %v928_v30 = vadd.f32 %v927_v56, %v735_v50  ;;  %1417 = vmatmul.f32.gmra.mxu0 %v6663_v32 }
 0x15e   : > { %1566 = vmatmul.f32.gmra.mxu1 %v6663_v32 }
 0x15f   : > { %v1106_v49 = vadd.f32 %v1105_v6, %v928_v30 }
 0x160   : > { %1799 = vmatmul.f32.gmra.mxu2 %v6712_v11 }
 0x161   : > { %v7245_v57 = vadd.f32 %v1311_v40, %v1106_v49 }
 0x162   : > { %2052 = vmatmul.f32.gmra.mxu3 %v6681_v46  ;;  %v742_v59 = vpop.f32.mrf.mxu0 }
 0x163   : > { %v931_v63 = vpop.f32.mrf.mxu1  ;;  %v743_v52 = vadd.f32 %v6855_v38, %v742_v59  ;;  %v1110_v17 = vpop.f32.mrf.mxu2 }
 0x165   : > { %v1317_v44 = vpop.f32.mrf.mxu3  ;;  %v932_v41 = vadd.f32 %v931_v63, %v743_v52  ;;  %1421 = vmatmul.f32.gmra.mxu0 %v6681_v46 }
 0x166   : > { %1570 = vmatmul.f32.gmra.mxu1 %v6681_v46 }
 0x167   : > { %v1111_v56 = vadd.f32 %v1110_v17, %v932_v41 }
 0x168   : > { %1807 = vmatmul.f32.gmra.mxu2 %v6730_v29 }
 0x169   : > { %v7252_v50 = vadd.f32 %v1317_v44, %v1111_v56 }
 0x16a   : > { %2056 = vmatmul.f32.gmra.mxu3 %v6699_v62  ;;  %v750_v11 = vpop.f32.mrf.mxu0 }
 0x16b   : > { %v935_v6 = vpop.f32.mrf.mxu1  ;;  %v751_v40 = vadd.f32 %v6855_v38, %v750_v11  ;;  %v1115_v30 = vpop.f32.mrf.mxu2 }
 0x16d   : > { %v1323_v49 = vpop.f32.mrf.mxu3  ;;  %v936_v59 = vadd.f32 %v935_v6, %v751_v40  ;;  %1425 = vmatmul.f32.gmra.mxu0 %v6699_v62 }
 0x16e   : > { %1574 = vmatmul.f32.gmra.mxu1 %v6699_v62 }
 0x16f   : > { %v1116_v63 = vadd.f32 %v1115_v30, %v936_v59 }
 0x170   : > { %1815 = vmatmul.f32.gmra.mxu2 %v6748_v2 }
 0x171   : > { %v7259_v52 = vadd.f32 %v1323_v49, %v1116_v63 }
 0x172   : > { %2060 = vmatmul.f32.gmra.mxu3 %v6717_v15  ;;  %v758_v29 = vpop.f32.mrf.mxu0 }
 0x173   : > { %v939_v17 = vpop.f32.mrf.mxu1  ;;  %v759_v44 = vadd.f32 %v6855_v38, %v758_v29  ;;  %v1120_v41 = vpop.f32.mrf.mxu2 }
 0x175   : > { %v1329_v56 = vpop.f32.mrf.mxu3  ;;  %v940_v11 = vadd.f32 %v939_v17, %v759_v44  ;;  %1429 = vmatmul.f32.gmra.mxu0 %v6717_v15 }
 0x176   : > { %1578 = vmatmul.f32.gmra.mxu1 %v6717_v15 }
 0x177   : > { %v1121_v6 = vadd.f32 %v1120_v41, %v940_v11 }
 0x178   : > { %1823 = vmatmul.f32.gmra.mxu2 %v6766_v48 }
 0x179   : > { %v7266_v40 = vadd.f32 %v1329_v56, %v1121_v6 }
 0x17a   : > { %2064 = vmatmul.f32.gmra.mxu3 %v6735_v37  ;;  %v766_v2 = vpop.f32.mrf.mxu0 }
 0x17b   : > { %v943_v30 = vpop.f32.mrf.mxu1  ;;  %v767_v49 = vadd.f32 %v6855_v38, %v766_v2  ;;  %v1125_v59 = vpop.f32.mrf.mxu2 }
 0x17d   : > { %v1335_v63 = vpop.f32.mrf.mxu3  ;;  %v944_v29 = vadd.f32 %v943_v30, %v767_v49  ;;  %1433 = vmatmul.f32.gmra.mxu0 %v6735_v37 }
 0x17e   : > { %1582 = vmatmul.f32.gmra.mxu1 %v6735_v37 }
 0x17f   : > { %v1126_v17 = vadd.f32 %v1125_v59, %v944_v29 }
 0x180   : > { %1831 = vmatmul.f32.gmra.mxu2 %v6789_v27 }
 0x181   : > { %v7273_v44 = vadd.f32 %v1335_v63, %v1126_v17 }
 0x182   : > { %2068 = vmatmul.f32.gmra.mxu3 %v6753_v10  ;;  %v774_v48 = vpop.f32.mrf.mxu0 }
 0x183   : > { %v947_v41 = vpop.f32.mrf.mxu1  ;;  %v775_v56 = vadd.f32 %v6855_v38, %v774_v48  ;;  %v1130_v11 = vpop.f32.mrf.mxu2 }
 0x185   : > { %v1341_v6 = vpop.f32.mrf.mxu3  ;;  %v948_v2 = vadd.f32 %v947_v41, %v775_v56  ;;  %1437 = vmatmul.f32.gmra.mxu0 %v6753_v10 }
 0x186   : > { %1586 = vmatmul.f32.gmra.mxu1 %v6753_v10 }
 0x187   : > { %v1131_v30 = vadd.f32 %v1130_v11, %v948_v2 }
 0x188   : > { %1839 = vmatmul.f32.gmra.mxu2 %v6817_v45 }
 0x189   : > { %v7280_v49 = vadd.f32 %v1341_v6, %v1131_v30 }
 0x18a   : > { %2072 = vmatmul.f32.gmra.mxu3 %v6771_v21  ;;  %v782_v27 = vpop.f32.mrf.mxu0 }
 0x18b   : > { %v951_v59 = vpop.f32.mrf.mxu1  ;;  %v783_v63 = vadd.f32 %v6855_v38, %v782_v27  ;;  %v1135_v29 = vpop.f32.mrf.mxu2 }
 0x18d   : > { %v1347_v17 = vpop.f32.mrf.mxu3  ;;  %v952_v48 = vadd.f32 %v951_v59, %v783_v63  ;;  %1441 = vmatmul.f32.gmra.mxu0 %v6771_v21 }
 0x18e   : > { %1590 = vmatmul.f32.gmra.mxu1 %v6771_v21 }
 0x18f   : > { %v1136_v41 = vadd.f32 %v1135_v29, %v952_v48 }
 0x190   : > { %1847 = vmatmul.f32.gmra.mxu2 %v6835_v28  ;;  %v7297_v28 = vld [vmem:[%s10496_s4] ss:$0 sm:$0xff] }
 0x191   : > { %v7287_v56 = vadd.f32 %v1347_v17, %v1136_v41 }
 0x192   : > { %2076 = vmatmul.f32.gmra.mxu3 %v6794_v5  ;;  %v790_v45 = vpop.f32.mrf.mxu0 }
 0x193   : > { %v955_v11 = vpop.f32.mrf.mxu1  ;;  %v791_v6 = vadd.f32 %v6855_v38, %v790_v45  ;;  %v1140_v2 = vpop.f32.mrf.mxu2 }
 0x195   : > { %v1353_v30 = vpop.f32.mrf.mxu3  ;;  %v956_v27 = vadd.f32 %v955_v11, %v791_v6  ;;  %1445 = vmatmul.f32.gmra.mxu0 %v6794_v5  ;;  %v11029_v6 = vld [vmem:[#allocation37_spill] sm:$0xff] }
 0x196   : > { %1594 = vmatmul.f32.gmra.mxu1 %v6794_v5 }
 0x197   : > { %v1141_v59 = vadd.f32 %v1140_v2, %v956_v27  ;;  %v11030_v27 = vld [vmem:[#allocation45_spill] sm:$0xff] }
 0x198   : > { %1855 = vmatmul.f32.gmra.mxu2 %v6858_v23 }
 0x199   : > { %v7299_v63 = vadd.f32 %v1353_v30, %v1141_v59 }
 0x19a   : > { %2080 = vmatmul.f32.gmra.mxu3 %v6822_v31  ;;  %v1386_v38 = vpop.f32.mrf.mxu0 }
 0x19b   : > { %v1535_v29 = vpop.f32.mrf.mxu1  ;;  %v1387_v17 = vadd.f32 %v1386_v38, %v6876_v55  ;;  %v1728_v48 = vpop.f32.mrf.mxu2 }
 0x19c   : > { %v1729_v41 = vadd.f32 %v7297_v28, %v1728_v48 }
 0x19d   : > { %v2017_v45 = vpop.f32.mrf.mxu3  ;;  %v7304_v11 = vadd.f32 %v1535_v29, %v1387_v17  ;;  %1449 = vmatmul.f32.gmra.mxu0 %v6822_v31 }
 0x19e   : > { %1598 = vmatmul.f32.gmra.mxu1 %v6822_v31  ;;  %v7308_v23 = vadd.f32 %v2017_v45, %v1729_v41  ;;  %v11032_v41 = vld [vmem:[#allocation46_spill] sm:$0xff] }
 0x19f   : > { %v11034_v31 = vld [vmem:[#allocation50_spill] sm:$0xff] }
 0x1a0   : > { %11028 = vst [vmem:[#allocation107_spill] sm:$0xff] %v7308_v23  ;;  %1863 = vmatmul.f32.gmra.mxu2 %v6879_v12  ;;  %v11033_v12 = vld [vmem:[#allocation40_spill] sm:$0xff] }
 0x1a2   : > { %2084 = vmatmul.f32.gmra.mxu3 %v11029_v6  ;;  %v1390_v2 = vpop.f32.mrf.mxu0 }
 0x1a3   : > { %v1539_v30 = vpop.f32.mrf.mxu1  ;;  %v1391_v55 = vadd.f32 %v1390_v2, %v11030_v27  ;;  %v1736_v59 = vpop.f32.mrf.mxu2 }
 0x1a4   : > { %v1737_v38 = vadd.f32 %v7297_v28, %v1736_v59 }
 0x1a5   : > { %v2021_v48 = vpop.f32.mrf.mxu3  ;;  %v7314_v29 = vadd.f32 %v1539_v30, %v1391_v55  ;;  %1453 = vmatmul.f32.gmra.mxu0 %v11029_v6 }
 0x1a6   : > { %1602 = vmatmul.f32.gmra.mxu1 %v11029_v6  ;;  %v7318_v17 = vadd.f32 %v2021_v48, %v1737_v38  ;;  %v11036_v38 = vld [vmem:[#allocation51_spill] sm:$0xff] }
 0x1a7   : > { %v11037_v48 = vld [vmem:[#allocation43_spill] sm:$0xff] }
 0x1a8   : > { %11031 = vst [vmem:[#allocation45_spill] sm:$0xff] %v7318_v17  ;;  %1871 = vmatmul.f32.gmra.mxu2 %v11032_v41  ;;  %v11038_v17 = vld [vmem:[#allocation55_spill] sm:$0xff] }
 0x1aa   : > { %2088 = vmatmul.f32.gmra.mxu3 %v11033_v12  ;;  %v1394_v45 = vpop.f32.mrf.mxu0 }
 0x1ab   : > { %v1543_v54 = vpop.f32.mrf.mxu1  ;;  %v1395_v2 = vadd.f32 %v1394_v45, %v11034_v31  ;;  %v1744_v27 = vpop.f32.mrf.mxu2 }
 0x1ac   : > { %v1745_v59 = vadd.f32 %v7297_v28, %v1744_v27 }
 0x1ad   : > { %v2025_v35 = vpop.f32.mrf.mxu3  ;;  %v7324_v30 = vadd.f32 %v1543_v54, %v1395_v2  ;;  %1457 = vmatmul.f32.gmra.mxu0 %v11033_v12  ;;  %v11040_v2 = vld [vmem:[#allocation56_spill] sm:$0xff] }
 0x1ae   : > { %1606 = vmatmul.f32.gmra.mxu1 %v11033_v12  ;;  %v7328_v55 = vadd.f32 %v2025_v35, %v1745_v59  ;;  %v11041_v59 = vld [vmem:[#allocation48_spill] sm:$0xff] }
 0x1af   : > { %v11042_v12 = vld [vmem:[#allocation60_spill] sm:$0xff] }
 0x1b0   : > { %11035 = vst [vmem:[#allocation46_spill] sm:$0xff] %v7328_v55  ;;  %1879 = vmatmul.f32.gmra.mxu2 %v11036_v38 }
 0x1b2   : > { %2092 = vmatmul.f32.gmra.mxu3 %v11037_v48  ;;  %v1398_v41 = vpop.f32.mrf.mxu0 }
 0x1b3   : > { %v1547_v6 = vpop.f32.mrf.mxu1  ;;  %v1399_v31 = vadd.f32 %v1398_v41, %v11038_v17  ;;  %v1752_v45 = vpop.f32.mrf.mxu2 }
 0x1b4   : > { %v1753_v27 = vadd.f32 %v7297_v28, %v1752_v45 }
 0x1b5   : > { %v2029_v23 = vpop.f32.mrf.mxu3  ;;  %v7334_v54 = vadd.f32 %v1547_v6, %v1399_v31  ;;  %1461 = vmatmul.f32.gmra.mxu0 %v11037_v48  ;;  %v11044_v31 = vld [vmem:[#allocation53_spill] sm:$0xff] }
 0x1b6   : > { %1610 = vmatmul.f32.gmra.mxu1 %v11037_v48  ;;  %v7338_v35 = vadd.f32 %v2029_v23, %v1753_v27  ;;  %v11062_v48 = vld [vmem:[#allocation91_spill] sm:$0xff] }
 0x1b8   : > { %11039 = vst [vmem:[#allocation50_spill] sm:$0xff] %v7338_v35  ;;  %1887 = vmatmul.f32.gmra.mxu2 %v11040_v2 }
 0x1ba   : > { %2096 = vmatmul.f32.gmra.mxu3 %v11041_v59  ;;  %v1402_v38 = vpop.f32.mrf.mxu0 }
 0x1bb   : > { %v1551_v55 = vpop.f32.mrf.mxu1  ;;  %v1403_v17 = vadd.f32 %v1402_v38, %v11042_v12  ;;  %v1760_v41 = vpop.f32.mrf.mxu2 }
 0x1bc   : > { %v1761_v45 = vadd.f32 %v7297_v28, %v1760_v41 }
 0x1bd   : > { %v2033_v36 = vpop.f32.mrf.mxu3  ;;  %v7344_v6 = vadd.f32 %v1551_v55, %v1403_v17  ;;  %1465 = vmatmul.f32.gmra.mxu0 %v11041_v59 }
 0x1be   : > { %1614 = vmatmul.f32.gmra.mxu1 %v11041_v59  ;;  %v7348_v23 = vadd.f32 %v2033_v36, %v1761_v45 }
 0x1c0   : > { %11043 = vst [vmem:[#allocation51_spill] sm:$0xff] %v7348_v23  ;;  %1895 = vmatmul.f32.gmra.mxu2 %v6966_v0 }
 0x1c2   : > { %2100 = vmatmul.f32.gmra.mxu3 %v11044_v31  ;;  %v1406_v27 = vpop.f32.mrf.mxu0 }
 0x1c3   : > { %v1555_v2 = vpop.f32.mrf.mxu1  ;;  %v1407_v12 = vadd.f32 %v1406_v27, %v6990_v53  ;;  %v1768_v38 = vpop.f32.mrf.mxu2 }
 0x1c4   : > { %v1769_v41 = vadd.f32 %v7297_v28, %v1768_v38 }
 0x1c5   : > { %v2037_v35 = vpop.f32.mrf.mxu3  ;;  %v7354_v55 = vadd.f32 %v1555_v2, %v1407_v12  ;;  %1469 = vmatmul.f32.gmra.mxu0 %v11044_v31 }
 0x1c6   : > { %1618 = vmatmul.f32.gmra.mxu1 %v11044_v31  ;;  %v7358_v36 = vadd.f32 %v2037_v35, %v1769_v41  ;;  %v11047_v41 = vld [vmem:[#allocation70_spill] sm:$0xff] }
 0x1c8   : > { %11045 = vst [vmem:[#allocation55_spill] sm:$0xff] %v7358_v36  ;;  %1903 = vmatmul.f32.gmra.mxu2 %v6993_v22 }
 0x1ca   : > { %2104 = vmatmul.f32.gmra.mxu3 %v6947_v4  ;;  %v1410_v0 = vpop.f32.mrf.mxu0 }
 0x1cb   : > { %v1559_v17 = vpop.f32.mrf.mxu1  ;;  %v1411_v53 = vadd.f32 %v1410_v0, %v7014_v9  ;;  %v1776_v45 = vpop.f32.mrf.mxu2 }
 0x1cc   : > { %v1777_v27 = vadd.f32 %v7297_v28, %v1776_v45 }
 0x1cd   : > { %v2041_v38 = vpop.f32.mrf.mxu3  ;;  %v7364_v2 = vadd.f32 %v1559_v17, %v1411_v53  ;;  %1473 = vmatmul.f32.gmra.mxu0 %v6947_v4 }
 0x1ce   : > { %1622 = vmatmul.f32.gmra.mxu1 %v6947_v4  ;;  %v7368_v35 = vadd.f32 %v2041_v38, %v1777_v27  ;;  %v11049_v27 = vld [vmem:[#allocation71_spill] sm:$0xff] }
 0x1cf   : > { %v11051_v4 = vld [vmem:[#allocation75_spill] sm:$0xff] }
 0x1d0   : > { %11046 = vst [vmem:[#allocation56_spill] sm:$0xff] %v7368_v35  ;;  %1911 = vmatmul.f32.gmra.mxu2 %v7017_v60  ;;  %v11050_v60 = vld [vmem:[#allocation65_spill] sm:$0xff] }
 0x1d2   : > { %2108 = vmatmul.f32.gmra.mxu3 %v6971_v24  ;;  %v1414_v22 = vpop.f32.mrf.mxu0 }
 0x1d3   : > { %v1563_v12 = vpop.f32.mrf.mxu1  ;;  %v1415_v9 = vadd.f32 %v1414_v22, %v11047_v41  ;;  %v1784_v0 = vpop.f32.mrf.mxu2 }
 0x1d4   : > { %v1785_v45 = vadd.f32 %v7297_v28, %v1784_v0 }
 0x1d5   : > { %v2045_v36 = vpop.f32.mrf.mxu3  ;;  %v7374_v17 = vadd.f32 %v1563_v12, %v1415_v9  ;;  %1477 = vmatmul.f32.gmra.mxu0 %v6971_v24  ;;  %v11053_v9 = vld [vmem:[#allocation76_spill] sm:$0xff] }
 0x1d6   : > { %1626 = vmatmul.f32.gmra.mxu1 %v6971_v24  ;;  %v7378_v53 = vadd.f32 %v2045_v36, %v1785_v45  ;;  %v11054_v45 = vld [vmem:[#allocation68_spill] sm:$0xff] }
 0x1d8   : > { %11048 = vst [vmem:[#allocation60_spill] sm:$0xff] %v7378_v53  ;;  %1919 = vmatmul.f32.gmra.mxu2 %v11049_v27 }
 0x1da   : > { %2112 = vmatmul.f32.gmra.mxu3 %v11050_v60  ;;  %v1418_v38 = vpop.f32.mrf.mxu0 }
 0x1db   : > { %v1567_v35 = vpop.f32.mrf.mxu1  ;;  %v1419_v22 = vadd.f32 %v1418_v38, %v11051_v4  ;;  %v1792_v41 = vpop.f32.mrf.mxu2 }
 0x1dc   : > { %v1793_v0 = vadd.f32 %v7297_v28, %v1792_v41 }
 0x1dd   : > { %v2049_v31 = vpop.f32.mrf.mxu3  ;;  %v7384_v12 = vadd.f32 %v1567_v35, %v1419_v22  ;;  %1481 = vmatmul.f32.gmra.mxu0 %v11050_v60  ;;  %v11057_v22 = vld [vmem:[#allocation73_spill] sm:$0xff] }
 0x1de   : > { %1630 = vmatmul.f32.gmra.mxu1 %v11050_v60  ;;  %v7388_v36 = vadd.f32 %v2049_v31, %v1793_v0  ;;  %v11056_v31 = vld [vmem:[#allocation81_spill] sm:$0xff] }
 0x1e0   : > { %11052 = vst [vmem:[#allocation70_spill] sm:$0xff] %v7388_v36  ;;  %1927 = vmatmul.f32.gmra.mxu2 %v11053_v9 }
 0x1e2   : > { %2116 = vmatmul.f32.gmra.mxu3 %v11054_v45  ;;  %v7392_v27 = vpop.f32.mrf.mxu0 }
 0x1e3   : > { %v7394_v53 = vpop.f32.mrf.mxu1  ;;  %v1800_v4 = vpop.f32.mrf.mxu2 }
 0x1e4   : > { %v1801_v38 = vadd.f32 %v7297_v28, %v1800_v4 }
 0x1e5   : > { %v2053_v41 = vpop.f32.mrf.mxu3  ;;  %1485 = vmatmul.f32.gmra.mxu0 %v11054_v45 }
 0x1e6   : > { %1634 = vmatmul.f32.gmra.mxu1 %v11054_v45  ;;  %v7399_v35 = vadd.f32 %v2053_v41, %v1801_v38  ;;  %v11059_v45 = vld [vmem:[#allocation86_spill] sm:$0xff] }
 0x1e7   : > { %v11060_v38 = vld [vmem:[#allocation78_spill] sm:$0xff] }
 0x1e8   : > { %11055 = vst [vmem:[#allocation71_spill] sm:$0xff] %v7399_v35  ;;  %1935 = vmatmul.f32.gmra.mxu2 %v11056_v31 }
 0x1ea   : > { %2120 = vmatmul.f32.gmra.mxu3 %v11057_v22  ;;  %v1426_v0 = vpop.f32.mrf.mxu0 }
 0x1eb   : > { %v7403_v9 = vpop.f32.mrf.mxu1  ;;  %v1808_v36 = vpop.f32.mrf.mxu2 }
 0x1ec   : > { %v1809_v60 = vadd.f32 %v7297_v28, %v1808_v36 }
 0x1ed   : > { %v2057_v24 = vpop.f32.mrf.mxu3  ;;  %1489 = vmatmul.f32.gmra.mxu0 %v11057_v22 }
 0x1ee   : > { %1638 = vmatmul.f32.gmra.mxu1 %v11057_v22  ;;  %v7408_v4 = vadd.f32 %v2057_v24, %v1809_v60  ;;  %v11063_v24 = vld [vmem:[#allocation83_spill] sm:$0xff] }
 0x1f0   : > { %11058 = vst [vmem:[#allocation75_spill] sm:$0xff] %v7408_v4  ;;  %1943 = vmatmul.f32.gmra.mxu2 %v11059_v45 }
 0x1f2   : > { %2124 = vmatmul.f32.gmra.mxu3 %v11060_v38  ;;  %v1430_v41 = vpop.f32.mrf.mxu0 }
 0x1f3   : > { %v1579_v31 = vpop.f32.mrf.mxu1  ;;  %v1816_v35 = vpop.f32.mrf.mxu2 }
 0x1f4   : > { %v1817_v23 = vadd.f32 %v7297_v28, %v1816_v35  ;;  %v11066_v28 = vld [vmem:[#allocation88_spill] sm:$0xff] }
 0x1f5   : > { %v2061_v59 = vpop.f32.mrf.mxu3  ;;  %1493 = vmatmul.f32.gmra.mxu0 %v11060_v38 }
 0x1f6   : > { %1642 = vmatmul.f32.gmra.mxu1 %v11060_v38  ;;  %v7415_v36 = vadd.f32 %v2061_v59, %v1817_v23 }
 0x1f8   : > { %11061 = vst [vmem:[#allocation76_spill] sm:$0xff] %v7415_v36  ;;  %1951 = vmatmul.f32.gmra.mxu2 %v11062_v48 }
 0x1fa   : > { %2128 = vmatmul.f32.gmra.mxu3 %v11063_v24  ;;  %v1434_v60 = vpop.f32.mrf.mxu0 }
 0x1fb   : > { %v1583_v45 = vpop.f32.mrf.mxu1  ;;  %v7419_v4 = vpop.f32.mrf.mxu2 }
 0x1fc   : > { %11064 = vst [vmem:[#allocation81_spill] sm:$0xff] %v7419_v4 }
 0x1fd   : > { %v7421_v22 = vpop.f32.mrf.mxu3  ;;  %1497 = vmatmul.f32.gmra.mxu0 %v11063_v24 }
 0x1fe   : > { %11065 = vst [vmem:[#allocation86_spill] sm:$0xff] %v7421_v22  ;;  %1646 = vmatmul.f32.gmra.mxu1 %v11063_v24 }
 0x200   : > { %1959 = vmatmul.f32.gmra.mxu2 %v7143_v61 }
 0x202   : > { %2132 = vmatmul.f32.gmra.mxu3 %v11066_v28  ;;  %v1438_v59 = vpop.f32.mrf.mxu0 }
 0x203   : > { %v1587_v23 = vpop.f32.mrf.mxu1  ;;  %v7427_v35 = vpop.f32.mrf.mxu2  ;;  %v1439_v36 = vadd.f32 %v1438_v59, %v7159_v42  ;;  %v11073_v59 = vld [vmem:[#allocation85_spill] sm:$0xff] }
 0x204   : > { %11067 = vst [vmem:[#allocation91_spill] sm:$0xff] %v7427_v35 }
 0x205   : > { %v7429_v48 = vpop.f32.mrf.mxu3  ;;  %1501 = vmatmul.f32.gmra.mxu0 %v11066_v28  ;;  %v1588_v14 = vadd.f32 %v1587_v23, %v1439_v36  ;;  %v11076_v36 = vld [vmem:[#allocation80_spill] sm:$0xff] }
 0x206   : > { %11068 = vst [vmem:[#allocation108_spill] sm:$0xff] %v7429_v48  ;;  %1650 = vmatmul.f32.gmra.mxu1 %v11066_v28  ;;  %v11071_v48 = vld [vmem:[#allocation95_spill] sm:$0xff] }
 0x207   : > { %v1435_v28 = vadd.f32 %v1434_v60, %v11071_v48 }
 0x208   : > { %1967 = vmatmul.f32.gmra.mxu2 %v7162_v7  ;;  %v11072_v7 = vld [vmem:[#allocation90_spill] sm:$0xff] }
 0x209   : > { %v1431_v16 = vadd.f32 %v1430_v41, %v11072_v7 }
 0x20a   : > { %2136 = vmatmul.f32.gmra.mxu3 %v7127_v47  ;;  %v1442_v22 = vpop.f32.mrf.mxu0 }
 0x20b   : > { %v1591_v24 = vpop.f32.mrf.mxu1  ;;  %v1443_v61 = vadd.f32 %v1442_v22, %v7173_v25  ;;  %v7436_v4 = vpop.f32.mrf.mxu2  ;;  %v1584_v25 = vadd.f32 %v1583_v45, %v1435_v28  ;;  %v1423_v45 = vadd.f32 %v7392_v27, %v11076_v36 }
 0x20c   : > { %11069 = vst [vmem:[#allocation109_spill] sm:$0xff] %v7436_v4  ;;  %v1675_v4 = vmax.f32 %v1588_v14, 0.0 }
 0x20d   : > { %v7439_v38 = vpop.f32.mrf.mxu3  ;;  %v1592_v35 = vadd.f32 %v1591_v24, %v1443_v61  ;;  %1505 = vmatmul.f32.gmra.mxu0 %v7127_v47  ;;  %v1674_v28 = vmax.f32 %v1584_v25, 0.0 }
 0x20e   : > { %11070 = vst [vmem:[#allocation110_spill] sm:$0xff] %v7439_v38  ;;  %1654 = vmatmul.f32.gmra.mxu1 %v7127_v47  ;;  %v1427_v38 = vadd.f32 %v1426_v0, %v11073_v59  ;;  %v1580_v47 = vadd.f32 %v1579_v31, %v1431_v16  ;;  %v7461_v14 = vand.u32 4294901760, %v1675_v4 }
 0x20f   : > { %v1676_v13 = vmax.f32 %v1592_v35, 0.0  ;;  %v1572_v35 = vadd.f32 %v7394_v53, %v1423_v45  ;;  %v7470_v48 = vand.u32 4294901760, %v1674_v28  ;;  %v1670_v45 = vmax.f32 %v7384_v12, 0.0 }
 0x210   : > { %1975 = vmatmul.f32.gmra.mxu2 %v7176_v39  ;;  %v1576_v0 = vadd.f32 %v7403_v9, %v1427_v38  ;;  %v1673_v16 = vmax.f32 %v1580_v47, 0.0  ;;  %v7488_v53 = vsub.f32 %v1675_v4, %v7461_v14 }
 0x211   : > { %v7453_v39 = vand.u32 4294901760, %v1676_v13 }
 0x212   : > { %2140 = vmatmul.f32.gmra.mxu3 %v7148_v34  ;;  %v1446_v22 = vpop.f32.mrf.mxu0  ;;  %v1672_v38 = vmax.f32 %v1576_v0, 0.0 }
 0x213   : > { %v1595_v42 = vpop.f32.mrf.mxu1  ;;  %v1447_v24 = vadd.f32 %v1446_v22, %v7182_v3  ;;  %v7449_v61 = vpop.f32.mrf.mxu2  ;;  %v7467_v23 = vsub.f32 %v1676_v13, %v7453_v39  ;;  %v7483_v13 = vand.u32 4294901760, %v1673_v16  ;;  %v11081_v22 = vld [vmem:[#allocation2_spill] sm:$0xff] }
 0x214   : > { %11074 = vst [vmem:[#allocation95_spill] sm:$0xff] %v7449_v61  ;;  %v7499_v36 = vand.u32 4294901760, %v1672_v38 }
 0x215   : > { %v7451_v60 = vpop.f32.mrf.mxu3  ;;  %v1596_v41 = vadd.f32 %v1595_v42, %v1447_v24  ;;  %1509 = vmatmul.f32.gmra.mxu0 %v7148_v34  ;;  %v11082_v42 = vld [vmem:[#allocation4_spill] sm:$0xff]  ;;  %v10617_v59 = vand.u32 4294901760, %v7467_v23  ;;  %v1671_v24 = vmax.f32 %v1572_v35, 0.0  ;;  %v7510_v0 = vsub.f32 %v1673_v16, %v7483_v13 }
 0x216   : > { %11075 = vst [vmem:[#allocation90_spill] sm:$0xff] %v7451_v60  ;;  %1658 = vmatmul.f32.gmra.mxu1 %v7148_v34  ;;  %v11087_v60 = vld [vmem:[#allocation3_spill] sm:$0xff] }
 0x217   : > { %v1677_v3 = vmax.f32 %v1596_v41, 0.0  ;;  %v7497_v41 = vsub.f32 %v1674_v28, %v7470_v48  ;;  %v10620_v28 = vand.u32 4294901760, %v7488_v53  ;;  %v3066_v35 = vsub.f32 %v7467_v23, %v10617_v59 }
 0x218   : > { %2571 = vmatmul.f32.vlgmr.msra.gmra.mxu2 %v6500_v26  ;;  %v7534_v59 = vand.u32 4294901760, %v1670_v45 }
 0x219   : > { %v7463_v31 = vand.u32 4294901760, %v1677_v3  ;;  %v11089_v34 = vand.u32 4294901760, %v7497_v41 }
 0x21a   : > { %2720 = vmatmul.f32.vlgmr.msra.gmra.mxu3 %v6500_v26  ;;  %v7472_v27 = vpop.f32.mrf.mxu0 }
 0x21b   : > { %11077 = vst [vmem:[#allocation85_spill] sm:$0xff] %v7472_v27  ;;  %v7474_v9 = vpop.f32.mrf.mxu1  ;;  %v7477_v47 = vsub.f32 %v1677_v3, %v7463_v31  ;;  %2897 = vmatpush.msrb.mxu0 %v7463_v31  ;;  %3348 = vmatpush.msrb.mxu3 %v7463_v31  ;;  %v7481_v26 = vpop.f32.mrf.mxu2 }
 0x21c   : > { %11078 = vst [vmem:[#allocation80_spill] sm:$0xff] %v7474_v9 }
 0x21d   : > { %11079 = vst [vmem:[#allocation111_spill] sm:$0xff] %v7481_v26  ;;  %v7485_v7 = vpop.f32.mrf.mxu3  ;;  %v10616_v25 = vand.u32 4294901760, %v7477_v47  ;;  %2170 = vmatmul.f32.vlgmr.msra.gmra.mxu0 %v11081_v22  ;;  %3220 = vmatpush.msrb.mxu2 %v7477_v47  ;;  %v1669_v22 = vmax.f32 %v7374_v17, 0.0  ;;  %v7532_v17 = vsub.f32 %v1672_v38, %v7499_v36  ;;  %v1668_v26 = vmax.f32 %v7364_v2, 0.0 }
 0x21e   : > { %11080 = vst [vmem:[#allocation112_spill] sm:$0xff] %v7485_v7  ;;  %2352 = vmatmul.f32.vlgmr.msra.gmra.mxu1 %v11082_v42  ;;  %2899 = vmatpush.msrb.mxu0 %v7453_v39  ;;  %v7518_v42 = vand.u32 4294901760, %v1671_v24  ;;  %v3067_v38 = vand.u32 4294901760, %v3066_v35  ;;  %v1667_v35 = vmax.f32 %v7354_v55, 0.0  ;;  %v1666_v55 = vmax.f32 %v7344_v6, 0.0 }
 0x21f   : > { %3350 = vmatpush.msrb.mxu3 %v7453_v39  ;;  %v3060_v4 = vsub.f32 %v7477_v47, %v10616_v25  ;;  %3223 = vmatpush.msrb.mxu2 %v7467_v23  ;;  %v10621_v25 = vand.u32 4294901760, %v7510_v0  ;;  %v11092_v61 = vand.u32 4294901760, %v7532_v17 }
 0x220   : > { %2575 = vmatmul.f32.gmra.mxu2 %v6510_v33  ;;  %2901 = vmatpush.msrb.mxu0 %v7461_v14  ;;  %v7589_v9 = vand.u32 4294901760, %v1667_v35 }
 0x221   : > { %3352 = vmatpush.msrb.mxu3 %v7461_v14  ;;  %v3061_v3 = vand.u32 4294901760, %v3060_v4  ;;  %3226 = vmatpush.msrb.mxu2 %v7488_v53  ;;  %v3090_v6 = vsub.f32 %v7532_v17, %v11092_v61 }
 0x222   : > { %2724 = vmatmul.f32.gmra.mxu3 %v6510_v33  ;;  %2903 = vmatpush.msrb.mxu0 %v7470_v48  ;;  %v7522_v12 = vpop.f32.mrf.mxu0  ;;  %v3072_v33 = vsub.f32 %v7488_v53, %v10620_v28  ;;  %v3078_v28 = vsub.f32 %v7497_v41, %v11089_v34  ;;  %v7565_v34 = vsub.f32 %v1670_v45, %v7534_v59 }
 0x223   : > { %11083 = vst [vmem:[#allocation2_spill] sm:$0xff] %v7522_v12  ;;  %v7524_v16 = vpop.f32.mrf.mxu1  ;;  %3354 = vmatpush.msrb.mxu3 %v7470_v48  ;;  %v7529_v4 = vpop.f32.mrf.mxu2  ;;  %3062 = vmatpush.msrb.mxu1 %v3061_v3  ;;  %v11088_v3 = vld [vmem:[#allocation5_spill] sm:$0xff]  ;;  %v3091_v45 = vand.u32 4294901760, %v3090_v6 }
 0x224   : > { %11084 = vst [vmem:[#allocation4_spill] sm:$0xff] %v7524_v16  ;;  %2905 = vmatpush.msrb.mxu0 %v7483_v13  ;;  %3229 = vmatpush.msrb.mxu2 %v7497_v41 }
 0x225   : > { %11085 = vst [vmem:[#allocation113_spill] sm:$0xff] %v7529_v4  ;;  %v7540_v7 = vpop.f32.mrf.mxu3  ;;  %3356 = vmatpush.msrb.mxu3 %v7483_v13  ;;  %v7546_v4 = vand.u32 4294901760, %v1669_v22  ;;  %2175 = vmatmul.f32.gmra.mxu0 %v11087_v60  ;;  %v3073_v60 = vand.u32 4294901760, %v3072_v33 }
 0x226   : > { %11086 = vst [vmem:[#allocation114_spill] sm:$0xff] %v7540_v7  ;;  %2358 = vmatmul.f32.gmra.mxu1 %v11088_v3  ;;  %v7554_v7 = vsub.f32 %v1671_v24, %v7518_v42  ;;  %2907 = vmatpush.msrb.mxu0 %v7499_v36  ;;  %v3084_v3 = vsub.f32 %v7510_v0, %v10621_v25  ;;  %v7567_v24 = vand.u32 4294901760, %v1668_v26 }
 0x227   : > { %3068 = vmatpush.msrb.mxu1 %v3067_v38  ;;  %3232 = vmatpush.msrb.mxu2 %v7510_v0  ;;  %v3079_v38 = vand.u32 4294901760, %v3078_v28  ;;  %v7578_v25 = vsub.f32 %v1669_v22, %v7546_v4  ;;  %v1665_v28 = vmax.f32 %v7334_v54, 0.0 }
 0x228   : > { %3358 = vmatpush.msrb.mxu3 %v7499_v36  ;;  %2579 = vmatmul.f32.gmra.mxu2 %v6532_v43  ;;  %v3085_v22 = vand.u32 4294901760, %v3084_v3  ;;  %v7598_v61 = vsub.f32 %v1668_v26, %v7567_v24 }
 0x229   : > { %2909 = vmatpush.msrb.mxu0 %v7518_v42  ;;  %3074 = vmatpush.msrb.mxu1 %v3073_v60  ;;  %v10622_v3 = vand.u32 4294901760, %v7578_v25  ;;  %v7610_v26 = vand.u32 4294901760, %v1665_v28 }
 0x22a   : > { %3235 = vmatpush.msrb.mxu2 %v7532_v17  ;;  %v7573_v33 = vpop.f32.mrf.mxu0  ;;  %3360 = vmatpush.msrb.mxu3 %v7518_v42 }
 0x22b   : > { %11090 = vst [vmem:[#allocation3_spill] sm:$0xff] %v7573_v33  ;;  %v7575_v2 = vpop.f32.mrf.mxu1  ;;  %2911 = vmatpush.msrb.mxu0 %v7534_v59  ;;  %v7586_v60 = vpop.f32.mrf.mxu2  ;;  %2728 = vmatmul.f32.gmra.mxu3 %v6532_v43  ;;  %v11095_v43 = vand.u32 4294901760, %v7554_v7 }
 0x22c   : > { %11091 = vst [vmem:[#allocation5_spill] sm:$0xff] %v7575_v2  ;;  %3080 = vmatpush.msrb.mxu1 %v3079_v38  ;;  %3238 = vmatpush.msrb.mxu2 %v7554_v7  ;;  %v1664_v38 = vmax.f32 %v7324_v30, 0.0  ;;  %v11097_v2 = vld [vmem:[#allocation7_spill] sm:$0xff]  ;;  %v1663_v30 = vmax.f32 %v7314_v29, 0.0 }
 0x22d   : > { %11093 = vst [vmem:[#allocation115_spill] sm:$0xff] %v7586_v60  ;;  %v7592_v16 = vpop.f32.mrf.mxu3  ;;  %3362 = vmatpush.msrb.mxu3 %v7534_v59  ;;  %v7600_v60 = vand.u32 4294901760, %v1666_v55  ;;  %2913 = vmatpush.msrb.mxu0 %v7546_v4  ;;  %v3096_v54 = vsub.f32 %v7554_v7, %v11095_v43  ;;  %v7618_v43 = vsub.f32 %v1667_v35, %v7589_v9 }
 0x22e   : > { %11094 = vst [vmem:[#allocation116_spill] sm:$0xff] %v7592_v16  ;;  %3086 = vmatpush.msrb.mxu1 %v3085_v22  ;;  %3241 = vmatpush.msrb.mxu2 %v7565_v34  ;;  %v11096_v16 = vld [vmem:[#allocation6_spill] sm:$0xff]  ;;  %v11098_v22 = vand.u32 4294901760, %v7565_v34  ;;  %v7636_v33 = vand.u32 4294901760, %v1664_v38 }
 0x22f   : > { %3364 = vmatpush.msrb.mxu3 %v7546_v4  ;;  %2180 = vmatmul.f32.gmra.mxu0 %v11096_v16  ;;  %v3097_v16 = vand.u32 4294901760, %v3096_v54  ;;  %v7631_v35 = vsub.f32 %v1666_v55, %v7600_v60 }
 0x230   : > { %2364 = vmatmul.f32.gmra.mxu1 %v11097_v2  ;;  %v3102_v27 = vsub.f32 %v7565_v34, %v11098_v22  ;;  %2915 = vmatpush.msrb.mxu0 %v7567_v24  ;;  %v3108_v22 = vsub.f32 %v7578_v25, %v10622_v3  ;;  %v7644_v3 = vsub.f32 %v1665_v28, %v7610_v26 }
 0x231   : > { %3092 = vmatpush.msrb.mxu1 %v3091_v45  ;;  %3244 = vmatpush.msrb.mxu2 %v7578_v25  ;;  %v1662_v45 = vmax.f32 %v7304_v11, 0.0  ;;  %v7649_v11 = vand.u32 4294901760, %v1663_v30  ;;  %v7663_v55 = vsub.f32 %v1664_v38, %v7636_v33  ;;  %v11106_v38 = vld [vmem:[#allocation9_spill] sm:$0xff] }
 0x232   : > { %3366 = vmatpush.msrb.mxu3 %v7567_v24  ;;  %v7625_v2 = vpop.f32.mrf.mxu0  ;;  %2583 = vmatmul.f32.gmra.mxu2 %v6555_v51  ;;  %v3103_v6 = vand.u32 4294901760, %v3102_v27  ;;  %v3109_v27 = vand.u32 4294901760, %v3108_v22 }
 0x233   : > { %11099 = vst [vmem:[#allocation6_spill] sm:$0xff] %v7625_v2  ;;  %v7633_v29 = vpop.f32.mrf.mxu1  ;;  %2917 = vmatpush.msrb.mxu0 %v7589_v9  ;;  %v7640_v54 = vpop.f32.mrf.mxu2  ;;  %3098 = vmatpush.msrb.mxu1 %v3097_v16  ;;  %v11103_v2 = vand.u32 4294901760, %v7598_v61  ;;  %v7673_v28 = vsub.f32 %v1663_v30, %v7649_v11  ;;  %v10623_v30 = vand.u32 4294901760, %v7663_v55 }
 0x234   : > { %11100 = vst [vmem:[#allocation7_spill] sm:$0xff] %v7633_v29  ;;  %3247 = vmatpush.msrb.mxu2 %v7598_v61  ;;  %3368 = vmatpush.msrb.mxu3 %v7589_v9 }
 0x235   : > { %11101 = vst [vmem:[#allocation117_spill] sm:$0xff] %v7640_v54  ;;  %v7647_v29 = vpop.f32.mrf.mxu3  ;;  %2919 = vmatpush.msrb.mxu0 %v7600_v60  ;;  %v3114_v16 = vsub.f32 %v7598_v61, %v11103_v2  ;;  %2732 = vmatmul.f32.gmra.mxu3 %v6555_v51  ;;  %v7658_v54 = vand.u32 4294901760, %v1662_v45  ;;  %v11104_v2 = vand.u32 4294901760, %v7618_v43 }
 0x236   : > { %11102 = vst [vmem:[#allocation118_spill] sm:$0xff] %v7647_v29  ;;  %3104 = vmatpush.msrb.mxu1 %v3103_v6  ;;  %3250 = vmatpush.msrb.mxu2 %v7618_v43  ;;  %v11105_v29 = vld [vmem:[#allocation8_spill] sm:$0xff] }
 0x237   : > { %3370 = vmatpush.msrb.mxu3 %v7600_v60  ;;  %2921 = vmatpush.msrb.mxu0 %v7610_v26  ;;  %v3120_v51 = vsub.f32 %v7618_v43, %v11104_v2  ;;  %v3115_v22 = vand.u32 4294901760, %v3114_v16  ;;  %v7686_v16 = vsub.f32 %v1662_v45, %v7658_v54  ;;  %v10624_v45 = vand.u32 4294901760, %v7673_v28 }
 0x238   : > { %3110 = vmatpush.msrb.mxu1 %v3109_v27  ;;  %3253 = vmatpush.msrb.mxu2 %v7631_v35  ;;  %v11107_v27 = vand.u32 4294901760, %v7631_v35 }
 0x239   : > { %3372 = vmatpush.msrb.mxu3 %v7610_v26  ;;  %2185 = vmatmul.f32.gmra.mxu0 %v11105_v29  ;;  %v3121_v29 = vand.u32 4294901760, %v3120_v51  ;;  %v3138_v51 = vsub.f32 %v7663_v55, %v10623_v30 }
 0x23a   : > { %2370 = vmatmul.f32.gmra.mxu1 %v11106_v38  ;;  %v3126_v12 = vsub.f32 %v7631_v35, %v11107_v27  ;;  %v7680_v18 = vpop.f32.mrf.mxu0  ;;  %2923 = vmatpush.msrb.mxu0 %v7636_v33  ;;  %v11111_v38 = vand.u32 4294901760, %v7644_v3 }
 0x23b   : > { %11108 = vst [vmem:[#allocation8_spill] sm:$0xff] %v7680_v18  ;;  %v7682_v2 = vpop.f32.mrf.mxu1  ;;  %3116 = vmatpush.msrb.mxu1 %v3115_v22  ;;  %v7689_v6 = vpop.f32.mrf.mxu2  ;;  %3256 = vmatpush.msrb.mxu2 %v7644_v3 }
 0x23c   : > { %11109 = vst [vmem:[#allocation9_spill] sm:$0xff] %v7682_v2  ;;  %3374 = vmatpush.msrb.mxu3 %v7636_v33  ;;  %v3132_v27 = vsub.f32 %v7644_v3, %v11111_v38  ;;  %2587 = vmatmul.f32.gmra.mxu2 %v6576_v58  ;;  %v3127_v22 = vand.u32 4294901760, %v3126_v12  ;;  %v10625_v38 = vand.u32 4294901760, %v7686_v16  ;;  %v3144_v12 = vsub.f32 %v7673_v28, %v10624_v45 }
 0x23d   : > { %11110 = vst [vmem:[#allocation119_spill] sm:$0xff] %v7689_v6  ;;  %v7696_v2 = vpop.f32.mrf.mxu3  ;;  %2925 = vmatpush.msrb.mxu0 %v7649_v11  ;;  %3122 = vmatpush.msrb.mxu1 %v3121_v29  ;;  %v11113_v29 = vand.u32 4294901760, %v7477_v47  ;;  %v11115_v45 = vand.u32 4294901760, %v7467_v23  ;;  %v11116_v47 = vld [vmem:[#allocation11_spill] sm:$0xff]  ;;  %v11119_v23 = vand.u32 4294901760, %v7510_v0  ;;  %v11124_v0 = vand.u32 4294901760, %v7565_v34 }
 0x23e   : > { %11112 = vst [vmem:[#allocation120_spill] sm:$0xff] %v7696_v2  ;;  %3259 = vmatpush.msrb.mxu2 %v7663_v55  ;;  %3376 = vmatpush.msrb.mxu3 %v7649_v11  ;;  %v3133_v2 = vand.u32 4294901760, %v3132_v27  ;;  %v3139_v27 = vand.u32 4294901760, %v3138_v51 }
 0x23f   : > { %2927 = vmatpush.msrb.mxu0 %v7658_v54  ;;  %2736 = vmatmul.f32.gmra.mxu3 %v6576_v58  ;;  %v11114_v58 = vld [vmem:[#allocation10_spill] sm:$0xff] }
 0x240   : > { %3128 = vmatpush.msrb.mxu1 %v3127_v22  ;;  %3262 = vmatpush.msrb.mxu2 %v7673_v28  ;;  %v3150_v22 = vsub.f32 %v7686_v16, %v10625_v38  ;;  %v11118_v38 = vand.u32 4294901760, %v7497_v41  ;;  %v11122_v41 = vld [vmem:[#allocation13_spill] sm:$0xff] }
 0x241   : > { %3378 = vmatpush.msrb.mxu3 %v7658_v54  ;;  %3479 = vmatpush.msra.mxu0 %v11113_v29  ;;  %v3145_v29 = vand.u32 4294901760, %v3144_v12  ;;  %v11120_v12 = vld [vmem:[#allocation12_spill] sm:$0xff] }
 0x242   : > { %3134 = vmatpush.msrb.mxu1 %v3133_v2  ;;  %v7716_v6 = vpop.f32.mrf.mxu0  ;;  %3265 = vmatpush.msrb.mxu2 %v7686_v16  ;;  %v3151_v51 = vand.u32 4294901760, %v3150_v22  ;;  %v11121_v22 = vand.u32 4294901760, %v7532_v17 }
 0x243   : > { %v7718_v30 = vpop.f32.mrf.mxu1  ;;  %2190 = vmatmul.f32.gmra.mxu0 %v11114_v58  ;;  %v7725_v18 = vpop.f32.mrf.mxu2  ;;  %2376 = vmatmul.f32.gmra.mxu1 %v11116_v47  ;;  %v11117_v58 = vand.u32 4294901760, %v7488_v53 }
 0x244   : > { %3483 = vmatpush.msra.mxu0 %v11115_v45  ;;  %3140 = vmatpush.msrb.mxu1 %v3139_v27 }
 0x245   : > { %v7730_v2 = vpop.f32.mrf.mxu3  ;;  %2591 = vmatmul.f32.gmra.mxu2 %v6594_v1 }
 0x246   : > { %3487 = vmatpush.msra.mxu0 %v11117_v58  ;;  %3146 = vmatpush.msrb.mxu1 %v3145_v29 }
 0x247   : > { %2740 = vmatmul.f32.gmra.mxu3 %v6594_v1 }
 0x248   : > { %3491 = vmatpush.msra.mxu0 %v11118_v38  ;;  %3152 = vmatpush.msrb.mxu1 %v3151_v51 }
 0x24a   : > { %3495 = vmatpush.msra.mxu0 %v11119_v23  ;;  %3606 = vmatpush.msra.mxu1 %v7463_v31  ;;  %v7741_v45 = vpop.f32.mrf.mxu0  ;;  %v11123_v31 = vand.u32 4294901760, %v7554_v7  ;;  %v11126_v7 = vld [vmem:[#allocation14_spill] sm:$0xff] }
 0x24b   : > { %v7743_v27 = vpop.f32.mrf.mxu1  ;;  %2195 = vmatmul.f32.gmra.mxu0 %v11120_v12  ;;  %v7746_v53 = vpop.f32.mrf.mxu2  ;;  %2382 = vmatmul.f32.gmra.mxu1 %v11122_v41  ;;  %v11145_v12 = vld [vmem:[#allocation22_spill] sm:$0xff] }
 0x24c   : > { %3499 = vmatpush.msra.mxu0 %v11121_v22  ;;  %3608 = vmatpush.msra.mxu1 %v7453_v39  ;;  %v11125_v39 = vand.u32 4294901760, %v7578_v25  ;;  %v11130_v25 = vand.u32 4294901760, %v7631_v35  ;;  %v11148_v22 = vld [vmem:[#allocation23_spill] sm:$0xff] }
 0x24d   : > { %v7751_v1 = vpop.f32.mrf.mxu3  ;;  %2595 = vmatmul.f32.gmra.mxu2 %v6612_v8 }
 0x24e   : > { %3503 = vmatpush.msra.mxu0 %v11123_v31  ;;  %3610 = vmatpush.msra.mxu1 %v7461_v14  ;;  %v11127_v14 = vand.u32 4294901760, %v7598_v61 }
 0x24f   : > { %2744 = vmatmul.f32.gmra.mxu3 %v6612_v8  ;;  %v11128_v8 = vld [vmem:[#allocation15_spill] sm:$0xff] }
 0x250   : > { %3507 = vmatpush.msra.mxu0 %v11124_v0  ;;  %3612 = vmatpush.msra.mxu1 %v7470_v48  ;;  %v11149_v0 = vld [vmem:[#allocation24_spill] sm:$0xff] }
 0x252   : > { %3511 = vmatpush.msra.mxu0 %v11125_v39  ;;  %3614 = vmatpush.msra.mxu1 %v7483_v13  ;;  %v7765_v17 = vpop.f32.mrf.mxu0  ;;  %v11129_v13 = vand.u32 4294901760, %v7618_v43  ;;  %v11132_v43 = vld [vmem:[#allocation16_spill] sm:$0xff] }
 0x253   : > { %v7767_v38 = vpop.f32.mrf.mxu1  ;;  %2200 = vmatmul.f32.gmra.mxu0 %v11126_v7  ;;  %v7770_v47 = vpop.f32.mrf.mxu2  ;;  %2388 = vmatmul.f32.gmra.mxu1 %v11128_v8  ;;  %v11152_v7 = vld [vmem:[#allocation25_spill] sm:$0xff] }
 0x254   : > { %3515 = vmatpush.msra.mxu0 %v11127_v14  ;;  %3616 = vmatpush.msra.mxu1 %v7499_v36  ;;  %v11131_v36 = vand.u32 4294901760, %v7644_v3  ;;  %v11136_v3 = vand.u32 4294901760, %v7686_v16 }
 0x255   : > { %v7775_v48 = vpop.f32.mrf.mxu3  ;;  %2599 = vmatmul.f32.gmra.mxu2 %v6635_v19 }
 0x256   : > { %3519 = vmatpush.msra.mxu0 %v11129_v13  ;;  %3618 = vmatpush.msra.mxu1 %v7518_v42  ;;  %v11133_v42 = vand.u32 4294901760, %v7663_v55  ;;  %v11137_v55 = vld [vmem:[#allocation18_spill] sm:$0xff] }
 0x257   : > { %2748 = vmatmul.f32.gmra.mxu3 %v6635_v19  ;;  %v11134_v19 = vld [vmem:[#allocation17_spill] sm:$0xff]  ;;  %v11153_v13 = vld [vmem:[#allocation26_spill] sm:$0xff] }
 0x258   : > { %3523 = vmatpush.msra.mxu0 %v11130_v25  ;;  %3620 = vmatpush.msra.mxu1 %v7534_v59 }
 0x25a   : > { %3527 = vmatpush.msra.mxu0 %v11131_v36  ;;  %3622 = vmatpush.msra.mxu1 %v7546_v4  ;;  %v7789_v34 = vpop.f32.mrf.mxu0  ;;  %v11135_v4 = vand.u32 4294901760, %v7673_v28  ;;  %v11156_v36 = vld [vmem:[#allocation27_spill] sm:$0xff] }
 0x25b   : > { %v7791_v61 = vpop.f32.mrf.mxu1  ;;  %2205 = vmatmul.f32.gmra.mxu0 %v11132_v43  ;;  %v7794_v29 = vpop.f32.mrf.mxu2  ;;  %2394 = vmatmul.f32.gmra.mxu1 %v11134_v19 }
 0x25c   : > { %3531 = vmatpush.msra.mxu0 %v11133_v42  ;;  %3624 = vmatpush.msra.mxu1 %v7567_v24 }
 0x25d   : > { %v7799_v59 = vpop.f32.mrf.mxu3  ;;  %2603 = vmatmul.f32.gmra.mxu2 %v6663_v32 }
 0x25e   : > { %3535 = vmatpush.msra.mxu0 %v11135_v4  ;;  %3626 = vmatpush.msra.mxu1 %v7589_v9  ;;  %v11140_v9 = vld [vmem:[#allocation19_spill] sm:$0xff]  ;;  %v11157_v4 = vld [vmem:[#allocation28_spill] sm:$0xff] }
 0x25f   : > { %2752 = vmatmul.f32.gmra.mxu3 %v6663_v32 }
 0x260   : > { %3539 = vmatpush.msra.mxu0 %v11136_v3  ;;  %3628 = vmatpush.msra.mxu1 %v7600_v60 }
 0x262   : > { %3630 = vmatpush.msra.mxu1 %v7610_v26  ;;  %v1486_v24 = vpop.f32.mrf.mxu0  ;;  %v11141_v26 = vld [vmem:[#allocation20_spill] sm:$0xff] }
 0x263   : > { %v7811_v35 = vpop.f32.mrf.mxu1  ;;  %2210 = vmatmul.f32.gmra.mxu0 %v11137_v55  ;;  %v7814_v58 = vpop.f32.mrf.mxu2  ;;  %2400 = vmatmul.f32.gmra.mxu1 %v11140_v9 }
 0x264   : > { %11138 = vst [vmem:[#allocation10_spill] sm:$0xff] %v7814_v58  ;;  %3632 = vmatpush.msra.mxu1 %v7636_v33  ;;  %v11144_v33 = vld [vmem:[#allocation21_spill] sm:$0xff] }
 0x265   : > { %v7817_v28 = vpop.f32.mrf.mxu3  ;;  %2607 = vmatmul.f32.gmra.mxu2 %v6681_v46 }
 0x266   : > { %11139 = vst [vmem:[#allocation11_spill] sm:$0xff] %v7817_v28  ;;  %3634 = vmatpush.msra.mxu1 %v7649_v11 }
 0x267   : > { %2756 = vmatmul.f32.gmra.mxu3 %v6681_v46 }
 0x268   : > { %3636 = vmatpush.msra.mxu1 %v7658_v54 }
 0x26a   : > { %v1490_v32 = vpop.f32.mrf.mxu0 }
 0x26b   : > { %v1639_v60 = vpop.f32.mrf.mxu1  ;;  %2215 = vmatmul.f32.gmra.mxu0 %v11141_v26  ;;  %v7825_v16 = vpop.f32.mrf.mxu2  ;;  %2406 = vmatmul.f32.gmra.mxu1 %v11144_v33  ;;  %v11160_v26 = vld [vmem:[#allocation29_spill] sm:$0xff] }
 0x26c   : > { %11142 = vst [vmem:[#allocation12_spill] sm:$0xff] %v7825_v16 }
 0x26d   : > { %v7827_v51 = vpop.f32.mrf.mxu3  ;;  %2611 = vmatmul.f32.gmra.mxu2 %v6699_v62 }
 0x26e   : > { %11143 = vst [vmem:[#allocation13_spill] sm:$0xff] %v7827_v51 }
 0x26f   : > { %2760 = vmatmul.f32.gmra.mxu3 %v6699_v62 }
 0x272   : > { %v1494_v23 = vpop.f32.mrf.mxu0 }
 0x273   : > { %v1643_v11 = vpop.f32.mrf.mxu1  ;;  %2220 = vmatmul.f32.gmra.mxu0 %v11145_v12  ;;  %v7833_v54 = vpop.f32.mrf.mxu2  ;;  %2412 = vmatmul.f32.gmra.mxu1 %v11148_v22  ;;  %v1491_v12 = vadd.f32 %v1490_v32, %v7259_v52 }
 0x274   : > { %11146 = vst [vmem:[#allocation14_spill] sm:$0xff] %v7833_v54 }
 0x275   : > { %v7835_v46 = vpop.f32.mrf.mxu3  ;;  %2615 = vmatmul.f32.gmra.mxu2 %v6717_v15  ;;  %v1640_v52 = vadd.f32 %v1639_v60, %v1491_v12  ;;  %v11171_v12 = vld [vmem:[#allocation104_spill] sm:$0xff] }
 0x276   : > { %11147 = vst [vmem:[#allocation15_spill] sm:$0xff] %v7835_v46 }
 0x277   : > { %2764 = vmatmul.f32.gmra.mxu3 %v6717_v15 }
 0x27a   : > { %v1498_v41 = vpop.f32.mrf.mxu0 }
 0x27b   : > { %v1647_v31 = vpop.f32.mrf.mxu1  ;;  %2225 = vmatmul.f32.gmra.mxu0 %v11149_v0  ;;  %v7841_v39 = vpop.f32.mrf.mxu2  ;;  %2418 = vmatmul.f32.gmra.mxu1 %v11152_v7  ;;  %v1499_v55 = vadd.f32 %v1498_v41, %v7273_v44 }
 0x27c   : > { %11150 = vst [vmem:[#allocation16_spill] sm:$0xff] %v7841_v39 }
 0x27d   : > { %v7843_v62 = vpop.f32.mrf.mxu3  ;;  %2619 = vmatmul.f32.gmra.mxu2 %v6735_v37  ;;  %v1648_v22 = vadd.f32 %v1647_v31, %v1499_v55 }
 0x27e   : > { %11151 = vst [vmem:[#allocation17_spill] sm:$0xff] %v7843_v62 }
 0x27f   : > { %2768 = vmatmul.f32.gmra.mxu3 %v6735_v37  ;;  %v1690_v32 = vmax.f32 %v1648_v22, 0.0  ;;  %v11172_v22 = vld [vmem:[#allocation8_spill] sm:$0xff] }
 0x282   : > { %v1502_v14 = vpop.f32.mrf.mxu0 }
 0x283   : > { %v1651_v8 = vpop.f32.mrf.mxu1  ;;  %2230 = vmatmul.f32.gmra.mxu0 %v11153_v13  ;;  %v7849_v25 = vpop.f32.mrf.mxu2  ;;  %2424 = vmatmul.f32.gmra.mxu1 %v11156_v36  ;;  %v1503_v43 = vadd.f32 %v1502_v14, %v7280_v49  ;;  %v1483_v13 = vadd.f32 %v7789_v34, %v7245_v57  ;;  %v11161_v36 = vld [vmem:[#allocation30_spill] sm:$0xff] }
 0x284   : > { %11154 = vst [vmem:[#allocation18_spill] sm:$0xff] %v7849_v25 }
 0x285   : > { %v7851_v15 = vpop.f32.mrf.mxu3  ;;  %2623 = vmatmul.f32.gmra.mxu2 %v6753_v10  ;;  %v1652_v49 = vadd.f32 %v1651_v8, %v1503_v43  ;;  %v11165_v8 = vld [vmem:[#allocation106_spill] sm:$0xff]  ;;  %v7890_v43 = vadd.f32 %v7791_v61, %v1483_v13 }
 0x286   : > { %11155 = vst [vmem:[#allocation19_spill] sm:$0xff] %v7851_v15  ;;  %v1475_v60 = vadd.f32 %v7741_v45, %v11165_v8 }
 0x287   : > { %2772 = vmatmul.f32.gmra.mxu3 %v6753_v10  ;;  %v1495_v10 = vadd.f32 %v1494_v23, %v7266_v40  ;;  %v1691_v44 = vmax.f32 %v1652_v49, 0.0 }
 0x289   : > { %v1644_v7 = vadd.f32 %v1643_v11, %v1495_v10  ;;  %v11170_v10 = vld [vmem:[#allocation105_spill] sm:$0xff] }
 0x28a   : > { %v1506_v42 = vpop.f32.mrf.mxu0  ;;  %v1471_v45 = vadd.f32 %v7716_v6, %v11170_v10  ;;  %v7919_v6 = vadd.f32 %v7743_v27, %v1475_v60  ;;  %v11179_v10 = vld [vmem:[#allocation9_spill] sm:$0xff] }
 0x28b   : > { %v1655_v19 = vpop.f32.mrf.mxu1  ;;  %2235 = vmatmul.f32.gmra.mxu0 %v11157_v4  ;;  %v1507_v37 = vadd.f32 %v1506_v42, %v7287_v56  ;;  %v7859_v3 = vpop.f32.mrf.mxu2  ;;  %2430 = vmatmul.f32.gmra.mxu1 %v11160_v26  ;;  %v1487_v56 = vadd.f32 %v1486_v24, %v7252_v50  ;;  %v1479_v50 = vadd.f32 %v7765_v17, %v7238_v20  ;;  %v11164_v24 = vld [vmem:[#allocation31_spill] sm:$0xff]  ;;  %v1689_v11 = vmax.f32 %v1644_v7, 0.0  ;;  %v11167_v4 = vld [vmem:[#allocation2_spill] sm:$0xff] }
 0x28c   : > { %11158 = vst [vmem:[#allocation20_spill] sm:$0xff] %v7859_v3  ;;  %v1688_v17 = vmax.f32 %v1640_v52, 0.0  ;;  %v11169_v26 = vld [vmem:[#allocation3_spill] sm:$0xff] }
 0x28d   : > { %v7862_v9 = vpop.f32.mrf.mxu3  ;;  %2627 = vmatmul.f32.gmra.mxu2 %v6771_v21  ;;  %v1656_v33 = vadd.f32 %v1655_v19, %v1507_v37  ;;  %v1636_v34 = vadd.f32 %v7811_v35, %v1487_v56  ;;  %v11166_v19 = vld [vmem:[#allocation101_spill] sm:$0xff]  ;;  %v7896_v37 = vand.u32 4294901760, %v1690_v32  ;;  %v11168_v35 = vld [vmem:[#allocation102_spill] sm:$0xff]  ;;  %v7906_v61 = vadd.f32 %v7767_v38, %v1479_v50 }
 0x28e   : > { %11159 = vst [vmem:[#allocation21_spill] sm:$0xff] %v7862_v9  ;;  %v7894_v20 = vadd.f32 %v11167_v4, %v11166_v19  ;;  %v1467_v56 = vadd.f32 %v11172_v22, %v11171_v12  ;;  %v1686_v38 = vmax.f32 %v7890_v43, 0.0  ;;  %v7937_v43 = vadd.f32 %v7718_v30, %v1471_v45  ;;  %v11177_v4 = vld [vmem:[#allocation33_spill] sm:$0xff] }
 0x28f   : > { %v1692_v0 = vmax.f32 %v1656_v33, 0.0  ;;  %2776 = vmatmul.f32.gmra.mxu3 %v6771_v21  ;;  %v1459_v33 = vadd.f32 %v11169_v26, %v11168_v35  ;;  %v1687_v7 = vmax.f32 %v1636_v34, 0.0  ;;  %v7930_v34 = vand.u32 4294901760, %v1688_v17  ;;  %v11178_v35 = vld [vmem:[#allocation34_spill] sm:$0xff] }
 0x290   : > { %v7933_v27 = vsub.f32 %v1690_v32, %v7896_v37  ;;  %v7944_v12 = vadd.f32 %v11179_v10, %v1467_v56  ;;  %v1684_v45 = vmax.f32 %v7919_v6, 0.0  ;;  %v11180_v56 = vld [vmem:[#allocation7_spill] sm:$0xff] }
 0x291   : > { %v7876_v31 = vand.u32 4294901760, %v1692_v0  ;;  %v7946_v32 = vand.u32 4294901760, %v1687_v7 }
 0x292   : > { %v1510_v41 = vpop.f32.mrf.mxu0  ;;  %v10629_v6 = vand.u32 4294901760, %v7933_v27 }
 0x293   : > { %v1659_v14 = vpop.f32.mrf.mxu1  ;;  %2240 = vmatmul.f32.gmra.mxu0 %v11161_v36  ;;  %v1511_v40 = vadd.f32 %v1510_v41, %v7299_v63  ;;  %v7874_v23 = vpop.f32.mrf.mxu2  ;;  %2436 = vmatmul.f32.gmra.mxu1 %v11164_v24  ;;  %v7885_v63 = vand.u32 4294901760, %v1691_v44  ;;  %v7899_v55 = vsub.f32 %v1692_v0, %v7876_v31  ;;  %v7913_v41 = vand.u32 4294901760, %v1689_v11  ;;  %v11173_v36 = vld [vmem:[#allocation32_spill] sm:$0xff]  ;;  %v11175_v24 = vld [vmem:[#allocation103_spill] sm:$0xff] }
 0x294   : > { %11162 = vst [vmem:[#allocation22_spill] sm:$0xff] %v7874_v23 }
 0x295   : > { %v7878_v21 = vpop.f32.mrf.mxu3  ;;  %2631 = vmatmul.f32.gmra.mxu2 %v6794_v5  ;;  %v1660_v57 = vadd.f32 %v1659_v14, %v1511_v40  ;;  %v7916_v0 = vsub.f32 %v1691_v44, %v7885_v63  ;;  %v11174_v40 = vld [vmem:[#allocation107_spill] sm:$0xff]  ;;  %v11176_v44 = vld [vmem:[#allocation6_spill] sm:$0xff]  ;;  %v10626_v60 = vand.u32 4294901760, %v7899_v55  ;;  %v7949_v22 = vsub.f32 %v1689_v11, %v7913_v41 }
 0x296   : > { %11163 = vst [vmem:[#allocation23_spill] sm:$0xff] %v7878_v21 }
 0x297   : > { %v1693_v42 = vmax.f32 %v1660_v57, 0.0  ;;  %2780 = vmatmul.f32.gmra.mxu3 %v6794_v5  ;;  %v1463_v57 = vadd.f32 %v11176_v44, %v11175_v24  ;;  %v10628_v30 = vand.u32 4294901760, %v7916_v0  ;;  %v3872_v11 = vsub.f32 %v7899_v55, %v10626_v60 }
 0x299   : > { %v7909_v49 = vand.u32 4294901760, %v1693_v42  ;;  %v3878_v10 = vsub.f32 %v7916_v0, %v10628_v30  ;;  %v3873_v30 = vand.u32 4294901760, %v3872_v11  ;;  %v11189_v11 = vld [vmem:[#allocation37_spill] sm:$0xff] }
 0x29a   : > { %v2171_v14 = vpop.f32.mrf.mxu0 }
 0x29b   : > { %v2353_v13 = vpop.f32.mrf.mxu1  ;;  %v7923_v5 = vsub.f32 %v1693_v42, %v7909_v49  ;;  %2245 = vmatmul.f32.gmra.mxu0 %v11173_v36  ;;  %v2172_v52 = vadd.f32 %v2171_v14, %v11174_v40  ;;  %3703 = vmatpush.msra.mxu2 %v7909_v49  ;;  %v2572_v50 = vpop.f32.mrf.mxu2  ;;  %v1685_v42 = vmax.f32 %v7906_v61, 0.0  ;;  %v7954_v61 = vand.u32 4294901760, %v1686_v38 }
 0x29c   : > { %2442 = vmatmul.f32.gmra.mxu1 %v11177_v4  ;;  %v7960_v36 = vadd.f32 %v11180_v56, %v1463_v57  ;;  %v7963_v40 = vsub.f32 %v1688_v17, %v7930_v34  ;;  %v11182_v57 = vld [vmem:[#allocation100_spill] sm:$0xff]  ;;  %v11183_v17 = vld [vmem:[#allocation85_spill] sm:$0xff] }
 0x29d   : > { %v2721_v8 = vpop.f32.mrf.mxu3  ;;  %v10627_v19 = vand.u32 4294901760, %v7923_v5  ;;  %2635 = vmatmul.f32.gmra.mxu2 %v11178_v35  ;;  %v2354_v26 = vadd.f32 %v2353_v13, %v2172_v52  ;;  %v1683_v52 = vmax.f32 %v7937_v43, 0.0  ;;  %v1451_v4 = vadd.f32 %v11183_v17, %v11182_v57  ;;  %v11184_v56 = vld [vmem:[#allocation5_spill] sm:$0xff] }
 0x29e   : > { %3705 = vmatpush.msra.mxu2 %v7876_v31  ;;  %v7987_v60 = vadd.f32 %v11184_v56, %v1459_v33  ;;  %v11186_v17 = vld [vmem:[#allocation45_spill] sm:$0xff]  ;;  %v3884_v33 = vsub.f32 %v7933_v27, %v10629_v6  ;;  %v3879_v6 = vand.u32 4294901760, %v3878_v10  ;;  %v11192_v10 = vand.u32 4294901760, %v7963_v40 }
 0x29f   : > { %v2573_v14 = vadd.f32 %v2572_v50, %v2354_v26  ;;  %v3866_v13 = vsub.f32 %v7923_v5, %v10627_v19  ;;  %v7971_v50 = vand.u32 4294901760, %v1685_v42  ;;  %2784 = vmatmul.f32.gmra.mxu3 %v11178_v35  ;;  %v7979_v26 = vsub.f32 %v1687_v7, %v7946_v32  ;;  %v11185_v7 = vld [vmem:[#allocation35_spill] sm:$0xff] }
 0x2a0   : > { %3707 = vmatpush.msra.mxu2 %v7885_v63  ;;  %v7990_v35 = vand.u32 4294901760, %v1684_v45 }
 0x2a1   : > { %v7974_v24 = vadd.f32 %v2721_v8, %v2573_v14  ;;  %v3867_v44 = vand.u32 4294901760, %v3866_v13  ;;  %v1682_v8 = vmax.f32 %v7944_v12, 0.0  ;;  %v7993_v14 = vsub.f32 %v1686_v38, %v7954_v61  ;;  %v11187_v38 = vld [vmem:[#allocation4_spill] sm:$0xff] }
 0x2a2   : > { %3709 = vmatpush.msra.mxu2 %v7896_v37  ;;  %v2176_v13 = vpop.f32.mrf.mxu0  ;;  %v8004_v56 = vadd.f32 %v11187_v38, %v7894_v20  ;;  %v11190_v20 = vand.u32 4294901760, %v7949_v22  ;;  %v11191_v12 = vld [vmem:[#allocation80_spill] sm:$0xff] }
 0x2a3   : > { %11181 = vst [vmem:[#allocation24_spill] sm:$0xff] %v7974_v24  ;;  %2250 = vmatmul.f32.gmra.mxu0 %v11185_v7  ;;  %3868 = vmatpush.msra.mxu3 %v3867_v44  ;;  %v2359_v57 = vpop.f32.mrf.mxu1  ;;  %v2177_v19 = vadd.f32 %v2176_v13, %v11186_v17  ;;  %v2576_v43 = vpop.f32.mrf.mxu2  ;;  %v1681_v7 = vmax.f32 %v7960_v36, 0.0  ;;  %v8007_v44 = vand.u32 4294901760, %v1683_v52  ;;  %v8010_v13 = vsub.f32 %v1685_v42, %v7971_v50  ;;  %v11188_v17 = vld [vmem:[#allocation36_spill] sm:$0xff] }
 0x2a4   : > { %3711 = vmatpush.msra.mxu2 %v7913_v41  ;;  %2448 = vmatmul.f32.gmra.mxu1 %v11188_v17  ;;  %v3890_v38 = vsub.f32 %v7949_v22, %v11190_v20  ;;  %v10630_v36 = vand.u32 4294901760, %v7979_v26  ;;  %v1600_v58 = vadd.f32 %v11191_v12, %v1451_v4  ;;  %v1680_v42 = vmax.f32 %v7987_v60, 0.0 }
 0x2a5   : > { %2639 = vmatmul.f32.gmra.mxu2 %v11189_v11  ;;  %v2725_v28 = vpop.f32.mrf.mxu3  ;;  %v2360_v51 = vadd.f32 %v2359_v57, %v2177_v19  ;;  %3874 = vmatpush.msra.mxu3 %v3873_v30  ;;  %v8021_v46 = vand.u32 4294901760, %v1682_v8  ;;  %v8024_v17 = vsub.f32 %v1684_v45, %v7990_v35  ;;  %v3885_v30 = vand.u32 4294901760, %v3884_v33 }
 0x2a6   : > { %3713 = vmatpush.msra.mxu2 %v7930_v34  ;;  %v3896_v57 = vsub.f32 %v7963_v40, %v11192_v10  ;;  %v10631_v20 = vand.u32 4294901760, %v7993_v14  ;;  %v1679_v4 = vmax.f32 %v8004_v56, 0.0  ;;  %v8032_v12 = vand.u32 4294901760, %v1681_v7  ;;  %v11194_v10 = vld [vmem:[#allocation38_spill] sm:$0xff] }
 0x2a7   : > { %v2577_v19 = vadd.f32 %v2576_v43, %v2360_v51  ;;  %3880 = vmatpush.msra.mxu3 %v3879_v6  ;;  %v8035_v60 = vsub.f32 %v1683_v52, %v8007_v44  ;;  %v3891_v45 = vand.u32 4294901760, %v3890_v38  ;;  %v3902_v6 = vsub.f32 %v7979_v26, %v10630_v36 }
 0x2a8   : > { %3715 = vmatpush.msra.mxu2 %v7946_v32  ;;  %2788 = vmatmul.f32.gmra.mxu3 %v11189_v11  ;;  %v1678_v33 = vmax.f32 %v1600_v58, 0.0  ;;  %v8045_v56 = vand.u32 4294901760, %v1680_v42  ;;  %v8049_v52 = vsub.f32 %v1682_v8, %v8021_v46  ;;  %v3908_v38 = vsub.f32 %v7993_v14, %v10631_v20  ;;  %v11196_v8 = vld [vmem:[#allocation40_spill] sm:$0xff] }
 0x2a9   : > { %v8038_v51 = vadd.f32 %v2725_v28, %v2577_v19  ;;  %3886 = vmatpush.msra.mxu3 %v3885_v30  ;;  %v3897_v28 = vand.u32 4294901760, %v3896_v57  ;;  %v8056_v30 = vand.u32 4294901760, %v1679_v4  ;;  %v8059_v58 = vsub.f32 %v1681_v7, %v8032_v12 }
 0x2aa   : > { %3717 = vmatpush.msra.mxu2 %v7954_v61  ;;  %v3903_v62 = vand.u32 4294901760, %v3902_v6  ;;  %v11198_v20 = vand.u32 4294901760, %v8010_v13  ;;  %v8069_v7 = vand.u32 4294901760, %v1678_v33 }
 0x2ab   : > { %11193 = vst [vmem:[#allocation25_spill] sm:$0xff] %v8038_v51  ;;  %2255 = vmatmul.f32.gmra.mxu0 %v11194_v10  ;;  %3892 = vmatpush.msra.mxu3 %v3891_v45  ;;  %v2580_v11 = vpop.f32.mrf.mxu2  ;;  %v11195_v10 = vld [vmem:[#allocation39_spill] sm:$0xff]  ;;  %v11197_v45 = vld [vmem:[#allocation46_spill] sm:$0xff] }
 0x2ac   : > { %3719 = vmatpush.msra.mxu2 %v7971_v50  ;;  %2454 = vmatmul.f32.gmra.mxu1 %v11195_v10  ;;  %v2181_v36 = vpop.f32.mrf.mxu0  ;;  %v3914_v19 = vsub.f32 %v8010_v13, %v11198_v20  ;;  %v8072_v10 = vsub.f32 %v1680_v42, %v8045_v56  ;;  %v8080_v20 = vsub.f32 %v1679_v4, %v8056_v30 }
 0x2ad   : > { %2643 = vmatmul.f32.gmra.mxu2 %v11196_v8  ;;  %v2365_v43 = vpop.f32.mrf.mxu1  ;;  %v2182_v57 = vadd.f32 %v2181_v36, %v11197_v45  ;;  %3898 = vmatpush.msra.mxu3 %v3897_v28  ;;  %v3909_v36 = vand.u32 4294901760, %v3908_v38  ;;  %v11199_v28 = vand.u32 4294901760, %v8024_v17  ;;  %v10632_v45 = vand.u32 4294901760, %v8049_v52 }
 0x2ae   : > { %3721 = vmatpush.msra.mxu2 %v7990_v35  ;;  %v2729_v54 = vpop.f32.mrf.mxu3  ;;  %v3915_v42 = vand.u32 4294901760, %v3914_v19  ;;  %v10633_v38 = vand.u32 4294901760, %v8059_v58  ;;  %v10634_v19 = vand.u32 4294901760, %v8072_v10 }
 0x2af   : > { %v2366_v15 = vadd.f32 %v2365_v43, %v2182_v57  ;;  %3904 = vmatpush.msra.mxu3 %v3903_v62  ;;  %v3920_v6 = vsub.f32 %v8024_v17, %v11199_v28  ;;  %v11200_v43 = vand.u32 4294901760, %v8035_v60  ;;  %v8089_v57 = vsub.f32 %v1678_v33, %v8069_v7  ;;  %v11201_v28 = vld [vmem:[#allocation41_spill] sm:$0xff] }
 0x2b0   : > { %3723 = vmatpush.msra.mxu2 %v8007_v44  ;;  %2792 = vmatmul.f32.gmra.mxu3 %v11196_v8  ;;  %v11203_v8 = vld [vmem:[#allocation42_spill] sm:$0xff] }
 0x2b1   : > { %v2581_v16 = vadd.f32 %v2580_v11, %v2366_v15  ;;  %3910 = vmatpush.msra.mxu3 %v3909_v36  ;;  %v3926_v62 = vsub.f32 %v8035_v60, %v11200_v43  ;;  %v3921_v15 = vand.u32 4294901760, %v3920_v6  ;;  %v3932_v11 = vsub.f32 %v8049_v52, %v10632_v45  ;;  %v11204_v36 = vld [vmem:[#allocation43_spill] sm:$0xff] }
 0x2b2   : > { %3725 = vmatpush.msra.mxu2 %v8021_v46 }
 0x2b3   : > { %2260 = vmatmul.f32.gmra.mxu0 %v11201_v28  ;;  %v8092_v4 = vadd.f32 %v2729_v54, %v2581_v16  ;;  %3916 = vmatpush.msra.mxu3 %v3915_v42  ;;  %v3927_v16 = vand.u32 4294901760, %v3926_v62  ;;  %v3938_v54 = vsub.f32 %v8059_v58, %v10633_v38  ;;  %v11205_v28 = vld [vmem:[#allocation50_spill] sm:$0xff]  ;;  %v10635_v62 = vand.u32 4294901760, %v8089_v57 }
 0x2b4   : > { %3727 = vmatpush.msra.mxu2 %v8032_v12  ;;  %2460 = vmatmul.f32.gmra.mxu1 %v11203_v8  ;;  %v3933_v8 = vand.u32 4294901760, %v3932_v11 }
 0x2b5   : > { %11202 = vst [vmem:[#allocation26_spill] sm:$0xff] %v8092_v4  ;;  %2647 = vmatmul.f32.gmra.mxu2 %v11204_v36  ;;  %3922 = vmatpush.msra.mxu3 %v3921_v15  ;;  %v2584_v33 = vpop.f32.mrf.mxu2  ;;  %v3944_v15 = vsub.f32 %v8072_v10, %v10634_v19  ;;  %v3939_v6 = vand.u32 4294901760, %v3938_v54  ;;  %v3956_v19 = vsub.f32 %v8089_v57, %v10635_v62  ;;  %v11213_v62 = vld [vmem:[#allocation52_spill] sm:$0xff] }
 0x2b6   : > { %3729 = vmatpush.msra.mxu2 %v8045_v56  ;;  %v2186_v42 = vpop.f32.mrf.mxu0 }
 0x2b7   : > { %v2371_v43 = vpop.f32.mrf.mxu1  ;;  %v2187_v45 = vadd.f32 %v2186_v42, %v11205_v28  ;;  %3928 = vmatpush.msra.mxu3 %v3927_v16  ;;  %v11206_v42 = vand.u32 4294901760, %v8080_v20  ;;  %v11207_v16 = vld [vmem:[#allocation44_spill] sm:$0xff]  ;;  %v3945_v9 = vand.u32 4294901760, %v3944_v15 }
 0x2b8   : > { %3731 = vmatpush.msra.mxu2 %v8056_v30  ;;  %2796 = vmatmul.f32.gmra.mxu3 %v11204_v36  ;;  %v2733_v39 = vpop.f32.mrf.mxu3  ;;  %v11208_v36 = vld [vmem:[#allocation47_spill] sm:$0xff] }
 0x2b9   : > { %v2372_v38 = vadd.f32 %v2371_v43, %v2187_v45  ;;  %3934 = vmatpush.msra.mxu3 %v3933_v8  ;;  %v3950_v28 = vsub.f32 %v8080_v20, %v11206_v42  ;;  %v11209_v45 = vld [vmem:[#allocation48_spill] sm:$0xff]  ;;  %v3957_v42 = vand.u32 4294901760, %v3956_v19  ;;  %v11216_v19 = vld [vmem:[#allocation55_spill] sm:$0xff] }
 0x2ba   : > { %3733 = vmatpush.msra.mxu2 %v8069_v7 }
 0x2bb   : > { %2265 = vmatmul.f32.gmra.mxu0 %v11207_v16  ;;  %v2585_v11 = vadd.f32 %v2584_v33, %v2372_v38  ;;  %3940 = vmatpush.msra.mxu3 %v3939_v6  ;;  %v3951_v54 = vand.u32 4294901760, %v3950_v28  ;;  %v11211_v38 = vld [vmem:[#allocation51_spill] sm:$0xff]  ;;  %v11212_v16 = vld [vmem:[#allocation49_spill] sm:$0xff] }
 0x2bc   : > { %2466 = vmatmul.f32.gmra.mxu1 %v11208_v36 }
 0x2bd   : > { %2651 = vmatmul.f32.gmra.mxu2 %v11209_v45  ;;  %v8123_v43 = vadd.f32 %v2733_v39, %v2585_v11  ;;  %3946 = vmatpush.msra.mxu3 %v3945_v9  ;;  %v11214_v11 = vld [vmem:[#allocation53_spill] sm:$0xff] }
 0x2bf   : > { %11210 = vst [vmem:[#allocation27_spill] sm:$0xff] %v8123_v43  ;;  %v2588_v25 = vpop.f32.mrf.mxu2  ;;  %3952 = vmatpush.msra.mxu3 %v3951_v54 }
 0x2c0   : > { %v2191_v8 = vpop.f32.mrf.mxu0  ;;  %2800 = vmatmul.f32.gmra.mxu3 %v11209_v45  ;;  %v2377_v6 = vpop.f32.mrf.mxu1 }
 0x2c1   : > { %v2192_v33 = vadd.f32 %v2191_v8, %v11211_v38  ;;  %3958 = vmatpush.msra.mxu3 %v3957_v42  ;;  %v11217_v42 = vld [vmem:[#allocation54_spill] sm:$0xff] }
 0x2c2   : > { %v2737_v36 = vpop.f32.mrf.mxu3 }
 0x2c3   : > { %v2378_v15 = vadd.f32 %v2377_v6, %v2192_v33  ;;  %2270 = vmatmul.f32.gmra.mxu0 %v11212_v16  ;;  %v11218_v6 = vld [vmem:[#allocation57_spill] sm:$0xff] }
 0x2c4   : > { %2472 = vmatmul.f32.gmra.mxu1 %v11213_v62  ;;  %v11219_v62 = vld [vmem:[#allocation58_spill] sm:$0xff] }
 0x2c5   : > { %v2589_v39 = vadd.f32 %v2588_v25, %v2378_v15  ;;  %2655 = vmatmul.f32.gmra.mxu2 %v11214_v11 }
 0x2c7   : > { %v8130_v9 = vadd.f32 %v2737_v36, %v2589_v39  ;;  %v11221_v39 = vld [vmem:[#allocation56_spill] sm:$0xff] }
 0x2c8   : > { %v2196_v28 = vpop.f32.mrf.mxu0  ;;  %v2592_v54 = vpop.f32.mrf.mxu2  ;;  %2804 = vmatmul.f32.gmra.mxu3 %v11214_v11 }
 0x2c9   : > { %11215 = vst [vmem:[#allocation28_spill] sm:$0xff] %v8130_v9  ;;  %v2197_v45 = vadd.f32 %v2196_v28, %v11216_v19  ;;  %v2383_v8 = vpop.f32.mrf.mxu1  ;;  %v11222_v19 = vld [vmem:[#allocation59_spill] sm:$0xff] }
 0x2ca   : > { %v2741_v33 = vpop.f32.mrf.mxu3 }
 0x2cb   : > { %v2384_v38 = vadd.f32 %v2383_v8, %v2197_v45  ;;  %2275 = vmatmul.f32.gmra.mxu0 %v11217_v42  ;;  %v11223_v8 = vld [vmem:[#allocation61_spill] sm:$0xff] }
 0x2cc   : > { %2478 = vmatmul.f32.gmra.mxu1 %v11218_v6  ;;  %v11224_v6 = vld [vmem:[#allocation62_spill] sm:$0xff] }
 0x2cd   : > { %v2593_v16 = vadd.f32 %v2592_v54, %v2384_v38  ;;  %2659 = vmatmul.f32.gmra.mxu2 %v11219_v62 }
 0x2cf   : > { %v8137_v25 = vadd.f32 %v2741_v33, %v2593_v16  ;;  %v11226_v16 = vld [vmem:[#allocation60_spill] sm:$0xff] }
 0x2d0   : > { %v2201_v15 = vpop.f32.mrf.mxu0  ;;  %v2596_v36 = vpop.f32.mrf.mxu2  ;;  %2808 = vmatmul.f32.gmra.mxu3 %v11219_v62 }
 0x2d1   : > { %11220 = vst [vmem:[#allocation29_spill] sm:$0xff] %v8137_v25  ;;  %v2202_v11 = vadd.f32 %v2201_v15, %v11221_v39  ;;  %v2389_v21 = vpop.f32.mrf.mxu1  ;;  %v11227_v39 = vld [vmem:[#allocation63_spill] sm:$0xff] }
 0x2d2   : > { %v2745_v45 = vpop.f32.mrf.mxu3 }
 0x2d3   : > { %v2390_v28 = vadd.f32 %v2389_v21, %v2202_v11  ;;  %2280 = vmatmul.f32.gmra.mxu0 %v11222_v19  ;;  %v11228_v11 = vld [vmem:[#allocation64_spill] sm:$0xff] }
 0x2d4   : > { %2484 = vmatmul.f32.gmra.mxu1 %v11223_v8  ;;  %v11229_v8 = vld [vmem:[#allocation65_spill] sm:$0xff] }
 0x2d5   : > { %v2597_v42 = vadd.f32 %v2596_v36, %v2390_v28  ;;  %2663 = vmatmul.f32.gmra.mxu2 %v11224_v6 }
 0x2d7   : > { %v8144_v54 = vadd.f32 %v2745_v45, %v2597_v42  ;;  %v11231_v42 = vld [vmem:[#allocation70_spill] sm:$0xff] }
 0x2d8   : > { %v2206_v38 = vpop.f32.mrf.mxu0  ;;  %v2600_v33 = vpop.f32.mrf.mxu2  ;;  %2812 = vmatmul.f32.gmra.mxu3 %v11224_v6 }
 0x2d9   : > { %11225 = vst [vmem:[#allocation30_spill] sm:$0xff] %v8144_v54  ;;  %v2207_v62 = vadd.f32 %v2206_v38, %v11226_v16  ;;  %v2395_v3 = vpop.f32.mrf.mxu1  ;;  %v11232_v16 = vld [vmem:[#allocation66_spill] sm:$0xff]  ;;  %v11256_v54 = vld [vmem:[#allocation88_spill] sm:$0xff] }
 0x2da   : > { %v2749_v21 = vpop.f32.mrf.mxu3 }
 0x2db   : > { %v2396_v15 = vadd.f32 %v2395_v3, %v2207_v62  ;;  %2285 = vmatmul.f32.gmra.mxu0 %v11227_v39  ;;  %v11233_v62 = vld [vmem:[#allocation67_spill] sm:$0xff] }
 0x2dc   : > { %2490 = vmatmul.f32.gmra.mxu1 %v11228_v11  ;;  %v11234_v11 = vld [vmem:[#allocation68_spill] sm:$0xff] }
 0x2dd   : > { %v2601_v19 = vadd.f32 %v2600_v33, %v2396_v15  ;;  %2667 = vmatmul.f32.gmra.mxu2 %v11229_v8 }
 0x2df   : > { %v8151_v36 = vadd.f32 %v2749_v21, %v2601_v19  ;;  %v11236_v19 = vld [vmem:[#allocation71_spill] sm:$0xff] }
 0x2e0   : > { %v2211_v28 = vpop.f32.mrf.mxu0  ;;  %v2604_v45 = vpop.f32.mrf.mxu2  ;;  %2816 = vmatmul.f32.gmra.mxu3 %v11229_v8 }
 0x2e1   : > { %11230 = vst [vmem:[#allocation31_spill] sm:$0xff] %v8151_v36  ;;  %v2212_v6 = vadd.f32 %v2211_v28, %v11231_v42  ;;  %v2401_v23 = vpop.f32.mrf.mxu1  ;;  %v11237_v42 = vld [vmem:[#allocation69_spill] sm:$0xff] }
 0x2e2   : > { %v2753_v3 = vpop.f32.mrf.mxu3 }
 0x2e3   : > { %v2402_v38 = vadd.f32 %v2401_v23, %v2212_v6  ;;  %2290 = vmatmul.f32.gmra.mxu0 %v11232_v16  ;;  %v11238_v6 = vld [vmem:[#allocation72_spill] sm:$0xff] }
 0x2e4   : > { %2496 = vmatmul.f32.gmra.mxu1 %v11233_v62  ;;  %v11239_v62 = vld [vmem:[#allocation73_spill] sm:$0xff] }
 0x2e5   : > { %v2605_v39 = vadd.f32 %v2604_v45, %v2402_v38  ;;  %2671 = vmatmul.f32.gmra.mxu2 %v11234_v11 }
 0x2e7   : > { %v8158_v33 = vadd.f32 %v2753_v3, %v2605_v39  ;;  %v11241_v39 = vld [vmem:[#allocation75_spill] sm:$0xff] }
 0x2e8   : > { %v2216_v15 = vpop.f32.mrf.mxu0  ;;  %v2608_v21 = vpop.f32.mrf.mxu2  ;;  %2820 = vmatmul.f32.gmra.mxu3 %v11234_v11 }
 0x2e9   : > { %11235 = vst [vmem:[#allocation106_spill] sm:$0xff] %v8158_v33  ;;  %v2217_v8 = vadd.f32 %v2216_v15, %v11236_v19  ;;  %v2407_v24 = vpop.f32.mrf.mxu1  ;;  %v11242_v19 = vld [vmem:[#allocation74_spill] sm:$0xff] }
 0x2ea   : > { %v2757_v23 = vpop.f32.mrf.mxu3 }
 0x2eb   : > { %v2408_v28 = vadd.f32 %v2407_v24, %v2217_v8  ;;  %2295 = vmatmul.f32.gmra.mxu0 %v11237_v42  ;;  %v11243_v8 = vld [vmem:[#allocation77_spill] sm:$0xff] }
 0x2ec   : > { %2502 = vmatmul.f32.gmra.mxu1 %v11238_v6  ;;  %v11244_v6 = vld [vmem:[#allocation78_spill] sm:$0xff] }
 0x2ed   : > { %v2609_v16 = vadd.f32 %v2608_v21, %v2408_v28  ;;  %2675 = vmatmul.f32.gmra.mxu2 %v11239_v62 }
 0x2ef   : > { %v8165_v45 = vadd.f32 %v2757_v23, %v2609_v16  ;;  %v11246_v16 = vld [vmem:[#allocation76_spill] sm:$0xff] }
 0x2f0   : > { %v2221_v38 = vpop.f32.mrf.mxu0  ;;  %v2612_v3 = vpop.f32.mrf.mxu2  ;;  %2824 = vmatmul.f32.gmra.mxu3 %v11239_v62 }
 0x2f1   : > { %11240 = vst [vmem:[#allocation101_spill] sm:$0xff] %v8165_v45  ;;  %v2222_v11 = vadd.f32 %v2221_v38, %v11241_v39  ;;  %v2413_v51 = vpop.f32.mrf.mxu1  ;;  %v11247_v38 = vld [vmem:[#allocation81_spill] sm:$0xff] }
 0x2f2   : > { %v2761_v24 = vpop.f32.mrf.mxu3 }
 0x2f3   : > { %v2414_v15 = vadd.f32 %v2413_v51, %v2222_v11  ;;  %2300 = vmatmul.f32.gmra.mxu0 %v11242_v19  ;;  %v8179_v51 = vld [vmem:[%s10496_s4] ss:$0 sm:$0xff]  ;;  %v11248_v11 = vld [vmem:[#allocation79_spill] sm:$0xff] }
 0x2f4   : > { %2508 = vmatmul.f32.gmra.mxu1 %v11243_v8  ;;  %v1825_v39 = vadd.f32 %v8179_v51, %v11247_v38  ;;  %v11249_v19 = vld [vmem:[#allocation82_spill] sm:$0xff]  ;;  %v11250_v8 = vld [vmem:[#allocation83_spill] sm:$0xff] }
 0x2f5   : > { %v2613_v42 = vadd.f32 %v2612_v3, %v2414_v15  ;;  %2679 = vmatmul.f32.gmra.mxu2 %v11244_v6  ;;  %v11253_v38 = vld [vmem:[#allocation91_spill] sm:$0xff] }
 0x2f7   : > { %v8172_v21 = vadd.f32 %v2761_v24, %v2613_v42  ;;  %v11251_v42 = vld [vmem:[#allocation86_spill] sm:$0xff] }
 0x2f8   : > { %v2226_v28 = vpop.f32.mrf.mxu0  ;;  %v2616_v23 = vpop.f32.mrf.mxu2  ;;  %2828 = vmatmul.f32.gmra.mxu3 %v11244_v6  ;;  %v2066_v6 = vadd.f32 %v11251_v42, %v1825_v39  ;;  %v11257_v39 = vld [vmem:[#allocation108_spill] sm:$0xff] }
 0x2f9   : > { %11245 = vst [vmem:[#allocation2_spill] sm:$0xff] %v8172_v21  ;;  %v2227_v62 = vadd.f32 %v2226_v28, %v11246_v16  ;;  %v2419_v4 = vpop.f32.mrf.mxu1 }
 0x2fa   : > { %v2765_v15 = vpop.f32.mrf.mxu3 }
 0x2fb   : > { %v2420_v3 = vadd.f32 %v2419_v4, %v2227_v62  ;;  %2305 = vmatmul.f32.gmra.mxu0 %v11248_v11  ;;  %v1833_v4 = vadd.f32 %v8179_v51, %v11253_v38  ;;  %v11254_v11 = vld [vmem:[#allocation84_spill] sm:$0xff]  ;;  %v11258_v38 = vld [vmem:[#allocation109_spill] sm:$0xff] }
 0x2fc   : > { %2514 = vmatmul.f32.gmra.mxu1 %v11249_v19 }
 0x2fd   : > { %v2617_v24 = vadd.f32 %v2616_v23, %v2420_v3  ;;  %2683 = vmatmul.f32.gmra.mxu2 %v11250_v8  ;;  %v11255_v23 = vld [vmem:[#allocation87_spill] sm:$0xff] }
 0x2ff   : > { %v8187_v28 = vadd.f32 %v2765_v15, %v2617_v24  ;;  %v2070_v15 = vadd.f32 %v11257_v39, %v1833_v4  ;;  %v11260_v4 = vld [vmem:[#allocation92_spill] sm:$0xff] }
 0x300   : > { %v2231_v16 = vpop.f32.mrf.mxu0  ;;  %v2620_v43 = vpop.f32.mrf.mxu2  ;;  %2832 = vmatmul.f32.gmra.mxu3 %v11250_v8 }
 0x301   : > { %11252 = vst [vmem:[#allocation102_spill] sm:$0xff] %v8187_v28  ;;  %v2232_v9 = vadd.f32 %v2231_v16, %v2066_v6  ;;  %v2425_v25 = vpop.f32.mrf.mxu1 }
 0x302   : > { %v2769_v19 = vpop.f32.mrf.mxu3 }
 0x303   : > { %v2426_v62 = vadd.f32 %v2425_v25, %v2232_v9  ;;  %2310 = vmatmul.f32.gmra.mxu0 %v11254_v11  ;;  %v1841_v9 = vadd.f32 %v8179_v51, %v11258_v38  ;;  %v11259_v11 = vld [vmem:[#allocation89_spill] sm:$0xff] }
 0x304   : > { %2520 = vmatmul.f32.gmra.mxu1 %v11255_v23 }
 0x305   : > { %v2621_v3 = vadd.f32 %v2620_v43, %v2426_v62  ;;  %2687 = vmatmul.f32.gmra.mxu2 %v11256_v54  ;;  %v2848_v43 = vld [vmem:[%s10497_s5] sm:$0xff] }
 0x307   : > { %v8196_v24 = vadd.f32 %v2769_v19, %v2621_v3  ;;  %v11261_v19 = vld [vmem:[#allocation93_spill] sm:$0xff]  ;;  %v11262_v3 = vld [vmem:[#allocation110_spill] sm:$0xff] }
 0x308   : > { %v2236_v42 = vpop.f32.mrf.mxu0  ;;  %v2624_v8 = vpop.f32.mrf.mxu2  ;;  %2836 = vmatmul.f32.gmra.mxu3 %v11256_v54  ;;  %v2074_v54 = vadd.f32 %v11262_v3, %v1841_v9  ;;  %v11269_v3 = vld [vmem:[#allocation90_spill] sm:$0xff] }
 0x309   : > { %v2237_v6 = vadd.f32 %v2236_v42, %v2070_v15  ;;  %v2431_v16 = vpop.f32.mrf.mxu1  ;;  %v8210_v15 = vand.u32 4294901760, %v2848_v43 }
 0x30a   : > { %v2773_v23 = vpop.f32.mrf.mxu3 }
 0x30b   : > { %v2432_v25 = vadd.f32 %v2431_v16, %v2237_v6  ;;  %2315 = vmatmul.f32.gmra.mxu0 %v11259_v11  ;;  %11263 = vst [vmem:[#allocation3_spill] sm:$0xff] %v8210_v15  ;;  %v11264_v11 = vld [vmem:[#allocation95_spill] sm:$0xff] }
 0x30c   : > { %2526 = vmatmul.f32.gmra.mxu1 %v11260_v4  ;;  %v1849_v36 = vadd.f32 %v8179_v51, %v11264_v11  ;;  %v11265_v4 = vld [vmem:[#allocation94_spill] sm:$0xff] }
 0x30d   : > { %v2625_v62 = vadd.f32 %v2624_v8, %v2432_v25  ;;  %2691 = vmatmul.f32.gmra.mxu2 %v11261_v19  ;;  %v8217_v8 = vsub.f32 %v2848_v43, %v8210_v15  ;;  %v11267_v25 = vld [vmem:[#allocation96_spill] sm:$0xff] }
 0x30e   : > { %v2078_v45 = vadd.f32 %v11269_v3, %v1849_v36  ;;  %v11274_v3 = vld [vmem:[#allocation99_spill] sm:$0xff] }
 0x30f   : > { %v8208_v39 = vadd.f32 %v2773_v23, %v2625_v62  ;;  %11266 = vst [vmem:[#allocation105_spill] sm:$0xff] %v8217_v8  ;;  %v11268_v62 = vld [vmem:[#allocation97_spill] sm:$0xff] }
 0x310   : > { %v2241_v42 = vpop.f32.mrf.mxu0  ;;  %v2628_v6 = vpop.f32.mrf.mxu2  ;;  %2840 = vmatmul.f32.gmra.mxu3 %v11261_v19 }
 0x311   : > { %v2242_v16 = vadd.f32 %v2241_v42, %v2074_v54  ;;  %v2437_v38 = vpop.f32.mrf.mxu1  ;;  %v8225_v54 = vand.u32 4294901760, %v8217_v8  ;;  %v2850_v42 = vld [vmem:[%s10497_s5 + $0x10] sm:$0xff] }
 0x312   : > { %v2777_v9 = vpop.f32.mrf.mxu3 }
 0x313   : > { %v2438_v33 = vadd.f32 %v2437_v38, %v2242_v16  ;;  %2320 = vmatmul.f32.gmra.mxu0 %v11265_v4  ;;  %11270 = vst [vmem:[#allocation104_spill] sm:$0xff] %v8225_v54 }
 0x314   : > { %2532 = vmatmul.f32.gmra.mxu1 %v11267_v25  ;;  %v2931_v25 = vsub.f32 %v8217_v8, %v8225_v54 }
 0x315   : > { %v2629_v23 = vadd.f32 %v2628_v6, %v2438_v33  ;;  %2695 = vmatmul.f32.gmra.mxu2 %v11268_v62  ;;  %v8231_v33 = vand.u32 4294901760, %v2850_v42  ;;  %v11272_v6 = vld [vmem:[#allocation111_spill] sm:$0xff] }
 0x316   : > { %v1857_v36 = vadd.f32 %v8179_v51, %v11272_v6 }
 0x317   : > { %v8222_v19 = vadd.f32 %v2777_v9, %v2629_v23  ;;  %11271 = vst [vmem:[#allocation8_spill] sm:$0xff] %v8231_v33  ;;  %v11273_v9 = vld [vmem:[#allocation98_spill] sm:$0xff] }
 0x318   : > { %v2246_v16 = vpop.f32.mrf.mxu0  ;;  %v2632_v43 = vpop.f32.mrf.mxu2  ;;  %2844 = vmatmul.f32.gmra.mxu3 %v11268_v62  ;;  %v8243_v62 = vsub.f32 %v2850_v42, %v8231_v33  ;;  %v11280_v42 = vand.u32 4294901760, %v7916_v0 }
 0x319   : > { %v2247_v38 = vadd.f32 %v2246_v16, %v2078_v45  ;;  %v2443_v11 = vpop.f32.mrf.mxu1  ;;  %v11275_v45 = vand.u32 4294901760, %v7923_v5  ;;  %v11277_v16 = vld [vmem:[#allocation112_spill] sm:$0xff] }
 0x31a   : > { %v2781_v23 = vpop.f32.mrf.mxu3  ;;  %11276 = vst [vmem:[#allocation32_spill] sm:$0xff] %v8243_v62  ;;  %v2082_v6 = vadd.f32 %v11277_v16, %v1857_v36  ;;  %v8260_v36 = vand.u32 4294901760, %v8243_v62 }
 0x31b   : > { %v2444_v4 = vadd.f32 %v2443_v11, %v2247_v38  ;;  %2325 = vmatmul.f32.gmra.mxu0 %v11273_v9  ;;  %v8248_v11 = vand.u32 4294901760, %v2931_v25  ;;  %v11279_v9 = vand.u32 4294901760, %v7899_v55  ;;  %v11282_v25 = vld [vmem:[#allocation113_spill] sm:$0xff] }
 0x31c   : > { %2538 = vmatmul.f32.gmra.mxu1 %v11274_v3  ;;  %11281 = vst [vmem:[#allocation103_spill] sm:$0xff] %v8260_v36 }
 0x31d   : > { %v2633_v21 = vadd.f32 %v2632_v43, %v2444_v4  ;;  %3268 = vmatmul.f32.vlgmr.msrb.gmra.mxu2 %v8217_v8  ;;  %11278 = vst [vmem:[#allocation107_spill] sm:$0xff] %v8248_v11  ;;  %v2852_v4 = vld [vmem:[%s10497_s5 + $0x20] sm:$0xff] }
 0x31e   : > { %4285 = vmatpush.msrb.mxu2 %v11275_v45  ;;  %v8267_v16 = vand.u32 4294901760, %v2852_v4 }
 0x31f   : > { %v8246_v38 = vadd.f32 %v2781_v23, %v2633_v21  ;;  %v1865_v23 = vadd.f32 %v8179_v51, %v11282_v25  ;;  %v11287_v25 = vand.u32 4294901760, %v7949_v22 }
 0x320   : > { %4289 = vmatpush.msrb.mxu2 %v11279_v9  ;;  %v2251_v28 = vpop.f32.mrf.mxu0  ;;  %v2636_v3 = vpop.f32.mrf.mxu2  ;;  %3382 = vmatmul.f32.vlgmr.msrb.gmra.mxu3 %v8225_v54  ;;  %11283 = vst [vmem:[#allocation6_spill] sm:$0xff] %v8267_v16 }
 0x321   : > { %v2252_v43 = vadd.f32 %v2251_v28, %v2082_v6  ;;  %4412 = vmatpush.msrb.mxu3 %v7909_v49  ;;  %v2449_v21 = vpop.f32.mrf.mxu1  ;;  %v11284_v6 = vand.u32 4294901760, %v7933_v27 }
 0x322   : > { %4293 = vmatpush.msrb.mxu2 %v11280_v42  ;;  %v2785_v28 = vpop.f32.mrf.mxu3  ;;  %v11285_v42 = vld [vmem:[#allocation114_spill] sm:$0xff] }
 0x323   : > { %v2450_v45 = vadd.f32 %v2449_v21, %v2252_v43  ;;  %2933 = vmatmul.f32.vlgmr.msrb.gmra.mxu0 %v8248_v11  ;;  %4414 = vmatpush.msrb.mxu3 %v7876_v31  ;;  %v2939_v43 = vsub.f32 %v8243_v62, %v8260_v36  ;;  %v2086_v21 = vadd.f32 %v11285_v42, %v1865_v23  ;;  %v11293_v42 = vand.u32 4294901760, %v7979_v26 }
 0x324   : > { %4026 = vmatpush.msrb.mxu0 %v7923_v5  ;;  %3154 = vmatmul.f32.vlgmr.msrb.gmra.mxu1 %v8210_v15 }
 0x325   : > { %4297 = vmatpush.msrb.mxu2 %v11284_v6  ;;  %v2637_v9 = vadd.f32 %v2636_v3, %v2450_v45  ;;  %4154 = vmatpush.msrb.mxu1 %v7909_v49  ;;  %v8285_v45 = vsub.f32 %v2852_v4, %v8267_v16 }
 0x326   : > { %4416 = vmatpush.msrb.mxu3 %v7885_v63  ;;  %3273 = vmatmul.f32.gmra.mxu2 %v8243_v62 }
 0x327   : > { %4029 = vmatpush.msrb.mxu0 %v7899_v55  ;;  %v8279_v5 = vadd.f32 %v2785_v28, %v2637_v9  ;;  %4156 = vmatpush.msrb.mxu1 %v7876_v31  ;;  %11288 = vst [vmem:[#allocation34_spill] sm:$0xff] %v8285_v45  ;;  %v8291_v28 = vand.u32 4294901760, %v2939_v43  ;;  %v11290_v31 = vld [vmem:[#allocation115_spill] sm:$0xff]  ;;  %v11291_v9 = vand.u32 4294901760, %v7963_v40  ;;  %v8304_v43 = vand.u32 4294901760, %v8285_v45 }
 0x328   : > { %4301 = vmatpush.msrb.mxu2 %v11287_v25  ;;  %v2256_v3 = vpop.f32.mrf.mxu0  ;;  %v2640_v49 = vpop.f32.mrf.mxu2  ;;  %4418 = vmatpush.msrb.mxu3 %v7896_v37  ;;  %v1873_v6 = vadd.f32 %v8179_v51, %v11290_v31 }
 0x329   : > { %11286 = vst [vmem:[#allocation33_spill] sm:$0xff] %v8279_v5  ;;  %4032 = vmatpush.msrb.mxu0 %v7916_v0  ;;  %v2257_v23 = vadd.f32 %v2256_v3, %v2086_v21  ;;  %3388 = vmatmul.f32.gmra.mxu3 %v8260_v36  ;;  %v2455_v55 = vpop.f32.mrf.mxu1  ;;  %v2854_v0 = vld [vmem:[%s10497_s5 + $0x30] sm:$0xff] }
 0x32a   : > { %4158 = vmatpush.msrb.mxu1 %v7885_v63  ;;  %11289 = vst [vmem:[#allocation9_spill] sm:$0xff] %v8291_v28  ;;  %4305 = vmatpush.msrb.mxu2 %v11291_v9  ;;  %v8311_v25 = vand.u32 4294901760, %v2854_v0  ;;  %v11295_v3 = vld [vmem:[#allocation116_spill] sm:$0xff] }
 0x32b   : > { %4420 = vmatpush.msrb.mxu3 %v7913_v41  ;;  %v2456_v4 = vadd.f32 %v2455_v55, %v2257_v23  ;;  %4035 = vmatpush.msrb.mxu0 %v7933_v27  ;;  %v2789_v63 = vpop.f32.mrf.mxu3  ;;  %11292 = vst [vmem:[#allocation7_spill] sm:$0xff] %v8304_v43  ;;  %v2090_v27 = vadd.f32 %v11295_v3, %v1873_v6  ;;  %v11297_v23 = vand.u32 4294901760, %v7993_v14 }
 0x32c   : > { %4160 = vmatpush.msrb.mxu1 %v7896_v37  ;;  %4309 = vmatpush.msrb.mxu2 %v11293_v42  ;;  %11294 = vst [vmem:[#allocation100_spill] sm:$0xff] %v8311_v25  ;;  %v2947_v55 = vsub.f32 %v8285_v45, %v8304_v43  ;;  %v8329_v9 = vsub.f32 %v2854_v0, %v8311_v25 }
 0x32d   : > { %4422 = vmatpush.msrb.mxu3 %v7930_v34  ;;  %v2641_v21 = vadd.f32 %v2640_v49, %v2456_v4  ;;  %2941 = vmatmul.f32.gmra.mxu0 %v8291_v28  ;;  %v11300_v4 = vld [vmem:[#allocation117_spill] sm:$0xff] }
 0x32e   : > { %3158 = vmatmul.f32.gmra.mxu1 %v8231_v33  ;;  %4038 = vmatpush.msrb.mxu0 %v7949_v22  ;;  %11299 = vst [vmem:[#allocation5_spill] sm:$0xff] %v8329_v9 }
 0x32f   : > { %4162 = vmatpush.msrb.mxu1 %v7913_v41  ;;  %v8316_v37 = vadd.f32 %v2789_v63, %v2641_v21  ;;  %4313 = vmatpush.msrb.mxu2 %v11297_v23  ;;  %v11298_v41 = vand.u32 4294901760, %v8010_v13  ;;  %v1881_v63 = vadd.f32 %v8179_v51, %v11300_v4  ;;  %v11302_v21 = vand.u32 4294901760, %v8024_v17  ;;  %v11305_v23 = vld [vmem:[#allocation118_spill] sm:$0xff] }
 0x330   : > { %4424 = vmatpush.msrb.mxu3 %v7946_v32  ;;  %v2261_v49 = vpop.f32.mrf.mxu0  ;;  %v2644_v31 = vpop.f32.mrf.mxu2  ;;  %3278 = vmatmul.f32.gmra.mxu2 %v8285_v45 }
 0x331   : > { %11296 = vst [vmem:[#allocation85_spill] sm:$0xff] %v8316_v37  ;;  %4041 = vmatpush.msrb.mxu0 %v7963_v40  ;;  %v2262_v6 = vadd.f32 %v2261_v49, %v2090_v27  ;;  %4164 = vmatpush.msrb.mxu1 %v7930_v34  ;;  %v2461_v22 = vpop.f32.mrf.mxu1  ;;  %v2856_v40 = vld [vmem:[%s10497_s5 + $0x40] sm:$0xff]  ;;  %v8340_v34 = vand.u32 4294901760, %v2947_v55  ;;  %v11306_v49 = vand.u32 4294901760, %v8035_v60 }
 0x332   : > { %4317 = vmatpush.msrb.mxu2 %v11298_v41  ;;  %4426 = vmatpush.msrb.mxu3 %v7954_v61  ;;  %v8350_v27 = vand.u32 4294901760, %v2856_v40 }
 0x333   : > { %4044 = vmatpush.msrb.mxu0 %v7979_v26  ;;  %v2462_v42 = vadd.f32 %v2461_v22, %v2262_v6  ;;  %3394 = vmatmul.f32.gmra.mxu3 %v8304_v43  ;;  %11301 = vst [vmem:[#allocation35_spill] sm:$0xff] %v8340_v34  ;;  %v2793_v0 = vpop.f32.mrf.mxu3  ;;  %v8348_v26 = vand.u32 4294901760, %v8329_v9  ;;  %v11308_v6 = vand.u32 4294901760, %v8049_v52 }
 0x334   : > { %4166 = vmatpush.msrb.mxu1 %v7946_v32  ;;  %4321 = vmatpush.msrb.mxu2 %v11302_v21  ;;  %11304 = vst [vmem:[#allocation4_spill] sm:$0xff] %v8350_v27  ;;  %v2094_v32 = vadd.f32 %v11305_v23, %v1881_v63  ;;  %v8368_v4 = vsub.f32 %v2856_v40, %v8350_v27  ;;  %v11310_v63 = vld [vmem:[#allocation119_spill] sm:$0xff] }
 0x335   : > { %4428 = vmatpush.msrb.mxu3 %v7971_v50  ;;  %v2645_v3 = vadd.f32 %v2644_v31, %v2462_v42  ;;  %4047 = vmatpush.msrb.mxu0 %v7993_v14  ;;  %11303 = vst [vmem:[#allocation45_spill] sm:$0xff] %v8348_v26  ;;  %v2955_v22 = vsub.f32 %v8329_v9, %v8348_v26 }
 0x336   : > { %4168 = vmatpush.msrb.mxu1 %v7954_v61  ;;  %4325 = vmatpush.msrb.mxu2 %v11306_v49  ;;  %11309 = vst [vmem:[#allocation37_spill] sm:$0xff] %v8368_v4  ;;  %v1889_v42 = vadd.f32 %v8179_v51, %v11310_v63  ;;  %v11316_v49 = vand.u32 4294901760, %v8072_v10  ;;  %v2860_v63 = vld [vmem:[%s10497_s5 + $0x60] sm:$0xff] }
 0x337   : > { %4430 = vmatpush.msrb.mxu3 %v7990_v35  ;;  %v8356_v55 = vadd.f32 %v2793_v0, %v2645_v3  ;;  %2949 = vmatmul.f32.gmra.mxu0 %v8340_v34  ;;  %v11311_v0 = vand.u32 4294901760, %v8059_v58  ;;  %v8387_v3 = vand.u32 4294901760, %v8368_v4 }
 0x338   : > { %3162 = vmatmul.f32.gmra.mxu1 %v8267_v16  ;;  %v2266_v14 = vpop.f32.mrf.mxu0  ;;  %v2648_v61 = vpop.f32.mrf.mxu2  ;;  %4050 = vmatpush.msrb.mxu0 %v8010_v13  ;;  %v2858_v13 = vld [vmem:[%s10497_s5 + $0x50] sm:$0xff] }
 0x339   : > { %11307 = vst [vmem:[#allocation36_spill] sm:$0xff] %v8356_v55  ;;  %4170 = vmatpush.msrb.mxu1 %v7971_v50  ;;  %v2267_v31 = vadd.f32 %v2266_v14, %v2094_v32  ;;  %4329 = vmatpush.msrb.mxu2 %v11308_v6  ;;  %v2467_v41 = vpop.f32.mrf.mxu1  ;;  %v8389_v23 = vand.u32 4294901760, %v2858_v13 }
 0x33a   : > { %4432 = vmatpush.msrb.mxu3 %v8007_v44  ;;  %3283 = vmatmul.f32.gmra.mxu2 %v8329_v9  ;;  %11313 = vst [vmem:[#allocation38_spill] sm:$0xff] %v8387_v3 }
 0x33b   : > { %4053 = vmatpush.msrb.mxu0 %v8024_v17  ;;  %v2468_v50 = vadd.f32 %v2467_v41, %v2267_v31  ;;  %4172 = vmatpush.msrb.mxu1 %v7990_v35  ;;  %v2797_v21 = vpop.f32.mrf.mxu3  ;;  %v8384_v17 = vand.u32 4294901760, %v2955_v22  ;;  %11314 = vst [vmem:[#allocation39_spill] sm:$0xff] %v8389_v23  ;;  %v11315_v35 = vld [vmem:[#allocation120_spill] sm:$0xff]  ;;  %v2963_v41 = vsub.f32 %v8368_v4, %v8387_v3 }
 0x33c   : > { %4333 = vmatpush.msrb.mxu2 %v11311_v0  ;;  %4434 = vmatpush.msrb.mxu3 %v8021_v46  ;;  %v2098_v32 = vadd.f32 %v11315_v35, %v1889_v42  ;;  %v11320_v42 = vand.u32 4294901760, %v8089_v57 }
 0x33d   : > { %4056 = vmatpush.msrb.mxu0 %v8035_v60  ;;  %v2649_v40 = vadd.f32 %v2648_v61, %v2468_v50  ;;  %3400 = vmatmul.f32.gmra.mxu3 %v8348_v26  ;;  %11312 = vst [vmem:[#allocation80_spill] sm:$0xff] %v8384_v17  ;;  %v11318_v61 = vand.u32 4294901760, %v8080_v20 }
 0x33e   : > { %4174 = vmatpush.msrb.mxu1 %v8007_v44  ;;  %4337 = vmatpush.msrb.mxu2 %v11316_v49 }
 0x33f   : > { %4436 = vmatpush.msrb.mxu3 %v8032_v12  ;;  %v8395_v60 = vadd.f32 %v2797_v21, %v2649_v40  ;;  %4059 = vmatpush.msrb.mxu0 %v8049_v52  ;;  %v8407_v52 = vsub.f32 %v2858_v13, %v8389_v23  ;;  %v8428_v13 = vand.u32 4294901760, %v2860_v63 }
 0x340   : > { %4176 = vmatpush.msrb.mxu1 %v8021_v46  ;;  %v2271_v44 = vpop.f32.mrf.mxu0  ;;  %v2652_v14 = vpop.f32.mrf.mxu2  ;;  %4341 = vmatpush.msrb.mxu2 %v11318_v61  ;;  %v1897_v46 = vadd.f32 %v8179_v51, %v7725_v18 }
 0x341   : > { %11317 = vst [vmem:[#allocation40_spill] sm:$0xff] %v8395_v60  ;;  %4438 = vmatpush.msrb.mxu3 %v8045_v56  ;;  %v2272_v31 = vadd.f32 %v2271_v44, %v2098_v32  ;;  %2957 = vmatmul.f32.gmra.mxu0 %v8384_v17  ;;  %v2473_v6 = vpop.f32.mrf.mxu1  ;;  %v8442_v32 = vsub.f32 %v2860_v63, %v8428_v13  ;;  %v8720_v60 = vand.u32 4294901760, %v8222_v19 }
 0x342   : > { %3166 = vmatmul.f32.gmra.mxu1 %v8311_v25  ;;  %11319 = vst [vmem:[#allocation46_spill] sm:$0xff] %v8407_v52  ;;  %4062 = vmatpush.msrb.mxu0 %v8059_v58  ;;  %v8426_v58 = vand.u32 4294901760, %v8407_v52  ;;  %v2102_v0 = vadd.f32 %v7730_v2, %v1897_v46 }
 0x343   : > { %4178 = vmatpush.msrb.mxu1 %v8032_v12  ;;  %v2474_v22 = vadd.f32 %v2473_v6, %v2272_v31  ;;  %4345 = vmatpush.msrb.mxu2 %v11320_v42  ;;  %v2801_v50 = vpop.f32.mrf.mxu3  ;;  %v8423_v12 = vand.u32 4294901760, %v2963_v41  ;;  %11323 = vst [vmem:[#allocation43_spill] sm:$0xff] %v8428_v13 }
 0x344   : > { %4440 = vmatpush.msrb.mxu3 %v8056_v30  ;;  %3288 = vmatmul.f32.gmra.mxu2 %v8368_v4  ;;  %11322 = vst [vmem:[#allocation42_spill] sm:$0xff] %v8426_v58  ;;  %v2971_v2 = vsub.f32 %v8407_v52, %v8426_v58 }
 0x345   : > { %4065 = vmatpush.msrb.mxu0 %v8072_v10  ;;  %v2653_v18 = vadd.f32 %v2652_v14, %v2474_v22  ;;  %4180 = vmatpush.msrb.mxu1 %v8045_v56  ;;  %11321 = vst [vmem:[#allocation41_spill] sm:$0xff] %v8423_v12  ;;  %v8454_v14 = vand.u32 4294901760, %v8442_v32 }
 0x346   : > { %4442 = vmatpush.msrb.mxu3 %v8069_v7  ;;  %11325 = vst [vmem:[#allocation44_spill] sm:$0xff] %v8442_v32  ;;  %v8451_v44 = vand.u32 4294901760, %v2971_v2 }
 0x347   : > { %3406 = vmatmul.f32.gmra.mxu3 %v8387_v3  ;;  %4068 = vmatpush.msrb.mxu0 %v8080_v20  ;;  %v8433_v21 = vadd.f32 %v2801_v50, %v2653_v18  ;;  %v1905_v20 = vadd.f32 %v8179_v51, %v7746_v53  ;;  %11327 = vst [vmem:[#allocation48_spill] sm:$0xff] %v8454_v14  ;;  %v2864_v18 = vld [vmem:[%s10497_s5 + $0x80] sm:$0xff] }
 0x348   : > { %4182 = vmatpush.msrb.mxu1 %v8056_v30  ;;  %v2276_v56 = vpop.f32.mrf.mxu0  ;;  %v2656_v10 = vpop.f32.mrf.mxu2  ;;  %11326 = vst [vmem:[#allocation47_spill] sm:$0xff] %v8451_v44  ;;  %v2979_v63 = vsub.f32 %v8442_v32, %v8454_v14  ;;  %v1913_v50 = vadd.f32 %v8179_v51, %v7770_v47 }
 0x349   : > { %11324 = vst [vmem:[#allocation50_spill] sm:$0xff] %v8433_v21  ;;  %4071 = vmatpush.msrb.mxu0 %v8089_v57  ;;  %v2277_v40 = vadd.f32 %v2276_v56, %v2102_v0  ;;  %v2479_v35 = vpop.f32.mrf.mxu1  ;;  %v2862_v57 = vld [vmem:[%s10497_s5 + $0x70] sm:$0xff]  ;;  %v2106_v53 = vadd.f32 %v7751_v1, %v1905_v20 }
 0x34a   : > { %4184 = vmatpush.msrb.mxu1 %v8069_v7  ;;  %2965 = vmatmul.f32.gmra.mxu0 %v8423_v12  ;;  %v8456_v61 = vand.u32 4294901760, %v2862_v57  ;;  %v2110_v47 = vadd.f32 %v7775_v48, %v1913_v50  ;;  %11378 = vst [vmem:[#allocation98_spill] sm:$0xff] %v8720_v60 }
 0x34b   : > { %3170 = vmatmul.f32.gmra.mxu1 %v8350_v27  ;;  %v2480_v30 = vadd.f32 %v2479_v35, %v2277_v40  ;;  %v2805_v7 = vpop.f32.mrf.mxu3  ;;  %v8480_v35 = vand.u32 4294901760, %v2864_v18 }
 0x34c   : > { %3293 = vmatmul.f32.gmra.mxu2 %v8407_v52  ;;  %11328 = vst [vmem:[#allocation51_spill] sm:$0xff] %v8456_v61  ;;  %v8466_v42 = vsub.f32 %v2862_v57, %v8456_v61 }
 0x34d   : > { %v2657_v49 = vadd.f32 %v2656_v10, %v2480_v30  ;;  %v8475_v10 = vand.u32 4294901760, %v2979_v63  ;;  %11333 = vst [vmem:[#allocation54_spill] sm:$0xff] %v8480_v35 }
 0x34e   : > { %11330 = vst [vmem:[#allocation52_spill] sm:$0xff] %v8466_v42  ;;  %v8478_v40 = vand.u32 4294901760, %v8466_v42 }
 0x34f   : > { %3412 = vmatmul.f32.gmra.mxu3 %v8426_v58  ;;  %v8460_v31 = vadd.f32 %v2805_v7, %v2657_v49  ;;  %11331 = vst [vmem:[#allocation53_spill] sm:$0xff] %v8475_v10 }
 0x350   : > { %v2281_v6 = vpop.f32.mrf.mxu0  ;;  %v2660_v41 = vpop.f32.mrf.mxu2  ;;  %11332 = vst [vmem:[#allocation55_spill] sm:$0xff] %v8478_v40  ;;  %v2987_v49 = vsub.f32 %v8466_v42, %v8478_v40 }
 0x351   : > { %11329 = vst [vmem:[#allocation49_spill] sm:$0xff] %v8460_v31  ;;  %v2282_v46 = vadd.f32 %v2281_v6, %v2106_v53  ;;  %v2485_v22 = vpop.f32.mrf.mxu1  ;;  %v8490_v53 = vsub.f32 %v2864_v18, %v8480_v35  ;;  %v1921_v6 = vadd.f32 %v8179_v51, %v7794_v29 }
 0x352   : > { %2973 = vmatmul.f32.gmra.mxu0 %v8451_v44  ;;  %v8499_v63 = vand.u32 4294901760, %v2987_v49 }
 0x353   : > { %3174 = vmatmul.f32.gmra.mxu1 %v8389_v23  ;;  %v2486_v1 = vadd.f32 %v2485_v22, %v2282_v46  ;;  %v2809_v0 = vpop.f32.mrf.mxu3  ;;  %11335 = vst [vmem:[#allocation58_spill] sm:$0xff] %v8490_v53  ;;  %v8502_v50 = vand.u32 4294901760, %v8490_v53  ;;  %v2114_v29 = vadd.f32 %v7799_v59, %v1921_v6  ;;  %v2868_v59 = vld [vmem:[%s10497_s5 + $0xa0] sm:$0xff] }
 0x354   : > { %3298 = vmatmul.f32.gmra.mxu2 %v8442_v32  ;;  %11336 = vst [vmem:[#allocation56_spill] sm:$0xff] %v8499_v63 }
 0x355   : > { %v2661_v56 = vadd.f32 %v2660_v41, %v2486_v1  ;;  %v2866_v41 = vld [vmem:[%s10497_s5 + $0x90] sm:$0xff]  ;;  %11337 = vst [vmem:[#allocation59_spill] sm:$0xff] %v8502_v50 }
 0x356   : > { %v8504_v1 = vand.u32 4294901760, %v2866_v41 }
 0x357   : > { %3418 = vmatmul.f32.gmra.mxu3 %v8454_v14  ;;  %v8484_v2 = vadd.f32 %v2809_v0, %v2661_v56 }
 0x358   : > { %v2286_v20 = vpop.f32.mrf.mxu0  ;;  %v2664_v30 = vpop.f32.mrf.mxu2  ;;  %11338 = vst [vmem:[#allocation61_spill] sm:$0xff] %v8504_v1 }
 0x359   : > { %11334 = vst [vmem:[#allocation57_spill] sm:$0xff] %v8484_v2  ;;  %v2287_v57 = vadd.f32 %v2286_v20, %v2110_v47  ;;  %v2491_v7 = vpop.f32.mrf.mxu1  ;;  %v2995_v20 = vsub.f32 %v8490_v53, %v8502_v50 }
 0x35a   : > { %2981 = vmatmul.f32.gmra.mxu0 %v8475_v10 }
 0x35b   : > { %3178 = vmatmul.f32.gmra.mxu1 %v8428_v13  ;;  %v2492_v48 = vadd.f32 %v2491_v7, %v2287_v57  ;;  %v2813_v46 = vpop.f32.mrf.mxu3  ;;  %v8521_v6 = vand.u32 4294901760, %v2995_v20 }
 0x35c   : > { %3303 = vmatmul.f32.gmra.mxu2 %v8466_v42 }
 0x35d   : > { %v2665_v22 = vadd.f32 %v2664_v30, %v2492_v48  ;;  %v8514_v30 = vsub.f32 %v2866_v41, %v8504_v1  ;;  %11341 = vst [vmem:[#allocation63_spill] sm:$0xff] %v8521_v6 }
 0x35f   : > { %3424 = vmatmul.f32.gmra.mxu3 %v8478_v40  ;;  %v8508_v51 = vadd.f32 %v2813_v46, %v2665_v22  ;;  %11340 = vst [vmem:[#allocation60_spill] sm:$0xff] %v8514_v30  ;;  %v8524_v48 = vand.u32 4294901760, %v8514_v30  ;;  %v8526_v46 = vand.u32 4294901760, %v2868_v59 }
 0x360   : > { %v2291_v18 = vpop.f32.mrf.mxu0  ;;  %v2668_v0 = vpop.f32.mrf.mxu2 }
 0x361   : > { %11339 = vst [vmem:[#allocation62_spill] sm:$0xff] %v8508_v51  ;;  %v2292_v56 = vadd.f32 %v2291_v18, %v2114_v29  ;;  %v2497_v47 = vpop.f32.mrf.mxu1  ;;  %v8735_v51 = vand.u32 4294901760, %v8208_v39 }
 0x362   : > { %2989 = vmatmul.f32.gmra.mxu0 %v8499_v63  ;;  %11342 = vst [vmem:[#allocation64_spill] sm:$0xff] %v8524_v48 }
 0x363   : > { %3182 = vmatmul.f32.gmra.mxu1 %v8456_v61  ;;  %v2498_v57 = vadd.f32 %v2497_v47, %v2292_v56  ;;  %v2817_v7 = vpop.f32.mrf.mxu3  ;;  %11343 = vst [vmem:[#allocation65_spill] sm:$0xff] %v8526_v46  ;;  %v8541_v56 = vsub.f32 %v2868_v59, %v8526_v46  ;;  %v2870_v47 = vld [vmem:[%s10497_s5 + $0xb0] sm:$0xff] }
 0x364   : > { %3308 = vmatmul.f32.gmra.mxu2 %v8490_v53  ;;  %11382 = vst [vmem:[#allocation114_spill] sm:$0xff] %v8735_v51 }
 0x365   : > { %v2669_v49 = vadd.f32 %v2668_v0, %v2498_v57  ;;  %v3003_v0 = vsub.f32 %v8514_v30, %v8524_v48  ;;  %11346 = vst [vmem:[#allocation67_spill] sm:$0xff] %v8541_v56 }
 0x367   : > { %3430 = vmatmul.f32.gmra.mxu3 %v8502_v50  ;;  %v8529_v41 = vadd.f32 %v2817_v7, %v2669_v49  ;;  %v8550_v57 = vand.u32 4294901760, %v3003_v0  ;;  %v8553_v7 = vand.u32 4294901760, %v8541_v56  ;;  %v8555_v49 = vand.u32 4294901760, %v2870_v47 }
 0x368   : > { %v8531_v22 = vpop.f32.mrf.mxu0  ;;  %v8533_v29 = vpop.f32.mrf.mxu2 }
 0x369   : > { %11344 = vst [vmem:[#allocation70_spill] sm:$0xff] %v8529_v41  ;;  %v8536_v18 = vpop.f32.mrf.mxu1  ;;  %v8568_v0 = vsub.f32 %v2870_v47, %v8555_v49 }
 0x36a   : > { %11345 = vst [vmem:[#allocation66_spill] sm:$0xff] %v8533_v29  ;;  %2997 = vmatmul.f32.gmra.mxu0 %v8521_v6 }
 0x36b   : > { %3186 = vmatmul.f32.gmra.mxu1 %v8480_v35  ;;  %v8547_v20 = vpop.f32.mrf.mxu3  ;;  %11348 = vst [vmem:[#allocation71_spill] sm:$0xff] %v8550_v57 }
 0x36c   : > { %11347 = vst [vmem:[#allocation68_spill] sm:$0xff] %v8547_v20  ;;  %3313 = vmatmul.f32.gmra.mxu2 %v8514_v30  ;;  %v3011_v30 = vsub.f32 %v8541_v56, %v8553_v7 }
 0x36d   : > { %11349 = vst [vmem:[#allocation69_spill] sm:$0xff] %v8553_v7 }
 0x36e   : > { %11350 = vst [vmem:[#allocation72_spill] sm:$0xff] %v8555_v49  ;;  %v8577_v40 = vand.u32 4294901760, %v3011_v30 }
 0x36f   : > { %3436 = vmatmul.f32.gmra.mxu3 %v8524_v48  ;;  %11351 = vst [vmem:[#allocation73_spill] sm:$0xff] %v8568_v0  ;;  %v2872_v48 = vld [vmem:[%s10497_s5 + $0xc0] sm:$0xff] }
 0x370   : > { %v8558_v59 = vpop.f32.mrf.mxu0  ;;  %v8560_v50 = vpop.f32.mrf.mxu2  ;;  %11353 = vst [vmem:[#allocation74_spill] sm:$0xff] %v8577_v40  ;;  %v8582_v63 = vand.u32 4294901760, %v2872_v48 }
 0x371   : > { %v8563_v6 = vpop.f32.mrf.mxu1 }
 0x372   : > { %3005 = vmatmul.f32.gmra.mxu0 %v8550_v57  ;;  %v8580_v57 = vand.u32 4294901760, %v8568_v0  ;;  %11355 = vst [vmem:[#allocation78_spill] sm:$0xff] %v8582_v63  ;;  %v8595_v30 = vsub.f32 %v2872_v48, %v8582_v63 }
 0x373   : > { %3190 = vmatmul.f32.gmra.mxu1 %v8504_v1  ;;  %v8574_v53 = vpop.f32.mrf.mxu3 }
 0x374   : > { %11352 = vst [vmem:[#allocation75_spill] sm:$0xff] %v8574_v53  ;;  %3318 = vmatmul.f32.gmra.mxu2 %v8541_v56  ;;  %v3019_v56 = vsub.f32 %v8568_v0, %v8580_v57 }
 0x375   : > { %11354 = vst [vmem:[#allocation77_spill] sm:$0xff] %v8580_v57 }
 0x376   : > { %11356 = vst [vmem:[#allocation76_spill] sm:$0xff] %v8595_v30  ;;  %v8604_v32 = vand.u32 4294901760, %v3019_v56 }
 0x377   : > { %3442 = vmatmul.f32.gmra.mxu3 %v8553_v7  ;;  %v2874_v7 = vld [vmem:[%s10497_s5 + $0xd0] sm:$0xff] }
 0x378   : > { %v8585_v47 = vpop.f32.mrf.mxu0  ;;  %v8587_v42 = vpop.f32.mrf.mxu2  ;;  %11358 = vst [vmem:[#allocation79_spill] sm:$0xff] %v8604_v32  ;;  %v8609_v58 = vand.u32 4294901760, %v2874_v7 }
 0x379   : > { %v8590_v14 = vpop.f32.mrf.mxu1 }
 0x37a   : > { %3013 = vmatmul.f32.gmra.mxu0 %v8577_v40  ;;  %v8607_v40 = vand.u32 4294901760, %v8595_v30  ;;  %11360 = vst [vmem:[#allocation83_spill] sm:$0xff] %v8609_v58  ;;  %v8622_v56 = vsub.f32 %v2874_v7, %v8609_v58 }
 0x37b   : > { %3194 = vmatmul.f32.gmra.mxu1 %v8526_v46  ;;  %v8601_v10 = vpop.f32.mrf.mxu3 }
 0x37c   : > { %11357 = vst [vmem:[#allocation81_spill] sm:$0xff] %v8601_v10  ;;  %3323 = vmatmul.f32.gmra.mxu2 %v8568_v0  ;;  %v3027_v0 = vsub.f32 %v8595_v30, %v8607_v40 }
 0x37d   : > { %11359 = vst [vmem:[#allocation82_spill] sm:$0xff] %v8607_v40 }
 0x37e   : > { %11361 = vst [vmem:[#allocation86_spill] sm:$0xff] %v8622_v56  ;;  %v8631_v12 = vand.u32 4294901760, %v3027_v0 }
 0x37f   : > { %3448 = vmatmul.f32.gmra.mxu3 %v8580_v57  ;;  %v2876_v57 = vld [vmem:[%s10497_s5 + $0xe0] sm:$0xff] }
 0x380   : > { %v8612_v48 = vpop.f32.mrf.mxu0  ;;  %v8614_v44 = vpop.f32.mrf.mxu2  ;;  %11363 = vst [vmem:[#allocation84_spill] sm:$0xff] %v8631_v12  ;;  %v8636_v4 = vand.u32 4294901760, %v2876_v57 }
 0x381   : > { %v8617_v52 = vpop.f32.mrf.mxu1 }
 0x382   : > { %3021 = vmatmul.f32.gmra.mxu0 %v8604_v32  ;;  %v8634_v32 = vand.u32 4294901760, %v8622_v56  ;;  %11365 = vst [vmem:[#allocation88_spill] sm:$0xff] %v8636_v4  ;;  %v8649_v0 = vsub.f32 %v2876_v57, %v8636_v4  ;;  %v2849_v57 = vld [vmem:[%s10497_s5 + $0x8] sm:$0xff] }
 0x383   : > { %3198 = vmatmul.f32.gmra.mxu1 %v8555_v49  ;;  %v8628_v3 = vpop.f32.mrf.mxu3  ;;  %v8673_v28 = vand.u32 4294901760, %v2849_v57 }
 0x384   : > { %11362 = vst [vmem:[#allocation91_spill] sm:$0xff] %v8628_v3  ;;  %3328 = vmatmul.f32.gmra.mxu2 %v8595_v30  ;;  %v3035_v30 = vsub.f32 %v8622_v56, %v8634_v32 }
 0x385   : > { %11364 = vst [vmem:[#allocation87_spill] sm:$0xff] %v8634_v32 }
 0x386   : > { %11366 = vst [vmem:[#allocation108_spill] sm:$0xff] %v8649_v0  ;;  %v8658_v43 = vand.u32 4294901760, %v3035_v30 }
 0x387   : > { %3454 = vmatmul.f32.gmra.mxu3 %v8607_v40  ;;  %v2878_v40 = vld [vmem:[%s10497_s5 + $0xf0] sm:$0xff]  ;;  %11370 = vst [vmem:[#allocation93_spill] sm:$0xff] %v8673_v28 }
 0x388   : > { %v8639_v7 = vpop.f32.mrf.mxu0  ;;  %v8641_v26 = vpop.f32.mrf.mxu2  ;;  %11367 = vst [vmem:[#allocation109_spill] sm:$0xff] %v8658_v43  ;;  %v8663_v34 = vand.u32 4294901760, %v2878_v40 }
 0x389   : > { %v8644_v17 = vpop.f32.mrf.mxu1 }
 0x38a   : > { %3029 = vmatmul.f32.gmra.mxu0 %v8631_v12  ;;  %v8661_v12 = vand.u32 4294901760, %v8649_v0  ;;  %11369 = vst [vmem:[#allocation92_spill] sm:$0xff] %v8663_v34  ;;  %v8681_v62 = vsub.f32 %v2878_v40, %v8663_v34  ;;  %v2851_v40 = vld [vmem:[%s10497_s5 + $0x18] sm:$0xff] }
 0x38b   : > { %3202 = vmatmul.f32.gmra.mxu1 %v8582_v63  ;;  %v8655_v9 = vpop.f32.mrf.mxu3  ;;  %v8714_v37 = vand.u32 4294901760, %v2851_v40 }
 0x38c   : > { %3333 = vmatmul.f32.gmra.mxu2 %v8622_v56  ;;  %11368 = vst [vmem:[#allocation89_spill] sm:$0xff] %v8661_v12  ;;  %v3043_v56 = vsub.f32 %v8649_v0, %v8661_v12 }
 0x38d   : > { %11371 = vst [vmem:[#allocation110_spill] sm:$0xff] %v8681_v62  ;;  %v8732_v2 = vsub.f32 %v2851_v40, %v8714_v37  ;;  %v2853_v40 = vld [vmem:[%s10497_s5 + $0x28] sm:$0xff] }
 0x38e   : > { %v8690_v54 = vand.u32 4294901760, %v3043_v56  ;;  %11377 = vst [vmem:[#allocation111_spill] sm:$0xff] %v8714_v37  ;;  %v8771_v53 = vand.u32 4294901760, %v2853_v40 }
 0x38f   : > { %3460 = vmatmul.f32.gmra.mxu3 %v8634_v32  ;;  %v8688_v32 = vsub.f32 %v2849_v57, %v8673_v28  ;;  %v8707_v57 = vand.u32 4294901760, %v8246_v38  ;;  %11381 = vst [vmem:[#allocation113_spill] sm:$0xff] %v8732_v2 }
 0x390   : > { %v8669_v45 = vpop.f32.mrf.mxu0  ;;  %v8671_v36 = vpop.f32.mrf.mxu2  ;;  %11373 = vst [vmem:[#allocation94_spill] sm:$0xff] %v8690_v54 }
 0x391   : > { %v8676_v30 = vpop.f32.mrf.mxu1  ;;  %11372 = vst [vmem:[#allocation95_spill] sm:$0xff] %v8688_v32 }
 0x392   : > { %3037 = vmatmul.f32.gmra.mxu0 %v8658_v43  ;;  %v8693_v43 = vand.u32 4294901760, %v8681_v62  ;;  %11376 = vst [vmem:[#allocation90_spill] sm:$0xff] %v8707_v57 }
 0x393   : > { %3206 = vmatmul.f32.gmra.mxu1 %v8609_v58  ;;  %v8684_v11 = vpop.f32.mrf.mxu3  ;;  %11393 = vst [vmem:[#allocation123_spill] sm:$0xff] %v8771_v53 }
 0x394   : > { %3338 = vmatmul.f32.gmra.mxu2 %v8649_v0  ;;  %11374 = vst [vmem:[#allocation96_spill] sm:$0xff] %v8693_v43  ;;  %v8704_v0 = vand.u32 4294901760, %v8688_v32 }
 0x396   : > { %11375 = vst [vmem:[#allocation97_spill] sm:$0xff] %v8704_v0  ;;  %v3737_v21 = vsub.f32 %v8688_v32, %v8704_v0  ;;  %v8745_v0 = vsub.f32 %v8222_v19, %v8720_v60  ;;  %v8763_v19 = vsub.f32 %v8208_v39, %v8735_v51 }
 0x397   : > { %3466 = vmatmul.f32.gmra.mxu3 %v8661_v12  ;;  %v3051_v12 = vsub.f32 %v8681_v62, %v8693_v43 }
 0x398   : > { %v8699_v8 = vpop.f32.mrf.mxu0  ;;  %v8701_v5 = vpop.f32.mrf.mxu2  ;;  %11384 = vst [vmem:[#allocation116_spill] sm:$0xff] %v8745_v0 }
 0x399   : > { %v8710_v56 = vpop.f32.mrf.mxu1  ;;  %v8729_v31 = vand.u32 4294901760, %v3051_v12  ;;  %11389 = vst [vmem:[#allocation121_spill] sm:$0xff] %v8763_v19 }
 0x39a   : > { %3045 = vmatmul.f32.gmra.mxu0 %v8690_v54  ;;  %v8727_v54 = vsub.f32 %v8246_v38, %v8707_v57  ;;  %v8747_v38 = vand.u32 4294901760, %v3737_v21  ;;  %v11390_v21 = vld [vmem:[#allocation102_spill] sm:$0xff] }
 0x39b   : > { %3210 = vmatmul.f32.gmra.mxu1 %v8636_v4  ;;  %v8717_v55 = vpop.f32.mrf.mxu3  ;;  %11380 = vst [vmem:[#allocation112_spill] sm:$0xff] %v8729_v31 }
 0x39c   : > { %3343 = vmatmul.f32.gmra.mxu2 %v8681_v62  ;;  %11379 = vst [vmem:[#allocation99_spill] sm:$0xff] %v8727_v54  ;;  %v8741_v62 = vand.u32 4294901760, %v8196_v24  ;;  %v11395_v39 = vand.u32 4294901760, %v8727_v54 }
 0x39d   : > { %11385 = vst [vmem:[#allocation117_spill] sm:$0xff] %v8747_v38 }
 0x39e   : > { %v8775_v32 = vsub.f32 %v8196_v24, %v8741_v62 }
 0x39f   : > { %3472 = vmatmul.f32.gmra.mxu3 %v8693_v43 }
 0x3a0   : > { %v8738_v41 = vpop.f32.mrf.mxu2  ;;  %v8749_v12 = vpop.f32.mrf.mxu0  ;;  %11394 = vst [vmem:[#allocation124_spill] sm:$0xff] %v8775_v32 }
 0x3a1   : > { %11383 = vst [vmem:[#allocation115_spill] sm:$0xff] %v8738_v41  ;;  %v8756_v43 = vpop.f32.mrf.mxu1  ;;  %v8759_v41 = vand.u32 4294901760, %v8732_v2 }
 0x3a2   : > { %11386 = vst [vmem:[#allocation118_spill] sm:$0xff] %v8749_v12  ;;  %3053 = vmatmul.f32.gmra.mxu0 %v8729_v31  ;;  %v8767_v12 = vand.u32 4294901760, %v11390_v21  ;;  %v11400_v31 = vld [vmem:[#allocation101_spill] sm:$0xff] }
 0x3a3   : > { %11387 = vst [vmem:[#allocation119_spill] sm:$0xff] %v8756_v43  ;;  %3214 = vmatmul.f32.gmra.mxu1 %v8663_v34  ;;  %v8769_v20 = vpop.f32.mrf.mxu3  ;;  %v4721_v43 = vsub.f32 %v8727_v54, %v11395_v39  ;;  %v3745_v34 = vsub.f32 %v8732_v2, %v8759_v41  ;;  %v8797_v39 = vsub.f32 %v2853_v40, %v8771_v53  ;;  %v11402_v2 = vand.u32 4294901760, %v8745_v0  ;;  %v11405_v40 = vld [vmem:[#allocation106_spill] sm:$0xff] }
 0x3a4   : > { %11388 = vst [vmem:[#allocation120_spill] sm:$0xff] %v8759_v41  ;;  %3739 = vmatmul.f32.vlgmr.msra.gmra.mxu2 %v8747_v38  ;;  %v8792_v38 = vsub.f32 %v11390_v21, %v8767_v12  ;;  %v8800_v41 = vand.u32 4294901760, %v11400_v31  ;;  %v8813_v4 = vand.u32 4294901760, %v11405_v40 }
 0x3a5   : > { %11391 = vst [vmem:[#allocation102_spill] sm:$0xff] %v8767_v12  ;;  %4881 = vmatpush.msra.mxu2 %v8727_v54  ;;  %v4727_v54 = vsub.f32 %v8745_v0, %v11402_v2  ;;  %v4722_v21 = vand.u32 4294901760, %v4721_v43  ;;  %v11408_v2 = vand.u32 4294901760, %v8763_v19 }
 0x3a6   : > { %11392 = vst [vmem:[#allocation122_spill] sm:$0xff] %v8769_v20  ;;  %v11396_v20 = vld [vmem:[#allocation2_spill] sm:$0xff] }
 0x3a7   : > { %v8786_v29 = vand.u32 4294901760, %v11396_v20  ;;  %3960 = vmatmul.f32.vlgmr.msra.gmra.mxu3 %v8673_v28  ;;  %11398 = vst [vmem:[#allocation125_spill] sm:$0xff] %v8792_v38  ;;  %4884 = vmatpush.msra.mxu2 %v8745_v0  ;;  %v8808_v28 = vand.u32 4294901760, %v3745_v34  ;;  %v4733_v24 = vsub.f32 %v8763_v19, %v11408_v2  ;;  %v8834_v0 = vand.u32 4294901760, %v8797_v39 }
 0x3a8   : > { %5009 = vmatpush.msra.mxu3 %v8707_v57  ;;  %11399 = vst [vmem:[#allocation126_spill] sm:$0xff] %v8797_v39  ;;  %v4728_v2 = vand.u32 4294901760, %v4727_v54 }
 0x3a9   : > { %11397 = vst [vmem:[#allocation2_spill] sm:$0xff] %v8786_v29  ;;  %4887 = vmatpush.msra.mxu2 %v8763_v19  ;;  %v8810_v10 = vpop.f32.mrf.mxu2  ;;  %v8817_v3 = vsub.f32 %v11396_v20, %v8786_v29  ;;  %v4734_v54 = vand.u32 4294901760, %v4733_v24 }
 0x3aa   : > { %11401 = vst [vmem:[#allocation101_spill] sm:$0xff] %v8800_v41  ;;  %5011 = vmatpush.msra.mxu3 %v8720_v60  ;;  %3541 = vmatmul.f32.vlgmr.msra.gmra.mxu0 %v8210_v15  ;;  %v8824_v43 = vpop.f32.mrf.mxu0 }
 0x3ab   : > { %11403 = vst [vmem:[#allocation127_spill] sm:$0xff] %v8808_v28  ;;  %3638 = vmatmul.f32.vlgmr.msra.gmra.mxu1 %v8210_v15  ;;  %v8826_v34 = vpop.f32.mrf.mxu1  ;;  %4558 = vmatpush.msra.mxu0 %v8707_v57  ;;  %v8838_v15 = vsub.f32 %v11400_v31, %v8800_v41  ;;  %v8856_v57 = vsub.f32 %v11405_v40, %v8813_v4 }
 0x3ac   : > { %11404 = vst [vmem:[#allocation128_spill] sm:$0xff] %v8810_v10  ;;  %v2855_v10 = vld [vmem:[%s10497_s5 + $0x38] sm:$0xff]  ;;  %4723 = vmatpush.msra.mxu1 %v4722_v21  ;;  %4890 = vmatpush.msra.mxu2 %v8775_v32  ;;  %v8845_v19 = vpop.f32.mrf.mxu3  ;;  %v11415_v21 = vld [vmem:[#allocation31_spill] sm:$0xff] }
 0x3ad   : > { %11406 = vst [vmem:[#allocation106_spill] sm:$0xff] %v8813_v4  ;;  %5013 = vmatpush.msra.mxu3 %v8735_v51  ;;  %v8848_v20 = vand.u32 4294901760, %v11415_v21  ;;  %3747 = vmatmul.f32.gmra.mxu2 %v8808_v28  ;;  %v8852_v31 = vand.u32 4294901760, %v2855_v10  ;;  %v11419_v28 = vand.u32 4294901760, %v8792_v38 }
 0x3ae   : > { %11407 = vst [vmem:[#allocation129_spill] sm:$0xff] %v8817_v3  ;;  %4560 = vmatpush.msra.mxu0 %v8720_v60  ;;  %4729 = vmatpush.msra.mxu1 %v4728_v2  ;;  %v11420_v60 = vld [vmem:[#allocation30_spill] sm:$0xff] }
 0x3af   : > { %11409 = vst [vmem:[#allocation130_spill] sm:$0xff] %v8824_v43  ;;  %4893 = vmatpush.msra.mxu2 %v8792_v38  ;;  %5015 = vmatpush.msra.mxu3 %v8741_v62  ;;  %v8868_v40 = vand.u32 4294901760, %v11420_v60 }
 0x3b0   : > { %11410 = vst [vmem:[#allocation131_spill] sm:$0xff] %v8826_v34  ;;  %v11413_v34 = vand.u32 4294901760, %v8775_v32  ;;  %4562 = vmatpush.msra.mxu0 %v8735_v51  ;;  %3964 = vmatmul.f32.gmra.mxu3 %v8714_v37  ;;  %v11428_v51 = vld [vmem:[#allocation28_spill] sm:$0xff] }
 0x3b1   : > { %11411 = vst [vmem:[#allocation132_spill] sm:$0xff] %v8834_v0  ;;  %4735 = vmatpush.msra.mxu1 %v4734_v54  ;;  %4896 = vmatpush.msra.mxu2 %v8817_v3  ;;  %v8896_v37 = vand.u32 4294901760, %v11428_v51 }
 0x3b2   : > { %11412 = vst [vmem:[#allocation133_spill] sm:$0xff] %v8838_v15  ;;  %v4739_v43 = vsub.f32 %v8775_v32, %v11413_v34  ;;  %v3753_v32 = vsub.f32 %v8797_v39, %v8834_v0  ;;  %v8874_v34 = vsub.f32 %v11415_v21, %v8848_v20  ;;  %5017 = vmatpush.msra.mxu3 %v8767_v12  ;;  %v11423_v0 = vld [vmem:[#allocation29_spill] sm:$0xff] }
 0x3b3   : > { %11414 = vst [vmem:[#allocation134_spill] sm:$0xff] %v8845_v19  ;;  %v4745_v19 = vsub.f32 %v8792_v38, %v11419_v28  ;;  %v8879_v28 = vsub.f32 %v2855_v10, %v8852_v31  ;;  %v8882_v39 = vand.u32 4294901760, %v11423_v0  ;;  %4564 = vmatpush.msra.mxu0 %v8741_v62  ;;  %4899 = vmatpush.msra.mxu2 %v8838_v15  ;;  %v8893_v10 = vpop.f32.mrf.mxu2 }
 0x3b4   : > { %11416 = vst [vmem:[#allocation31_spill] sm:$0xff] %v8848_v20  ;;  %v4740_v24 = vand.u32 4294901760, %v4739_v43  ;;  %v11425_v43 = vand.u32 4294901760, %v8817_v3  ;;  %5019 = vmatpush.msra.mxu3 %v8786_v29  ;;  %v8891_v38 = vand.u32 4294901760, %v3753_v32  ;;  %3545 = vmatmul.f32.gmra.mxu0 %v8231_v33 }
 0x3b5   : > { %11417 = vst [vmem:[#allocation135_spill] sm:$0xff] %v8852_v31  ;;  %v4746_v2 = vand.u32 4294901760, %v4745_v19  ;;  %3642 = vmatmul.f32.gmra.mxu1 %v8231_v33  ;;  %v8907_v19 = vpop.f32.mrf.mxu0  ;;  %v8909_v32 = vpop.f32.mrf.mxu1  ;;  %4566 = vmatpush.msra.mxu0 %v8767_v12  ;;  %v8921_v33 = vsub.f32 %v11423_v0, %v8882_v39  ;;  %v8939_v12 = vsub.f32 %v11428_v51, %v8896_v37 }
 0x3b6   : > { %11418 = vst [vmem:[#allocation136_spill] sm:$0xff] %v8856_v57  ;;  %4741 = vmatpush.msra.mxu1 %v4740_v24  ;;  %v4751_v54 = vsub.f32 %v8817_v3, %v11425_v43  ;;  %v8900_v24 = vsub.f32 %v11420_v60, %v8868_v40  ;;  %v11431_v43 = vand.u32 4294901760, %v8838_v15  ;;  %v8917_v3 = vand.u32 4294901760, %v8879_v28  ;;  %4902 = vmatpush.msra.mxu2 %v8856_v57 }
 0x3b7   : > { %11421 = vst [vmem:[#allocation30_spill] sm:$0xff] %v8874_v34  ;;  %5021 = vmatpush.msra.mxu3 %v8800_v41  ;;  %3755 = vmatmul.f32.gmra.mxu2 %v8891_v38 }
 0x3b8   : > { %11422 = vst [vmem:[#allocation137_spill] sm:$0xff] %v8879_v28  ;;  %v4757_v21 = vsub.f32 %v8838_v15, %v11431_v43  ;;  %4747 = vmatpush.msra.mxu1 %v4746_v2  ;;  %v4752_v43 = vand.u32 4294901760, %v4751_v54  ;;  %v8928_v15 = vpop.f32.mrf.mxu3  ;;  %v11438_v2 = vld [vmem:[#allocation27_spill] sm:$0xff]  ;;  %4568 = vmatpush.msra.mxu0 %v8786_v29  ;;  %v11442_v29 = vld [vmem:[#allocation26_spill] sm:$0xff] }
 0x3b9   : > { %11424 = vst [vmem:[#allocation29_spill] sm:$0xff] %v8882_v39  ;;  %v8931_v60 = vand.u32 4294901760, %v11438_v2  ;;  %4905 = vmatpush.msra.mxu2 %v8874_v34  ;;  %5023 = vmatpush.msra.mxu3 %v8813_v4  ;;  %v8951_v51 = vand.u32 4294901760, %v11442_v29 }
 0x3ba   : > { %11426 = vst [vmem:[#allocation138_spill] sm:$0xff] %v8891_v38  ;;  %4753 = vmatpush.msra.mxu1 %v4752_v43  ;;  %v4758_v54 = vand.u32 4294901760, %v4757_v21  ;;  %4570 = vmatpush.msra.mxu0 %v8800_v41  ;;  %v11441_v38 = vand.u32 4294901760, %v8874_v34  ;;  %v2859_v43 = vld [vmem:[%s10497_s5 + $0x58] sm:$0xff] }
 0x3bb   : > { %11427 = vst [vmem:[#allocation139_spill] sm:$0xff] %v8893_v10  ;;  %v2857_v10 = vld [vmem:[%s10497_s5 + $0x48] sm:$0xff]  ;;  %3968 = vmatmul.f32.gmra.mxu3 %v8771_v53  ;;  %4908 = vmatpush.msra.mxu2 %v8900_v24  ;;  %v9002_v53 = vand.u32 4294901760, %v2859_v43 }
 0x3bc   : > { %11429 = vst [vmem:[#allocation28_spill] sm:$0xff] %v8896_v37  ;;  %v8935_v0 = vand.u32 4294901760, %v2857_v10  ;;  %4759 = vmatpush.msra.mxu1 %v4758_v54  ;;  %5025 = vmatpush.msra.mxu3 %v8848_v20 }
 0x3bd   : > { %11430 = vst [vmem:[#allocation140_spill] sm:$0xff] %v8900_v24  ;;  %4572 = vmatpush.msra.mxu0 %v8813_v4  ;;  %4911 = vmatpush.msra.mxu2 %v8921_v33  ;;  %v8979_v41 = vpop.f32.mrf.mxu2 }
 0x3be   : > { %11432 = vst [vmem:[#allocation141_spill] sm:$0xff] %v8907_v19  ;;  %5027 = vmatpush.msra.mxu3 %v8868_v40  ;;  %3549 = vmatmul.f32.gmra.mxu0 %v8267_v16 }
 0x3bf   : > { %11433 = vst [vmem:[#allocation142_spill] sm:$0xff] %v8909_v32  ;;  %v11436_v32 = vand.u32 4294901760, %v8856_v57  ;;  %3646 = vmatmul.f32.gmra.mxu1 %v8267_v16  ;;  %4574 = vmatpush.msra.mxu0 %v8848_v20 }
 0x3c0   : > { %11434 = vst [vmem:[#allocation143_spill] sm:$0xff] %v8917_v3  ;;  %4914 = vmatpush.msra.mxu2 %v8939_v12  ;;  %5029 = vmatpush.msra.mxu3 %v8882_v39  ;;  %v9013_v20 = vpop.f32.mrf.mxu3 }
 0x3c1   : > { %11435 = vst [vmem:[#allocation144_spill] sm:$0xff] %v8921_v33  ;;  %v4763_v19 = vsub.f32 %v8856_v57, %v11436_v32  ;;  %v3761_v57 = vsub.f32 %v8879_v28, %v8917_v3  ;;  %v8957_v32 = vsub.f32 %v11438_v2, %v8931_v60  ;;  %v11445_v3 = vld [vmem:[#allocation25_spill] sm:$0xff]  ;;  %v11453_v2 = vand.u32 4294901760, %v8921_v33  ;;  %4576 = vmatpush.msra.mxu0 %v8868_v40 }
 0x3c2   : > { %11437 = vst [vmem:[#allocation145_spill] sm:$0xff] %v8928_v15  ;;  %v4769_v15 = vsub.f32 %v8874_v34, %v11441_v38  ;;  %v8962_v38 = vsub.f32 %v2857_v10, %v8935_v0  ;;  %v8965_v28 = vand.u32 4294901760, %v11445_v3  ;;  %5031 = vmatpush.msra.mxu3 %v8896_v37 }
 0x3c3   : > { %11439 = vst [vmem:[#allocation27_spill] sm:$0xff] %v8935_v0  ;;  %v4764_v21 = vand.u32 4294901760, %v4763_v19  ;;  %v11447_v19 = vand.u32 4294901760, %v8900_v24  ;;  %v8977_v34 = vand.u32 4294901760, %v3761_v57  ;;  %v8995_v57 = vpop.f32.mrf.mxu1  ;;  %4917 = vmatpush.msra.mxu2 %v8957_v32  ;;  %4578 = vmatpush.msra.mxu0 %v8882_v39 }
 0x3c4   : > { %11440 = vst [vmem:[#allocation146_spill] sm:$0xff] %v8939_v12  ;;  %v4770_v10 = vand.u32 4294901760, %v4769_v15  ;;  %v8993_v15 = vpop.f32.mrf.mxu0  ;;  %v9006_v16 = vsub.f32 %v11445_v3, %v8965_v28  ;;  %3972 = vmatmul.f32.gmra.mxu3 %v8852_v31 }
 0x3c5   : > { %11443 = vst [vmem:[#allocation26_spill] sm:$0xff] %v8957_v32  ;;  %4765 = vmatpush.msra.mxu1 %v4764_v21  ;;  %v4775_v54 = vsub.f32 %v8900_v24, %v11447_v19  ;;  %v11450_v21 = vld [vmem:[#allocation24_spill] sm:$0xff]  ;;  %v8986_v19 = vsub.f32 %v11442_v29, %v8951_v51  ;;  %v4781_v24 = vsub.f32 %v8921_v33, %v11453_v2  ;;  %v9000_v29 = vand.u32 4294901760, %v8962_v38 }
 0x3c6   : > { %11444 = vst [vmem:[#allocation147_spill] sm:$0xff] %v8962_v38  ;;  %v8982_v4 = vand.u32 4294901760, %v11450_v21  ;;  %v11457_v33 = vand.u32 4294901760, %v8939_v12  ;;  %3763 = vmatmul.f32.gmra.mxu2 %v8977_v34  ;;  %5033 = vmatpush.msra.mxu3 %v8931_v60 }
 0x3c7   : > { %11446 = vst [vmem:[#allocation25_spill] sm:$0xff] %v8965_v28  ;;  %4771 = vmatpush.msra.mxu1 %v4770_v10  ;;  %v4776_v2 = vand.u32 4294901760, %v4775_v54  ;;  %v4782_v3 = vand.u32 4294901760, %v4781_v24  ;;  %v2861_v54 = vld [vmem:[%s10497_s5 + $0x68] sm:$0xff]  ;;  %4920 = vmatpush.msra.mxu2 %v8986_v19 }
 0x3c8   : > { %11448 = vst [vmem:[#allocation148_spill] sm:$0xff] %v8977_v34  ;;  %v4787_v10 = vsub.f32 %v8939_v12, %v11457_v33  ;;  %v11459_v33 = vand.u32 4294901760, %v8957_v32  ;;  %v3769_v12 = vsub.f32 %v8962_v38, %v9000_v29  ;;  %4580 = vmatpush.msra.mxu0 %v8896_v37  ;;  %5035 = vmatpush.msra.mxu3 %v8951_v51  ;;  %v9058_v37 = vand.u32 4294901760, %v2861_v54 }
 0x3c9   : > { %11449 = vst [vmem:[#allocation149_spill] sm:$0xff] %v8979_v41  ;;  %v9019_v41 = vsub.f32 %v11450_v21, %v8982_v4  ;;  %4777 = vmatpush.msra.mxu1 %v4776_v2  ;;  %v9031_v21 = vsub.f32 %v2859_v43, %v9002_v53  ;;  %v11461_v43 = vand.u32 4294901760, %v8986_v19  ;;  %4923 = vmatpush.msra.mxu2 %v9006_v16 }
 0x3ca   : > { %11451 = vst [vmem:[#allocation24_spill] sm:$0xff] %v8982_v4  ;;  %v4793_v34 = vsub.f32 %v8957_v32, %v11459_v33  ;;  %v4788_v24 = vand.u32 4294901760, %v4787_v10  ;;  %v9049_v2 = vand.u32 4294901760, %v3769_v12  ;;  %v9053_v32 = vpop.f32.mrf.mxu2  ;;  %3553 = vmatmul.f32.gmra.mxu0 %v8311_v25  ;;  %3650 = vmatmul.f32.gmra.mxu1 %v8311_v25  ;;  %v9066_v12 = vpop.f32.mrf.mxu3 }
 0x3cb   : > { %11452 = vst [vmem:[#allocation150_spill] sm:$0xff] %v8986_v19  ;;  %4783 = vmatpush.msra.mxu1 %v4782_v3  ;;  %v4799_v33 = vsub.f32 %v8986_v19, %v11461_v43  ;;  %v9051_v38 = vpop.f32.mrf.mxu1  ;;  %v11465_v43 = vand.u32 4294901760, %v9006_v16  ;;  %4582 = vmatpush.msra.mxu0 %v8931_v60  ;;  %v11466_v19 = vand.u32 4294901760, %v9019_v41 }
 0x3cc   : > { %11454 = vst [vmem:[#allocation151_spill] sm:$0xff] %v9000_v29  ;;  %v9044_v29 = vpop.f32.mrf.mxu0  ;;  %v4794_v3 = vand.u32 4294901760, %v4793_v34  ;;  %4926 = vmatpush.msra.mxu2 %v9019_v41  ;;  %5037 = vmatpush.msra.mxu3 %v8965_v28 }
 0x3cd   : > { %11455 = vst [vmem:[#allocation152_spill] sm:$0xff] %v9002_v53  ;;  %4789 = vmatpush.msra.mxu1 %v4788_v24  ;;  %v9056_v24 = vand.u32 4294901760, %v9031_v21  ;;  %v4805_v10 = vsub.f32 %v9006_v16, %v11465_v43  ;;  %v4800_v34 = vand.u32 4294901760, %v4799_v33  ;;  %v4811_v39 = vsub.f32 %v9019_v41, %v11466_v19  ;;  %4584 = vmatpush.msra.mxu0 %v8951_v51  ;;  %v2863_v33 = vld [vmem:[%s10497_s5 + $0x78] sm:$0xff] }
 0x3ce   : > { %11456 = vst [vmem:[#allocation153_spill] sm:$0xff] %v9006_v16  ;;  %3771 = vmatmul.f32.gmra.mxu2 %v9049_v2  ;;  %5039 = vmatpush.msra.mxu3 %v8982_v4 }
 0x3cf   : > { %11458 = vst [vmem:[#allocation154_spill] sm:$0xff] %v9019_v41  ;;  %4795 = vmatpush.msra.mxu1 %v4794_v3  ;;  %v3777_v43 = vsub.f32 %v9031_v21, %v9056_v24  ;;  %v9078_v3 = vsub.f32 %v2861_v54, %v9058_v37  ;;  %v4806_v25 = vand.u32 4294901760, %v4805_v10  ;;  %3976 = vmatmul.f32.gmra.mxu3 %v8935_v0  ;;  %v4812_v19 = vand.u32 4294901760, %v4811_v39 }
 0x3d0   : > { %11460 = vst [vmem:[#allocation155_spill] sm:$0xff] %v9031_v21  ;;  %4586 = vmatpush.msra.mxu0 %v8965_v28  ;;  %v9098_v21 = vand.u32 4294901760, %v2863_v33 }
 0x3d1   : > { %11462 = vst [vmem:[#allocation156_spill] sm:$0xff] %v9049_v2  ;;  %4801 = vmatpush.msra.mxu1 %v4800_v34  ;;  %v9089_v54 = vand.u32 4294901760, %v3777_v43  ;;  %v9096_v10 = vand.u32 4294901760, %v9078_v3 }
 0x3d2   : > { %11463 = vst [vmem:[#allocation157_spill] sm:$0xff] %v9056_v24  ;;  %4588 = vmatpush.msra.mxu0 %v8982_v4  ;;  %v9093_v24 = vpop.f32.mrf.mxu2  ;;  %3654 = vmatmul.f32.gmra.mxu1 %v8350_v27  ;;  %v9108_v43 = vsub.f32 %v2863_v33, %v9098_v21  ;;  %v2865_v4 = vld [vmem:[%s10497_s5 + $0x88] sm:$0xff] }
 0x3d3   : > { %11464 = vst [vmem:[#allocation158_spill] sm:$0xff] %v9058_v37  ;;  %4807 = vmatpush.msra.mxu1 %v4806_v25  ;;  %v9091_v34 = vpop.f32.mrf.mxu1  ;;  %3557 = vmatmul.f32.gmra.mxu0 %v8350_v27  ;;  %v9102_v25 = vpop.f32.mrf.mxu3  ;;  %v3785_v39 = vsub.f32 %v9078_v3, %v9096_v10 }
 0x3d4   : > { %11467 = vst [vmem:[#allocation159_spill] sm:$0xff] %v9078_v3  ;;  %v9086_v2 = vpop.f32.mrf.mxu0 }
 0x3d5   : > { %11468 = vst [vmem:[#allocation160_spill] sm:$0xff] %v9089_v54  ;;  %4813 = vmatpush.msra.mxu1 %v4812_v19  ;;  %v9116_v41 = vand.u32 4294901760, %v3785_v39 }
 0x3d6   : > { %11469 = vst [vmem:[#allocation161_spill] sm:$0xff] %v9096_v10  ;;  %3779 = vmatmul.f32.gmra.mxu2 %v9089_v54  ;;  %v9123_v54 = vand.u32 4294901760, %v9108_v43  ;;  %v9125_v10 = vand.u32 4294901760, %v2865_v4 }
 0x3d7   : > { %11470 = vst [vmem:[#allocation162_spill] sm:$0xff] %v9098_v21  ;;  %3980 = vmatmul.f32.gmra.mxu3 %v9002_v53  ;;  %v2867_v53 = vld [vmem:[%s10497_s5 + $0x98] sm:$0xff] }
 0x3d8   : > { %11471 = vst [vmem:[#allocation163_spill] sm:$0xff] %v9108_v43  ;;  %v3793_v39 = vsub.f32 %v9108_v43, %v9123_v54  ;;  %v9135_v3 = vsub.f32 %v2865_v4, %v9125_v10 }
 0x3d9   : > { %11472 = vst [vmem:[#allocation164_spill] sm:$0xff] %v9116_v41 }
 0x3da   : > { %v9120_v28 = vpop.f32.mrf.mxu2  ;;  %11475 = vst [vmem:[#allocation167_spill] sm:$0xff] %v9123_v54  ;;  %3658 = vmatmul.f32.gmra.mxu1 %v8389_v23  ;;  %v9143_v16 = vand.u32 4294901760, %v3793_v39  ;;  %v9152_v54 = vand.u32 4294901760, %v2867_v53 }
 0x3db   : > { %v9118_v27 = vpop.f32.mrf.mxu1  ;;  %11474 = vst [vmem:[#allocation166_spill] sm:$0xff] %v9120_v28  ;;  %3561 = vmatmul.f32.gmra.mxu0 %v8389_v23  ;;  %v9129_v33 = vpop.f32.mrf.mxu3 }
 0x3dc   : > { %v9114_v19 = vpop.f32.mrf.mxu0  ;;  %11473 = vst [vmem:[#allocation165_spill] sm:$0xff] %v9118_v27  ;;  %v9162_v43 = vsub.f32 %v2867_v53, %v9152_v54 }
 0x3dd   : > { %11476 = vst [vmem:[#allocation168_spill] sm:$0xff] %v9125_v10 }
 0x3de   : > { %11477 = vst [vmem:[#allocation169_spill] sm:$0xff] %v9129_v33  ;;  %3787 = vmatmul.f32.gmra.mxu2 %v9116_v41  ;;  %v9150_v41 = vand.u32 4294901760, %v9135_v3 }
 0x3df   : > { %11478 = vst [vmem:[#allocation170_spill] sm:$0xff] %v9135_v3  ;;  %3984 = vmatmul.f32.gmra.mxu3 %v9058_v37  ;;  %v2869_v37 = vld [vmem:[%s10497_s5 + $0xa8] sm:$0xff] }
 0x3e0   : > { %11480 = vst [vmem:[#allocation172_spill] sm:$0xff] %v9143_v16  ;;  %v3801_v39 = vsub.f32 %v9135_v3, %v9150_v41 }
 0x3e1   : > { %11483 = vst [vmem:[#allocation175_spill] sm:$0xff] %v9150_v41  ;;  %v9179_v41 = vand.u32 4294901760, %v2869_v37 }
 0x3e2   : > { %v9147_v33 = vpop.f32.mrf.mxu2  ;;  %11484 = vst [vmem:[#allocation176_spill] sm:$0xff] %v9152_v54  ;;  %3662 = vmatmul.f32.gmra.mxu1 %v8428_v13 }
 0x3e3   : > { %v9145_v23 = vpop.f32.mrf.mxu1  ;;  %11482 = vst [vmem:[#allocation174_spill] sm:$0xff] %v9147_v33  ;;  %3565 = vmatmul.f32.gmra.mxu0 %v8428_v13  ;;  %v9156_v4 = vpop.f32.mrf.mxu3  ;;  %v9189_v3 = vsub.f32 %v2869_v37, %v9179_v41 }
 0x3e4   : > { %v9141_v28 = vpop.f32.mrf.mxu0  ;;  %11481 = vst [vmem:[#allocation173_spill] sm:$0xff] %v9145_v23  ;;  %v9170_v23 = vand.u32 4294901760, %v3801_v39 }
 0x3e5   : > { %11479 = vst [vmem:[#allocation171_spill] sm:$0xff] %v9141_v28  ;;  %v11531_v28 = vld [vmem:[#allocation21_spill] sm:$0xff] }
 0x3e6   : > { %11485 = vst [vmem:[#allocation177_spill] sm:$0xff] %v9156_v4  ;;  %3795 = vmatmul.f32.gmra.mxu2 %v9143_v16  ;;  %v9177_v16 = vand.u32 4294901760, %v9162_v43 }
 0x3e7   : > { %11486 = vst [vmem:[#allocation178_spill] sm:$0xff] %v9162_v43  ;;  %3988 = vmatmul.f32.gmra.mxu3 %v9098_v21  ;;  %v2871_v21 = vld [vmem:[%s10497_s5 + $0xb8] sm:$0xff] }
 0x3e8   : > { %11488 = vst [vmem:[#allocation180_spill] sm:$0xff] %v9170_v23  ;;  %v3809_v39 = vsub.f32 %v9162_v43, %v9177_v16 }
 0x3e9   : > { %11491 = vst [vmem:[#allocation183_spill] sm:$0xff] %v9177_v16  ;;  %v9206_v16 = vand.u32 4294901760, %v2871_v21 }
 0x3ea   : > { %v9174_v4 = vpop.f32.mrf.mxu2  ;;  %11492 = vst [vmem:[#allocation184_spill] sm:$0xff] %v9179_v41  ;;  %3666 = vmatmul.f32.gmra.mxu1 %v8456_v61 }
 0x3eb   : > { %v9172_v13 = vpop.f32.mrf.mxu1  ;;  %11490 = vst [vmem:[#allocation182_spill] sm:$0xff] %v9174_v4  ;;  %3569 = vmatmul.f32.gmra.mxu0 %v8456_v61  ;;  %v9183_v53 = vpop.f32.mrf.mxu3 }
 0x3ec   : > { %v9168_v33 = vpop.f32.mrf.mxu0  ;;  %11489 = vst [vmem:[#allocation181_spill] sm:$0xff] %v9172_v13  ;;  %v9197_v13 = vand.u32 4294901760, %v3809_v39 }
 0x3ed   : > { %11487 = vst [vmem:[#allocation179_spill] sm:$0xff] %v9168_v33 }
 0x3ee   : > { %11493 = vst [vmem:[#allocation185_spill] sm:$0xff] %v9183_v53  ;;  %3803 = vmatmul.f32.gmra.mxu2 %v9170_v23  ;;  %v9204_v23 = vand.u32 4294901760, %v9189_v3 }
 0x3ef   : > { %11494 = vst [vmem:[#allocation186_spill] sm:$0xff] %v9189_v3  ;;  %3992 = vmatmul.f32.gmra.mxu3 %v9125_v10  ;;  %v11529_v10 = vld [vmem:[#allocation18_spill] sm:$0xff] }
 0x3f0   : > { %11496 = vst [vmem:[#allocation188_spill] sm:$0xff] %v9197_v13  ;;  %v3817_v39 = vsub.f32 %v9189_v3, %v9204_v23 }
 0x3f1   : > { %11499 = vst [vmem:[#allocation191_spill] sm:$0xff] %v9204_v23 }
 0x3f2   : > { %v9201_v53 = vpop.f32.mrf.mxu2  ;;  %11500 = vst [vmem:[#allocation192_spill] sm:$0xff] %v9206_v16  ;;  %3670 = vmatmul.f32.gmra.mxu1 %v8480_v35  ;;  %v9224_v43 = vand.u32 4294901760, %v3817_v39 }
 0x3f3   : > { %v9199_v61 = vpop.f32.mrf.mxu1  ;;  %11498 = vst [vmem:[#allocation190_spill] sm:$0xff] %v9201_v53  ;;  %3573 = vmatmul.f32.gmra.mxu0 %v8480_v35  ;;  %v9210_v37 = vpop.f32.mrf.mxu3  ;;  %v2873_v53 = vld [vmem:[%s10497_s5 + $0xc8] sm:$0xff] }
 0x3f4   : > { %v9195_v4 = vpop.f32.mrf.mxu0  ;;  %11497 = vst [vmem:[#allocation189_spill] sm:$0xff] %v9199_v61  ;;  %v9216_v61 = vsub.f32 %v2871_v21, %v9206_v16  ;;  %v9233_v23 = vand.u32 4294901760, %v2873_v53 }
 0x3f5   : > { %11495 = vst [vmem:[#allocation187_spill] sm:$0xff] %v9195_v4 }
 0x3f6   : > { %11501 = vst [vmem:[#allocation193_spill] sm:$0xff] %v9210_v37  ;;  %3811 = vmatmul.f32.gmra.mxu2 %v9197_v13  ;;  %v9231_v13 = vand.u32 4294901760, %v9216_v61 }
 0x3f7   : > { %11502 = vst [vmem:[#allocation194_spill] sm:$0xff] %v9216_v61  ;;  %3996 = vmatmul.f32.gmra.mxu3 %v9152_v54 }
 0x3f8   : > { %11504 = vst [vmem:[#allocation196_spill] sm:$0xff] %v9224_v43  ;;  %v3825_v39 = vsub.f32 %v9216_v61, %v9231_v13 }
 0x3f9   : > { %11507 = vst [vmem:[#allocation199_spill] sm:$0xff] %v9231_v13 }
 0x3fa   : > { %v9228_v37 = vpop.f32.mrf.mxu2  ;;  %11508 = vst [vmem:[#allocation200_spill] sm:$0xff] %v9233_v23  ;;  %3674 = vmatmul.f32.gmra.mxu1 %v8504_v1  ;;  %v9251_v3 = vand.u32 4294901760, %v3825_v39 }
 0x3fb   : > { %v9226_v35 = vpop.f32.mrf.mxu1  ;;  %11506 = vst [vmem:[#allocation198_spill] sm:$0xff] %v9228_v37  ;;  %3577 = vmatmul.f32.gmra.mxu0 %v8504_v1  ;;  %v9237_v21 = vpop.f32.mrf.mxu3  ;;  %v2875_v37 = vld [vmem:[%s10497_s5 + $0xd8] sm:$0xff] }
 0x3fc   : > { %v9222_v4 = vpop.f32.mrf.mxu0  ;;  %11505 = vst [vmem:[#allocation197_spill] sm:$0xff] %v9226_v35  ;;  %v9243_v35 = vsub.f32 %v2873_v53, %v9233_v23  ;;  %v9260_v13 = vand.u32 4294901760, %v2875_v37 }
 0x3fd   : > { %11503 = vst [vmem:[#allocation195_spill] sm:$0xff] %v9222_v4 }
 0x3fe   : > { %11509 = vst [vmem:[#allocation201_spill] sm:$0xff] %v9237_v21  ;;  %3819 = vmatmul.f32.gmra.mxu2 %v9224_v43  ;;  %v9258_v43 = vand.u32 4294901760, %v9243_v35 }
 0x3ff   : > { %11510 = vst [vmem:[#allocation202_spill] sm:$0xff] %v9243_v35  ;;  %4000 = vmatmul.f32.gmra.mxu3 %v9179_v41 }
 0x400   : > { %11512 = vst [vmem:[#allocation204_spill] sm:$0xff] %v9251_v3  ;;  %v3833_v39 = vsub.f32 %v9243_v35, %v9258_v43 }
 0x401   : > { %11515 = vst [vmem:[#allocation207_spill] sm:$0xff] %v9258_v43 }
 0x402   : > { %v9255_v21 = vpop.f32.mrf.mxu2  ;;  %11516 = vst [vmem:[#allocation208_spill] sm:$0xff] %v9260_v13  ;;  %3678 = vmatmul.f32.gmra.mxu1 %v8526_v46 }
 0x403   : > { %v9253_v1 = vpop.f32.mrf.mxu1  ;;  %11514 = vst [vmem:[#allocation206_spill] sm:$0xff] %v9255_v21  ;;  %3581 = vmatmul.f32.gmra.mxu0 %v8526_v46  ;;  %v9264_v53 = vpop.f32.mrf.mxu3  ;;  %v2877_v21 = vld [vmem:[%s10497_s5 + $0xe8] sm:$0xff]  ;;  %v6364_v46 = vld [vmem:[%s10496_s4] ss:$0 sm:$0xff] }
 0x404   : > { %v9249_v4 = vpop.f32.mrf.mxu0  ;;  %11513 = vst [vmem:[#allocation205_spill] sm:$0xff] %v9253_v1  ;;  %v9270_v1 = vsub.f32 %v2875_v37, %v9260_v13  ;;  %v9291_v41 = vand.u32 4294901760, %v2877_v21  ;;  %v1961_v33 = vadd.f32 %v6364_v46, %v11529_v10 }
 0x405   : > { %11511 = vst [vmem:[#allocation203_spill] sm:$0xff] %v9249_v4  ;;  %v11519_v4 = vld [vmem:[#allocation22_spill] sm:$0xff] }
 0x406   : > { %11517 = vst [vmem:[#allocation209_spill] sm:$0xff] %v9264_v53  ;;  %3827 = vmatmul.f32.gmra.mxu2 %v9251_v3  ;;  %v1977_v53 = vadd.f32 %v6364_v46, %v11519_v4  ;;  %v9282_v3 = vand.u32 4294901760, %v3833_v39  ;;  %v9289_v35 = vand.u32 4294901760, %v9270_v1 }
 0x407   : > { %11518 = vst [vmem:[#allocation210_spill] sm:$0xff] %v9270_v1  ;;  %4004 = vmatmul.f32.gmra.mxu3 %v9206_v16  ;;  %v11526_v16 = vld [vmem:[#allocation20_spill] sm:$0xff] }
 0x408   : > { %11521 = vst [vmem:[#allocation211_spill] sm:$0xff] %v9282_v3  ;;  %v1969_v54 = vadd.f32 %v6364_v46, %v11526_v16 }
 0x409   : > { %11524 = vst [vmem:[#allocation214_spill] sm:$0xff] %v9289_v35 }
 0x40a   : > { %v9286_v37 = vpop.f32.mrf.mxu2  ;;  %11525 = vst [vmem:[#allocation215_spill] sm:$0xff] %v9291_v41  ;;  %3682 = vmatmul.f32.gmra.mxu1 %v8555_v49  ;;  %v2138_v16 = vadd.f32 %v11531_v28, %v1969_v54 }
 0x40b   : > { %v9284_v43 = vpop.f32.mrf.mxu1  ;;  %11523 = vst [vmem:[#allocation213_spill] sm:$0xff] %v9286_v37  ;;  %3585 = vmatmul.f32.gmra.mxu0 %v8555_v49  ;;  %v9296_v4 = vpop.f32.mrf.mxu3  ;;  %v3841_v37 = vsub.f32 %v9270_v1, %v9289_v35  ;;  %v2879_v49 = vld [vmem:[%s10497_s5 + $0xf8] sm:$0xff] }
 0x40c   : > { %v9280_v61 = vpop.f32.mrf.mxu0  ;;  %11522 = vst [vmem:[#allocation212_spill] sm:$0xff] %v9284_v43  ;;  %v9304_v43 = vsub.f32 %v2877_v21, %v9291_v41  ;;  %v9326_v54 = vand.u32 4294901760, %v2879_v49 }
 0x40d   : > { %11520 = vst [vmem:[#allocation22_spill] sm:$0xff] %v9280_v61  ;;  %v11528_v61 = vld [vmem:[#allocation23_spill] sm:$0xff]  ;;  %v9317_v21 = vand.u32 4294901760, %v3841_v37  ;;  %v11541_v37 = vld [vmem:[#allocation12_spill] sm:$0xff] }
 0x40e   : > { %11527 = vst [vmem:[#allocation20_spill] sm:$0xff] %v9296_v4  ;;  %v2142_v39 = vadd.f32 %v11528_v61, %v1977_v53  ;;  %3835 = vmatmul.f32.gmra.mxu2 %v9282_v3  ;;  %v11532_v61 = vld [vmem:[#allocation16_spill] sm:$0xff]  ;;  %v2322_v53 = vadd.f32 %v8669_v45, %v2138_v16  ;;  %v11534_v4 = vld [vmem:[#allocation19_spill] sm:$0xff]  ;;  %v11542_v16 = vld [vmem:[#allocation17_spill] sm:$0xff] }
 0x40f   : > { %11530 = vst [vmem:[#allocation23_spill] sm:$0xff] %v9304_v43  ;;  %4008 = vmatmul.f32.gmra.mxu3 %v9233_v23  ;;  %v1953_v10 = vadd.f32 %v6364_v46, %v11532_v61  ;;  %v2134_v35 = vadd.f32 %v11534_v4, %v1961_v33  ;;  %v1937_v4 = vadd.f32 %v6364_v46, %v11541_v37 }
 0x410   : > { %v2327_v27 = vadd.f32 %v8699_v8, %v2142_v39  ;;  %11535 = vst [vmem:[#allocation21_spill] sm:$0xff] %v9317_v21  ;;  %v9324_v8 = vand.u32 4294901760, %v9304_v43  ;;  %v11539_v39 = vld [vmem:[#allocation14_spill] sm:$0xff] }
 0x411   : > { %v1945_v23 = vadd.f32 %v6364_v46, %v11539_v39  ;;  %v2317_v45 = vadd.f32 %v8639_v7, %v2134_v35 }
 0x412   : > { %v9321_v28 = vpop.f32.mrf.mxu2  ;;  %11538 = vst [vmem:[#allocation216_spill] sm:$0xff] %v9324_v8  ;;  %v2540_v61 = vadd.f32 %v8710_v56, %v2327_v27  ;;  %3686 = vmatmul.f32.gmra.mxu1 %v8582_v63  ;;  %v3849_v39 = vsub.f32 %v9304_v43, %v9324_v8  ;;  %v9342_v27 = vsub.f32 %v2879_v49, %v9326_v54  ;;  %v11543_v56 = vld [vmem:[#allocation15_spill] sm:$0xff] }
 0x413   : > { %v9319_v1 = vpop.f32.mrf.mxu1  ;;  %11537 = vst [vmem:[#allocation19_spill] sm:$0xff] %v9321_v28  ;;  %3589 = vmatmul.f32.gmra.mxu0 %v8582_v63  ;;  %v9333_v33 = vpop.f32.mrf.mxu3  ;;  %v2130_v28 = vadd.f32 %v11542_v16, %v1953_v10  ;;  %v2126_v35 = vadd.f32 %v11543_v56, %v1945_v23  ;;  %v2528_v10 = vadd.f32 %v8644_v17, %v2317_v45 }
 0x414   : > { %v9314_v3 = vpop.f32.mrf.mxu0  ;;  %11536 = vst [vmem:[#allocation16_spill] sm:$0xff] %v9319_v1  ;;  %v2534_v1 = vadd.f32 %v8676_v30, %v2322_v53  ;;  %v2697_v63 = vadd.f32 %v8701_v5, %v2540_v61  ;;  %v11545_v30 = vld [vmem:[#allocation13_spill] sm:$0xff]  ;;  %v9362_v5 = vand.u32 4294901760, %v9342_v27 }
 0x415   : > { %11533 = vst [vmem:[#allocation18_spill] sm:$0xff] %v9314_v3  ;;  %v2312_v7 = vadd.f32 %v8612_v48, %v2130_v28  ;;  %v2122_v53 = vadd.f32 %v11545_v30, %v1937_v4  ;;  %v2307_v16 = vadd.f32 %v8585_v47, %v2126_v35  ;;  %v9355_v3 = vand.u32 4294901760, %v3849_v39  ;;  %v11556_v35 = vld [vmem:[#allocation91_spill] sm:$0xff] }
 0x416   : > { %11540 = vst [vmem:[#allocation14_spill] sm:$0xff] %v9333_v33  ;;  %3843 = vmatmul.f32.gmra.mxu2 %v9317_v21  ;;  %v11544_v33 = vld [vmem:[#allocation10_spill] sm:$0xff]  ;;  %v2693_v21 = vadd.f32 %v8671_v36, %v2534_v1  ;;  %v2846_v28 = vadd.f32 %v8717_v55, %v2697_v63  ;;  %v11550_v36 = vld [vmem:[#allocation11_spill] sm:$0xff]  ;;  %v2689_v47 = vadd.f32 %v8641_v26, %v2528_v10  ;;  %v11560_v10 = vld [vmem:[#allocation81_spill] sm:$0xff] }
 0x417   : > { %v1929_v37 = vadd.f32 %v6364_v46, %v11544_v33  ;;  %4012 = vmatmul.f32.gmra.mxu3 %v9260_v13  ;;  %11547 = vst [vmem:[#allocation17_spill] sm:$0xff] %v9355_v3  ;;  %v2302_v17 = vadd.f32 %v8558_v59, %v2122_v53  ;;  %v2522_v46 = vadd.f32 %v8617_v52, %v2312_v7 }
 0x418   : > { %v2516_v45 = vadd.f32 %v8590_v14, %v2307_v16  ;;  %v2842_v33 = vadd.f32 %v8684_v11, %v2693_v21  ;;  %v3857_v55 = vsub.f32 %v9342_v27, %v9362_v5  ;;  %v9381_v26 = vand.u32 4294901760, %v2846_v28  ;;  %v11561_v16 = vld [vmem:[#allocation66_spill] sm:$0xff] }
 0x419   : > { %v2118_v1 = vadd.f32 %v11550_v36, %v1929_v37  ;;  %v2510_v52 = vadd.f32 %v8563_v6, %v2302_v17  ;;  %v2685_v63 = vadd.f32 %v8614_v44, %v2522_v46  ;;  %v2838_v4 = vadd.f32 %v8655_v9, %v2689_v47  ;;  %v11562_v17 = vld [vmem:[#allocation75_spill] sm:$0xff] }
 0x41a   : > { %v9359_v48 = vpop.f32.mrf.mxu2  ;;  %3690 = vmatmul.f32.gmra.mxu1 %v8609_v58  ;;  %v2681_v14 = vadd.f32 %v8587_v42, %v2516_v45  ;;  %v9386_v11 = vand.u32 4294901760, %v2842_v33  ;;  %v9391_v39 = vand.u32 4294901760, %v3857_v55  ;;  %v9400_v7 = vsub.f32 %v2846_v28, %v9381_v26  ;;  %v11557_v42 = vld [vmem:[#allocation88_spill] sm:$0xff] }
 0x41b   : > { %v9357_v23 = vpop.f32.mrf.mxu1  ;;  %11549 = vst [vmem:[#allocation10_spill] sm:$0xff] %v9359_v48  ;;  %3593 = vmatmul.f32.gmra.mxu0 %v8609_v58  ;;  %v9371_v61 = vpop.f32.mrf.mxu3  ;;  %v2297_v59 = vadd.f32 %v8531_v22, %v2118_v1  ;;  %v2677_v44 = vadd.f32 %v8560_v50, %v2510_v52  ;;  %v2834_v9 = vadd.f32 %v11556_v35, %v2685_v63  ;;  %v9403_v37 = vand.u32 4294901760, %v2838_v4 }
 0x41c   : > { %v9353_v49 = vpop.f32.mrf.mxu0  ;;  %11548 = vst [vmem:[#allocation15_spill] sm:$0xff] %v9357_v23  ;;  %v2830_v30 = vadd.f32 %v11560_v10, %v2681_v14  ;;  %v9410_v53 = vsub.f32 %v2842_v33, %v9386_v11  ;;  %v10855_v36 = vand.u32 4294901760, %v9400_v7  ;;  %v11565_v33 = vld [vmem:[#allocation68_spill] sm:$0xff]  ;;  %v11589_v23 = vld [vmem:[#allocation111_spill] sm:$0xff] }
 0x41d   : > { %11546 = vst [vmem:[#allocation12_spill] sm:$0xff] %v9353_v49  ;;  %v2504_v21 = vadd.f32 %v8536_v18, %v2297_v59  ;;  %v2826_v46 = vadd.f32 %v11562_v17, %v2677_v44  ;;  %v9415_v28 = vand.u32 4294901760, %v2834_v9  ;;  %v9419_v1 = vsub.f32 %v2838_v4, %v9403_v37  ;;  %v11571_v17 = vld [vmem:[#allocation93_spill] sm:$0xff] }
 0x41e   : > { %11551 = vst [vmem:[#allocation13_spill] sm:$0xff] %v9371_v61  ;;  %3851 = vmatmul.f32.gmra.mxu2 %v9355_v3  ;;  %v9422_v47 = vand.u32 4294901760, %v2830_v30  ;;  %v10858_v45 = vand.u32 4294901760, %v9410_v53  ;;  %v5527_v4 = vsub.f32 %v9400_v7, %v10855_v36  ;;  %v11574_v3 = vld [vmem:[#allocation70_spill] sm:$0xff] }
 0x41f   : > { %4016 = vmatmul.f32.gmra.mxu3 %v9291_v41  ;;  %11553 = vst [vmem:[#allocation217_spill] sm:$0xff] %v9391_v39  ;;  %v2673_v50 = vadd.f32 %v11561_v16, %v2504_v21  ;;  %v9430_v63 = vand.u32 4294901760, %v2826_v46  ;;  %v9433_v14 = vsub.f32 %v2834_v9, %v9415_v28  ;;  %v11568_v21 = vld [vmem:[#allocation92_spill] sm:$0xff]  ;;  %v11586_v61 = vld [vmem:[#allocation90_spill] sm:$0xff] }
 0x420   : > { %11558 = vst [vmem:[#allocation91_spill] sm:$0xff] %v9403_v37  ;;  %v9446_v16 = vsub.f32 %v2830_v30, %v9422_v47  ;;  %v5533_v9 = vsub.f32 %v9410_v53, %v10858_v45  ;;  %v5528_v36 = vand.u32 4294901760, %v5527_v4  ;;  %v11573_v30 = vand.u32 4294901760, %v9419_v1  ;;  %v11577_v4 = vld [vmem:[#allocation62_spill] sm:$0xff] }
 0x421   : > { %11563 = vst [vmem:[#allocation81_spill] sm:$0xff] %v9415_v28  ;;  %v2822_v59 = vadd.f32 %v11565_v33, %v2673_v50  ;;  %v9455_v33 = vsub.f32 %v2826_v46, %v9430_v63  ;;  %v9464_v45 = vand.u32 4294901760, %v11574_v3  ;;  %v9472_v35 = vand.u32 4294901760, %v11577_v4 }
 0x422   : > { %v9395_v6 = vpop.f32.mrf.mxu2  ;;  %3694 = vmatmul.f32.gmra.mxu1 %v11557_v42  ;;  %11564 = vst [vmem:[#allocation66_spill] sm:$0xff] %v9422_v47 }
 0x423   : > { %v9393_v56 = vpop.f32.mrf.mxu1  ;;  %11555 = vst [vmem:[#allocation219_spill] sm:$0xff] %v9395_v6  ;;  %3597 = vmatmul.f32.gmra.mxu0 %v11557_v42  ;;  %v9406_v18 = vpop.f32.mrf.mxu3  ;;  %v9451_v50 = vand.u32 4294901760, %v2822_v59  ;;  %v11592_v49 = vand.u32 4294901760, %v9455_v33 }
 0x424   : > { %v9388_v22 = vpop.f32.mrf.mxu0  ;;  %11554 = vst [vmem:[#allocation218_spill] sm:$0xff] %v9393_v56  ;;  %v11582_v56 = vld [vmem:[#allocation57_spill] sm:$0xff] }
 0x425   : > { %11552 = vst [vmem:[#allocation11_spill] sm:$0xff] %v9388_v22  ;;  %v9469_v42 = vsub.f32 %v2822_v59, %v9451_v50  ;;  %v9488_v22 = vand.u32 4294901760, %v11582_v56 }
 0x426   : > { %11559 = vst [vmem:[#allocation220_spill] sm:$0xff] %v9406_v18  ;;  %3859 = vmatmul.f32.gmra.mxu2 %v9391_v39  ;;  %v5539_v39 = vsub.f32 %v9419_v1, %v11573_v30  ;;  %v11579_v30 = vand.u32 4294901760, %v9433_v14 }
 0x427   : > { %4020 = vmatmul.f32.gmra.mxu3 %v9326_v54  ;;  %11566 = vst [vmem:[#allocation75_spill] sm:$0xff] %v9430_v63 }
 0x428   : > { %11567 = vst [vmem:[#allocation68_spill] sm:$0xff] %v9433_v14  ;;  %v5540_v59 = vand.u32 4294901760, %v5539_v39 }
 0x429   : > { %11569 = vst [vmem:[#allocation221_spill] sm:$0xff] %v9446_v16 }
 0x42a   : > { %v9439_v44 = vpop.f32.mrf.mxu2  ;;  %3698 = vmatmul.f32.gmra.mxu1 %v11568_v21  ;;  %11570 = vst [vmem:[#allocation222_spill] sm:$0xff] %v9451_v50 }
 0x42b   : > { %v9428_v52 = vpop.f32.mrf.mxu1  ;;  %3601 = vmatmul.f32.gmra.mxu0 %v11568_v21  ;;  %v9443_v10 = vpop.f32.mrf.mxu3  ;;  %11572 = vst [vmem:[#allocation223_spill] sm:$0xff] %v9455_v33  ;;  %v5534_v21 = vand.u32 4294901760, %v5533_v9  ;;  %v11581_v9 = vld [vmem:[#allocation97_spill] sm:$0xff] }
 0x42c   : > { %v9426_v55 = vpop.f32.mrf.mxu0  ;;  %11575 = vst [vmem:[#allocation70_spill] sm:$0xff] %v9464_v45 }
 0x42d   : > { %11576 = vst [vmem:[#allocation224_spill] sm:$0xff] %v9469_v42 }
 0x42e   : > { %4347 = vmatmul.f32.vlgmr.msrb.gmra.mxu2 %v11571_v17  ;;  %11578 = vst [vmem:[#allocation62_spill] sm:$0xff] %v9472_v35 }
 0x42f   : > { %5364 = vmatpush.msrb.mxu2 %v9381_v26  ;;  %4444 = vmatmul.f32.vlgmr.msrb.gmra.mxu3 %v11571_v17  ;;  %v5545_v17 = vsub.f32 %v9433_v14, %v11579_v30  ;;  %v11584_v30 = vld [vmem:[#allocation99_spill] sm:$0xff] }
 0x430   : > { %5529 = vmatpush.msrb.mxu3 %v5528_v36  ;;  %v11580_v36 = vld [vmem:[#allocation95_spill] sm:$0xff]  ;;  %v11585_v58 = vand.u32 4294901760, %v11584_v30 }
 0x431   : > { %5366 = vmatpush.msrb.mxu2 %v9386_v11 }
 0x432   : > { %5535 = vmatpush.msrb.mxu3 %v5534_v21  ;;  %v9479_v18 = vpop.f32.mrf.mxu2  ;;  %4188 = vmatmul.f32.vlgmr.msrb.gmra.mxu1 %v11581_v9  ;;  %v9492_v21 = vsub.f32 %v11574_v3, %v9464_v45  ;;  %v9506_v3 = vsub.f32 %v11577_v4, %v9472_v35  ;;  %v11595_v9 = vld [vmem:[#allocation98_spill] sm:$0xff]  ;;  %v9521_v4 = vsub.f32 %v11582_v56, %v9488_v22 }
 0x433   : > { %5368 = vmatpush.msrb.mxu2 %v9403_v37  ;;  %4074 = vmatmul.f32.vlgmr.msrb.gmra.mxu0 %v11580_v36  ;;  %v9485_v6 = vpop.f32.mrf.mxu1  ;;  %v11587_v36 = vand.u32 4294901760, %v9446_v16  ;;  %v9502_v48 = vpop.f32.mrf.mxu3 }
 0x434   : > { %v9483_v46 = vpop.f32.mrf.mxu0  ;;  %11583 = vst [vmem:[#allocation57_spill] sm:$0xff] %v9492_v21  ;;  %5140 = vmatpush.msrb.mxu0 %v11585_v58  ;;  %5267 = vmatpush.msrb.mxu1 %v11586_v61  ;;  %v11590_v58 = vld [vmem:[#allocation116_spill] sm:$0xff]  ;;  %v5546_v61 = vand.u32 4294901760, %v5545_v17 }
 0x435   : > { %v5551_v39 = vsub.f32 %v9446_v16, %v11587_v36  ;;  %5370 = vmatpush.msrb.mxu2 %v9415_v28  ;;  %5541 = vmatpush.msrb.mxu3 %v5540_v59  ;;  %11588 = vst [vmem:[#allocation99_spill] sm:$0xff] %v9506_v3  ;;  %v11591_v30 = vand.u32 4294901760, %v11590_v58  ;;  %v5557_v36 = vsub.f32 %v9455_v33, %v11592_v49  ;;  %v11593_v28 = vld [vmem:[#allocation49_spill] sm:$0xff]  ;;  %v11599_v49 = vld [vmem:[#allocation114_spill] sm:$0xff]  ;;  %v11600_v33 = vand.u32 4294901760, %v9469_v42 }
 0x436   : > { %4351 = vmatmul.f32.gmra.mxu2 %v11589_v23  ;;  %v9515_v59 = vand.u32 4294901760, %v11593_v28  ;;  %5269 = vmatpush.msrb.mxu1 %v11595_v9  ;;  %11596 = vst [vmem:[#allocation116_spill] sm:$0xff] %v9521_v4  ;;  %v11597_v16 = vld [vmem:[#allocation121_spill] sm:$0xff] }
 0x437   : > { %5144 = vmatpush.msrb.mxu0 %v11591_v30  ;;  %5372 = vmatpush.msrb.mxu2 %v9422_v47  ;;  %v11598_v58 = vand.u32 4294901760, %v11597_v16  ;;  %v5552_v17 = vand.u32 4294901760, %v5551_v39  ;;  %v10879_v30 = vand.u32 4294901760, %v9492_v21  ;;  %v5563_v9 = vsub.f32 %v9469_v42, %v11600_v33  ;;  %v11601_v47 = vld [vmem:[#allocation50_spill] sm:$0xff] }
 0x438   : > { %11594 = vst [vmem:[#allocation90_spill] sm:$0xff] %v9515_v59  ;;  %5547 = vmatpush.msrb.mxu3 %v5546_v61  ;;  %5271 = vmatpush.msrb.mxu1 %v11599_v49  ;;  %v9532_v37 = vand.u32 4294901760, %v11601_v47  ;;  %v5558_v56 = vand.u32 4294901760, %v5557_v36  ;;  %v9538_v39 = vsub.f32 %v11593_v28, %v9515_v59  ;;  %v11602_v61 = vld [vmem:[#allocation124_spill] sm:$0xff]  ;;  %v11606_v28 = vld [vmem:[#allocation113_spill] sm:$0xff]  ;;  %v11619_v42 = vld [vmem:[#allocation2_spill] sm:$0xff] }
 0x439   : > { %5148 = vmatpush.msrb.mxu0 %v11598_v58  ;;  %4448 = vmatmul.f32.gmra.mxu3 %v11589_v23  ;;  %v11603_v58 = vand.u32 4294901760, %v11602_v61  ;;  %v11604_v49 = vld [vmem:[#allocation40_spill] sm:$0xff]  ;;  %v5569_v36 = vsub.f32 %v9492_v21, %v10879_v30  ;;  %v3168_v30 = vadd.f32 %v8995_v57, %v8993_v15  ;;  %v11614_v15 = vld [vmem:[#allocation123_spill] sm:$0xff]  ;;  %v11615_v57 = vld [vmem:[#allocation129_spill] sm:$0xff] }
 0x43a   : > { %5374 = vmatpush.msrb.mxu2 %v9430_v63  ;;  %5553 = vmatpush.msrb.mxu3 %v5552_v17  ;;  %v9544_v33 = vand.u32 4294901760, %v11604_v49  ;;  %v9551_v16 = vpop.f32.mrf.mxu2  ;;  %v11607_v61 = vld [vmem:[#allocation120_spill] sm:$0xff]  ;;  %v11609_v17 = vld [vmem:[#allocation125_spill] sm:$0xff] }
 0x43b   : > { %5152 = vmatpush.msrb.mxu0 %v11603_v58  ;;  %5273 = vmatpush.msrb.mxu1 %v8741_v62  ;;  %11605 = vst [vmem:[#allocation49_spill] sm:$0xff] %v9551_v16  ;;  %v5564_v58 = vand.u32 4294901760, %v5563_v9  ;;  %v11608_v63 = vld [vmem:[#allocation36_spill] sm:$0xff]  ;;  %v11610_v21 = vand.u32 4294901760, %v11609_v17  ;;  %v11612_v9 = vand.u32 4294901760, %v9506_v3  ;;  %v5570_v17 = vand.u32 4294901760, %v5569_v36 }
 0x43c   : > { %5376 = vmatpush.msrb.mxu2 %v9451_v50  ;;  %5559 = vmatpush.msrb.mxu3 %v5558_v56  ;;  %v9555_v62 = vpop.f32.mrf.mxu0  ;;  %v9557_v23 = vpop.f32.mrf.mxu1  ;;  %v9560_v50 = vand.u32 4294901760, %v11608_v63  ;;  %v9564_v56 = vsub.f32 %v11601_v47, %v9532_v37  ;;  %v9580_v47 = vsub.f32 %v11604_v49, %v9544_v33 }
 0x43d   : > { %4079 = vmatmul.f32.gmra.mxu0 %v11606_v28  ;;  %4194 = vmatmul.f32.gmra.mxu1 %v11607_v61  ;;  %v11611_v28 = vld [vmem:[#allocation102_spill] sm:$0xff]  ;;  %v5575_v61 = vsub.f32 %v9506_v3, %v11612_v9  ;;  %v11620_v3 = vld [vmem:[#allocation149_spill] sm:$0xff] }
 0x43e   : > { %5156 = vmatpush.msrb.mxu0 %v11610_v21  ;;  %5275 = vmatpush.msrb.mxu1 %v11611_v28  ;;  %v9576_v16 = vpop.f32.mrf.mxu3  ;;  %v11616_v21 = vand.u32 4294901760, %v11615_v57  ;;  %v11617_v28 = vand.u32 4294901760, %v9521_v4  ;;  %v9595_v49 = vsub.f32 %v11608_v63, %v9560_v50  ;;  %v11621_v57 = vld [vmem:[#allocation133_spill] sm:$0xff] }
 0x43f   : > { %5378 = vmatpush.msrb.mxu2 %v9464_v45  ;;  %5565 = vmatpush.msrb.mxu3 %v5564_v58  ;;  %11613 = vst [vmem:[#allocation98_spill] sm:$0xff] %v9576_v16  ;;  %v11618_v45 = vld [vmem:[#allocation85_spill] sm:$0xff]  ;;  %v3285_v16 = vadd.f32 %v11620_v3, %v3168_v30  ;;  %v11622_v36 = vand.u32 4294901760, %v11621_v57  ;;  %v11633_v30 = vld [vmem:[#allocation31_spill] sm:$0xff] }
 0x440   : > { %4355 = vmatmul.f32.gmra.mxu2 %v11614_v15  ;;  %5160 = vmatpush.msrb.mxu0 %v11616_v21  ;;  %v5581_v9 = vsub.f32 %v9521_v4, %v11617_v28  ;;  %v9589_v58 = vand.u32 4294901760, %v11618_v45  ;;  %v5576_v21 = vand.u32 4294901760, %v5575_v61  ;;  %v10894_v28 = vand.u32 4294901760, %v9564_v56  ;;  %v11623_v4 = vld [vmem:[#allocation33_spill] sm:$0xff] }
 0x441   : > { %5277 = vmatpush.msrb.mxu1 %v11619_v42  ;;  %5380 = vmatpush.msrb.mxu2 %v9472_v35  ;;  %v9602_v14 = vand.u32 4294901760, %v11623_v4  ;;  %v11624_v42 = vld [vmem:[#allocation101_spill] sm:$0xff]  ;;  %v11625_v35 = vand.u32 4294901760, %v9538_v39 }
 0x442   : > { %5571 = vmatpush.msrb.mxu3 %v5570_v17  ;;  %5164 = vmatpush.msrb.mxu0 %v11622_v36  ;;  %v5582_v3 = vand.u32 4294901760, %v5581_v9  ;;  %v9613_v61 = vsub.f32 %v11618_v45, %v9589_v58  ;;  %v11626_v17 = vld [vmem:[#allocation136_spill] sm:$0xff]  ;;  %v11628_v36 = vld [vmem:[#allocation106_spill] sm:$0xff]  ;;  %v5593_v9 = vsub.f32 %v9564_v56, %v10894_v28  ;;  %v11634_v28 = vand.u32 4294901760, %v9580_v47 }
 0x443   : > { %4452 = vmatmul.f32.gmra.mxu3 %v11614_v15  ;;  %5279 = vmatpush.msrb.mxu1 %v11624_v42  ;;  %v5587_v63 = vsub.f32 %v9538_v39, %v11625_v35  ;;  %v11627_v57 = vand.u32 4294901760, %v11626_v17  ;;  %v3402_v42 = vadd.f32 %v9013_v20, %v3285_v16  ;;  %v3172_v35 = vadd.f32 %v9051_v38, %v9044_v29  ;;  %v11630_v20 = vld [vmem:[#allocation132_spill] sm:$0xff] }
 0x444   : > { %5382 = vmatpush.msrb.mxu2 %v9488_v22  ;;  %5577 = vmatpush.msrb.mxu3 %v5576_v21  ;;  %v9628_v17 = vsub.f32 %v11623_v4, %v9602_v14  ;;  %v5599_v45 = vsub.f32 %v9580_v47, %v11634_v28  ;;  %v10899_v4 = vand.u32 4294901760, %v9613_v61 }
 0x445   : > { %5168 = vmatpush.msrb.mxu0 %v11627_v57  ;;  %5281 = vmatpush.msrb.mxu1 %v11628_v36  ;;  %v11629_v57 = vld [vmem:[#allocation126_spill] sm:$0xff]  ;;  %v5588_v16 = vand.u32 4294901760, %v5587_v63  ;;  %v3290_v63 = vadd.f32 %v9053_v32, %v3172_v35 }
 0x446   : > { %5384 = vmatpush.msrb.mxu2 %v9515_v59  ;;  %5583 = vmatpush.msrb.mxu3 %v5582_v3  ;;  %v11631_v36 = vld [vmem:[#allocation30_spill] sm:$0xff]  ;;  %v5600_v35 = vand.u32 4294901760, %v5599_v45 }
 0x447   : > { %4084 = vmatmul.f32.gmra.mxu0 %v11629_v57  ;;  %4200 = vmatmul.f32.gmra.mxu1 %v11630_v20  ;;  %v3554_v38 = vpop.f32.mrf.mxu0  ;;  %v3651_v29 = vpop.f32.mrf.mxu1  ;;  %v11632_v3 = vand.u32 4294901760, %v11631_v36  ;;  %v11635_v20 = vld [vmem:[#allocation140_spill] sm:$0xff]  ;;  %v11641_v45 = vld [vmem:[#allocation146_spill] sm:$0xff] }
 0x448   : > { %5283 = vmatpush.msrb.mxu1 %v11633_v30  ;;  %v3555_v15 = vadd.f32 %v3554_v38, %v3402_v42  ;;  %5386 = vmatpush.msrb.mxu2 %v9532_v37  ;;  %v3973_v57 = vpop.f32.mrf.mxu3  ;;  %v11636_v36 = vand.u32 4294901760, %v11635_v20  ;;  %v11637_v30 = vand.u32 4294901760, %v9595_v49  ;;  %v10898_v42 = vand.u32 4294901760, %v9628_v17 }
 0x449   : > { %v3764_v21 = vpop.f32.mrf.mxu2  ;;  %5172 = vmatpush.msrb.mxu0 %v11632_v3  ;;  %5589 = vmatpush.msrb.mxu3 %v5588_v16  ;;  %v5594_v3 = vand.u32 4294901760, %v5593_v9  ;;  %v11638_v16 = vld [vmem:[#allocation144_spill] sm:$0xff]  ;;  %v11640_v9 = vld [vmem:[#allocation29_spill] sm:$0xff]  ;;  %v3176_v20 = vadd.f32 %v9091_v34, %v9086_v2 }
 0x44a   : > { %4359 = vmatmul.f32.gmra.mxu2 %v8852_v31  ;;  %v5605_v59 = vsub.f32 %v9595_v49, %v11637_v30  ;;  %v3652_v28 = vadd.f32 %v3651_v29, %v3555_v15  ;;  %5285 = vmatpush.msrb.mxu1 %v8868_v40  ;;  %v11639_v32 = vand.u32 4294901760, %v11638_v16  ;;  %v5611_v15 = vsub.f32 %v9613_v61, %v10899_v4 }
 0x44b   : > { %5176 = vmatpush.msrb.mxu0 %v11636_v36  ;;  %5388 = vmatpush.msrb.mxu2 %v9544_v33  ;;  %v3408_v40 = vadd.f32 %v9066_v12, %v3290_v63  ;;  %v5617_v30 = vsub.f32 %v9628_v17, %v10898_v42  ;;  %v11644_v63 = vld [vmem:[#allocation137_spill] sm:$0xff]  ;;  %v3295_v16 = vadd.f32 %v9093_v24, %v3176_v20  ;;  %v11669_v42 = vld [vmem:[#allocation179_spill] sm:$0xff] }
 0x44c   : > { %5595 = vmatpush.msrb.mxu3 %v5594_v3  ;;  %v3765_v38 = vadd.f32 %v3764_v21, %v3652_v28  ;;  %5287 = vmatpush.msrb.mxu1 %v11640_v9  ;;  %v5606_v29 = vand.u32 4294901760, %v5605_v59  ;;  %v11642_v21 = vand.u32 4294901760, %v11641_v45  ;;  %v11643_v3 = vld [vmem:[#allocation28_spill] sm:$0xff]  ;;  %v11645_v59 = vld [vmem:[#allocation143_spill] sm:$0xff]  ;;  %v11651_v20 = vld [vmem:[#allocation153_spill] sm:$0xff] }
 0x44d   : > { %5180 = vmatpush.msrb.mxu0 %v11639_v32  ;;  %4456 = vmatmul.f32.gmra.mxu3 %v8852_v31  ;;  %v11646_v32 = vld [vmem:[#allocation26_spill] sm:$0xff]  ;;  %v3414_v24 = vadd.f32 %v9102_v25, %v3295_v16  ;;  %v11656_v25 = vld [vmem:[#allocation24_spill] sm:$0xff]  ;;  %v11657_v16 = vld [vmem:[#allocation147_spill] sm:$0xff] }
 0x44e   : > { %5390 = vmatpush.msrb.mxu2 %v9560_v50  ;;  %5601 = vmatpush.msrb.mxu3 %v5600_v35  ;;  %v9661_v36 = vadd.f32 %v3973_v57, %v3765_v38  ;;  %v5612_v57 = vand.u32 4294901760, %v5611_v15  ;;  %v11647_v35 = vand.u32 4294901760, %v11646_v32  ;;  %v11650_v15 = vld [vmem:[#allocation165_spill] sm:$0xff]  ;;  %v11698_v31 = vld [vmem:[#allocation207_spill] sm:$0xff] }
 0x44f   : > { %5184 = vmatpush.msrb.mxu0 %v11642_v21  ;;  %5289 = vmatpush.msrb.mxu1 %v11643_v3  ;;  %v3655_v12 = vpop.f32.mrf.mxu1  ;;  %v11652_v3 = vand.u32 4294901760, %v11651_v20  ;;  %v11662_v20 = vld [vmem:[#allocation171_spill] sm:$0xff] }
 0x450   : > { %v3558_v28 = vpop.f32.mrf.mxu0  ;;  %5392 = vmatpush.msrb.mxu2 %v9589_v58  ;;  %5607 = vmatpush.msrb.mxu3 %v5606_v29  ;;  %v11648_v29 = vld [vmem:[#allocation150_spill] sm:$0xff] }
 0x451   : > { %v3559_v2 = vadd.f32 %v3558_v28, %v3408_v40  ;;  %v3772_v34 = vpop.f32.mrf.mxu2  ;;  %4089 = vmatmul.f32.gmra.mxu0 %v11644_v63  ;;  %4206 = vmatmul.f32.gmra.mxu1 %v11645_v59  ;;  %v5618_v40 = vand.u32 4294901760, %v5617_v30  ;;  %v11649_v45 = vand.u32 4294901760, %v11648_v29  ;;  %v11653_v28 = vld [vmem:[#allocation25_spill] sm:$0xff]  ;;  %v11660_v29 = vld [vmem:[#allocation152_spill] sm:$0xff]  ;;  %v11686_v59 = vld [vmem:[#allocation191_spill] sm:$0xff] }
 0x452   : > { %5188 = vmatpush.msrb.mxu0 %v11647_v35  ;;  %5291 = vmatpush.msrb.mxu1 %v8931_v60  ;;  %v3977_v9 = vpop.f32.mrf.mxu3  ;;  %v3180_v60 = vadd.f32 %v11650_v15, %v9114_v19  ;;  %v11658_v19 = vld [vmem:[#allocation166_spill] sm:$0xff] }
 0x453   : > { %v3656_v38 = vadd.f32 %v3655_v12, %v3559_v2  ;;  %5394 = vmatpush.msrb.mxu2 %v9602_v14  ;;  %5613 = vmatpush.msrb.mxu3 %v5612_v57  ;;  %v11654_v12 = vld [vmem:[#allocation154_spill] sm:$0xff] }
 0x454   : > { %4363 = vmatmul.f32.gmra.mxu2 %v8935_v0  ;;  %5192 = vmatpush.msrb.mxu0 %v11649_v45  ;;  %v3300_v35 = vadd.f32 %v11658_v19, %v3180_v60  ;;  %v11666_v19 = vld [vmem:[#allocation157_spill] sm:$0xff] }
 0x455   : > { %v3773_v21 = vadd.f32 %v3772_v34, %v3656_v38  ;;  %5293 = vmatpush.msrb.mxu1 %v8951_v51  ;;  %5619 = vmatpush.msrb.mxu3 %v5618_v40  ;;  %v11655_v34 = vand.u32 4294901760, %v11654_v12  ;;  %v11659_v38 = vld [vmem:[#allocation151_spill] sm:$0xff] }
 0x456   : > { %4460 = vmatmul.f32.gmra.mxu3 %v8935_v0  ;;  %5196 = vmatpush.msrb.mxu0 %v11652_v3  ;;  %v11663_v3 = vld [vmem:[#allocation173_spill] sm:$0xff]  ;;  %v11697_v0 = vld [vmem:[#allocation202_spill] sm:$0xff] }
 0x457   : > { %v9687_v30 = vadd.f32 %v3977_v9, %v3773_v21  ;;  %5295 = vmatpush.msrb.mxu1 %v11653_v28  ;;  %v3659_v57 = vpop.f32.mrf.mxu1  ;;  %v11661_v21 = vld [vmem:[#allocation169_spill] sm:$0xff] }
 0x458   : > { %v3562_v2 = vpop.f32.mrf.mxu0  ;;  %5200 = vmatpush.msrb.mxu0 %v11655_v34  ;;  %v3420_v15 = vadd.f32 %v11661_v21, %v3300_v35  ;;  %v11667_v35 = vld [vmem:[#allocation158_spill] sm:$0xff] }
 0x459   : > { %v3563_v51 = vadd.f32 %v3562_v2, %v3414_v24  ;;  %v3780_v32 = vpop.f32.mrf.mxu2  ;;  %5297 = vmatpush.msrb.mxu1 %v11656_v25  ;;  %4094 = vmatmul.f32.gmra.mxu0 %v11657_v16  ;;  %v3184_v24 = vadd.f32 %v11663_v3, %v11662_v20  ;;  %v11664_v25 = vld [vmem:[#allocation155_spill] sm:$0xff]  ;;  %v11668_v20 = vld [vmem:[#allocation177_spill] sm:$0xff]  ;;  %v11685_v16 = vld [vmem:[#allocation186_spill] sm:$0xff] }
 0x45a   : > { %4212 = vmatmul.f32.gmra.mxu1 %v11659_v38  ;;  %v3981_v9 = vpop.f32.mrf.mxu3 }
 0x45b   : > { %v3660_v40 = vadd.f32 %v3659_v57, %v3563_v51  ;;  %v11665_v51 = vld [vmem:[#allocation174_spill] sm:$0xff] }
 0x45c   : > { %4367 = vmatmul.f32.gmra.mxu2 %v11660_v29  ;;  %v3305_v57 = vadd.f32 %v11665_v51, %v3184_v24  ;;  %v11671_v51 = vld [vmem:[#allocation159_spill] sm:$0xff] }
 0x45d   : > { %v3781_v45 = vadd.f32 %v3780_v32, %v3660_v40 }
 0x45e   : > { %4464 = vmatmul.f32.gmra.mxu3 %v11660_v29  ;;  %v3426_v3 = vadd.f32 %v11668_v20, %v3305_v57  ;;  %v11674_v57 = vld [vmem:[#allocation162_spill] sm:$0xff]  ;;  %v11696_v29 = vld [vmem:[#allocation119_spill] sm:$0xff] }
 0x45f   : > { %v9701_v28 = vadd.f32 %v3981_v9, %v3781_v45  ;;  %v3663_v34 = vpop.f32.mrf.mxu1  ;;  %v11670_v9 = vld [vmem:[#allocation181_spill] sm:$0xff] }
 0x460   : > { %v3566_v2 = vpop.f32.mrf.mxu0  ;;  %v3188_v45 = vadd.f32 %v11670_v9, %v11669_v42  ;;  %v11675_v42 = vld [vmem:[#allocation185_spill] sm:$0xff] }
 0x461   : > { %v3567_v12 = vadd.f32 %v3566_v2, %v3420_v15  ;;  %v3788_v60 = vpop.f32.mrf.mxu2  ;;  %4099 = vmatmul.f32.gmra.mxu0 %v11664_v25 }
 0x462   : > { %4218 = vmatmul.f32.gmra.mxu1 %v11666_v19  ;;  %v3985_v40 = vpop.f32.mrf.mxu3  ;;  %v11673_v19 = vld [vmem:[#allocation161_spill] sm:$0xff] }
 0x463   : > { %v3664_v32 = vadd.f32 %v3663_v34, %v3567_v12  ;;  %v11672_v12 = vld [vmem:[#allocation182_spill] sm:$0xff] }
 0x464   : > { %4371 = vmatmul.f32.gmra.mxu2 %v11667_v35  ;;  %v3310_v34 = vadd.f32 %v11672_v12, %v3188_v45  ;;  %v11677_v45 = vld [vmem:[#allocation167_spill] sm:$0xff] }
 0x465   : > { %v3789_v21 = vadd.f32 %v3788_v60, %v3664_v32 }
 0x466   : > { %4468 = vmatmul.f32.gmra.mxu3 %v11667_v35  ;;  %v3432_v9 = vadd.f32 %v11675_v42, %v3310_v34  ;;  %v11680_v42 = vld [vmem:[#allocation175_spill] sm:$0xff] }
 0x467   : > { %v9711_v15 = vadd.f32 %v3985_v40, %v3789_v21  ;;  %v3667_v25 = vpop.f32.mrf.mxu1 }
 0x468   : > { %v3570_v2 = vpop.f32.mrf.mxu0 }
 0x469   : > { %v3571_v4 = vadd.f32 %v3570_v2, %v3426_v3  ;;  %v3796_v24 = vpop.f32.mrf.mxu2  ;;  %4104 = vmatmul.f32.gmra.mxu0 %v11671_v51  ;;  %v11676_v51 = vld [vmem:[#allocation163_spill] sm:$0xff] }
 0x46a   : > { %4224 = vmatmul.f32.gmra.mxu1 %v11673_v19  ;;  %v3989_v32 = vpop.f32.mrf.mxu3 }
 0x46b   : > { %v3668_v60 = vadd.f32 %v3667_v25, %v3571_v4  ;;  %v11678_v25 = vld [vmem:[#allocation168_spill] sm:$0xff] }
 0x46c   : > { %4375 = vmatmul.f32.gmra.mxu2 %v11674_v57 }
 0x46d   : > { %v3797_v20 = vadd.f32 %v3796_v24, %v3668_v60 }
 0x46e   : > { %4472 = vmatmul.f32.gmra.mxu3 %v11674_v57  ;;  %v11689_v57 = vld [vmem:[#allocation199_spill] sm:$0xff] }
 0x46f   : > { %v9719_v40 = vadd.f32 %v3989_v32, %v3797_v20  ;;  %v3671_v2 = vpop.f32.mrf.mxu1  ;;  %v11679_v20 = vld [vmem:[#allocation170_spill] sm:$0xff] }
 0x470   : > { %v3574_v21 = vpop.f32.mrf.mxu0 }
 0x471   : > { %v3575_v3 = vadd.f32 %v3574_v21, %v3432_v9  ;;  %v3804_v38 = vpop.f32.mrf.mxu2  ;;  %4109 = vmatmul.f32.gmra.mxu0 %v11676_v51  ;;  %v11681_v21 = vld [vmem:[#allocation176_spill] sm:$0xff] }
 0x472   : > { %4230 = vmatmul.f32.gmra.mxu1 %v11677_v45  ;;  %v3993_v4 = vpop.f32.mrf.mxu3 }
 0x473   : > { %v3672_v12 = vadd.f32 %v3671_v2, %v3575_v3  ;;  %v11682_v2 = vld [vmem:[#allocation178_spill] sm:$0xff] }
 0x474   : > { %4379 = vmatmul.f32.gmra.mxu2 %v11678_v25 }
 0x475   : > { %v3805_v19 = vadd.f32 %v3804_v38, %v3672_v12  ;;  %v11683_v12 = vld [vmem:[#allocation183_spill] sm:$0xff] }
 0x476   : > { %4476 = vmatmul.f32.gmra.mxu3 %v11678_v25  ;;  %v11688_v25 = vld [vmem:[#allocation194_spill] sm:$0xff] }
 0x477   : > { %v9725_v24 = vadd.f32 %v3993_v4, %v3805_v19  ;;  %v9729_v60 = vpop.f32.mrf.mxu1 }
 0x478   : > { %v9727_v34 = vpop.f32.mrf.mxu0 }
 0x479   : > { %v9731_v32 = vpop.f32.mrf.mxu2  ;;  %4114 = vmatmul.f32.gmra.mxu0 %v11679_v20  ;;  %v11684_v20 = vld [vmem:[#allocation184_spill] sm:$0xff] }
 0x47a   : > { %4236 = vmatmul.f32.gmra.mxu1 %v11680_v42  ;;  %v9735_v9 = vpop.f32.mrf.mxu3 }
 0x47c   : > { %4383 = vmatmul.f32.gmra.mxu2 %v11681_v21 }
 0x47e   : > { %4480 = vmatmul.f32.gmra.mxu3 %v11681_v21 }
 0x47f   : > { %v9741_v19 = vpop.f32.mrf.mxu1 }
 0x480   : > { %v9739_v38 = vpop.f32.mrf.mxu0 }
 0x481   : > { %v9743_v3 = vpop.f32.mrf.mxu2  ;;  %4119 = vmatmul.f32.gmra.mxu0 %v11682_v2 }
 0x482   : > { %4242 = vmatmul.f32.gmra.mxu1 %v11683_v12  ;;  %v9747_v4 = vpop.f32.mrf.mxu3  ;;  %v11687_v12 = vld [vmem:[#allocation192_spill] sm:$0xff] }
 0x484   : > { %4387 = vmatmul.f32.gmra.mxu2 %v11684_v20 }
 0x486   : > { %4484 = vmatmul.f32.gmra.mxu3 %v11684_v20 }
 0x487   : > { %v9753_v45 = vpop.f32.mrf.mxu1 }
 0x488   : > { %v9751_v42 = vpop.f32.mrf.mxu0 }
 0x489   : > { %v9755_v51 = vpop.f32.mrf.mxu2  ;;  %4124 = vmatmul.f32.gmra.mxu0 %v11685_v16  ;;  %v11691_v16 = vld [vmem:[#allocation200_spill] sm:$0xff] }
 0x48a   : > { %4248 = vmatmul.f32.gmra.mxu1 %v11686_v59  ;;  %v9759_v2 = vpop.f32.mrf.mxu3 }
 0x48c   : > { %4391 = vmatmul.f32.gmra.mxu2 %v11687_v12 }
 0x48e   : > { %4488 = vmatmul.f32.gmra.mxu3 %v11687_v12  ;;  %v11695_v12 = vld [vmem:[#allocation118_spill] sm:$0xff] }
 0x48f   : > { %v9765_v20 = vpop.f32.mrf.mxu1 }
 0x490   : > { %v9763_v63 = vpop.f32.mrf.mxu0 }
 0x491   : > { %v9767_v21 = vpop.f32.mrf.mxu2  ;;  %4129 = vmatmul.f32.gmra.mxu0 %v11688_v25 }
 0x492   : > { %4254 = vmatmul.f32.gmra.mxu1 %v11689_v57  ;;  %v9771_v35 = vpop.f32.mrf.mxu3 }
 0x493   : > { %11690 = vst [vmem:[#allocation121_spill] sm:$0xff] %v9771_v35 }
 0x494   : > { %4395 = vmatmul.f32.gmra.mxu2 %v11691_v16 }
 0x496   : > { %4492 = vmatmul.f32.gmra.mxu3 %v11691_v16  ;;  %v3156_v16 = vadd.f32 %v11696_v29, %v11695_v12  ;;  %v11700_v29 = vld [vmem:[#allocation115_spill] sm:$0xff] }
 0x497   : > { %v9785_v57 = vpop.f32.mrf.mxu1 }
 0x498   : > { %v9776_v59 = vpop.f32.mrf.mxu0  ;;  %11693 = vst [vmem:[#allocation50_spill] sm:$0xff] %v9785_v57  ;;  %v3270_v12 = vadd.f32 %v11700_v29, %v3156_v16  ;;  %v11704_v29 = vld [vmem:[#allocation122_spill] sm:$0xff] }
 0x499   : > { %11692 = vst [vmem:[#allocation114_spill] sm:$0xff] %v9776_v59  ;;  %v9787_v25 = vpop.f32.mrf.mxu2  ;;  %4134 = vmatmul.f32.gmra.mxu0 %v11697_v0  ;;  %v10917_v59 = vmov 0.0  }
 0x49a   : > { %11694 = vst [vmem:[#allocation124_spill] sm:$0xff] %v9787_v25  ;;  %4260 = vmatmul.f32.gmra.mxu1 %v11698_v31  ;;  %v9793_v35 = vpop.f32.mrf.mxu3 }
 0x49b   : > { %11699 = vst [vmem:[#allocation40_spill] sm:$0xff] %v9793_v35  ;;  %v11705_v35 = vld [vmem:[#allocation210_spill] sm:$0xff] }
 0x49c   : > { %347 = vst.msk [vmem:[%s9783_s28] sm:$0xff] %vm346_vm1, %v10917_v59  ;;  %4399 = vmatmul.f32.gmra.mxu2 %v9260_v13 }
 0x49d   : > { %348 = vst.msk [vmem:[%s9783_s28 + $0x8] sm:$0xff] %vm346_vm1, %v10917_v59 }
 0x49e   : > { %349 = vst.msk [vmem:[%s9783_s28 + $0x10] sm:$0xff] %vm346_vm1, %v10917_v59  ;;  %4496 = vmatmul.f32.gmra.mxu3 %v9260_v13  ;;  %v3384_v13 = vadd.f32 %v11704_v29, %v3270_v12 }
 0x49f   : > { %350 = vst.msk [vmem:[%s9783_s28 + $0x18] sm:$0xff] %vm346_vm1, %v10917_v59  ;;  %v9818_v0 = vpop.f32.mrf.mxu1 }
 0x4a0   : > { %351 = vst.msk [vmem:[%s9783_s28 + $0x20] sm:$0xff] %vm346_vm1, %v10917_v59  ;;  %v9813_v31 = vpop.f32.mrf.mxu0  ;;  %v3543_v12 = vadd.f32 %v9426_v55, %v3384_v13 }
 0x4a1   : > { %11701 = vst [vmem:[#allocation36_spill] sm:$0xff] %v9813_v31  ;;  %v9820_v16 = vpop.f32.mrf.mxu2  ;;  %4139 = vmatmul.f32.gmra.mxu0 %v11705_v35  ;;  %v11706_v31 = vld [vmem:[#allocation214_spill] sm:$0xff]  ;;  %v11715_v35 = vld [vmem:[#allocation141_spill] sm:$0xff] }
 0x4a2   : > { %352 = vst.msk [vmem:[%s9783_s28 + $0x28] sm:$0xff] %vm346_vm1, %v10917_v59  ;;  %4266 = vmatmul.f32.gmra.mxu1 %v11706_v31  ;;  %v9831_v25 = vpop.f32.mrf.mxu3  ;;  %v3640_v13 = vadd.f32 %v9428_v52, %v3543_v12 }
 0x4a3   : > { %11702 = vst [vmem:[#allocation125_spill] sm:$0xff] %v9818_v0  ;;  %v11709_v0 = vld [vmem:[#allocation131_spill] sm:$0xff] }
 0x4a4   : > { %11703 = vst [vmem:[#allocation102_spill] sm:$0xff] %v9820_v16  ;;  %v11708_v16 = vld [vmem:[#allocation130_spill] sm:$0xff]  ;;  %4403 = vmatmul.f32.gmra.mxu2 %v9291_v41 }
 0x4a5   : > { %353 = vst.msk [vmem:[%s9783_s28 + $0x30] sm:$0xff] %vm346_vm1, %v10917_v59  ;;  %v3160_v57 = vadd.f32 %v11709_v0, %v11708_v16  ;;  %v11710_v0 = vld [vmem:[#allocation128_spill] sm:$0xff] }
 0x4a6   : > { %354 = vst.msk [vmem:[%s9783_s28 + $0x38] sm:$0xff] %vm346_vm1, %v10917_v59  ;;  %4500 = vmatmul.f32.gmra.mxu3 %v9291_v41  ;;  %v11716_v41 = vld [vmem:[#allocation142_spill] sm:$0xff] }
 0x4a7   : > { %11707 = vst [vmem:[#allocation129_spill] sm:$0xff] %v9831_v25  ;;  %v3275_v16 = vadd.f32 %v11710_v0, %v3160_v57  ;;  %v9860_v29 = vpop.f32.mrf.mxu1  ;;  %v11714_v57 = vld [vmem:[#allocation134_spill] sm:$0xff]  ;;  %v3741_v0 = vadd.f32 %v9439_v44, %v3640_v13  ;;  %v11717_v25 = vld [vmem:[#allocation139_spill] sm:$0xff] }
 0x4a8   : > { %355 = vst.msk [vmem:[%s9783_s28 + $0x40] sm:$0xff] %vm346_vm1, %v10917_v59  ;;  %v9855_v55 = vpop.f32.mrf.mxu0 }
 0x4a9   : > { %356 = vst.msk [vmem:[%s9783_s28 + $0x48] sm:$0xff] %vm346_vm1, %v10917_v59  ;;  %v9862_v31 = vpop.f32.mrf.mxu2  ;;  %4144 = vmatmul.f32.gmra.mxu0 %v9304_v43  ;;  %v3390_v12 = vadd.f32 %v11714_v57, %v3275_v16  ;;  %v3962_v43 = vadd.f32 %v9443_v10, %v3741_v0  ;;  %v11719_v57 = vld [vmem:[#allocation145_spill] sm:$0xff]  ;;  %v11720_v0 = vand.u32 4294901760, %v9400_v7 }
 0x4aa   : > { %357 = vst.msk [vmem:[%s9783_s28 + $0x50] sm:$0xff] %vm346_vm1, %v10917_v59  ;;  %4272 = vmatmul.f32.gmra.mxu1 %v9324_v8  ;;  %v9872_v52 = vpop.f32.mrf.mxu3 }
 0x4ab   : > { %358 = vst.msk [vmem:[%s9783_s28 + $0x58] sm:$0xff] %vm346_vm1, %v10917_v59 }
 0x4ac   : > { %359 = vst.msk [vmem:[%s9783_s28 + $0x60] sm:$0xff] %vm346_vm1, %v10917_v59  ;;  %4407 = vmatmul.f32.gmra.mxu2 %v9326_v54 }
 0x4ad   : > { %360 = vst.msk [vmem:[%s9783_s28 + $0x68] sm:$0xff] %vm346_vm1, %v10917_v59 }
 0x4ae   : > { %11711 = vst [vmem:[#allocation85_spill] sm:$0xff] %v9860_v29  ;;  %v3547_v29 = vadd.f32 %v9483_v46, %v3390_v12  ;;  %4504 = vmatmul.f32.gmra.mxu3 %v9326_v54  ;;  %v11718_v46 = vld [vmem:[#allocation105_spill] sm:$0xff] }
 0x4af   : > { %11712 = vst [vmem:[#allocation2_spill] sm:$0xff] %v9862_v31  ;;  %v3164_v31 = vadd.f32 %v11716_v41, %v11715_v35  ;;  %v4189_v8 = vpop.f32.mrf.mxu1 }
 0x4b0   : > { %361 = vst.msk [vmem:[%s9783_s28 + $0x70] sm:$0xff] %vm346_vm1, %v10917_v59  ;;  %v3644_v16 = vadd.f32 %v9485_v6, %v3547_v29  ;;  %v2880_v6 = vld [vmem:[%s9783_s28] sm:$0xff] }
 0x4b1   : > { %362 = vst.msk [vmem:[%s9783_s28 + $0x78] sm:$0xff] %vm346_vm1, %v10917_v59  ;;  %v4075_v59 = vpop.f32.mrf.mxu0  ;;  %4149 = vmatmul.f32.gmra.mxu0 %v9342_v27  ;;  %v4348_v13 = vpop.f32.mrf.mxu2 }
 0x4b2   : > { %11713 = vst [vmem:[#allocation149_spill] sm:$0xff] %v9872_v52  ;;  %v3280_v52 = vadd.f32 %v11717_v25, %v3164_v31  ;;  %v4076_v44 = vadd.f32 %v4075_v59, %v3962_v43  ;;  %4278 = vmatmul.f32.gmra.mxu1 %v9362_v5  ;;  %v4445_v41 = vpop.f32.mrf.mxu3  ;;  %v3749_v10 = vadd.f32 %v9479_v18, %v3644_v16  ;;  %v11721_v25 = vld [vmem:[#allocation104_spill] sm:$0xff]  ;;  %v11722_v59 = vand.u32 4294901760, %v9410_v53 }
 0x4b3   : > { %v11723_v18 = vand.u32 4294901760, %v9419_v1 }
 0x4b4   : > { %v4190_v35 = vadd.f32 %v4189_v8, %v4076_v44  ;;  %4929 = vmatmul.f32.vlgmr.msra.gmra.mxu2 %v11718_v46  ;;  %v3396_v12 = vadd.f32 %v11719_v57, %v3280_v52  ;;  %v3966_v29 = vadd.f32 %v9502_v48, %v3749_v10  ;;  %v11724_v44 = vld [vmem:[#allocation107_spill] sm:$0xff] }
 0x4b5   : > { %5946 = vmatpush.msra.mxu2 %v11720_v0 }
 0x4b6   : > { %v4349_v31 = vadd.f32 %v4348_v13, %v4190_v35  ;;  %5043 = vmatmul.f32.vlgmr.msra.gmra.mxu3 %v11721_v25  ;;  %v3551_v43 = vadd.f32 %v9555_v62, %v3396_v12  ;;  %v11725_v13 = vld [vmem:[#allocation3_spill] sm:$0xff] }
 0x4b7   : > { %5950 = vmatpush.msra.mxu2 %v11722_v59  ;;  %6073 = vmatpush.msra.mxu3 %v9381_v26  ;;  %v11728_v12 = vld [vmem:[#allocation91_spill] sm:$0xff] }
 0x4b8   : > { %v4446_v8 = vadd.f32 %v4445_v41, %v4349_v31  ;;  %v3648_v46 = vadd.f32 %v9557_v23, %v3551_v43  ;;  %v11726_v41 = vld [vmem:[#allocation68_spill] sm:$0xff]  ;;  %v11729_v23 = vld [vmem:[#allocation221_spill] sm:$0xff]  ;;  %v11733_v43 = vld [vmem:[#allocation223_spill] sm:$0xff] }
 0x4b9   : > { %5954 = vmatpush.msra.mxu2 %v11723_v18  ;;  %6075 = vmatpush.msra.mxu3 %v9386_v11  ;;  %v4352_v16 = vpop.f32.mrf.mxu2  ;;  %v11727_v57 = vand.u32 4294901760, %v11726_v41  ;;  %v11730_v31 = vand.u32 4294901760, %v11729_v23  ;;  %v11734_v59 = vand.u32 4294901760, %v11733_v43  ;;  %v11737_v18 = vld [vmem:[#allocation224_spill] sm:$0xff] }
 0x4ba   : > { %v4508_v52 = vadd.f32 %v4446_v8, %v2880_v6  ;;  %4594 = vmatmul.f32.vlgmr.msra.gmra.mxu0 %v11724_v44  ;;  %4815 = vmatmul.f32.vlgmr.msra.gmra.mxu1 %v11725_v13  ;;  %v4080_v62 = vpop.f32.mrf.mxu0  ;;  %v4195_v35 = vpop.f32.mrf.mxu1  ;;  %v11735_v8 = vld [vmem:[#allocation66_spill] sm:$0xff] }
 0x4bb   : > { %5687 = vmatpush.msra.mxu0 %v9400_v7  ;;  %5815 = vmatpush.msra.mxu1 %v9381_v26  ;;  %v4081_v48 = vadd.f32 %v4080_v62, %v3966_v29  ;;  %v11731_v7 = vld [vmem:[#allocation81_spill] sm:$0xff] }
 0x4bc   : > { %4525 = vst.msk [vmem:[%s9783_s28] sm:$0xff] %vm346_vm1, %v4508_v52  ;;  %5958 = vmatpush.msra.mxu2 %v11727_v57  ;;  %6077 = vmatpush.msra.mxu3 %v11728_v12  ;;  %v4449_v10 = vpop.f32.mrf.mxu3  ;;  %v11732_v26 = vld [vmem:[#allocation49_spill] sm:$0xff]  ;;  %v11738_v52 = vand.u32 4294901760, %v11737_v18 }
 0x4bd   : > { %5690 = vmatpush.msra.mxu0 %v9410_v53  ;;  %5817 = vmatpush.msra.mxu1 %v9386_v11  ;;  %v4196_v0 = vadd.f32 %v4195_v35, %v4081_v48  ;;  %v3757_v25 = vadd.f32 %v11732_v26, %v3648_v46  ;;  %v2881_v53 = vld [vmem:[%s9783_s28 + $0x8] sm:$0xff]  ;;  %v11736_v11 = vld [vmem:[#allocation32_spill] sm:$0xff]  ;;  %v11741_v62 = vld [vmem:[#allocation9_spill] sm:$0xff] }
 0x4be   : > { %5962 = vmatpush.msra.mxu2 %v11730_v31  ;;  %6079 = vmatpush.msra.mxu3 %v11731_v7  ;;  %v11742_v48 = vld [vmem:[#allocation103_spill] sm:$0xff]  ;;  %v11745_v31 = vld [vmem:[#allocation222_spill] sm:$0xff] }
 0x4bf   : > { %5693 = vmatpush.msra.mxu0 %v9419_v1  ;;  %5819 = vmatpush.msra.mxu1 %v11728_v12  ;;  %v4353_v6 = vadd.f32 %v4352_v16, %v4196_v0  ;;  %v11739_v1 = vld [vmem:[#allocation98_spill] sm:$0xff]  ;;  %v11740_v16 = vld [vmem:[#allocation75_spill] sm:$0xff]  ;;  %v11743_v12 = vld [vmem:[#allocation57_spill] sm:$0xff] }
 0x4c0   : > { %5966 = vmatpush.msra.mxu2 %v11734_v59  ;;  %6081 = vmatpush.msra.mxu3 %v11735_v8  ;;  %v3970_v44 = vadd.f32 %v11739_v1, %v3757_v25  ;;  %v11747_v25 = vld [vmem:[#allocation99_spill] sm:$0xff]  ;;  %v11749_v59 = vld [vmem:[#allocation70_spill] sm:$0xff] }
 0x4c1   : > { %4934 = vmatmul.f32.gmra.mxu2 %v11736_v11  ;;  %5696 = vmatpush.msra.mxu0 %v11726_v41  ;;  %v4450_v29 = vadd.f32 %v4449_v10, %v4353_v6  ;;  %v11744_v10 = vand.u32 4294901760, %v11743_v12  ;;  %v11748_v6 = vand.u32 4294901760, %v11747_v25 }
 0x4c2   : > { %5821 = vmatpush.msra.mxu1 %v11731_v7  ;;  %5970 = vmatpush.msra.mxu2 %v11738_v52  ;;  %v11746_v7 = vld [vmem:[#allocation8_spill] sm:$0xff] }
 0x4c3   : > { %6083 = vmatpush.msra.mxu3 %v11740_v16  ;;  %4602 = vmatmul.f32.gmra.mxu0 %v11741_v62  ;;  %v4509_v35 = vadd.f32 %v4450_v29, %v2881_v53  ;;  %v4356_v46 = vpop.f32.mrf.mxu2  ;;  %v11750_v53 = vld [vmem:[#allocation116_spill] sm:$0xff]  ;;  %v11752_v29 = vld [vmem:[#allocation62_spill] sm:$0xff] }
 0x4c4   : > { %5049 = vmatmul.f32.gmra.mxu3 %v11742_v48  ;;  %5699 = vmatpush.msra.mxu0 %v11729_v23  ;;  %v4085_v57 = vpop.f32.mrf.mxu0  ;;  %v4201_v41 = vpop.f32.mrf.mxu1  ;;  %v11751_v11 = vand.u32 4294901760, %v11750_v53  ;;  %v2882_v52 = vld [vmem:[%s9783_s28 + $0x10] sm:$0xff] }
 0x4c5   : > { %5823 = vmatpush.msra.mxu1 %v11735_v8  ;;  %5974 = vmatpush.msra.mxu2 %v11744_v10  ;;  %4526 = vst.msk [vmem:[%s9783_s28 + $0x8] sm:$0xff] %vm346_vm1, %v4509_v35  ;;  %v4086_v0 = vadd.f32 %v4085_v57, %v3970_v44  ;;  %v11754_v44 = vand.u32 4294901760, %v9538_v39  ;;  %v11756_v35 = vld [vmem:[#allocation7_spill] sm:$0xff]  ;;  %v11757_v57 = vand.u32 4294901760, %v9564_v56  ;;  %v11759_v10 = vld [vmem:[#allocation6_spill] sm:$0xff] }
 0x4c6   : > { %6085 = vmatpush.msra.mxu3 %v11745_v31  ;;  %4819 = vmatmul.f32.gmra.mxu1 %v11746_v7  ;;  %v4453_v26 = vpop.f32.mrf.mxu3 }
 0x4c7   : > { %5702 = vmatpush.msra.mxu0 %v11733_v43  ;;  %5825 = vmatpush.msra.mxu1 %v11740_v16  ;;  %v4202_v23 = vadd.f32 %v4201_v41, %v4086_v0  ;;  %v11753_v43 = vld [vmem:[#allocation34_spill] sm:$0xff] }
 0x4c8   : > { %5978 = vmatpush.msra.mxu2 %v11748_v6  ;;  %6087 = vmatpush.msra.mxu3 %v11749_v59  ;;  %v11762_v6 = vld [vmem:[#allocation5_spill] sm:$0xff] }
 0x4c9   : > { %5705 = vmatpush.msra.mxu0 %v11737_v18  ;;  %5827 = vmatpush.msra.mxu1 %v11745_v31  ;;  %v4357_v8 = vadd.f32 %v4356_v46, %v4202_v23  ;;  %v11755_v18 = vld [vmem:[#allocation35_spill] sm:$0xff]  ;;  %v11761_v23 = vand.u32 4294901760, %v9595_v49 }
 0x4ca   : > { %5982 = vmatpush.msra.mxu2 %v11751_v11  ;;  %6089 = vmatpush.msra.mxu3 %v11752_v29 }
 0x4cb   : > { %4939 = vmatmul.f32.gmra.mxu2 %v11753_v43  ;;  %5708 = vmatpush.msra.mxu0 %v11743_v12  ;;  %v4454_v1 = vadd.f32 %v4453_v26, %v4357_v8  ;;  %v11758_v12 = vld [vmem:[#allocation90_spill] sm:$0xff]  ;;  %v11760_v26 = vand.u32 4294901760, %v9580_v47  ;;  %v11764_v8 = vld [vmem:[#allocation80_spill] sm:$0xff]  ;;  %v11765_v43 = vld [vmem:[#allocation45_spill] sm:$0xff] }
 0x4cc   : > { %5829 = vmatpush.msra.mxu1 %v11749_v59  ;;  %5986 = vmatpush.msra.mxu2 %v11754_v44  ;;  %v11763_v59 = vand.u32 4294901760, %v9613_v61  ;;  %v11767_v44 = vld [vmem:[#allocation100_spill] sm:$0xff] }
 0x4cd   : > { %6091 = vmatpush.msra.mxu3 %v9488_v22  ;;  %4610 = vmatmul.f32.gmra.mxu0 %v11755_v18  ;;  %v4510_v16 = vadd.f32 %v4454_v1, %v2882_v52  ;;  %v4360_v62 = vpop.f32.mrf.mxu2  ;;  %v11768_v18 = vld [vmem:[#allocation37_spill] sm:$0xff] }
 0x4ce   : > { %5055 = vmatmul.f32.gmra.mxu3 %v11756_v35  ;;  %5711 = vmatpush.msra.mxu0 %v11747_v25  ;;  %v4090_v46 = vpop.f32.mrf.mxu0  ;;  %v4207_v48 = vpop.f32.mrf.mxu1  ;;  %v2883_v25 = vld [vmem:[%s9783_s28 + $0x18] sm:$0xff] }
 0x4cf   : > { %5831 = vmatpush.msra.mxu1 %v11752_v29  ;;  %5990 = vmatpush.msra.mxu2 %v11757_v57  ;;  %4527 = vst.msk [vmem:[%s9783_s28 + $0x10] sm:$0xff] %vm346_vm1, %v4510_v16  ;;  %v4091_v41 = vadd.f32 %v4090_v46, %v9661_v36  ;;  %v11769_v46 = vld [vmem:[#allocation41_spill] sm:$0xff]  ;;  %v11771_v57 = vld [vmem:[#allocation4_spill] sm:$0xff] }
 0x4d0   : > { %6093 = vmatpush.msra.mxu3 %v11758_v12  ;;  %4823 = vmatmul.f32.gmra.mxu1 %v11759_v10  ;;  %v4457_v0 = vpop.f32.mrf.mxu3 }
 0x4d1   : > { %5714 = vmatpush.msra.mxu0 %v11750_v53  ;;  %5833 = vmatpush.msra.mxu1 %v9488_v22  ;;  %v4208_v31 = vadd.f32 %v4207_v48, %v4091_v41  ;;  %v11770_v48 = vld [vmem:[#allocation38_spill] sm:$0xff] }
 0x4d2   : > { %5994 = vmatpush.msra.mxu2 %v11760_v26  ;;  %6095 = vmatpush.msra.mxu3 %v9532_v37 }
 0x4d3   : > { %5717 = vmatpush.msra.mxu0 %v9538_v39  ;;  %5835 = vmatpush.msra.mxu1 %v11758_v12  ;;  %v4361_v36 = vadd.f32 %v4360_v62, %v4208_v31  ;;  %v11774_v31 = vld [vmem:[#allocation189_spill] sm:$0xff] }
 0x4d4   : > { %5998 = vmatpush.msra.mxu2 %v11761_v23  ;;  %6097 = vmatpush.msra.mxu3 %v9544_v33 }
 0x4d5   : > { %4944 = vmatmul.f32.gmra.mxu2 %v11762_v6  ;;  %5720 = vmatpush.msra.mxu0 %v9564_v56  ;;  %v4458_v22 = vadd.f32 %v4457_v0, %v4361_v36  ;;  %v11773_v0 = vld [vmem:[#allocation187_spill] sm:$0xff] }
 0x4d6   : > { %5837 = vmatpush.msra.mxu1 %v9532_v37  ;;  %6002 = vmatpush.msra.mxu2 %v11763_v59  ;;  %v4095_v39 = vpop.f32.mrf.mxu0  ;;  %v11766_v37 = vand.u32 4294901760, %v9628_v17  ;;  %v3192_v26 = vadd.f32 %v11774_v31, %v11773_v0  ;;  %v11776_v59 = vld [vmem:[#allocation42_spill] sm:$0xff]  ;;  %v11787_v31 = vld [vmem:[#allocation52_spill] sm:$0xff] }
 0x4d7   : > { %6099 = vmatpush.msra.mxu3 %v9560_v50  ;;  %4618 = vmatmul.f32.gmra.mxu0 %v11764_v8  ;;  %v4511_v53 = vadd.f32 %v4458_v22, %v2883_v25  ;;  %v4096_v11 = vadd.f32 %v4095_v39, %v9687_v30  ;;  %v4213_v29 = vpop.f32.mrf.mxu1  ;;  %v4364_v52 = vpop.f32.mrf.mxu2  ;;  %v11775_v22 = vld [vmem:[#allocation47_spill] sm:$0xff] }
 0x4d8   : > { %5061 = vmatmul.f32.gmra.mxu3 %v11765_v43  ;;  %5723 = vmatpush.msra.mxu0 %v9580_v47  ;;  %v2886_v43 = vld [vmem:[%s9783_s28 + $0x30] sm:$0xff] }
 0x4d9   : > { %5839 = vmatpush.msra.mxu1 %v9544_v33  ;;  %6006 = vmatpush.msra.mxu2 %v11766_v37  ;;  %4528 = vst.msk [vmem:[%s9783_s28 + $0x18] sm:$0xff] %vm346_vm1, %v4511_v53  ;;  %v4214_v56 = vadd.f32 %v4213_v29, %v4096_v11  ;;  %v4461_v1 = vpop.f32.mrf.mxu3  ;;  %v2884_v33 = vld [vmem:[%s9783_s28 + $0x20] sm:$0xff]  ;;  %v11777_v53 = vld [vmem:[#allocation39_spill] sm:$0xff] }
 0x4da   : > { %6101 = vmatpush.msra.mxu3 %v9589_v58  ;;  %4827 = vmatmul.f32.gmra.mxu1 %v11767_v44  ;;  %v11778_v11 = vld [vmem:[#allocation190_spill] sm:$0xff] }
 0x4db   : > { %5726 = vmatpush.msra.mxu0 %v9595_v49  ;;  %5841 = vmatpush.msra.mxu1 %v9560_v50  ;;  %v4365_v30 = vadd.f32 %v4364_v52, %v4214_v56  ;;  %v3315_v29 = vadd.f32 %v11778_v11, %v3192_v26  ;;  %v11779_v56 = vld [vmem:[#allocation44_spill] sm:$0xff] }
 0x4dc   : > { %6103 = vmatpush.msra.mxu3 %v9602_v14  ;;  %v11791_v11 = vld [vmem:[#allocation56_spill] sm:$0xff] }
 0x4dd   : > { %5729 = vmatpush.msra.mxu0 %v9613_v61  ;;  %5843 = vmatpush.msra.mxu1 %v9589_v58  ;;  %v4462_v47 = vadd.f32 %v4461_v1, %v4365_v30  ;;  %v11780_v1 = vld [vmem:[#allocation193_spill] sm:$0xff] }
 0x4de   : > { %4949 = vmatmul.f32.gmra.mxu2 %v11768_v18  ;;  %v4100_v16 = vpop.f32.mrf.mxu0  ;;  %v3438_v30 = vadd.f32 %v11780_v1, %v3315_v29  ;;  %v11792_v29 = vld [vmem:[#allocation55_spill] sm:$0xff] }
 0x4df   : > { %5732 = vmatpush.msra.mxu0 %v9628_v17  ;;  %5845 = vmatpush.msra.mxu1 %v9602_v14  ;;  %v4512_v49 = vadd.f32 %v4462_v47, %v2884_v33  ;;  %v4101_v50 = vadd.f32 %v4100_v16, %v9701_v28  ;;  %v4219_v62 = vpop.f32.mrf.mxu1  ;;  %v4368_v35 = vpop.f32.mrf.mxu2  ;;  %v2885_v17 = vld [vmem:[%s9783_s28 + $0x28] sm:$0xff]  ;;  %v11772_v14 = vld [vmem:[#allocation46_spill] sm:$0xff]  ;;  %v11782_v47 = vld [vmem:[#allocation197_spill] sm:$0xff] }
 0x4e0   : > { %4626 = vmatmul.f32.gmra.mxu0 %v11769_v46  ;;  %5067 = vmatmul.f32.gmra.mxu3 %v11770_v48  ;;  %v11781_v33 = vld [vmem:[#allocation195_spill] sm:$0xff]  ;;  %v11784_v46 = vld [vmem:[#allocation48_spill] sm:$0xff]  ;;  %v3579_v48 = vadd.f32 %v9727_v34, %v3438_v30 }
 0x4e1   : > { %4529 = vst.msk [vmem:[%s9783_s28 + $0x20] sm:$0xff] %vm346_vm1, %v4512_v49  ;;  %v4220_v58 = vadd.f32 %v4219_v62, %v4101_v50  ;;  %v4465_v61 = vpop.f32.mrf.mxu3  ;;  %v3196_v18 = vadd.f32 %v11782_v47, %v11781_v33  ;;  %v11789_v34 = vld [vmem:[#allocation203_spill] sm:$0xff] }
 0x4e2   : > { %4831 = vmatmul.f32.gmra.mxu1 %v11771_v57 }
 0x4e3   : > { %v4369_v41 = vadd.f32 %v4368_v35, %v4220_v58  ;;  %v11783_v35 = vld [vmem:[#allocation53_spill] sm:$0xff] }
 0x4e5   : > { %v4466_v12 = vadd.f32 %v4465_v61, %v4369_v41  ;;  %v11785_v41 = vld [vmem:[#allocation43_spill] sm:$0xff] }
 0x4e6   : > { %4954 = vmatmul.f32.gmra.mxu2 %v11772_v14  ;;  %v4105_v28 = vpop.f32.mrf.mxu0 }
 0x4e7   : > { %v4513_v36 = vadd.f32 %v4466_v12, %v2885_v17  ;;  %v4106_v23 = vadd.f32 %v4105_v28, %v9711_v15  ;;  %v4225_v25 = vpop.f32.mrf.mxu1  ;;  %v4372_v6 = vpop.f32.mrf.mxu2  ;;  %v11786_v17 = vld [vmem:[#allocation198_spill] sm:$0xff]  ;;  %v2887_v28 = vld [vmem:[%s9783_s28 + $0x38] sm:$0xff] }
 0x4e8   : > { %4634 = vmatmul.f32.gmra.mxu0 %v11775_v22  ;;  %5073 = vmatmul.f32.gmra.mxu3 %v11776_v59  ;;  %v3320_v12 = vadd.f32 %v11786_v17, %v3196_v18  ;;  %v11799_v17 = vld [vmem:[#allocation63_spill] sm:$0xff] }
 0x4e9   : > { %4530 = vst.msk [vmem:[%s9783_s28 + $0x28] sm:$0xff] %vm346_vm1, %v4513_v36  ;;  %v4226_v39 = vadd.f32 %v4225_v25, %v4106_v23  ;;  %v4469_v8 = vpop.f32.mrf.mxu3  ;;  %v11788_v36 = vld [vmem:[#allocation201_spill] sm:$0xff] }
 0x4ea   : > { %4835 = vmatmul.f32.gmra.mxu1 %v11777_v53  ;;  %v3444_v23 = vadd.f32 %v11788_v36, %v3320_v12  ;;  %v11790_v25 = vld [vmem:[#allocation205_spill] sm:$0xff]  ;;  %v11800_v12 = vld [vmem:[#allocation59_spill] sm:$0xff] }
 0x4eb   : > { %v4373_v52 = vadd.f32 %v4372_v6, %v4226_v39  ;;  %v3200_v6 = vadd.f32 %v11790_v25, %v11789_v34  ;;  %v2889_v36 = vld [vmem:[%s9783_s28 + $0x48] sm:$0xff] }
 0x4ed   : > { %v4470_v37 = vadd.f32 %v4469_v8, %v4373_v52  ;;  %v3583_v52 = vadd.f32 %v9739_v38, %v3444_v23  ;;  %v11796_v38 = vld [vmem:[#allocation209_spill] sm:$0xff] }
 0x4ee   : > { %4959 = vmatmul.f32.gmra.mxu2 %v11779_v56  ;;  %v4110_v15 = vpop.f32.mrf.mxu0  ;;  %v11793_v56 = vld [vmem:[#allocation51_spill] sm:$0xff] }
 0x4ef   : > { %v4514_v16 = vadd.f32 %v4470_v37, %v2886_v43  ;;  %v4111_v49 = vadd.f32 %v4110_v15, %v9719_v40  ;;  %v4231_v50 = vpop.f32.mrf.mxu1  ;;  %v4376_v62 = vpop.f32.mrf.mxu2  ;;  %v3676_v40 = vadd.f32 %v9729_v60, %v3579_v48  ;;  %v11794_v15 = vld [vmem:[#allocation206_spill] sm:$0xff]  ;;  %v3680_v47 = vadd.f32 %v9741_v19, %v3583_v52 }
 0x4f0   : > { %4642 = vmatmul.f32.gmra.mxu0 %v11783_v35  ;;  %5079 = vmatmul.f32.gmra.mxu3 %v11784_v46  ;;  %v3325_v1 = vadd.f32 %v11794_v15, %v3200_v6  ;;  %v11803_v6 = vld [vmem:[#allocation60_spill] sm:$0xff] }
 0x4f1   : > { %4531 = vst.msk [vmem:[%s9783_s28 + $0x30] sm:$0xff] %vm346_vm1, %v4514_v16  ;;  %v4232_v58 = vadd.f32 %v4231_v50, %v4111_v49  ;;  %v4473_v61 = vpop.f32.mrf.mxu3  ;;  %v3813_v60 = vadd.f32 %v9731_v32, %v3676_v40  ;;  %v11795_v16 = vld [vmem:[#allocation58_spill] sm:$0xff] }
 0x4f2   : > { %4839 = vmatmul.f32.gmra.mxu1 %v11785_v41  ;;  %v3450_v49 = vadd.f32 %v11796_v38, %v3325_v1  ;;  %v11797_v50 = vld [vmem:[#allocation22_spill] sm:$0xff] }
 0x4f3   : > { %v4377_v14 = vadd.f32 %v4376_v62, %v4232_v58  ;;  %v3998_v33 = vadd.f32 %v9735_v9, %v3813_v60  ;;  %v11798_v62 = vld [vmem:[#allocation212_spill] sm:$0xff]  ;;  %v3821_v9 = vadd.f32 %v9743_v3, %v3680_v47  ;;  %v11801_v40 = vld [vmem:[#allocation54_spill] sm:$0xff] }
 0x4f4   : > { %v3204_v35 = vadd.f32 %v11798_v62, %v11797_v50  ;;  %v3587_v19 = vadd.f32 %v9751_v42, %v3450_v49  ;;  %v11804_v42 = vld [vmem:[#allocation20_spill] sm:$0xff]  ;;  %v11811_v49 = vld [vmem:[#allocation67_spill] sm:$0xff] }
 0x4f5   : > { %v4474_v0 = vadd.f32 %v4473_v61, %v4377_v14  ;;  %v4002_v23 = vadd.f32 %v9747_v4, %v3821_v9  ;;  %v11813_v62 = vld [vmem:[#allocation12_spill] sm:$0xff]  ;;  %v11816_v9 = vld [vmem:[#allocation69_spill] sm:$0xff] }
 0x4f6   : > { %4964 = vmatmul.f32.gmra.mxu2 %v11787_v31  ;;  %v4115_v26 = vpop.f32.mrf.mxu0  ;;  %v3684_v34 = vadd.f32 %v9753_v45, %v3587_v19 }
 0x4f7   : > { %v4515_v22 = vadd.f32 %v4474_v0, %v2887_v28  ;;  %v4116_v59 = vadd.f32 %v4115_v26, %v9725_v24  ;;  %v4237_v39 = vpop.f32.mrf.mxu1  ;;  %v4380_v8 = vpop.f32.mrf.mxu2  ;;  %v2888_v24 = vld [vmem:[%s9783_s28 + $0x40] sm:$0xff]  ;;  %v11802_v0 = vld [vmem:[#allocation213_spill] sm:$0xff] }
 0x4f8   : > { %4650 = vmatmul.f32.gmra.mxu0 %v11791_v11  ;;  %5085 = vmatmul.f32.gmra.mxu3 %v11792_v29  ;;  %v3330_v31 = vadd.f32 %v11802_v0, %v3204_v35  ;;  %v3829_v45 = vadd.f32 %v9755_v51, %v3684_v34  ;;  %v11814_v35 = vld [vmem:[#allocation15_spill] sm:$0xff]  ;;  %v11818_v0 = vld [vmem:[#allocation65_spill] sm:$0xff] }
 0x4f9   : > { %4532 = vst.msk [vmem:[%s9783_s28 + $0x38] sm:$0xff] %vm346_vm1, %v4515_v22  ;;  %v4238_v43 = vadd.f32 %v4237_v39, %v4116_v59  ;;  %v4477_v37 = vpop.f32.mrf.mxu3  ;;  %v11805_v59 = vld [vmem:[#allocation18_spill] sm:$0xff]  ;;  %v11806_v39 = vld [vmem:[#allocation16_spill] sm:$0xff]  ;;  %v11820_v34 = vld [vmem:[#allocation121_spill] sm:$0xff] }
 0x4fa   : > { %4843 = vmatmul.f32.gmra.mxu1 %v11793_v56  ;;  %v3456_v22 = vadd.f32 %v11804_v42, %v3330_v31  ;;  %v11819_v31 = vld [vmem:[#allocation10_spill] sm:$0xff] }
 0x4fb   : > { %v4381_v30 = vadd.f32 %v4380_v8, %v4238_v43  ;;  %v3208_v8 = vadd.f32 %v11806_v39, %v11805_v59  ;;  %v11807_v43 = vld [vmem:[#allocation71_spill] sm:$0xff]  ;;  %v11823_v59 = vld [vmem:[#allocation13_spill] sm:$0xff] }
 0x4fc   : > { %v3591_v4 = vadd.f32 %v9763_v63, %v3456_v22  ;;  %v11812_v63 = vld [vmem:[#allocation14_spill] sm:$0xff]  ;;  %v11822_v22 = vld [vmem:[#allocation73_spill] sm:$0xff] }
 0x4fd   : > { %v4478_v18 = vadd.f32 %v4477_v37, %v4381_v30  ;;  %v11808_v37 = vld [vmem:[#allocation64_spill] sm:$0xff]  ;;  %v11809_v30 = vld [vmem:[#allocation61_spill] sm:$0xff] }
 0x4fe   : > { %4969 = vmatmul.f32.gmra.mxu2 %v11795_v16  ;;  %v4120_v32 = vpop.f32.mrf.mxu0  ;;  %v4006_v16 = vadd.f32 %v9759_v2, %v3829_v45  ;;  %v11817_v2 = vld [vmem:[#allocation114_spill] sm:$0xff]  ;;  %v11826_v45 = vld [vmem:[#allocation79_spill] sm:$0xff] }
 0x4ff   : > { %v4516_v46 = vadd.f32 %v4478_v18, %v2888_v24  ;;  %v4121_v48 = vadd.f32 %v4120_v32, %v3998_v33  ;;  %v4243_v58 = vpop.f32.mrf.mxu1  ;;  %v4384_v61 = vpop.f32.mrf.mxu2  ;;  %v11810_v24 = vld [vmem:[#allocation19_spill] sm:$0xff]  ;;  %v2890_v18 = vld [vmem:[%s9783_s28 + $0x50] sm:$0xff]  ;;  %v3688_v32 = vadd.f32 %v9765_v20, %v3591_v4  ;;  %v11827_v4 = vld [vmem:[#allocation77_spill] sm:$0xff] }
 0x500   : > { %4658 = vmatmul.f32.gmra.mxu0 %v11799_v17  ;;  %5091 = vmatmul.f32.gmra.mxu3 %v11800_v12  ;;  %v3335_v33 = vadd.f32 %v11810_v24, %v3208_v8  ;;  %v11815_v12 = vld [vmem:[#allocation74_spill] sm:$0xff]  ;;  %v11824_v8 = vld [vmem:[#allocation11_spill] sm:$0xff]  ;;  %v11829_v24 = vld [vmem:[#allocation36_spill] sm:$0xff] }
 0x501   : > { %4533 = vst.msk [vmem:[%s9783_s28 + $0x40] sm:$0xff] %vm346_vm1, %v4516_v46  ;;  %v4244_v14 = vadd.f32 %v4243_v58, %v4121_v48  ;;  %v4481_v28 = vpop.f32.mrf.mxu3  ;;  %v3212_v46 = vadd.f32 %v11814_v35, %v11813_v62  ;;  %v3837_v20 = vadd.f32 %v9767_v21, %v3688_v32  ;;  %v11831_v32 = vld [vmem:[#allocation219_spill] sm:$0xff]  ;;  %v11833_v62 = vld [vmem:[#allocation125_spill] sm:$0xff] }
 0x502   : > { %4847 = vmatmul.f32.gmra.mxu1 %v11801_v40  ;;  %v3462_v50 = vadd.f32 %v11812_v63, %v3335_v33  ;;  %v11832_v63 = vld [vmem:[#allocation40_spill] sm:$0xff] }
 0x503   : > { %v4385_v26 = vadd.f32 %v4384_v61, %v4244_v14 }
 0x504   : > { %v3595_v19 = vadd.f32 %v11817_v2, %v3462_v50 }
 0x505   : > { %v4482_v25 = vadd.f32 %v4481_v28, %v4385_v26  ;;  %v3340_v26 = vadd.f32 %v11819_v31, %v3212_v46 }
 0x506   : > { %4974 = vmatmul.f32.gmra.mxu2 %v11803_v6  ;;  %v4125_v3 = vpop.f32.mrf.mxu0  ;;  %v11821_v6 = vld [vmem:[#allocation50_spill] sm:$0xff] }
 0x507   : > { %v4517_v11 = vadd.f32 %v4482_v25, %v2889_v36  ;;  %v4126_v29 = vadd.f32 %v4125_v3, %v4002_v23  ;;  %v4249_v60 = vpop.f32.mrf.mxu1  ;;  %v4388_v52 = vpop.f32.mrf.mxu2  ;;  %v2891_v23 = vld [vmem:[%s9783_s28 + $0x58] sm:$0xff]  ;;  %v4010_v25 = vadd.f32 %v11820_v34, %v3837_v20  ;;  %v3692_v3 = vadd.f32 %v11821_v6, %v3595_v19  ;;  %v11836_v19 = vld [vmem:[#allocation84_spill] sm:$0xff]  ;;  %v11839_v34 = vld [vmem:[#allocation78_spill] sm:$0xff] }
 0x508   : > { %4666 = vmatmul.f32.gmra.mxu0 %v11807_v43  ;;  %5097 = vmatmul.f32.gmra.mxu3 %v11808_v37  ;;  %v3468_v39 = vadd.f32 %v11823_v59, %v3340_v26  ;;  %v2893_v6 = vld [vmem:[%s9783_s28 + $0x68] sm:$0xff] }
 0x509   : > { %4534 = vst.msk [vmem:[%s9783_s28 + $0x48] sm:$0xff] %vm346_vm1, %v4517_v11  ;;  %v4250_v15 = vadd.f32 %v4249_v60, %v4126_v29  ;;  %v4485_v1 = vpop.f32.mrf.mxu3  ;;  %v11825_v11 = vld [vmem:[#allocation218_spill] sm:$0xff] }
 0x50a   : > { %4851 = vmatmul.f32.gmra.mxu1 %v11809_v30  ;;  %v3216_v29 = vadd.f32 %v11825_v11, %v11824_v8  ;;  %v3599_v33 = vadd.f32 %v11829_v24, %v3468_v39  ;;  %v11842_v39 = vld [vmem:[#allocation86_spill] sm:$0xff] }
 0x50b   : > { %v4389_v47 = vadd.f32 %v4388_v52, %v4250_v15  ;;  %v11828_v15 = vld [vmem:[#allocation124_spill] sm:$0xff] }
 0x50c   : > { %v3696_v35 = vadd.f32 %v11833_v62, %v3599_v33  ;;  %v2894_v33 = vld [vmem:[%s9783_s28 + $0x70] sm:$0xff]  ;;  %v11849_v62 = vld [vmem:[#allocation94_spill] sm:$0xff] }
 0x50d   : > { %v4486_v38 = vadd.f32 %v4485_v1, %v4389_v47  ;;  %v3845_v1 = vadd.f32 %v11828_v15, %v3692_v3  ;;  %v11840_v3 = vld [vmem:[#allocation129_spill] sm:$0xff] }
 0x50e   : > { %4979 = vmatmul.f32.gmra.mxu2 %v11811_v49  ;;  %v4130_v51 = vpop.f32.mrf.mxu0 }
 0x50f   : > { %v4518_v48 = vadd.f32 %v4486_v38, %v2890_v18  ;;  %v4131_v58 = vadd.f32 %v4130_v51, %v4006_v16  ;;  %v4255_v61 = vpop.f32.mrf.mxu1  ;;  %v4392_v17 = vpop.f32.mrf.mxu2  ;;  %v11830_v16 = vld [vmem:[#allocation72_spill] sm:$0xff]  ;;  %v3345_v38 = vadd.f32 %v11831_v32, %v3216_v29  ;;  %v2892_v51 = vld [vmem:[%s9783_s28 + $0x60] sm:$0xff]  ;;  %v4014_v50 = vadd.f32 %v11832_v63, %v3845_v1  ;;  %v11846_v1 = vld [vmem:[#allocation83_spill] sm:$0xff] }
 0x510   : > { %4674 = vmatmul.f32.gmra.mxu0 %v11815_v12  ;;  %5103 = vmatmul.f32.gmra.mxu3 %v11816_v9 }
 0x511   : > { %4535 = vst.msk [vmem:[%s9783_s28 + $0x50] sm:$0xff] %vm346_vm1, %v4518_v48  ;;  %v4256_v14 = vadd.f32 %v4255_v61, %v4131_v58  ;;  %v4489_v28 = vpop.f32.mrf.mxu3  ;;  %v11834_v48 = vld [vmem:[#allocation76_spill] sm:$0xff] }
 0x512   : > { %4855 = vmatmul.f32.gmra.mxu1 %v11818_v0  ;;  %v11835_v61 = vld [vmem:[#allocation220_spill] sm:$0xff] }
 0x513   : > { %v4393_v36 = vadd.f32 %v4392_v17, %v4256_v14  ;;  %v3474_v17 = vadd.f32 %v11835_v61, %v3345_v38  ;;  %v11837_v14 = vld [vmem:[#allocation82_spill] sm:$0xff]  ;;  %v11848_v38 = vld [vmem:[#allocation108_spill] sm:$0xff] }
 0x515   : > { %v4490_v42 = vadd.f32 %v4489_v28, %v4393_v36  ;;  %v11838_v28 = vld [vmem:[#allocation102_spill] sm:$0xff]  ;;  %v3603_v26 = vadd.f32 %v9855_v55, %v3474_v17 }
 0x516   : > { %4984 = vmatmul.f32.gmra.mxu2 %v11822_v22  ;;  %v4135_v21 = vpop.f32.mrf.mxu0  ;;  %v3853_v31 = vadd.f32 %v11838_v28, %v3696_v35  ;;  %v11841_v22 = vld [vmem:[#allocation85_spill] sm:$0xff]  ;;  %v11854_v28 = vld [vmem:[#allocation96_spill] sm:$0xff] }
 0x517   : > { %v4519_v60 = vadd.f32 %v4490_v42, %v2891_v23  ;;  %v4136_v52 = vadd.f32 %v4135_v21, %v4010_v25  ;;  %v4261_v43 = vpop.f32.mrf.mxu1  ;;  %v4396_v37 = vpop.f32.mrf.mxu2  ;;  %v3700_v21 = vadd.f32 %v11841_v22, %v3603_v26  ;;  %v11850_v35 = vld [vmem:[#allocation89_spill] sm:$0xff]  ;;  %v11855_v26 = vld [vmem:[#allocation92_spill] sm:$0xff] }
 0x518   : > { %4682 = vmatmul.f32.gmra.mxu0 %v11826_v45  ;;  %5109 = vmatmul.f32.gmra.mxu3 %v11827_v4  ;;  %v4018_v42 = vadd.f32 %v11840_v3, %v3853_v31 }
 0x519   : > { %4536 = vst.msk [vmem:[%s9783_s28 + $0x58] sm:$0xff] %vm346_vm1, %v4519_v60  ;;  %v4262_v47 = vadd.f32 %v4261_v43, %v4136_v52  ;;  %v4493_v18 = vpop.f32.mrf.mxu3  ;;  %v11843_v52 = vld [vmem:[#allocation109_spill] sm:$0xff]  ;;  %v11844_v43 = vld [vmem:[#allocation87_spill] sm:$0xff] }
 0x51a   : > { %4859 = vmatmul.f32.gmra.mxu1 %v11830_v16 }
 0x51b   : > { %v4397_v49 = vadd.f32 %v4396_v37, %v4262_v47  ;;  %v11845_v37 = vld [vmem:[#allocation2_spill] sm:$0xff]  ;;  %v11847_v47 = vld [vmem:[#allocation149_spill] sm:$0xff] }
 0x51c   : > { %v3861_v45 = vadd.f32 %v11845_v37, %v3700_v21  ;;  %v11861_v37 = vld [vmem:[#allocation123_spill] sm:$0xff] }
 0x51d   : > { %v4494_v46 = vadd.f32 %v4493_v18, %v4397_v49 }
 0x51e   : > { %4989 = vmatmul.f32.gmra.mxu2 %v11834_v48  ;;  %v4140_v58 = vpop.f32.mrf.mxu0  ;;  %v4022_v18 = vadd.f32 %v11847_v47, %v3861_v45 }
 0x51f   : > { %v4520_v12 = vadd.f32 %v4494_v46, %v2892_v51  ;;  %v4141_v9 = vadd.f32 %v4140_v58, %v4014_v50  ;;  %v4267_v20 = vpop.f32.mrf.mxu1  ;;  %v4400_v2 = vpop.f32.mrf.mxu2  ;;  %v11851_v58 = vld [vmem:[#allocation88_spill] sm:$0xff] }
 0x520   : > { %4690 = vmatmul.f32.gmra.mxu0 %v11836_v19  ;;  %5115 = vmatmul.f32.gmra.mxu3 %v11837_v14  ;;  %v11853_v14 = vld [vmem:[#allocation112_spill] sm:$0xff] }
 0x521   : > { %4537 = vst.msk [vmem:[%s9783_s28 + $0x60] sm:$0xff] %vm346_vm1, %v4520_v12  ;;  %v4268_v36 = vadd.f32 %v4267_v20, %v4141_v9  ;;  %v4497_v23 = vpop.f32.mrf.mxu3  ;;  %v2895_v12 = vld [vmem:[%s9783_s28 + $0x78] sm:$0xff]  ;;  %v11852_v20 = vld [vmem:[#allocation110_spill] sm:$0xff] }
 0x522   : > { %4863 = vmatmul.f32.gmra.mxu1 %v11839_v34 }
 0x523   : > { %v4401_v25 = vadd.f32 %v4400_v2, %v4268_v36 }
 0x525   : > { %v4498_v59 = vadd.f32 %v4497_v23, %v4401_v25  ;;  %v11856_v25 = vld [vmem:[#allocation117_spill] sm:$0xff] }
 0x526   : > { %4994 = vmatmul.f32.gmra.mxu2 %v11842_v39  ;;  %v4145_v8 = vpop.f32.mrf.mxu0 }
 0x527   : > { %v4521_v11 = vadd.f32 %v4498_v59, %v2893_v6  ;;  %v4146_v55 = vadd.f32 %v4145_v8, %v4018_v42  ;;  %v4273_v29 = vpop.f32.mrf.mxu1  ;;  %v4404_v60 = vpop.f32.mrf.mxu2  ;;  %v11857_v6 = vld [vmem:[#allocation93_spill] sm:$0xff]  ;;  %v11858_v59 = vld [vmem:[#allocation127_spill] sm:$0xff] }
 0x528   : > { %4698 = vmatmul.f32.gmra.mxu0 %v11843_v52  ;;  %5121 = vmatmul.f32.gmra.mxu3 %v11844_v43  ;;  %v11860_v52 = vld [vmem:[#allocation138_spill] sm:$0xff] }
 0x529   : > { %4538 = vst.msk [vmem:[%s9783_s28 + $0x68] sm:$0xff] %vm346_vm1, %v4521_v11  ;;  %v4274_v4 = vadd.f32 %v4273_v29, %v4146_v55  ;;  %v4501_v15 = vpop.f32.mrf.mxu3  ;;  %v11859_v11 = vld [vmem:[#allocation111_spill] sm:$0xff] }
 0x52a   : > { %4867 = vmatmul.f32.gmra.mxu1 %v11846_v1 }
 0x52b   : > { %v4405_v24 = vadd.f32 %v4404_v60, %v4274_v4 }
 0x52d   : > { %v4502_v32 = vadd.f32 %v4501_v15, %v4405_v24 }
 0x52e   : > { %4999 = vmatmul.f32.gmra.mxu2 %v11848_v38  ;;  %v4150_v49 = vpop.f32.mrf.mxu0 }
 0x52f   : > { %v4522_v51 = vadd.f32 %v4502_v32, %v2894_v33  ;;  %v4151_v63 = vadd.f32 %v4150_v49, %v4022_v18  ;;  %v4279_v50 = vpop.f32.mrf.mxu1  ;;  %v4408_v46 = vpop.f32.mrf.mxu2  ;;  %v11862_v33 = vld [vmem:[#allocation148_spill] sm:$0xff]  ;;  %v11863_v18 = vld [vmem:[#allocation135_spill] sm:$0xff] }
 0x530   : > { %4706 = vmatmul.f32.gmra.mxu0 %v11849_v62  ;;  %5127 = vmatmul.f32.gmra.mxu3 %v11850_v35  ;;  %v11865_v35 = vld [vmem:[#allocation27_spill] sm:$0xff] }
 0x531   : > { %4539 = vst.msk [vmem:[%s9783_s28 + $0x70] sm:$0xff] %vm346_vm1, %v4522_v51  ;;  %v4280_v48 = vadd.f32 %v4279_v50, %v4151_v63  ;;  %v4505_v17 = vpop.f32.mrf.mxu3 }
 0x532   : > { %4871 = vmatmul.f32.gmra.mxu1 %v11851_v58 }
 0x533   : > { %v4409_v61 = vadd.f32 %v4408_v46, %v4280_v48 }
 0x535   : > { %v4506_v9 = vadd.f32 %v4505_v17, %v4409_v61 }
 0x536   : > { %5004 = vmatmul.f32.gmra.mxu2 %v11852_v20 }
 0x537   : > { %v4523_v2 = vadd.f32 %v4506_v9, %v2895_v12  ;;  %v10142_v19 = vpop.f32.mrf.mxu0  ;;  %v10148_v31 = vpop.f32.mrf.mxu1  ;;  %v11866_v12 = vld [vmem:[#allocation160_spill] sm:$0xff] }
 0x538   : > { %4714 = vmatmul.f32.gmra.mxu0 %v11853_v14  ;;  %5133 = vmatmul.f32.gmra.mxu3 %v11854_v28  ;;  %v10151_v36 = vpop.f32.mrf.mxu2 }
 0x539   : > { %4540 = vst.msk [vmem:[%s9783_s28 + $0x78] sm:$0xff] %vm346_vm1, %v4523_v2  ;;  %v10153_v23 = vpop.f32.mrf.mxu3  ;;  %v11867_v2 = vld [vmem:[#allocation152_spill] sm:$0xff] }
 0x53a   : > { %4875 = vmatmul.f32.gmra.mxu1 %v11855_v26 }
 0x53e   : > { %5400 = vmatmul.f32.vlgmr.msrb.gmra.mxu2 %v11856_v25 }
 0x540   : > { %5202 = vmatmul.f32.vlgmr.msrb.gmra.mxu0 %v11725_v13  ;;  %5621 = vmatmul.f32.vlgmr.msrb.gmra.mxu3 %v11857_v6  ;;  %v4603_v3 = vpop.f32.mrf.mxu0 }
 0x542   : > { %5299 = vmatmul.f32.vlgmr.msrb.gmra.mxu1 %v11725_v13 }
 0x543   : > { %v4820_v42 = vpop.f32.mrf.mxu1 }
 0x544   : > { %v4821_v22 = vadd.f32 %v4820_v42, %v4603_v3  ;;  %v4935_v21 = vpop.f32.mrf.mxu2  ;;  %v11868_v42 = vld [vmem:[#allocation164_spill] sm:$0xff] }
 0x546   : > { %5408 = vmatmul.f32.gmra.mxu2 %v11858_v59  ;;  %v4936_v39 = vadd.f32 %v4935_v21, %v4821_v22  ;;  %v11869_v59 = vld [vmem:[#allocation158_spill] sm:$0xff] }
 0x547   : > { %v5050_v8 = vpop.f32.mrf.mxu3 }
 0x548   : > { %5206 = vmatmul.f32.gmra.mxu0 %v11746_v7  ;;  %5625 = vmatmul.f32.gmra.mxu3 %v11859_v11  ;;  %v10162_v55 = vadd.f32 %v5050_v8, %v4936_v39 }
 0x54a   : > { %5303 = vmatmul.f32.gmra.mxu1 %v11746_v7  ;;  %v4611_v29 = vpop.f32.mrf.mxu0 }
 0x54d   : > { %v4824_v60 = vpop.f32.mrf.mxu1 }
 0x54e   : > { %5416 = vmatmul.f32.gmra.mxu2 %v11860_v52  ;;  %v4825_v13 = vadd.f32 %v4824_v60, %v4611_v29  ;;  %v4940_v43 = vpop.f32.mrf.mxu2  ;;  %v11870_v52 = vld [vmem:[#allocation172_spill] sm:$0xff] }
 0x550   : > { %5210 = vmatmul.f32.gmra.mxu0 %v11759_v10  ;;  %5629 = vmatmul.f32.gmra.mxu3 %v11861_v37  ;;  %v4941_v45 = vadd.f32 %v4940_v43, %v4825_v13 }
 0x551   : > { %v5056_v4 = vpop.f32.mrf.mxu3 }
 0x552   : > { %5307 = vmatmul.f32.gmra.mxu1 %v11759_v10  ;;  %v10169_v15 = vadd.f32 %v5056_v4, %v4941_v45  ;;  %v11864_v10 = vld [vmem:[#allocation156_spill] sm:$0xff]  ;;  %v11871_v45 = vld [vmem:[#allocation162_spill] sm:$0xff] }
 0x554   : > { %v4619_v24 = vpop.f32.mrf.mxu0 }
 0x556   : > { %5424 = vmatmul.f32.gmra.mxu2 %v11862_v33 }
 0x557   : > { %v4828_v7 = vpop.f32.mrf.mxu1 }
 0x558   : > { %v4829_v47 = vadd.f32 %v4828_v7, %v4619_v24  ;;  %5214 = vmatmul.f32.gmra.mxu0 %v11767_v44  ;;  %5633 = vmatmul.f32.gmra.mxu3 %v11863_v18  ;;  %v4945_v32 = vpop.f32.mrf.mxu2 }
 0x55a   : > { %v4946_v38 = vadd.f32 %v4945_v32, %v4829_v47  ;;  %5311 = vmatmul.f32.gmra.mxu1 %v11767_v44  ;;  %v11872_v47 = vld [vmem:[#allocation180_spill] sm:$0xff] }
 0x55b   : > { %v5062_v49 = vpop.f32.mrf.mxu3 }
 0x55c   : > { %v10175_v51 = vadd.f32 %v5062_v49, %v4946_v38  ;;  %v11873_v49 = vld [vmem:[#allocation168_spill] sm:$0xff] }
 0x55d   : > { %v4627_v63 = vpop.f32.mrf.mxu0 }
 0x55e   : > { %5432 = vmatmul.f32.gmra.mxu2 %v11864_v10 }
 0x55f   : > { %v4832_v50 = vpop.f32.mrf.mxu1 }
 0x560   : > { %v4833_v62 = vadd.f32 %v4832_v50, %v4627_v63  ;;  %5218 = vmatmul.f32.gmra.mxu0 %v11771_v57  ;;  %5637 = vmatmul.f32.gmra.mxu3 %v11865_v35 }
 0x561   : > { %v4950_v46 = vpop.f32.mrf.mxu2 }
 0x562   : > { %v4951_v48 = vadd.f32 %v4950_v46, %v4833_v62  ;;  %5315 = vmatmul.f32.gmra.mxu1 %v11771_v57  ;;  %v11874_v46 = vld [vmem:[#allocation188_spill] sm:$0xff] }
 0x563   : > { %v5068_v61 = vpop.f32.mrf.mxu3 }
 0x564   : > { %v10181_v17 = vadd.f32 %v5068_v61, %v4951_v48 }
 0x565   : > { %v4635_v44 = vpop.f32.mrf.mxu0 }
 0x566   : > { %5440 = vmatmul.f32.gmra.mxu2 %v11866_v12 }
 0x567   : > { %v4836_v9 = vpop.f32.mrf.mxu1 }
 0x568   : > { %v4837_v20 = vadd.f32 %v4836_v9, %v4635_v44  ;;  %5222 = vmatmul.f32.gmra.mxu0 %v11777_v53  ;;  %5641 = vmatmul.f32.gmra.mxu3 %v11867_v2  ;;  %v11875_v44 = vld [vmem:[#allocation176_spill] sm:$0xff] }
 0x569   : > { %v4955_v14 = vpop.f32.mrf.mxu2 }
 0x56a   : > { %v4956_v28 = vadd.f32 %v4955_v14, %v4837_v20  ;;  %5319 = vmatmul.f32.gmra.mxu1 %v11777_v53 }
 0x56b   : > { %v5074_v25 = vpop.f32.mrf.mxu3 }
 0x56c   : > { %v10187_v3 = vadd.f32 %v5074_v25, %v4956_v28  ;;  %v11876_v28 = vld [vmem:[#allocation196_spill] sm:$0xff] }
 0x56d   : > { %v4643_v57 = vpop.f32.mrf.mxu0 }
 0x56e   : > { %5448 = vmatmul.f32.gmra.mxu2 %v11868_v42  ;;  %v11877_v42 = vld [vmem:[#allocation184_spill] sm:$0xff] }
 0x56f   : > { %v4840_v22 = vpop.f32.mrf.mxu1 }
 0x570   : > { %v4841_v21 = vadd.f32 %v4840_v22, %v4643_v57  ;;  %5226 = vmatmul.f32.gmra.mxu0 %v11785_v41  ;;  %5645 = vmatmul.f32.gmra.mxu3 %v11869_v59 }
 0x571   : > { %v4960_v39 = vpop.f32.mrf.mxu2 }
 0x572   : > { %v4961_v8 = vadd.f32 %v4960_v39, %v4841_v21  ;;  %5323 = vmatmul.f32.gmra.mxu1 %v11785_v41 }
 0x573   : > { %v5080_v29 = vpop.f32.mrf.mxu3 }
 0x574   : > { %v10193_v60 = vadd.f32 %v5080_v29, %v4961_v8  ;;  %v11878_v29 = vld [vmem:[#allocation204_spill] sm:$0xff] }
 0x575   : > { %v4651_v53 = vpop.f32.mrf.mxu0 }
 0x576   : > { %5456 = vmatmul.f32.gmra.mxu2 %v11870_v52 }
 0x577   : > { %v4844_v13 = vpop.f32.mrf.mxu1 }
 0x578   : > { %v4845_v43 = vadd.f32 %v4844_v13, %v4651_v53  ;;  %5230 = vmatmul.f32.gmra.mxu0 %v11793_v56  ;;  %5649 = vmatmul.f32.gmra.mxu3 %v11871_v45  ;;  %v11879_v13 = vld [vmem:[#allocation192_spill] sm:$0xff] }
 0x579   : > { %v4965_v4 = vpop.f32.mrf.mxu2 }
 0x57a   : > { %v4966_v24 = vadd.f32 %v4965_v4, %v4845_v43  ;;  %5327 = vmatmul.f32.gmra.mxu1 %v11793_v56 }
 0x57b   : > { %v5086_v33 = vpop.f32.mrf.mxu3 }
 0x57c   : > { %v10199_v7 = vadd.f32 %v5086_v33, %v4966_v24 }
 0x57d   : > { %v4659_v41 = vpop.f32.mrf.mxu0 }
 0x57e   : > { %5464 = vmatmul.f32.gmra.mxu2 %v11872_v47 }
 0x57f   : > { %v4848_v32 = vpop.f32.mrf.mxu1 }
 0x580   : > { %v4849_v38 = vadd.f32 %v4848_v32, %v4659_v41  ;;  %5234 = vmatmul.f32.gmra.mxu0 %v11801_v40  ;;  %5653 = vmatmul.f32.gmra.mxu3 %v11873_v49  ;;  %v11880_v41 = vld [vmem:[#allocation211_spill] sm:$0xff] }
 0x581   : > { %v4970_v63 = vpop.f32.mrf.mxu2 }
 0x582   : > { %v4971_v10 = vadd.f32 %v4970_v63, %v4849_v38  ;;  %5331 = vmatmul.f32.gmra.mxu1 %v11801_v40  ;;  %v11881_v38 = vld [vmem:[#allocation200_spill] sm:$0xff] }
 0x583   : > { %v5092_v50 = vpop.f32.mrf.mxu3 }
 0x584   : > { %v10205_v62 = vadd.f32 %v5092_v50, %v4971_v10 }
 0x585   : > { %v4667_v56 = vpop.f32.mrf.mxu0 }
 0x586   : > { %5472 = vmatmul.f32.gmra.mxu2 %v11874_v46  ;;  %v11882_v46 = vld [vmem:[#allocation21_spill] sm:$0xff] }
 0x587   : > { %v4852_v48 = vpop.f32.mrf.mxu1 }
 0x588   : > { %v4853_v61 = vadd.f32 %v4852_v48, %v4667_v56  ;;  %5238 = vmatmul.f32.gmra.mxu0 %v11809_v30  ;;  %5657 = vmatmul.f32.gmra.mxu3 %v11875_v44 }
 0x589   : > { %v4975_v12 = vpop.f32.mrf.mxu2 }
 0x58a   : > { %v4976_v9 = vadd.f32 %v4975_v12, %v4853_v61  ;;  %5335 = vmatmul.f32.gmra.mxu1 %v11809_v30  ;;  %v11883_v12 = vld [vmem:[#allocation208_spill] sm:$0xff] }
 0x58b   : > { %v5098_v20 = vpop.f32.mrf.mxu3 }
 0x58c   : > { %v10211_v14 = vadd.f32 %v5098_v20, %v4976_v9 }
 0x58d   : > { %v4675_v40 = vpop.f32.mrf.mxu0 }
 0x58e   : > { %5480 = vmatmul.f32.gmra.mxu2 %v11876_v28 }
 0x58f   : > { %v4856_v25 = vpop.f32.mrf.mxu1 }
 0x590   : > { %v4857_v57 = vadd.f32 %v4856_v25, %v4675_v40  ;;  %5242 = vmatmul.f32.gmra.mxu0 %v11818_v0  ;;  %5661 = vmatmul.f32.gmra.mxu3 %v11877_v42  ;;  %v11884_v25 = vld [vmem:[#allocation17_spill] sm:$0xff] }
 0x591   : > { %v4980_v22 = vpop.f32.mrf.mxu2 }
 0x592   : > { %v4981_v21 = vadd.f32 %v4980_v22, %v4857_v57  ;;  %5339 = vmatmul.f32.gmra.mxu1 %v11818_v0 }
 0x593   : > { %v5104_v39 = vpop.f32.mrf.mxu3 }
 0x594   : > { %v10217_v8 = vadd.f32 %v5104_v39, %v4981_v21  ;;  %v11885_v21 = vld [vmem:[#allocation215_spill] sm:$0xff] }
 0x595   : > { %v4683_v30 = vpop.f32.mrf.mxu0 }
 0x596   : > { %5488 = vmatmul.f32.gmra.mxu2 %v11878_v29 }
 0x597   : > { %v4860_v53 = vpop.f32.mrf.mxu1 }
 0x598   : > { %v4861_v52 = vadd.f32 %v4860_v53, %v4683_v30  ;;  %5246 = vmatmul.f32.gmra.mxu0 %v11830_v16  ;;  %5665 = vmatmul.f32.gmra.mxu3 %v11879_v13 }
 0x599   : > { %v4985_v43 = vpop.f32.mrf.mxu2 }
 0x59a   : > { %v4986_v4 = vadd.f32 %v4985_v43, %v4861_v52  ;;  %5343 = vmatmul.f32.gmra.mxu1 %v11830_v16  ;;  %v11886_v43 = vld [vmem:[#allocation217_spill] sm:$0xff] }
 0x59b   : > { %v5110_v24 = vpop.f32.mrf.mxu3 }
 0x59c   : > { %v10223_v33 = vadd.f32 %v5110_v24, %v4986_v4 }
 0x59d   : > { %v4691_v0 = vpop.f32.mrf.mxu0 }
 0x59e   : > { %5496 = vmatmul.f32.gmra.mxu2 %v11880_v41 }
 0x59f   : > { %v4864_v47 = vpop.f32.mrf.mxu1 }
 0x5a0   : > { %v4865_v32 = vadd.f32 %v4864_v47, %v4691_v0  ;;  %5250 = vmatmul.f32.gmra.mxu0 %v11839_v34  ;;  %5669 = vmatmul.f32.gmra.mxu3 %v11881_v38 }
 0x5a1   : > { %v4990_v63 = vpop.f32.mrf.mxu2 }
 0x5a2   : > { %v4991_v10 = vadd.f32 %v4990_v63, %v4865_v32  ;;  %5347 = vmatmul.f32.gmra.mxu1 %v11839_v34 }
 0x5a3   : > { %v5116_v50 = vpop.f32.mrf.mxu3 }
 0x5a4   : > { %v10229_v56 = vadd.f32 %v5116_v50, %v4991_v10 }
 0x5a5   : > { %v4699_v16 = vpop.f32.mrf.mxu0 }
 0x5a6   : > { %5504 = vmatmul.f32.gmra.mxu2 %v11882_v46  ;;  %v11889_v46 = vld [vmem:[#allocation97_spill] sm:$0xff] }
 0x5a7   : > { %v4868_v48 = vpop.f32.mrf.mxu1 }
 0x5a8   : > { %v4869_v61 = vadd.f32 %v4868_v48, %v4699_v16  ;;  %5254 = vmatmul.f32.gmra.mxu0 %v11846_v1  ;;  %5673 = vmatmul.f32.gmra.mxu3 %v11883_v12 }
 0x5a9   : > { %v4995_v9 = vpop.f32.mrf.mxu2 }
 0x5aa   : > { %v4996_v20 = vadd.f32 %v4995_v9, %v4869_v61  ;;  %5351 = vmatmul.f32.gmra.mxu1 %v11846_v1  ;;  %v4817_v1 = vadd.f32 %v10148_v31, %v10142_v19 }
 0x5ab   : > { %v5122_v40 = vpop.f32.mrf.mxu3 }
 0x5ac   : > { %v10235_v28 = vadd.f32 %v5122_v40, %v4996_v20  ;;  %v4931_v24 = vadd.f32 %v10151_v36, %v4817_v1  ;;  %v11887_v36 = vld [vmem:[#allocation95_spill] sm:$0xff] }
 0x5ad   : > { %v4707_v34 = vpop.f32.mrf.mxu0 }
 0x5ae   : > { %5512 = vmatmul.f32.gmra.mxu2 %v11884_v25  ;;  %v5045_v19 = vadd.f32 %v10153_v23, %v4931_v24  ;;  %v11888_v23 = vmov 0.0   ;;  %v11893_v24 = vld [vmem:[#allocation132_spill] sm:$0xff] }
 0x5af   : > { %v4872_v57 = vpop.f32.mrf.mxu1  ;;  %363 = vst.msk [vmem:[%s10259_s8] sm:$0xff] %vm346_vm1, %v11888_v23 }
 0x5b0   : > { %v4873_v22 = vadd.f32 %v4872_v57, %v4707_v34  ;;  %5258 = vmatmul.f32.gmra.mxu0 %v11851_v58  ;;  %5677 = vmatmul.f32.gmra.mxu3 %v11885_v21  ;;  %364 = vst.msk [vmem:[%s10259_s8 + $0x8] sm:$0xff] %vm346_vm1, %v11888_v23  ;;  %v11890_v34 = vld [vmem:[#allocation113_spill] sm:$0xff]  ;;  %v11891_v57 = vld [vmem:[#allocation120_spill] sm:$0xff] }
 0x5b1   : > { %v5000_v39 = vpop.f32.mrf.mxu2  ;;  %365 = vst.msk [vmem:[%s10259_s8 + $0x10] sm:$0xff] %vm346_vm1, %v11888_v23 }
 0x5b2   : > { %v5001_v30 = vadd.f32 %v5000_v39, %v4873_v22  ;;  %5355 = vmatmul.f32.gmra.mxu1 %v11851_v58  ;;  %366 = vst.msk [vmem:[%s10259_s8 + $0x18] sm:$0xff] %vm346_vm1, %v11888_v23 }
 0x5b3   : > { %v5128_v29 = vpop.f32.mrf.mxu3  ;;  %367 = vst.msk [vmem:[%s10259_s8 + $0x20] sm:$0xff] %vm346_vm1, %v11888_v23 }
 0x5b4   : > { %v10243_v53 = vadd.f32 %v5128_v29, %v5001_v30  ;;  %368 = vst.msk [vmem:[%s10259_s8 + $0x28] sm:$0xff] %vm346_vm1, %v11888_v23 }
 0x5b5   : > { %v4715_v52 = vpop.f32.mrf.mxu0  ;;  %369 = vst.msk [vmem:[%s10259_s8 + $0x30] sm:$0xff] %vm346_vm1, %v11888_v23 }
 0x5b6   : > { %5520 = vmatmul.f32.gmra.mxu2 %v11886_v43  ;;  %370 = vst.msk [vmem:[%s10259_s8 + $0x38] sm:$0xff] %vm346_vm1, %v11888_v23 }
 0x5b7   : > { %v4876_v4 = vpop.f32.mrf.mxu1  ;;  %371 = vst.msk [vmem:[%s10259_s8 + $0x40] sm:$0xff] %vm346_vm1, %v11888_v23 }
 0x5b8   : > { %v4877_v0 = vadd.f32 %v4876_v4, %v4715_v52  ;;  %5262 = vmatmul.f32.gmra.mxu0 %v11855_v26  ;;  %5681 = vmatmul.f32.gmra.mxu3 %v9326_v54  ;;  %372 = vst.msk [vmem:[%s10259_s8 + $0x48] sm:$0xff] %vm346_vm1, %v11888_v23  ;;  %v11892_v52 = vld [vmem:[#allocation126_spill] sm:$0xff] }
 0x5b9   : > { %v5005_v41 = vpop.f32.mrf.mxu2  ;;  %373 = vst.msk [vmem:[%s10259_s8 + $0x50] sm:$0xff] %vm346_vm1, %v11888_v23 }
 0x5ba   : > { %v5006_v58 = vadd.f32 %v5005_v41, %v4877_v0  ;;  %5359 = vmatmul.f32.gmra.mxu1 %v11855_v26  ;;  %374 = vst.msk [vmem:[%s10259_s8 + $0x58] sm:$0xff] %vm346_vm1, %v11888_v23 }
 0x5bb   : > { %v5134_v47 = vpop.f32.mrf.mxu3  ;;  %375 = vst.msk [vmem:[%s10259_s8 + $0x60] sm:$0xff] %vm346_vm1, %v11888_v23 }
 0x5bc   : > { %v10251_v31 = vadd.f32 %v5134_v47, %v5006_v58  ;;  %376 = vst.msk [vmem:[%s10259_s8 + $0x68] sm:$0xff] %vm346_vm1, %v11888_v23 }
 0x5bd   : > { %v5203_v32 = vpop.f32.mrf.mxu0  ;;  %377 = vst.msk [vmem:[%s10259_s8 + $0x70] sm:$0xff] %vm346_vm1, %v11888_v23 }
 0x5be   : > { %v5204_v63 = vadd.f32 %v5203_v32, %v5045_v19  ;;  %6008 = vmatmul.f32.vlgmr.msra.gmra.mxu2 %v11857_v6  ;;  %378 = vst.msk [vmem:[%s10259_s8 + $0x78] sm:$0xff] %vm346_vm1, %v11888_v23  ;;  %v11894_v32 = vld [vmem:[#allocation137_spill] sm:$0xff] }
 0x5bf   : > { %v5300_v10 = vpop.f32.mrf.mxu1 }
 0x5c0   : > { %v5301_v26 = vadd.f32 %v5300_v10, %v5204_v63  ;;  %5735 = vmatmul.f32.vlgmr.msra.gmra.mxu0 %v11887_v36  ;;  %6105 = vmatmul.f32.vlgmr.msra.gmra.mxu3 %v11857_v6  ;;  %v11895_v10 = vld [vmem:[#allocation143_spill] sm:$0xff] }
 0x5c1   : > { %v5401_v50 = vpop.f32.mrf.mxu2 }
 0x5c2   : > { %v5402_v16 = vadd.f32 %v5401_v50, %v5301_v26  ;;  %5849 = vmatmul.f32.vlgmr.msra.gmra.mxu1 %v11889_v46  ;;  %v11896_v46 = vld [vmem:[#allocation147_spill] sm:$0xff] }
 0x5c3   : > { %v5622_v48 = vpop.f32.mrf.mxu3 }
 0x5c4   : > { %v10276_v6 = vadd.f32 %v5622_v48, %v5402_v16 }
 0x5c5   : > { %v5207_v61 = vpop.f32.mrf.mxu0 }
 0x5c6   : > { %v5208_v9 = vadd.f32 %v5207_v61, %v10162_v55  ;;  %6012 = vmatmul.f32.gmra.mxu2 %v11859_v11  ;;  %v11897_v61 = vld [vmem:[#allocation151_spill] sm:$0xff] }
 0x5c7   : > { %v5304_v20 = vpop.f32.mrf.mxu1 }
 0x5c8   : > { %v5305_v40 = vadd.f32 %v5304_v20, %v5208_v9  ;;  %5740 = vmatmul.f32.gmra.mxu0 %v11890_v34  ;;  %6109 = vmatmul.f32.gmra.mxu3 %v11859_v11 }
 0x5c9   : > { %v5409_v55 = vpop.f32.mrf.mxu2 }
 0x5ca   : > { %v5410_v25 = vadd.f32 %v5409_v55, %v5305_v40  ;;  %5855 = vmatmul.f32.gmra.mxu1 %v11891_v57 }
 0x5cb   : > { %v5626_v22 = vpop.f32.mrf.mxu3 }
 0x5cc   : > { %v10307_v39 = vadd.f32 %v5626_v22, %v5410_v25  ;;  %v11898_v25 = vld [vmem:[#allocation155_spill] sm:$0xff]  ;;  %v11899_v22 = vld [vmem:[#allocation157_spill] sm:$0xff] }
 0x5cd   : > { %v5211_v11 = vpop.f32.mrf.mxu0 }
 0x5ce   : > { %v5212_v30 = vadd.f32 %v5211_v11, %v10169_v15  ;;  %6016 = vmatmul.f32.gmra.mxu2 %v11861_v37 }
 0x5cf   : > { %v5308_v29 = vpop.f32.mrf.mxu1 }
 0x5d0   : > { %v5309_v1 = vadd.f32 %v5308_v29, %v5212_v30  ;;  %5745 = vmatmul.f32.gmra.mxu0 %v11892_v52  ;;  %6113 = vmatmul.f32.gmra.mxu3 %v11861_v37 }
 0x5d1   : > { %v5417_v43 = vpop.f32.mrf.mxu2 }
 0x5d2   : > { %v5418_v4 = vadd.f32 %v5417_v43, %v5309_v1  ;;  %5861 = vmatmul.f32.gmra.mxu1 %v11893_v24  ;;  %v11900_v43 = vld [vmem:[#allocation159_spill] sm:$0xff]  ;;  %v11901_v24 = vld [vmem:[#allocation161_spill] sm:$0xff] }
 0x5d3   : > { %v5630_v0 = vpop.f32.mrf.mxu3 }
 0x5d4   : > { %v10326_v15 = vadd.f32 %v5630_v0, %v5418_v4 }
 0x5d5   : > { %v5215_v41 = vpop.f32.mrf.mxu0 }
 0x5d6   : > { %v5216_v58 = vadd.f32 %v5215_v41, %v10175_v51  ;;  %6020 = vmatmul.f32.gmra.mxu2 %v11863_v18 }
 0x5d7   : > { %v5312_v47 = vpop.f32.mrf.mxu1 }
 0x5d8   : > { %v5313_v19 = vadd.f32 %v5312_v47, %v5216_v58  ;;  %5750 = vmatmul.f32.gmra.mxu0 %v11894_v32  ;;  %6117 = vmatmul.f32.gmra.mxu3 %v11863_v18  ;;  %v11902_v32 = vld [vmem:[#allocation163_spill] sm:$0xff] }
 0x5d9   : > { %v5425_v63 = vpop.f32.mrf.mxu2 }
 0x5da   : > { %v5426_v37 = vadd.f32 %v5425_v63, %v5313_v19  ;;  %5867 = vmatmul.f32.gmra.mxu1 %v11895_v10 }
 0x5db   : > { %v5634_v26 = vpop.f32.mrf.mxu3 }
 0x5dc   : > { %v10333_v36 = vadd.f32 %v5634_v26, %v5426_v37  ;;  %v11903_v37 = vld [vmem:[#allocation167_spill] sm:$0xff] }
 0x5dd   : > { %v5219_v23 = vpop.f32.mrf.mxu0 }
 0x5de   : > { %v5220_v50 = vadd.f32 %v5219_v23, %v10181_v17  ;;  %6024 = vmatmul.f32.gmra.mxu2 %v11865_v35 }
 0x5df   : > { %v5316_v51 = vpop.f32.mrf.mxu1 }
 0x5e0   : > { %v5317_v16 = vadd.f32 %v5316_v51, %v5220_v50  ;;  %5755 = vmatmul.f32.gmra.mxu0 %v11896_v46  ;;  %6121 = vmatmul.f32.gmra.mxu3 %v11865_v35 }
 0x5e1   : > { %v5433_v48 = vpop.f32.mrf.mxu2 }
 0x5e2   : > { %v5434_v18 = vadd.f32 %v5433_v48, %v5317_v16  ;;  %5873 = vmatmul.f32.gmra.mxu1 %v11897_v61  ;;  %v11904_v16 = vld [vmem:[#allocation170_spill] sm:$0xff]  ;;  %v11905_v48 = vld [vmem:[#allocation175_spill] sm:$0xff] }
 0x5e3   : > { %v5638_v9 = vpop.f32.mrf.mxu3 }
 0x5e4   : > { %v10340_v20 = vadd.f32 %v5638_v9, %v5434_v18 }
 0x5e5   : > { %v5223_v40 = vpop.f32.mrf.mxu0 }
 0x5e6   : > { %v5224_v34 = vadd.f32 %v5223_v40, %v10187_v3  ;;  %6028 = vmatmul.f32.gmra.mxu2 %v11867_v2 }
 0x5e7   : > { %v5320_v17 = vpop.f32.mrf.mxu1 }
 0x5e8   : > { %v5321_v55 = vadd.f32 %v5320_v17, %v5224_v34  ;;  %5760 = vmatmul.f32.gmra.mxu0 %v11898_v25  ;;  %6125 = vmatmul.f32.gmra.mxu3 %v11867_v2  ;;  %v11906_v17 = vld [vmem:[#allocation178_spill] sm:$0xff]  ;;  %v11907_v25 = vld [vmem:[#allocation183_spill] sm:$0xff] }
 0x5e9   : > { %v5441_v57 = vpop.f32.mrf.mxu2 }
 0x5ea   : > { %v5442_v35 = vadd.f32 %v5441_v57, %v5321_v55  ;;  %5879 = vmatmul.f32.gmra.mxu1 %v11899_v22 }
 0x5eb   : > { %v5642_v11 = vpop.f32.mrf.mxu3 }
 0x5ec   : > { %v10347_v30 = vadd.f32 %v5642_v11, %v5442_v35 }
 0x5ed   : > { %v5227_v29 = vpop.f32.mrf.mxu0 }
 0x5ee   : > { %v5228_v1 = vadd.f32 %v5227_v29, %v10193_v60  ;;  %6032 = vmatmul.f32.gmra.mxu2 %v11869_v59 }
 0x5ef   : > { %v5324_v3 = vpop.f32.mrf.mxu1 }
 0x5f0   : > { %v5325_v52 = vadd.f32 %v5324_v3, %v5228_v1  ;;  %5765 = vmatmul.f32.gmra.mxu0 %v11900_v43  ;;  %6129 = vmatmul.f32.gmra.mxu3 %v11869_v59  ;;  %v11908_v1 = vld [vmem:[#allocation186_spill] sm:$0xff] }
 0x5f1   : > { %v5449_v4 = vpop.f32.mrf.mxu2 }
 0x5f2   : > { %v5450_v2 = vadd.f32 %v5449_v4, %v5325_v52  ;;  %5885 = vmatmul.f32.gmra.mxu1 %v11901_v24  ;;  %v11909_v52 = vld [vmem:[#allocation191_spill] sm:$0xff] }
 0x5f3   : > { %v5646_v0 = vpop.f32.mrf.mxu3 }
 0x5f4   : > { %v10354_v41 = vadd.f32 %v5646_v0, %v5450_v2 }
 0x5f5   : > { %v5231_v58 = vpop.f32.mrf.mxu0 }
 0x5f6   : > { %v5232_v47 = vadd.f32 %v5231_v58, %v10199_v7  ;;  %6036 = vmatmul.f32.gmra.mxu2 %v11871_v45  ;;  %v11910_v58 = vld [vmem:[#allocation194_spill] sm:$0xff] }
 0x5f7   : > { %v5328_v60 = vpop.f32.mrf.mxu1 }
 0x5f8   : > { %v5329_v19 = vadd.f32 %v5328_v60, %v5232_v47  ;;  %5770 = vmatmul.f32.gmra.mxu0 %v11902_v32  ;;  %6133 = vmatmul.f32.gmra.mxu3 %v11871_v45  ;;  %v11911_v60 = vld [vmem:[#allocation199_spill] sm:$0xff] }
 0x5f9   : > { %v5457_v63 = vpop.f32.mrf.mxu2 }
 0x5fa   : > { %v5458_v59 = vadd.f32 %v5457_v63, %v5329_v19  ;;  %5891 = vmatmul.f32.gmra.mxu1 %v11903_v37 }
 0x5fb   : > { %v5650_v10 = vpop.f32.mrf.mxu3 }
 0x5fc   : > { %v10361_v26 = vadd.f32 %v5650_v10, %v5458_v59  ;;  %v11912_v10 = vld [vmem:[#allocation202_spill] sm:$0xff] }
 0x5fd   : > { %v5235_v23 = vpop.f32.mrf.mxu0 }
 0x5fe   : > { %v5236_v50 = vadd.f32 %v5235_v23, %v10205_v62  ;;  %6040 = vmatmul.f32.gmra.mxu2 %v11873_v49 }
 0x5ff   : > { %v5332_v7 = vpop.f32.mrf.mxu1 }
 0x600   : > { %v5333_v51 = vadd.f32 %v5332_v7, %v5236_v50  ;;  %5775 = vmatmul.f32.gmra.mxu0 %v11904_v16  ;;  %6137 = vmatmul.f32.gmra.mxu3 %v11873_v49  ;;  %v11913_v50 = vld [vmem:[#allocation207_spill] sm:$0xff] }
 0x601   : > { %v5465_v46 = vpop.f32.mrf.mxu2 }
 0x602   : > { %v5466_v45 = vadd.f32 %v5465_v46, %v5333_v51  ;;  %5897 = vmatmul.f32.gmra.mxu1 %v11905_v48  ;;  %v11914_v48 = vld [vmem:[#allocation210_spill] sm:$0xff] }
 0x603   : > { %v5654_v18 = vpop.f32.mrf.mxu3 }
 0x604   : > { %v10368_v61 = vadd.f32 %v5654_v18, %v5466_v45 }
 0x605   : > { %v5239_v9 = vpop.f32.mrf.mxu0 }
 0x606   : > { %v5240_v40 = vadd.f32 %v5239_v9, %v10211_v14  ;;  %6044 = vmatmul.f32.gmra.mxu2 %v11875_v44  ;;  %v11915_v9 = vld [vmem:[#allocation214_spill] sm:$0xff] }
 0x607   : > { %v5336_v62 = vpop.f32.mrf.mxu1 }
 0x608   : > { %v5337_v34 = vadd.f32 %v5336_v62, %v5240_v40  ;;  %5780 = vmatmul.f32.gmra.mxu0 %v11906_v17  ;;  %6141 = vmatmul.f32.gmra.mxu3 %v11875_v44 }
 0x609   : > { %v5473_v55 = vpop.f32.mrf.mxu2 }
 0x60a   : > { %v5474_v49 = vadd.f32 %v5473_v55, %v5337_v34  ;;  %5903 = vmatmul.f32.gmra.mxu1 %v11907_v25 }
 0x60b   : > { %v5658_v57 = vpop.f32.mrf.mxu3 }
 0x60c   : > { %v10375_v35 = vadd.f32 %v5658_v57, %v5474_v49  ;;  %v11916_v49 = vld [vmem:[#allocation23_spill] sm:$0xff]  ;;  %v11917_v57 = vld [vmem:[#allocation216_spill] sm:$0xff] }
 0x60d   : > { %v5243_v22 = vpop.f32.mrf.mxu0 }
 0x60e   : > { %v5244_v11 = vadd.f32 %v5243_v22, %v10217_v8  ;;  %6048 = vmatmul.f32.gmra.mxu2 %v11877_v42 }
 0x60f   : > { %v5340_v14 = vpop.f32.mrf.mxu1 }
 0x610   : > { %v5341_v29 = vadd.f32 %v5340_v14, %v5244_v11  ;;  %5785 = vmatmul.f32.gmra.mxu0 %v11908_v1  ;;  %6145 = vmatmul.f32.gmra.mxu3 %v11877_v42 }
 0x611   : > { %v5481_v3 = vpop.f32.mrf.mxu2 }
 0x612   : > { %v5482_v44 = vadd.f32 %v5481_v3, %v5341_v29  ;;  %5909 = vmatmul.f32.gmra.mxu1 %v11909_v52 }
 0x613   : > { %v5662_v43 = vpop.f32.mrf.mxu3 }
 0x614   : > { %v10382_v4 = vadd.f32 %v5662_v43, %v5482_v44 }
 0x615   : > { %v5247_v2 = vpop.f32.mrf.mxu0 }
 0x616   : > { %v5248_v24 = vadd.f32 %v5247_v2, %v10223_v33  ;;  %6052 = vmatmul.f32.gmra.mxu2 %v11879_v13 }
 0x617   : > { %v5344_v8 = vpop.f32.mrf.mxu1 }
 0x618   : > { %v5345_v0 = vadd.f32 %v5344_v8, %v5248_v24  ;;  %5790 = vmatmul.f32.gmra.mxu0 %v11910_v58  ;;  %6149 = vmatmul.f32.gmra.mxu3 %v11879_v13  ;;  %v4541_v58 = vld [vmem:[%s10259_s8] sm:$0xff] }
 0x619   : > { %v5489_v47 = vpop.f32.mrf.mxu2 }
 0x61a   : > { %v5490_v42 = vadd.f32 %v5489_v47, %v5345_v0  ;;  %5915 = vmatmul.f32.gmra.mxu1 %v11911_v60 }
 0x61b   : > { %v5666_v19 = vpop.f32.mrf.mxu3 }
 0x61c   : > { %v10389_v32 = vadd.f32 %v5666_v19, %v5490_v42 }
 0x61d   : > { %v5251_v63 = vpop.f32.mrf.mxu0 }
 0x61e   : > { %v5252_v59 = vadd.f32 %v5251_v63, %v10229_v56  ;;  %6056 = vmatmul.f32.gmra.mxu2 %v11881_v38 }
 0x61f   : > { %v5348_v33 = vpop.f32.mrf.mxu1 }
 0x620   : > { %v5349_v37 = vadd.f32 %v5348_v33, %v5252_v59  ;;  %5795 = vmatmul.f32.gmra.mxu0 %v11912_v10  ;;  %6153 = vmatmul.f32.gmra.mxu3 %v11881_v38  ;;  %v4542_v59 = vld [vmem:[%s10259_s8 + $0x8] sm:$0xff] }
 0x621   : > { %v5497_v23 = vpop.f32.mrf.mxu2 }
 0x622   : > { %v5498_v13 = vadd.f32 %v5497_v23, %v5349_v37  ;;  %5921 = vmatmul.f32.gmra.mxu1 %v11913_v50 }
 0x623   : > { %v5670_v7 = vpop.f32.mrf.mxu3 }
 0x624   : > { %v10396_v51 = vadd.f32 %v5670_v7, %v5498_v13 }
 0x625   : > { %v5255_v16 = vpop.f32.mrf.mxu0 }
 0x626   : > { %v5256_v46 = vadd.f32 %v5255_v16, %v10235_v28  ;;  %6060 = vmatmul.f32.gmra.mxu2 %v11883_v12 }
 0x627   : > { %v5352_v56 = vpop.f32.mrf.mxu1 }
 0x628   : > { %v5353_v45 = vadd.f32 %v5352_v56, %v5256_v46  ;;  %5800 = vmatmul.f32.gmra.mxu0 %v11914_v48  ;;  %6157 = vmatmul.f32.gmra.mxu3 %v11883_v12  ;;  %v4543_v46 = vld [vmem:[%s10259_s8 + $0x10] sm:$0xff] }
 0x629   : > { %v5505_v18 = vpop.f32.mrf.mxu2 }
 0x62a   : > { %v5506_v38 = vadd.f32 %v5505_v18, %v5353_v45  ;;  %5927 = vmatmul.f32.gmra.mxu1 %v11915_v9 }
 0x62b   : > { %v5674_v40 = vpop.f32.mrf.mxu3 }
 0x62c   : > { %v10403_v62 = vadd.f32 %v5674_v40, %v5506_v38 }
 0x62d   : > { %v5259_v34 = vpop.f32.mrf.mxu0 }
 0x62e   : > { %v5260_v17 = vadd.f32 %v5259_v34, %v10243_v53  ;;  %6064 = vmatmul.f32.gmra.mxu2 %v11885_v21 }
 0x62f   : > { %v5356_v28 = vpop.f32.mrf.mxu1 }
 0x630   : > { %v5357_v55 = vadd.f32 %v5356_v28, %v5260_v17  ;;  %5805 = vmatmul.f32.gmra.mxu0 %v11916_v49  ;;  %6161 = vmatmul.f32.gmra.mxu3 %v11885_v21  ;;  %v4544_v17 = vld [vmem:[%s10259_s8 + $0x18] sm:$0xff] }
 0x631   : > { %v5513_v25 = vpop.f32.mrf.mxu2 }
 0x632   : > { %v5514_v12 = vadd.f32 %v5513_v25, %v5357_v55  ;;  %5933 = vmatmul.f32.gmra.mxu1 %v11917_v57 }
 0x633   : > { %v5678_v22 = vpop.f32.mrf.mxu3 }
 0x634   : > { %v10410_v11 = vadd.f32 %v5678_v22, %v5514_v12 }
 0x635   : > { %v5263_v14 = vpop.f32.mrf.mxu0 }
 0x636   : > { %v5264_v29 = vadd.f32 %v5263_v14, %v10251_v31  ;;  %6068 = vmatmul.f32.gmra.mxu2 %v9326_v54 }
 0x637   : > { %v5360_v53 = vpop.f32.mrf.mxu1 }
 0x638   : > { %v5361_v1 = vadd.f32 %v5360_v53, %v5264_v29  ;;  %5810 = vmatmul.f32.gmra.mxu0 %v9342_v27  ;;  %6165 = vmatmul.f32.gmra.mxu3 %v9326_v54  ;;  %v4545_v29 = vld [vmem:[%s10259_s8 + $0x20] sm:$0xff] }
 0x639   : > { %v5521_v21 = vpop.f32.mrf.mxu2 }
 0x63a   : > { %v5522_v3 = vadd.f32 %v5521_v21, %v5361_v1  ;;  %5939 = vmatmul.f32.gmra.mxu1 %v9362_v5 }
 0x63b   : > { %v5682_v44 = vpop.f32.mrf.mxu3 }
 0x63c   : > { %v10417_v52 = vadd.f32 %v5682_v44, %v5522_v3 }
 0x63d   : > { %v5736_v43 = vpop.f32.mrf.mxu0 }
 0x63e   : > { %v5737_v31 = vadd.f32 %v5736_v43, %v10276_v6 }
 0x63f   : > { %v5850_v2 = vpop.f32.mrf.mxu1 }
 0x640   : > { %v5851_v24 = vadd.f32 %v5850_v2, %v5737_v31 }
 0x641   : > { %v6009_v8 = vpop.f32.mrf.mxu2 }
 0x642   : > { %v6010_v0 = vadd.f32 %v6009_v8, %v5851_v24  ;;  %v4546_v24 = vld [vmem:[%s10259_s8 + $0x28] sm:$0xff] }
 0x643   : > { %v6106_v27 = vpop.f32.mrf.mxu3 }
 0x644   : > { %v6107_v47 = vadd.f32 %v6106_v27, %v6010_v0 }
 0x645   : > { %v5741_v54 = vpop.f32.mrf.mxu0 }
 0x646   : > { %v6169_v42 = vadd.f32 %v6107_v47, %v4541_v58  ;;  %v5742_v5 = vadd.f32 %v5741_v54, %v10307_v39 }
 0x647   : > { %v5856_v60 = vpop.f32.mrf.mxu1 }
 0x648   : > { %6185 = vst.msk [vmem:[%s10259_s8] sm:$0xff] %vm346_vm1, %v6169_v42  ;;  %v5857_v19 = vadd.f32 %v5856_v60, %v5742_v5  ;;  %v4547_v60 = vld [vmem:[%s10259_s8 + $0x30] sm:$0xff] }
 0x649   : > { %v6013_v63 = vpop.f32.mrf.mxu2 }
 0x64a   : > { %v6014_v6 = vadd.f32 %v6013_v63, %v5857_v19 }
 0x64b   : > { %v6110_v33 = vpop.f32.mrf.mxu3 }
 0x64c   : > { %v6111_v37 = vadd.f32 %v6110_v33, %v6014_v6 }
 0x64d   : > { %v5746_v10 = vpop.f32.mrf.mxu0 }
 0x64e   : > { %v6170_v23 = vadd.f32 %v6111_v37, %v4542_v59  ;;  %v5747_v13 = vadd.f32 %v5746_v10, %v10326_v15 }
 0x64f   : > { %v5862_v50 = vpop.f32.mrf.mxu1 }
 0x650   : > { %6186 = vst.msk [vmem:[%s10259_s8 + $0x8] sm:$0xff] %vm346_vm1, %v6170_v23  ;;  %v5863_v39 = vadd.f32 %v5862_v50, %v5747_v13  ;;  %v4548_v13 = vld [vmem:[%s10259_s8 + $0x38] sm:$0xff] }
 0x651   : > { %v6017_v7 = vpop.f32.mrf.mxu2 }
 0x652   : > { %v6018_v16 = vadd.f32 %v6017_v7, %v5863_v39 }
 0x653   : > { %v6114_v56 = vpop.f32.mrf.mxu3 }
 0x654   : > { %v6115_v45 = vadd.f32 %v6114_v56, %v6018_v16 }
 0x655   : > { %v5751_v48 = vpop.f32.mrf.mxu0 }
 0x656   : > { %v6171_v18 = vadd.f32 %v6115_v45, %v4543_v46  ;;  %v5752_v38 = vadd.f32 %v5751_v48, %v10333_v36 }
 0x657   : > { %v5868_v9 = vpop.f32.mrf.mxu1 }
 0x658   : > { %6187 = vst.msk [vmem:[%s10259_s8 + $0x10] sm:$0xff] %vm346_vm1, %v6171_v18  ;;  %v5869_v15 = vadd.f32 %v5868_v9, %v5752_v38  ;;  %v4549_v18 = vld [vmem:[%s10259_s8 + $0x40] sm:$0xff] }
 0x659   : > { %v6021_v40 = vpop.f32.mrf.mxu2 }
 0x65a   : > { %v6022_v34 = vadd.f32 %v6021_v40, %v5869_v15 }
 0x65b   : > { %v6118_v28 = vpop.f32.mrf.mxu3 }
 0x65c   : > { %v6119_v55 = vadd.f32 %v6118_v28, %v6022_v34 }
 0x65d   : > { %v5756_v49 = vpop.f32.mrf.mxu0 }
 0x65e   : > { %v6172_v25 = vadd.f32 %v6119_v55, %v4544_v17  ;;  %v5757_v12 = vadd.f32 %v5756_v49, %v10340_v20  ;;  %v4550_v49 = vld [vmem:[%s10259_s8 + $0x48] sm:$0xff] }
 0x65f   : > { %v5874_v57 = vpop.f32.mrf.mxu1 }
 0x660   : > { %6188 = vst.msk [vmem:[%s10259_s8 + $0x18] sm:$0xff] %vm346_vm1, %v6172_v25  ;;  %v5875_v36 = vadd.f32 %v5874_v57, %v5757_v12 }
 0x661   : > { %v6025_v22 = vpop.f32.mrf.mxu2 }
 0x662   : > { %v6026_v14 = vadd.f32 %v6025_v22, %v5875_v36 }
 0x663   : > { %v6122_v53 = vpop.f32.mrf.mxu3 }
 0x664   : > { %v6123_v1 = vadd.f32 %v6122_v53, %v6026_v14 }
 0x665   : > { %v5761_v21 = vpop.f32.mrf.mxu0 }
 0x666   : > { %v6173_v3 = vadd.f32 %v6123_v1, %v4545_v29  ;;  %v5762_v44 = vadd.f32 %v5761_v21, %v10347_v30  ;;  %v4551_v1 = vld [vmem:[%s10259_s8 + $0x50] sm:$0xff] }
 0x667   : > { %v5880_v43 = vpop.f32.mrf.mxu1 }
 0x668   : > { %6189 = vst.msk [vmem:[%s10259_s8 + $0x20] sm:$0xff] %vm346_vm1, %v6173_v3  ;;  %v5881_v20 = vadd.f32 %v5880_v43, %v5762_v44 }
 0x669   : > { %v6029_v31 = vpop.f32.mrf.mxu2 }
 0x66a   : > { %v6030_v2 = vadd.f32 %v6029_v31, %v5881_v20 }
 0x66b   : > { %v6126_v8 = vpop.f32.mrf.mxu3 }
 0x66c   : > { %v6127_v0 = vadd.f32 %v6126_v8, %v6030_v2  ;;  %v4552_v8 = vld [vmem:[%s10259_s8 + $0x58] sm:$0xff] }
 0x66d   : > { %v5766_v58 = vpop.f32.mrf.mxu0 }
 0x66e   : > { %v6174_v27 = vadd.f32 %v6127_v0, %v4546_v24  ;;  %v5767_v47 = vadd.f32 %v5766_v58, %v10354_v41 }
 0x66f   : > { %v5886_v54 = vpop.f32.mrf.mxu1 }
 0x670   : > { %6190 = vst.msk [vmem:[%s10259_s8 + $0x28] sm:$0xff] %vm346_vm1, %v6174_v27  ;;  %v5887_v30 = vadd.f32 %v5886_v54, %v5767_v47 }
 0x671   : > { %v6033_v42 = vpop.f32.mrf.mxu2 }
 0x672   : > { %v6034_v5 = vadd.f32 %v6033_v42, %v5887_v30 }
 0x673   : > { %v6130_v19 = vpop.f32.mrf.mxu3 }
 0x674   : > { %v6131_v63 = vadd.f32 %v6130_v19, %v6034_v5 }
 0x675   : > { %v5771_v6 = vpop.f32.mrf.mxu0 }
 0x676   : > { %v6175_v59 = vadd.f32 %v6131_v63, %v4547_v60  ;;  %v5772_v33 = vadd.f32 %v5771_v6, %v10361_v26  ;;  %v4553_v60 = vld [vmem:[%s10259_s8 + $0x60] sm:$0xff] }
 0x677   : > { %v5892_v37 = vpop.f32.mrf.mxu1 }
 0x678   : > { %6191 = vst.msk [vmem:[%s10259_s8 + $0x30] sm:$0xff] %vm346_vm1, %v6175_v59  ;;  %v5893_v41 = vadd.f32 %v5892_v37, %v5772_v33 }
 0x679   : > { %v6037_v10 = vpop.f32.mrf.mxu2 }
 0x67a   : > { %v6038_v23 = vadd.f32 %v6037_v10, %v5893_v41 }
 0x67b   : > { %v6134_v50 = vpop.f32.mrf.mxu3 }
 0x67c   : > { %v6135_v39 = vadd.f32 %v6134_v50, %v6038_v23  ;;  %v4554_v23 = vld [vmem:[%s10259_s8 + $0x68] sm:$0xff] }
 0x67d   : > { %v5776_v7 = vpop.f32.mrf.mxu0 }
 0x67e   : > { %v6176_v16 = vadd.f32 %v6135_v39, %v4548_v13  ;;  %v5777_v46 = vadd.f32 %v5776_v7, %v10368_v61 }
 0x67f   : > { %v5898_v56 = vpop.f32.mrf.mxu1 }
 0x680   : > { %6192 = vst.msk [vmem:[%s10259_s8 + $0x38] sm:$0xff] %vm346_vm1, %v6176_v16  ;;  %v5899_v26 = vadd.f32 %v5898_v56, %v5777_v46 }
 0x681   : > { %v6041_v45 = vpop.f32.mrf.mxu2 }
 0x682   : > { %v6042_v48 = vadd.f32 %v6041_v45, %v5899_v26  ;;  %v4555_v45 = vld [vmem:[%s10259_s8 + $0x70] sm:$0xff] }
 0x683   : > { %v6138_v38 = vpop.f32.mrf.mxu3 }
 0x684   : > { %v6139_v9 = vadd.f32 %v6138_v38, %v6042_v48 }
 0x685   : > { %v5781_v15 = vpop.f32.mrf.mxu0 }
 0x686   : > { %v6177_v40 = vadd.f32 %v6139_v9, %v4549_v18  ;;  %v5782_v34 = vadd.f32 %v5781_v15, %v10375_v35 }
 0x687   : > { %v5904_v17 = vpop.f32.mrf.mxu1 }
 0x688   : > { %6193 = vst.msk [vmem:[%s10259_s8 + $0x40] sm:$0xff] %vm346_vm1, %v6177_v40  ;;  %v5905_v61 = vadd.f32 %v5904_v17, %v5782_v34 }
 0x689   : > { %v6045_v28 = vpop.f32.mrf.mxu2 }
 0x68a   : > { %v6046_v55 = vadd.f32 %v6045_v28, %v5905_v61  ;;  %v4556_v61 = vld [vmem:[%s10259_s8 + $0x78] sm:$0xff] }
 0x68b   : > { %v6142_v25 = vpop.f32.mrf.mxu3 }
 0x68c   : > { %v6143_v12 = vadd.f32 %v6142_v25, %v6046_v55 }
 0x68d   : > { %v5786_v57 = vpop.f32.mrf.mxu0 }
 0x68e   : > { %v6178_v36 = vadd.f32 %v6143_v12, %v4550_v49  ;;  %v5787_v22 = vadd.f32 %v5786_v57, %v10382_v4 }
 0x68f   : > { %v5910_v14 = vpop.f32.mrf.mxu1 }
 0x690   : > { %6194 = vst.msk [vmem:[%s10259_s8 + $0x48] sm:$0xff] %vm346_vm1, %v6178_v36  ;;  %v5911_v35 = vadd.f32 %v5910_v14, %v5787_v22 }
 0x691   : > { %v6049_v29 = vpop.f32.mrf.mxu2 }
 0x692   : > { %v6050_v53 = vadd.f32 %v6049_v29, %v5911_v35 }
 0x693   : > { %v6146_v21 = vpop.f32.mrf.mxu3 }
 0x694   : > { %v6147_v3 = vadd.f32 %v6146_v21, %v6050_v53 }
 0x695   : > { %v5791_v44 = vpop.f32.mrf.mxu0 }
 0x696   : > { %v6179_v43 = vadd.f32 %v6147_v3, %v4551_v1  ;;  %v5792_v20 = vadd.f32 %v5791_v44, %v10389_v32 }
 0x697   : > { %v5916_v31 = vpop.f32.mrf.mxu1 }
 0x698   : > { %6195 = vst.msk [vmem:[%s10259_s8 + $0x50] sm:$0xff] %vm346_vm1, %v6179_v43  ;;  %v5917_v4 = vadd.f32 %v5916_v31, %v5792_v20 }
 0x699   : > { %v6053_v2 = vpop.f32.mrf.mxu2 }
 0x69a   : > { %v6054_v24 = vadd.f32 %v6053_v2, %v5917_v4 }
 0x69b   : > { %v6150_v0 = vpop.f32.mrf.mxu3 }
 0x69c   : > { %v6151_v58 = vadd.f32 %v6150_v0, %v6054_v24 }
 0x69d   : > { %v5796_v27 = vpop.f32.mrf.mxu0 }
 0x69e   : > { %v6180_v47 = vadd.f32 %v6151_v58, %v4552_v8  ;;  %v5797_v54 = vadd.f32 %v5796_v27, %v10396_v51 }
 0x69f   : > { %v5922_v30 = vpop.f32.mrf.mxu1 }
 0x6a0   : > { %6196 = vst.msk [vmem:[%s10259_s8 + $0x58] sm:$0xff] %vm346_vm1, %v6180_v47  ;;  %v5923_v32 = vadd.f32 %v5922_v30, %v5797_v54 }
 0x6a1   : > { %v6057_v42 = vpop.f32.mrf.mxu2 }
 0x6a2   : > { %v6058_v5 = vadd.f32 %v6057_v42, %v5923_v32 }
 0x6a3   : > { %v6154_v19 = vpop.f32.mrf.mxu3 }
 0x6a4   : > { %v6155_v63 = vadd.f32 %v6154_v19, %v6058_v5 }
 0x6a5   : > { %v5801_v6 = vpop.f32.mrf.mxu0 }
 0x6a6   : > { %v6181_v59 = vadd.f32 %v6155_v63, %v4553_v60  ;;  %v5802_v33 = vadd.f32 %v5801_v6, %v10403_v62 }
 0x6a7   : > { %v5928_v37 = vpop.f32.mrf.mxu1 }
 0x6a8   : > { %6197 = vst.msk [vmem:[%s10259_s8 + $0x60] sm:$0xff] %vm346_vm1, %v6181_v59  ;;  %v5929_v51 = vadd.f32 %v5928_v37, %v5802_v33 }
 0x6a9   : > { %v6061_v41 = vpop.f32.mrf.mxu2 }
 0x6aa   : > { %v6062_v10 = vadd.f32 %v6061_v41, %v5929_v51 }
 0x6ab   : > { %v6158_v13 = vpop.f32.mrf.mxu3 }
 0x6ac   : > { %v6159_v50 = vadd.f32 %v6158_v13, %v6062_v10 }
 0x6ad   : > { %v5806_v39 = vpop.f32.mrf.mxu0 }
 0x6ae   : > { %v6182_v7 = vadd.f32 %v6159_v50, %v4554_v23  ;;  %v5807_v16 = vadd.f32 %v5806_v39, %v10410_v11 }
 0x6af   : > { %v5934_v46 = vpop.f32.mrf.mxu1 }
 0x6b0   : > { %6198 = vst.msk [vmem:[%s10259_s8 + $0x68] sm:$0xff] %vm346_vm1, %v6182_v7  ;;  %v5935_v62 = vadd.f32 %v5934_v46, %v5807_v16 }
 0x6b1   : > { %v6065_v56 = vpop.f32.mrf.mxu2 }
 0x6b2   : > { %v6066_v26 = vadd.f32 %v6065_v56, %v5935_v62 }
 0x6b3   : > { %v6162_v48 = vpop.f32.mrf.mxu3 }
 0x6b4   : > { %v6163_v18 = vadd.f32 %v6162_v48, %v6066_v26 }
 0x6b5   : > { %v5811_v38 = vpop.f32.mrf.mxu0 }
 0x6b6   : > { %v6183_v9 = vadd.f32 %v6163_v18, %v4555_v45  ;;  %v5812_v15 = vadd.f32 %v5811_v38, %v10417_v52 }
 0x6b7   : > { %v5940_v40 = vpop.f32.mrf.mxu1 }
 0x6b8   : > { %6199 = vst.msk [vmem:[%s10259_s8 + $0x70] sm:$0xff] %vm346_vm1, %v6183_v9  ;;  %v5941_v34 = vadd.f32 %v5940_v40, %v5812_v15 }
 0x6b9   : > { %v6069_v11 = vpop.f32.mrf.mxu2 }
 0x6ba   : > { %v6070_v17 = vadd.f32 %v6069_v11, %v5941_v34 }
 0x6bb   : > { %v6166_v28 = vpop.f32.mrf.mxu3 }
 0x6bc   : > { %v6167_v55 = vadd.f32 %v6166_v28, %v6070_v17 }
 0x6be   : > { %v6184_v49 = vadd.f32 %v6167_v55, %v4556_v61 }
 0x6c0   : > { %6200 = vst.msk [vmem:[%s10259_s8 + $0x78] sm:$0xff] %vm346_vm1, %v6184_v49 }
 0x6c1 PF: > { %s18_s26 = sadd.s32 1, %s6387_s26   ;;  %s11918_s24 = smov %s6383_s25 }
 0x6c2   : > { %p15_p5 = scmp.ge.s32.totalorder %s18_s26, 4   ;;  %s11919_s25 = smov %s11921_s27 }
 0x6c4   :  { %17 = sbr.rel (!%p15_p5) target bundleno = 2 (0x2), region = 93 }

</bundles_post_ra>
